<compile_context>
chip_gen: v7x
topology: tpu7x:2x2x1
jax: 0.10.0
libtpu: 0.0.40
codegen_flags: <defaults>
</compile_context>

<pallas_src>
import math
from functools import partial

import jax
import jax.numpy as jnp
from jax.experimental import pallas as pl
from jax.experimental.pallas import tpu as pltpu

# ----------------------------- configuration --------------------------------
INPUT_DIM = 2
HIDDEN_DIM = 32
NUM_HIST = 8
TIME_SPAN = NUM_HIST            # time_span=None -> num_historical_steps
NUM_FREQ_BANDS = 4
NUM_LAYERS = 2
NUM_HEADS = 4
HEAD_DIM = 8                    # num_heads * head_dim == hidden_dim
EPS_LN = 1e-5
NEG_BIG = 1e30


# ------------------------------ small helpers -------------------------------
def _ln(x, g, b):
    """torch.nn.LayerNorm over last axis (biased variance, eps=1e-5), f32 math."""
    mu = jnp.mean(x, axis=-1, keepdims=True)
    var = jnp.mean((x - mu) ** 2, axis=-1, keepdims=True)
    return (x - mu) * jax.lax.rsqrt(var + EPS_LN) * g + b


def _angle_between_2d(ctr, nbr):
    return jnp.arctan2(ctr[..., 0] * nbr[..., 1] - ctr[..., 1] * nbr[..., 0],
                       (ctr[..., :2] * nbr[..., :2]).sum(-1))


def _wrap_angle(a):
    return -math.pi + (a + math.pi) % (2.0 * math.pi)


def _round_up(x, m):
    return ((x + m - 1) // m) * m


def _rep_spec(shape):
    nd = len(shape)
    return pl.BlockSpec(shape, lambda i, nd=nd: (0,) * nd)


# --------------------------- FourierEmbedding kernel -------------------------
def _fourier_kernel(x_ref, fmat_ref, w1c_ref, w1s_ref, w1x_ref, b1_ref, g1_ref,
                    be1_ref, segm_ref, w2_ref, b2_ref, og_ref, ob_ref, ow_ref,
                    obias_ref, out_ref):
    bf = jnp.bfloat16
    x = x_ref[...]                                                   # (TM, C) f32

    # frequency features (kept f32: phase precision matters before cos/sin)
    xf = jnp.dot(x, fmat_ref[...], preferred_element_type=jnp.float32)   # (TM, C*F)
    cosf = jnp.cos(xf)
    sinf = jnp.sin(xf)

    # per-channel MLP stage 1 as three block-diagonal matmuls (no lane concat)
    h = (jnp.dot(cosf.astype(bf), w1c_ref[...], preferred_element_type=jnp.float32)
         + jnp.dot(sinf.astype(bf), w1s_ref[...], preferred_element_type=jnp.float32)
         + jnp.dot(x, w1x_ref[...], preferred_element_type=jnp.float32)
         + b1_ref[...])                                              # (TM, C*D)

    # per-channel LayerNorm via segment-mean matmuls; var = E[h^2] - mu^2
    segm = segm_ref[...]                                             # (C*D, C*D)
    mu = jnp.dot(h, segm, preferred_element_type=jnp.float32)
    ex2 = jnp.dot(h * h, segm, preferred_element_type=jnp.float32)
    var = jnp.maximum(ex2 - mu * mu, 0.0)
    h = (h - mu) * jax.lax.rsqrt(var + EPS_LN) * g1_ref[...] + be1_ref[...]
    h = jnp.maximum(h, 0.0)

    # per-channel MLP stage 2 + channel sum in one stacked matmul
    acc = jnp.dot(h.astype(bf), w2_ref[...],
                  preferred_element_type=jnp.float32) + b2_ref[...]  # (TM, D)

    y = _ln(acc, og_ref[...], ob_ref[...])
    y = jnp.maximum(y, 0.0)
    y = jnp.dot(y.astype(bf), ow_ref[...],
                preferred_element_type=jnp.float32) + obias_ref[...]
    out_ref[...] = y.astype(out_ref.dtype)


_FOURIER_PACKED = ("fmat", "w1_cos", "w1_sin", "w1_x", "b1_all", "g1_all",
                   "be1_all", "seg_mean", "w2_stack", "b2_sum",
                   "out_g", "out_b", "out_w", "out_bias")


def fourier_embedding(x, p, out_dtype=jnp.bfloat16):
    """x: (M, C) float32 -> (M, hidden) out_dtype."""
    M, C = x.shape
    D = p["out_w"].shape[1]
    TM = min(2048, _round_up(M, 16))
    M_pad = _round_up(M, TM)
    if M_pad != M:
        x = jnp.pad(x, ((0, M_pad - M), (0, 0)))
    in_specs = [pl.BlockSpec((TM, C), lambda i: (i, 0))] + \
               [_rep_spec(p[name].shape) for name in _FOURIER_PACKED]
    y = pl.pallas_call(
        _fourier_kernel,
        out_shape=jax.ShapeDtypeStruct((M_pad, D), out_dtype),
        grid=(M_pad // TM,),
        in_specs=in_specs,
        out_specs=pl.BlockSpec((TM, D), lambda i: (i, 0)),
        compiler_params=pltpu.CompilerParams(dimension_semantics=("parallel",)),
    )(x, *[p[name] for name in _FOURIER_PACKED])
    return y[:M]


# ---------------------------- AttentionLayer kernel --------------------------
ATTN_PACKED = ["wx", "bx", "wr", "br", "wg_agg", "wg_x", "wout",
               "w1", "b1", "w2", "lng", "lnb", "smb", "seg", "seg_t"]


def _attn_kernel(x_ref, r_ref, mb_ref, rv_ref,
                 wx_ref, bx_ref, wr_ref, br_ref, wga_ref, wgx_ref, wout_ref,
                 w1_ref, b1_ref, w2_ref, lng_ref, lnb_ref, smb_ref,
                 seg_ref, segt_ref, out_ref,
                 *, n_layers, n_heads, head_dim, seq, a_tile):
    H = seq
    A = a_tile
    D = n_heads * head_dim
    nh_p = seg_ref.shape[1]
    bf = jnp.bfloat16

    x = x_ref[...].astype(jnp.float32)               # (A*H, D)   residual stream (f32)
    r = r_ref[...].astype(jnp.float32)               # (A*H*H, D) edge emb [a, dst, src]
    bias4 = mb_ref[...].reshape(A, H, H, 1)          # additive mask bias (0 / -1e30)
    rv = rv_ref[...]                                 # (A*H, 1) row validity (0/1)

    seg = seg_ref[...]                               # (D, nh_p) head fold
    seg_t = segt_ref[...]                            # (nh_p, D) head expand

    # layer-invariant part of the edge LayerNorm (affine applied per layer)
    r_mu = jnp.mean(r, axis=-1, keepdims=True)
    r_var = jnp.mean((r - r_mu) ** 2, axis=-1, keepdims=True)
    r_hat = (r - r_mu) * jax.lax.rsqrt(r_var + EPS_LN)

    for l in range(n_layers):                        # both layers fused in one call
        lng = lng_ref[l]                             # (5, D): pre_x, pre_r, post, ffpre, ffpost
        lnb = lnb_ref[l]
        smb = smb_ref[l]                             # (3, D): bg, bout, b2

        xn = _ln(x, lng[0:1], lnb[0:1])              # (A*H, D) f32
        xn_b = xn.astype(bf)
        rn_b = (r_hat * lng[1:2] + lnb[1:2]).astype(bf)

        # packed projections (attention scale pre-folded into the q weight columns)
        qkvs = jnp.dot(xn_b, wx_ref[l], preferred_element_type=jnp.float32) + bx_ref[l]
        q = qkvs[:, 0:D]
        k = qkvs[:, D:2 * D]
        v = qkvs[:, 2 * D:3 * D]
        s_dst = qkvs[:, 3 * D:4 * D]
        kvr = jnp.dot(rn_b, wr_ref[l], preferred_element_type=jnp.float32) + br_ref[l]
        kr = kvr[:, 0:D]
        vr = kvr[:, D:2 * D]

        k_full = k.reshape(A, 1, H, D) + kr.reshape(A, H, H, D)   # (A, Hd, Hs, D)
        v_full = v.reshape(A, 1, H, D) + vr.reshape(A, H, H, D)
        q4 = q.reshape(A, H, 1, D)

        # per-head scores via segment matmul; additive mask bias (no selects)
        prod = q4 * k_full                                          # (A, Hd, Hs, D)
        sim = jnp.dot(prod.reshape(A * H * H, D), seg,
                      preferred_element_type=jnp.float32).reshape(A, H, H, nh_p)
        sim = sim + bias4
        mx = jnp.max(sim, axis=2, keepdims=True)                    # (A, Hd, 1, nh_p)
        p = jnp.exp(sim - mx)                                       # masked -> exact 0
        denom = jnp.sum(p, axis=2, keepdims=True) + 1e-16           # PyG softmax eps
        attn = p * (1.0 / denom)                                    # exact reciprocal

        # expand head weights back to D lanes, aggregate over sources,
        # then zero empty destination rows (PyG empty-row -> 0 semantics)
        attn_d = jnp.dot(attn.reshape(A * H * H, nh_p), seg_t,
                         preferred_element_type=jnp.float32).reshape(A, H, H, D)
        agg = jnp.sum(attn_d * v_full, axis=2).reshape(A * H, D) * rv

        gate = jax.nn.sigmoid(
            jnp.dot(agg.astype(bf), wga_ref[l], preferred_element_type=jnp.float32)
            + jnp.dot(xn_b, wgx_ref[l], preferred_element_type=jnp.float32)
            + smb[0:1])
        upd = agg + gate * (s_dst - agg)
        attn_out = jnp.dot(upd.astype(bf), wout_ref[l],
                           preferred_element_type=jnp.float32) + smb[1:2]

        x2 = x + _ln(attn_out, lng[2:3], lnb[2:3])
        xf = _ln(x2, lng[3:4], lnb[3:4])
        h1 = jnp.maximum(
            jnp.dot(xf.astype(bf), w1_ref[l], preferred_element_type=jnp.float32)
            + b1_ref[l], 0.0)
        ff = jnp.dot(h1.astype(bf), w2_ref[l],
                     preferred_element_type=jnp.float32) + smb[2:3]
        x = x2 + _ln(ff, lng[4:5], lnb[4:5])

    out_ref[...] = x


def _pick_a_tile(n_agents):
    """Even tile (bf16 16-row blocks), <=64, grid>=2 when n_agents>=3 (v7x megacore)."""
    if n_agents <= 2:
        return max(1, n_agents)
    half = (n_agents + 1) // 2
    return min(64, _round_up(half, 2))


def attention_layers(x, r, edge_mask, packed, *, n_agents, seq, n_layers):
    """x: (N*seq, D) bf16; r: (N*seq*seq, D) bf16; edge_mask: (N, seq, seq) f32."""
    _, D = x.shape

    mask_bias = (edge_mask - 1.0) * NEG_BIG                         # (N, H, H) f32
    row_valid = (jnp.max(edge_mask, axis=2) > 0.5)
    row_valid = row_valid.astype(jnp.float32).reshape(-1, 1)        # (N*H, 1)

    a_tile = _pick_a_tile(n_agents)
    n_pad = _round_up(n_agents, a_tile)
    if n_pad != n_agents:
        pad_a = n_pad - n_agents
        x = jnp.pad(x, ((0, pad_a * seq), (0, 0)))
        r = jnp.pad(r, ((0, pad_a * seq * seq), (0, 0)))
        mask_bias = jnp.pad(mask_bias, ((0, pad_a), (0, 0), (0, 0)))
        row_valid = jnp.pad(row_valid, ((0, pad_a * seq), (0, 0)))

    kernel = partial(_attn_kernel, n_layers=n_layers, n_heads=NUM_HEADS,
                     head_dim=HEAD_DIM, seq=seq, a_tile=a_tile)
    in_specs = [
        pl.BlockSpec((a_tile * seq, D), lambda n: (n, 0)),
        pl.BlockSpec((a_tile * seq * seq, D), lambda n: (n, 0)),
        pl.BlockSpec((a_tile, seq, seq), lambda n: (n, 0, 0)),
        pl.BlockSpec((a_tile * seq, 1), lambda n: (n, 0)),
    ] + [_rep_spec(packed[name].shape) for name in ATTN_PACKED]
    y = pl.pallas_call(
        kernel,
        out_shape=jax.ShapeDtypeStruct((n_pad * seq, D), jnp.float32),
        grid=(n_pad // a_tile,),
        in_specs=in_specs,
        out_specs=pl.BlockSpec((a_tile * seq, D), lambda n: (n, 0)),
        compiler_params=pltpu.CompilerParams(dimension_semantics=("parallel",)),
    )(x, r, mask_bias, row_valid, *[packed[name] for name in ATTN_PACKED])
    return y[:n_agents * seq]


# ------------------------------ parameter init -------------------------------
def _normal(key, shape, scale=0.1):
    return scale * jax.random.normal(key, shape, jnp.float32)


def init_fourier_params(key, in_dim, hidden, n_freq):
    ks = jax.random.split(key, 4)
    feat = 2 * n_freq + 1
    return {
        "freqs": jax.random.normal(ks[0], (in_dim, n_freq), jnp.float32),
        "w1": _normal(ks[1], (in_dim, feat, hidden)),
        "b1": jnp.zeros((in_dim, hidden), jnp.float32),
        "g1": jnp.ones((in_dim, hidden), jnp.float32),
        "be1": jnp.zeros((in_dim, hidden), jnp.float32),
        "w2": _normal(ks[2], (in_dim, hidden, hidden)),
        "b2": jnp.zeros((in_dim, hidden), jnp.float32),
        "out_g": jnp.ones((1, hidden), jnp.float32),
        "out_b": jnp.zeros((1, hidden), jnp.float32),
        "out_w": _normal(ks[3], (hidden, hidden)),
        "out_bias": jnp.zeros((1, hidden), jnp.float32),
    }


def pack_fourier_params(p):
    """Pack per-channel Fourier MLPs into block-diagonal / stacked matrices."""
    C, F = p["freqs"].shape
    D = p["out_w"].shape[1]

    fmat = jnp.zeros((C, C * F), jnp.float32)
    w1_cos = jnp.zeros((C * F, C * D), jnp.float32)
    w1_sin = jnp.zeros((C * F, C * D), jnp.float32)
    w1_x = jnp.zeros((C, C * D), jnp.float32)
    for c in range(C):
        fmat = fmat.at[c, c * F:(c + 1) * F].set(2.0 * math.pi * p["freqs"][c])
        w1_cos = w1_cos.at[c * F:(c + 1) * F, c * D:(c + 1) * D].set(p["w1"][c, 0:F, :])
        w1_sin = w1_sin.at[c * F:(c + 1) * F, c * D:(c + 1) * D].set(p["w1"][c, F:2 * F, :])
        w1_x = w1_x.at[c, c * D:(c + 1) * D].set(p["w1"][c, 2 * F, :])

    blk = jnp.arange(C * D) // D
    seg_mean = (blk[:, None] == blk[None, :]).astype(jnp.float32) / float(D)

    return {
        "fmat": fmat,                                   # f32 (phase precision)
        "w1_cos": w1_cos.astype(jnp.bfloat16),
        "w1_sin": w1_sin.astype(jnp.bfloat16),
        "w1_x": w1_x,                                   # tiny K, keep f32
        "b1_all": p["b1"].reshape(1, C * D),
        "g1_all": p["g1"].reshape(1, C * D),
        "be1_all": p["be1"].reshape(1, C * D),
        "seg_mean": seg_mean,                           # f32 (LN stats stay f32)
        "w2_stack": p["w2"].reshape(C * D, D).astype(jnp.bfloat16),
        "b2_sum": jnp.sum(p["b2"], axis=0, keepdims=True),
        "out_g": p["out_g"], "out_b": p["out_b"],
        "out_w": p["out_w"].astype(jnp.bfloat16),
        "out_bias": p["out_bias"],
    }


def init_attn_params(key, hidden, n_heads, head_dim):
    dh = n_heads * head_dim
    ks = jax.random.split(key, 10)
    ones = lambda s: jnp.ones(s, jnp.float32)
    zeros = lambda s: jnp.zeros(s, jnp.float32)
    return {
        "pre_x_g": ones((1, hidden)), "pre_x_b": zeros((1, hidden)),
        "pre_r_g": ones((1, hidden)), "pre_r_b": zeros((1, hidden)),
        "wq": _normal(ks[0], (hidden, dh)), "bq": zeros((1, dh)),
        "wk": _normal(ks[1], (hidden, dh)),
        "wv": _normal(ks[2], (hidden, dh)), "bv": zeros((1, dh)),
        "wkr": _normal(ks[3], (hidden, dh)),
        "wvr": _normal(ks[4], (hidden, dh)), "bvr": zeros((1, dh)),
        "ws": _normal(ks[5], (hidden, dh)), "bs": zeros((1, dh)),
        "wg": _normal(ks[6], (dh + hidden, dh)), "bg": zeros((1, dh)),
        "wout": _normal(ks[7], (dh, hidden)), "bout": zeros((1, hidden)),
        "post_g": ones((1, hidden)), "post_b": zeros((1, hidden)),
        "ffpre_g": ones((1, hidden)), "ffpre_b": zeros((1, hidden)),
        "w1": _normal(ks[8], (hidden, 4 * hidden)), "b1": zeros((1, 4 * hidden)),
        "w2": _normal(ks[9], (4 * hidden, hidden)), "b2": zeros((1, hidden)),
        "ffpost_g": ones((1, hidden)), "ffpost_b": zeros((1, hidden)),
    }


def pack_attn_layers(layer_params):
    """Pack per-layer tensors into stacked arrays; fold scale; pre-cast to bf16."""
    D = HIDDEN_DIM
    scale = HEAD_DIM ** -0.5
    bf = jnp.bfloat16

    def pack_one(p):
        wx = jnp.concatenate([p["wq"] * scale, p["wk"], p["wv"], p["ws"]], axis=1)
        bx = jnp.concatenate([p["bq"] * scale, jnp.zeros((1, D), jnp.float32),
                              p["bv"], p["bs"]], axis=1)
        wr = jnp.concatenate([p["wkr"], p["wvr"]], axis=1)
        br = jnp.concatenate([jnp.zeros((1, D), jnp.float32), p["bvr"]], axis=1)
        return {
            "wx": wx.astype(bf), "bx": bx,                                    # (D,4D)/(1,4D)
            "wr": wr.astype(bf), "br": br,                                    # (D,2D)/(1,2D)
            "wg_agg": p["wg"][:D].astype(bf),
            "wg_x": p["wg"][D:].astype(bf),
            "wout": p["wout"].astype(bf),
            "w1": p["w1"].astype(bf), "b1": p["b1"],
            "w2": p["w2"].astype(bf),
            "lng": jnp.concatenate([p["pre_x_g"], p["pre_r_g"], p["post_g"],
                                    p["ffpre_g"], p["ffpost_g"]], axis=0),    # (5, D)
            "lnb": jnp.concatenate([p["pre_x_b"], p["pre_r_b"], p["post_b"],
                                    p["ffpre_b"], p["ffpost_b"]], axis=0),
            "smb": jnp.concatenate([p["bg"], p["bout"], p["b2"]], axis=0),    # (3, D)
        }

    per_layer = [pack_one(p) for p in layer_params]
    packed = {k: jnp.stack([q[k] for q in per_layer], axis=0) for k in per_layer[0]}

    # layer-independent head-segment fold/expand constants (avoid per-step iota)
    nh_p = max(8, NUM_HEADS)
    d_idx = jnp.arange(NUM_HEADS * HEAD_DIM) // HEAD_DIM
    h_idx = jnp.arange(nh_p)
    seg = (d_idx[:, None] == h_idx[None, :]).astype(jnp.float32)    # (D, nh_p)
    packed["seg"] = seg
    packed["seg_t"] = seg.T                                         # (nh_p, D)
    return packed


# ------------------------------- forward pass --------------------------------
def giganet_encoder_forward(position, valid_mask, params):
    """position: (N, T, >=2) float; valid_mask: (N, T) bool."""
    N = position.shape[0]
    H = NUM_HIST
    mask = valid_mask[:, :H]
    pos_a = position[:, :H, :INPUT_DIM].astype(jnp.float32)              # (N, H, 2)

    motion = jnp.concatenate(
        [jnp.zeros((N, 1, INPUT_DIM), jnp.float32), pos_a[:, 1:] - pos_a[:, :-1]],
        axis=1)                                                           # (N, H, 2)
    head_a = jnp.arctan2(motion[..., 1], motion[..., 0])                  # (N, H)
    head_vec = jnp.stack([jnp.cos(head_a), jnp.sin(head_a)], axis=-1)     # (N, H, 2)
    x_feat = jnp.stack(
        [jnp.linalg.norm(motion, axis=-1), _angle_between_2d(head_vec, motion)],
        axis=-1)                                                          # (N, H, 2)

    # x_a embedding (Pallas Fourier kernel, bf16 output feeding attention)
    x_a = fourier_embedding(x_feat.reshape(-1, 2), params["x_a_emb"])     # (N*H, D) bf16

    # dense temporal relative features r_t[n, dst j, src i]
    t = jnp.arange(H)
    rel_pos = pos_a[:, None, :, :] - pos_a[:, :, None, :]                 # pos[src]-pos[dst]
    rel_head = _wrap_angle(head_a[:, None, :] - head_a[:, :, None])
    r_feat = jnp.stack([
        jnp.linalg.norm(rel_pos, axis=-1),
        _angle_between_2d(head_vec[:, :, None, :], rel_pos),
        rel_head,
        jnp.broadcast_to((t[None, :] - t[:, None]).astype(jnp.float32), (N, H, H)),
    ], axis=-1)                                                           # (N, H, H, 4)
    r_t = fourier_embedding(r_feat.reshape(-1, 4), params["r_t_emb"])     # (N*H*H, D) bf16

    # edge mask == dense_to_sparse(mask_t) filtered to (dst > src, dst-src <= span)
    causal = (t[:, None] > t[None, :]) & ((t[:, None] - t[None, :]) <= TIME_SPAN)
    edge_mask = (mask[:, :, None] & mask[:, None, :] & causal[None]).astype(jnp.float32)

    # both temporal attention layers fused in a single pallas_call
    x = attention_layers(x_a, r_t, edge_mask, params["t_attn_packed"],
                         n_agents=N, seq=H, n_layers=NUM_LAYERS)

    return {"x_a": x, "heading": head_a}


# ----------------------------------- main ------------------------------------
if __name__ == "__main__":
    key = jax.random.PRNGKey(0)
    k_pos, k_mask, k_params = jax.random.split(key, 3)

    N_AGENTS, T_TOTAL = 2, 10
    position = 10.0 * jax.random.normal(k_pos, (N_AGENTS, T_TOTAL, 3), jnp.float32)
    valid_mask = jax.random.bernoulli(k_mask, 0.9, (N_AGENTS, T_TOTAL))

    kf1, kf2, *kl = jax.random.split(k_params, 2 + NUM_LAYERS)
    params = {
        "x_a_emb": pack_fourier_params(
            init_fourier_params(kf1, 2, HIDDEN_DIM, NUM_FREQ_BANDS)),
        "r_t_emb": pack_fourier_params(
            init_fourier_params(kf2, 4, HIDDEN_DIM, NUM_FREQ_BANDS)),
        "t_attn_packed": pack_attn_layers(
            [init_attn_params(k, HIDDEN_DIM, NUM_HEADS, HEAD_DIM) for k in kl]),
    }

    forward = jax.jit(giganet_encoder_forward)
    out = forward(position, valid_mask, params)
    out = jax.block_until_ready(out)

    assert out["x_a"].shape == (N_AGENTS * NUM_HIST, HIDDEN_DIM)
    assert out["heading"].shape == (N_AGENTS, NUM_HIST)
    assert bool(jnp.all(jnp.isfinite(out["x_a"])))
    assert bool(jnp.all(jnp.isfinite(out["heading"])))
    print("KERNEL_OK")
</pallas_src>

<mosaic_0001>
module attributes {stable_mosaic.version = 11 : i64} {
  func.func @_fourier_kernel(%arg0: i32, %arg1: memref<128x4xf32, #tpu.memory_space<vmem>>, %arg2: memref<4x16xf32, #tpu.memory_space<vmem>>, %arg3: memref<16x128xbf16, #tpu.memory_space<vmem>>, %arg4: memref<16x128xbf16, #tpu.memory_space<vmem>>, %arg5: memref<4x128xf32, #tpu.memory_space<vmem>>, %arg6: memref<1x128xf32, #tpu.memory_space<vmem>>, %arg7: memref<1x128xf32, #tpu.memory_space<vmem>>, %arg8: memref<1x128xf32, #tpu.memory_space<vmem>>, %arg9: memref<128x128xf32, #tpu.memory_space<vmem>>, %arg10: memref<128x32xbf16, #tpu.memory_space<vmem>>, %arg11: memref<1x32xf32, #tpu.memory_space<vmem>>, %arg12: memref<1x32xf32, #tpu.memory_space<vmem>>, %arg13: memref<1x32xf32, #tpu.memory_space<vmem>>, %arg14: memref<32x32xbf16, #tpu.memory_space<vmem>>, %arg15: memref<1x32xf32, #tpu.memory_space<vmem>>, %arg16: memref<128x32xbf16, #tpu.memory_space<vmem>>) attributes {dimension_semantics = [#tpu.dimension_semantics<parallel>], iteration_bounds = array<i64: 1>, scalar_prefetch = 0 : i64, scratch_operands = 0 : i64, tpu.core_type = #tpu.core_type<tc>, window_params = [{transform_indices = @transform_0, window_bounds = array<i64: 128, 4>}, {pipeline_mode = #tpu.pipeline_mode<synchronous>, transform_indices = @transform_1, window_bounds = array<i64: 4, 16>}, {pipeline_mode = #tpu.pipeline_mode<synchronous>, transform_indices = @transform_2, window_bounds = array<i64: 16, 128>}, {pipeline_mode = #tpu.pipeline_mode<synchronous>, transform_indices = @transform_3, window_bounds = array<i64: 16, 128>}, {pipeline_mode = #tpu.pipeline_mode<synchronous>, transform_indices = @transform_4, window_bounds = array<i64: 4, 128>}, {pipeline_mode = #tpu.pipeline_mode<synchronous>, transform_indices = @transform_5, window_bounds = array<i64: 1, 128>}, {pipeline_mode = #tpu.pipeline_mode<synchronous>, transform_indices = @transform_6, window_bounds = array<i64: 1, 128>}, {pipeline_mode = #tpu.pipeline_mode<synchronous>, transform_indices = @transform_7, window_bounds = array<i64: 1, 128>}, {pipeline_mode = #tpu.pipeline_mode<synchronous>, transform_indices = @transform_8, window_bounds = array<i64: 128, 128>}, {pipeline_mode = #tpu.pipeline_mode<synchronous>, transform_indices = @transform_9, window_bounds = array<i64: 128, 32>}, {pipeline_mode = #tpu.pipeline_mode<synchronous>, transform_indices = @transform_10, window_bounds = array<i64: 1, 32>}, {pipeline_mode = #tpu.pipeline_mode<synchronous>, transform_indices = @transform_11, window_bounds = array<i64: 1, 32>}, {pipeline_mode = #tpu.pipeline_mode<synchronous>, transform_indices = @transform_12, window_bounds = array<i64: 1, 32>}, {pipeline_mode = #tpu.pipeline_mode<synchronous>, transform_indices = @transform_13, window_bounds = array<i64: 32, 32>}, {pipeline_mode = #tpu.pipeline_mode<synchronous>, transform_indices = @transform_14, window_bounds = array<i64: 1, 32>}, {transform_indices = @transform_15, window_bounds = array<i64: 128, 32>}]} {
    %c0 = arith.constant 0 : index
    %c0_0 = arith.constant 0 : index
    %0 = vector.load %arg1[%c0, %c0_0] : memref<128x4xf32, #tpu.memory_space<vmem>>, vector<128x4xf32>
    %c0_1 = arith.constant 0 : index
    %c0_2 = arith.constant 0 : index
    %1 = vector.load %arg2[%c0_1, %c0_2] : memref<4x16xf32, #tpu.memory_space<vmem>>, vector<4x16xf32>
    %cst = arith.constant dense<0.000000e+00> : vector<128x16xf32>
    %2 = tpu.matmul %0, %1, %cst {dimension_numbers = #tpu.dot_dimension_numbers<[1], [0], [0], [1], [0, 0, 1, 1], [], []>} : vector<128x4xf32>, vector<4x16xf32>, vector<128x16xf32> -> vector<128x16xf32>
    %3 = math.cos %2 : vector<128x16xf32>
    %4 = math.sin %2 : vector<128x16xf32>
    %5 = arith.truncf %3 : vector<128x16xf32> to vector<128x16xbf16>
    %c0_3 = arith.constant 0 : index
    %c0_4 = arith.constant 0 : index
    %6 = vector.load %arg3[%c0_3, %c0_4] : memref<16x128xbf16, #tpu.memory_space<vmem>>, vector<16x128xbf16>
    %cst_5 = arith.constant dense<0.000000e+00> : vector<128x128xf32>
    %7 = tpu.matmul %5, %6, %cst_5 {dimension_numbers = #tpu.dot_dimension_numbers<[1], [0], [0], [1], [0, 0, 1, 1], [], []>} : vector<128x16xbf16>, vector<16x128xbf16>, vector<128x128xf32> -> vector<128x128xf32>
    %8 = arith.truncf %4 : vector<128x16xf32> to vector<128x16xbf16>
    %c0_6 = arith.constant 0 : index
    %c0_7 = arith.constant 0 : index
    %9 = vector.load %arg4[%c0_6, %c0_7] : memref<16x128xbf16, #tpu.memory_space<vmem>>, vector<16x128xbf16>
    %cst_8 = arith.constant dense<0.000000e+00> : vector<128x128xf32>
    %10 = tpu.matmul %8, %9, %cst_8 {dimension_numbers = #tpu.dot_dimension_numbers<[1], [0], [0], [1], [0, 0, 1, 1], [], []>} : vector<128x16xbf16>, vector<16x128xbf16>, vector<128x128xf32> -> vector<128x128xf32>
    %11 = arith.addf %7, %10 : vector<128x128xf32>
    %c0_9 = arith.constant 0 : index
    %c0_10 = arith.constant 0 : index
    %12 = vector.load %arg5[%c0_9, %c0_10] : memref<4x128xf32, #tpu.memory_space<vmem>>, vector<4x128xf32>
    %cst_11 = arith.constant dense<0.000000e+00> : vector<128x128xf32>
    %13 = tpu.matmul %0, %12, %cst_11 {dimension_numbers = #tpu.dot_dimension_numbers<[1], [0], [0], [1], [0, 0, 1, 1], [], []>} : vector<128x4xf32>, vector<4x128xf32>, vector<128x128xf32> -> vector<128x128xf32>
    %14 = arith.addf %11, %13 : vector<128x128xf32>
    %c0_12 = arith.constant 0 : index
    %c0_13 = arith.constant 0 : index
    %15 = vector.load %arg6[%c0_12, %c0_13] : memref<1x128xf32, #tpu.memory_space<vmem>>, vector<1x128xf32>
    %16 = vector.broadcast %15 : vector<1x128xf32> to vector<128x128xf32>
    %17 = arith.addf %14, %16 : vector<128x128xf32>
    %c0_14 = arith.constant 0 : index
    %c0_15 = arith.constant 0 : index
    %18 = vector.load %arg9[%c0_14, %c0_15] : memref<128x128xf32, #tpu.memory_space<vmem>>, vector<128x128xf32>
    %cst_16 = arith.constant dense<0.000000e+00> : vector<128x128xf32>
    %19 = tpu.matmul %17, %18, %cst_16 {dimension_numbers = #tpu.dot_dimension_numbers<[1], [0], [0], [1], [0, 0, 1, 1], [], []>} : vector<128x128xf32>, vector<128x128xf32>, vector<128x128xf32> -> vector<128x128xf32>
    %20 = arith.mulf %17, %17 : vector<128x128xf32>
    %cst_17 = arith.constant dense<0.000000e+00> : vector<128x128xf32>
    %21 = tpu.matmul %20, %18, %cst_17 {dimension_numbers = #tpu.dot_dimension_numbers<[1], [0], [0], [1], [0, 0, 1, 1], [], []>} : vector<128x128xf32>, vector<128x128xf32>, vector<128x128xf32> -> vector<128x128xf32>
    %22 = arith.mulf %19, %19 : vector<128x128xf32>
    %23 = arith.subf %21, %22 : vector<128x128xf32>
    %cst_18 = arith.constant 0.000000e+00 : f32
    %24 = vector.broadcast %cst_18 : f32 to vector<128x128xf32>
    %25 = arith.maximumf %23, %24 : vector<128x128xf32>
    %26 = arith.subf %17, %19 : vector<128x128xf32>
    %cst_19 = arith.constant 9.99999974E-6 : f32
    %27 = vector.broadcast %cst_19 : f32 to vector<128x128xf32>
    %28 = arith.addf %25, %27 : vector<128x128xf32>
    %29 = math.rsqrt %28 : vector<128x128xf32>
    %30 = arith.mulf %26, %29 : vector<128x128xf32>
    %c0_20 = arith.constant 0 : index
    %c0_21 = arith.constant 0 : index
    %31 = vector.load %arg7[%c0_20, %c0_21] : memref<1x128xf32, #tpu.memory_space<vmem>>, vector<1x128xf32>
    %32 = vector.broadcast %31 : vector<1x128xf32> to vector<128x128xf32>
    %33 = arith.mulf %30, %32 : vector<128x128xf32>
    %c0_22 = arith.constant 0 : index
    %c0_23 = arith.constant 0 : index
    %34 = vector.load %arg8[%c0_22, %c0_23] : memref<1x128xf32, #tpu.memory_space<vmem>>, vector<1x128xf32>
    %35 = vector.broadcast %34 : vector<1x128xf32> to vector<128x128xf32>
    %36 = arith.addf %33, %35 : vector<128x128xf32>
    %cst_24 = arith.constant 0.000000e+00 : f32
    %37 = vector.broadcast %cst_24 : f32 to vector<128x128xf32>
    %38 = arith.maximumf %36, %37 : vector<128x128xf32>
    %39 = arith.truncf %38 : vector<128x128xf32> to vector<128x128xbf16>
    %c0_25 = arith.constant 0 : index
    %c0_26 = arith.constant 0 : index
    %40 = vector.load %arg10[%c0_25, %c0_26] : memref<128x32xbf16, #tpu.memory_space<vmem>>, vector<128x32xbf16>
    %cst_27 = arith.constant dense<0.000000e+00> : vector<128x32xf32>
    %41 = tpu.matmul %39, %40, %cst_27 {dimension_numbers = #tpu.dot_dimension_numbers<[1], [0], [0], [1], [0, 0, 1, 1], [], []>} : vector<128x128xbf16>, vector<128x32xbf16>, vector<128x32xf32> -> vector<128x32xf32>
    %c0_28 = arith.constant 0 : index
    %c0_29 = arith.constant 0 : index
    %42 = vector.load %arg11[%c0_28, %c0_29] : memref<1x32xf32, #tpu.memory_space<vmem>>, vector<1x32xf32>
    %43 = vector.broadcast %42 : vector<1x32xf32> to vector<128x32xf32>
    %44 = arith.addf %41, %43 : vector<128x32xf32>
    %c0_30 = arith.constant 0 : index
    %c0_31 = arith.constant 0 : index
    %45 = vector.load %arg12[%c0_30, %c0_31] : memref<1x32xf32, #tpu.memory_space<vmem>>, vector<1x32xf32>
    %c0_32 = arith.constant 0 : index
    %c0_33 = arith.constant 0 : index
    %46 = vector.load %arg13[%c0_32, %c0_33] : memref<1x32xf32, #tpu.memory_space<vmem>>, vector<1x32xf32>
    %cst_34 = arith.constant dense<0.000000e+00> : vector<128xf32>
    %47 = vector.multi_reduction <add>, %44, %cst_34 [1] : vector<128x32xf32> to vector<128xf32>
    %48 = vector.shape_cast %47 : vector<128xf32> to vector<128x1xf32>
    %cst_35 = arith.constant 3.200000e+01 : f32
    %49 = vector.broadcast %cst_35 : f32 to vector<128x1xf32>
    %50 = arith.divf %48, %49 : vector<128x1xf32>
    %51 = vector.broadcast %50 : vector<128x1xf32> to vector<128x32xf32>
    %52 = arith.subf %44, %51 : vector<128x32xf32>
    %53 = arith.mulf %52, %52 : vector<128x32xf32>
    %cst_36 = arith.constant dense<0.000000e+00> : vector<128xf32>
    %54 = vector.multi_reduction <add>, %53, %cst_36 [1] : vector<128x32xf32> to vector<128xf32>
    %55 = vector.shape_cast %54 : vector<128xf32> to vector<128x1xf32>
    %cst_37 = arith.constant 3.200000e+01 : f32
    %56 = vector.broadcast %cst_37 : f32 to vector<128x1xf32>
    %57 = arith.divf %55, %56 : vector<128x1xf32>
    %58 = vector.broadcast %50 : vector<128x1xf32> to vector<128x32xf32>
    %59 = arith.subf %44, %58 : vector<128x32xf32>
    %cst_38 = arith.constant 9.99999974E-6 : f32
    %60 = vector.broadcast %cst_38 : f32 to vector<128x1xf32>
    %61 = arith.addf %57, %60 : vector<128x1xf32>
    %62 = math.rsqrt %61 : vector<128x1xf32>
    %63 = vector.broadcast %62 : vector<128x1xf32> to vector<128x32xf32>
    %64 = arith.mulf %59, %63 : vector<128x32xf32>
    %65 = vector.broadcast %45 : vector<1x32xf32> to vector<128x32xf32>
    %66 = arith.mulf %64, %65 : vector<128x32xf32>
    %67 = vector.broadcast %46 : vector<1x32xf32> to vector<128x32xf32>
    %68 = arith.addf %66, %67 : vector<128x32xf32>
    %cst_39 = arith.constant 0.000000e+00 : f32
    %69 = vector.broadcast %cst_39 : f32 to vector<128x32xf32>
    %70 = arith.maximumf %68, %69 : vector<128x32xf32>
    %71 = arith.truncf %70 : vector<128x32xf32> to vector<128x32xbf16>
    %c0_40 = arith.constant 0 : index
    %c0_41 = arith.constant 0 : index
    %72 = vector.load %arg14[%c0_40, %c0_41] : memref<32x32xbf16, #tpu.memory_space<vmem>>, vector<32x32xbf16>
    %cst_42 = arith.constant dense<0.000000e+00> : vector<128x32xf32>
    %73 = tpu.matmul %71, %72, %cst_42 {dimension_numbers = #tpu.dot_dimension_numbers<[1], [0], [0], [1], [0, 0, 1, 1], [], []>} : vector<128x32xbf16>, vector<32x32xbf16>, vector<128x32xf32> -> vector<128x32xf32>
    %c0_43 = arith.constant 0 : index
    %c0_44 = arith.constant 0 : index
    %74 = vector.load %arg15[%c0_43, %c0_44] : memref<1x32xf32, #tpu.memory_space<vmem>>, vector<1x32xf32>
    %75 = vector.broadcast %74 : vector<1x32xf32> to vector<128x32xf32>
    %76 = arith.addf %73, %75 : vector<128x32xf32>
    %77 = arith.truncf %76 : vector<128x32xf32> to vector<128x32xbf16>
    %c0_45 = arith.constant 0 : index
    %c0_46 = arith.constant 0 : index
    %78 = vector.load %arg16[%c0_45, %c0_46] : memref<128x32xbf16, #tpu.memory_space<vmem>>, vector<128x32xbf16>
    tpu.vector_store %arg16[%c0_45, %c0_46], %77 {strides = array<i32>} : memref<128x32xbf16, #tpu.memory_space<vmem>>, vector<128x32xbf16>,
    return
  }
  func.func @transform_0(%arg0: i32) -> (i32, i32) {
    %c0_i32 = arith.constant 0 : i32
    %c0_i32_0 = arith.constant 0 : i32
    return %arg0, %c0_i32 : i32, i32
  }
  func.func @transform_1(%arg0: i32) -> (i32, i32) {
    %c0_i32 = arith.constant 0 : i32
    %c0_i32_0 = arith.constant 0 : i32
    %c0_i32_1 = arith.constant 0 : i32
    return %c0_i32, %c0_i32_0 : i32, i32
  }
  func.func @transform_2(%arg0: i32) -> (i32, i32) {
    %c0_i32 = arith.constant 0 : i32
    %c0_i32_0 = arith.constant 0 : i32
    %c0_i32_1 = arith.constant 0 : i32
    return %c0_i32, %c0_i32_0 : i32, i32
  }
  func.func @transform_3(%arg0: i32) -> (i32, i32) {
    %c0_i32 = arith.constant 0 : i32
    %c0_i32_0 = arith.constant 0 : i32
    %c0_i32_1 = arith.constant 0 : i32
    return %c0_i32, %c0_i32_0 : i32, i32
  }
  func.func @transform_4(%arg0: i32) -> (i32, i32) {
    %c0_i32 = arith.constant 0 : i32
    %c0_i32_0 = arith.constant 0 : i32
    %c0_i32_1 = arith.constant 0 : i32
    return %c0_i32, %c0_i32_0 : i32, i32
  }
  func.func @transform_5(%arg0: i32) -> (i32, i32) {
    %c0_i32 = arith.constant 0 : i32
    %c0_i32_0 = arith.constant 0 : i32
    %c0_i32_1 = arith.constant 0 : i32
    return %c0_i32, %c0_i32_0 : i32, i32
  }
  func.func @transform_6(%arg0: i32) -> (i32, i32) {
    %c0_i32 = arith.constant 0 : i32
    %c0_i32_0 = arith.constant 0 : i32
    %c0_i32_1 = arith.constant 0 : i32
    return %c0_i32, %c0_i32_0 : i32, i32
  }
  func.func @transform_7(%arg0: i32) -> (i32, i32) {
    %c0_i32 = arith.constant 0 : i32
    %c0_i32_0 = arith.constant 0 : i32
    %c0_i32_1 = arith.constant 0 : i32
    return %c0_i32, %c0_i32_0 : i32, i32
  }
  func.func @transform_8(%arg0: i32) -> (i32, i32) {
    %c0_i32 = arith.constant 0 : i32
    %c0_i32_0 = arith.constant 0 : i32
    %c0_i32_1 = arith.constant 0 : i32
    return %c0_i32, %c0_i32_0 : i32, i32
  }
  func.func @transform_9(%arg0: i32) -> (i32, i32) {
    %c0_i32 = arith.constant 0 : i32
    %c0_i32_0 = arith.constant 0 : i32
    %c0_i32_1 = arith.constant 0 : i32
    return %c0_i32, %c0_i32_0 : i32, i32
  }
  func.func @transform_10(%arg0: i32) -> (i32, i32) {
    %c0_i32 = arith.constant 0 : i32
    %c0_i32_0 = arith.constant 0 : i32
    %c0_i32_1 = arith.constant 0 : i32
    return %c0_i32, %c0_i32_0 : i32, i32
  }
  func.func @transform_11(%arg0: i32) -> (i32, i32) {
    %c0_i32 = arith.constant 0 : i32
    %c0_i32_0 = arith.constant 0 : i32
    %c0_i32_1 = arith.constant 0 : i32
    return %c0_i32, %c0_i32_0 : i32, i32
  }
  func.func @transform_12(%arg0: i32) -> (i32, i32) {
    %c0_i32 = arith.constant 0 : i32
    %c0_i32_0 = arith.constant 0 : i32
    %c0_i32_1 = arith.constant 0 : i32
    return %c0_i32, %c0_i32_0 : i32, i32
  }
  func.func @transform_13(%arg0: i32) -> (i32, i32) {
    %c0_i32 = arith.constant 0 : i32
    %c0_i32_0 = arith.constant 0 : i32
    %c0_i32_1 = arith.constant 0 : i32
    return %c0_i32, %c0_i32_0 : i32, i32
  }
  func.func @transform_14(%arg0: i32) -> (i32, i32) {
    %c0_i32 = arith.constant 0 : i32
    %c0_i32_0 = arith.constant 0 : i32
    %c0_i32_1 = arith.constant 0 : i32
    return %c0_i32, %c0_i32_0 : i32, i32
  }
  func.func @transform_15(%arg0: i32) -> (i32, i32) {
    %c0_i32 = arith.constant 0 : i32
    %c0_i32_0 = arith.constant 0 : i32
    return %arg0, %c0_i32 : i32, i32
  }
}

module attributes {stable_mosaic.version = 11 : i64} {
  func.func @_fourier_kernel(%arg0: i32, %arg1: memref<16x2xf32, #tpu.memory_space<vmem>>, %arg2: memref<2x8xf32, #tpu.memory_space<vmem>>, %arg3: memref<8x64xbf16, #tpu.memory_space<vmem>>, %arg4: memref<8x64xbf16, #tpu.memory_space<vmem>>, %arg5: memref<2x64xf32, #tpu.memory_space<vmem>>, %arg6: memref<1x64xf32, #tpu.memory_space<vmem>>, %arg7: memref<1x64xf32, #tpu.memory_space<vmem>>, %arg8: memref<1x64xf32, #tpu.memory_space<vmem>>, %arg9: memref<64x64xf32, #tpu.memory_space<vmem>>, %arg10: memref<64x32xbf16, #tpu.memory_space<vmem>>, %arg11: memref<1x32xf32, #tpu.memory_space<vmem>>, %arg12: memref<1x32xf32, #tpu.memory_space<vmem>>, %arg13: memref<1x32xf32, #tpu.memory_space<vmem>>, %arg14: memref<32x32xbf16, #tpu.memory_space<vmem>>, %arg15: memref<1x32xf32, #tpu.memory_space<vmem>>, %arg16: memref<16x32xbf16, #tpu.memory_space<vmem>>) attributes {dimension_semantics = [#tpu.dimension_semantics<parallel>], iteration_bounds = array<i64: 1>, scalar_prefetch = 0 : i64, scratch_operands = 0 : i64, tpu.core_type = #tpu.core_type<tc>, window_params = [{transform_indices = @transform_0, window_bounds = array<i64: 16, 2>}, {pipeline_mode = #tpu.pipeline_mode<synchronous>, transform_indices = @transform_1, window_bounds = array<i64: 2, 8>}, {pipeline_mode = #tpu.pipeline_mode<synchronous>, transform_indices = @transform_2, window_bounds = array<i64: 8, 64>}, {pipeline_mode = #tpu.pipeline_mode<synchronous>, transform_indices = @transform_3, window_bounds = array<i64: 8, 64>}, {pipeline_mode = #tpu.pipeline_mode<synchronous>, transform_indices = @transform_4, window_bounds = array<i64: 2, 64>}, {pipeline_mode = #tpu.pipeline_mode<synchronous>, transform_indices = @transform_5, window_bounds = array<i64: 1, 64>}, {pipeline_mode = #tpu.pipeline_mode<synchronous>, transform_indices = @transform_6, window_bounds = array<i64: 1, 64>}, {pipeline_mode = #tpu.pipeline_mode<synchronous>, transform_indices = @transform_7, window_bounds = array<i64: 1, 64>}, {pipeline_mode = #tpu.pipeline_mode<synchronous>, transform_indices = @transform_8, window_bounds = array<i64: 64, 64>}, {pipeline_mode = #tpu.pipeline_mode<synchronous>, transform_indices = @transform_9, window_bounds = array<i64: 64, 32>}, {pipeline_mode = #tpu.pipeline_mode<synchronous>, transform_indices = @transform_10, window_bounds = array<i64: 1, 32>}, {pipeline_mode = #tpu.pipeline_mode<synchronous>, transform_indices = @transform_11, window_bounds = array<i64: 1, 32>}, {pipeline_mode = #tpu.pipeline_mode<synchronous>, transform_indices = @transform_12, window_bounds = array<i64: 1, 32>}, {pipeline_mode = #tpu.pipeline_mode<synchronous>, transform_indices = @transform_13, window_bounds = array<i64: 32, 32>}, {pipeline_mode = #tpu.pipeline_mode<synchronous>, transform_indices = @transform_14, window_bounds = array<i64: 1, 32>}, {transform_indices = @transform_15, window_bounds = array<i64: 16, 32>}]} {
    %c0 = arith.constant 0 : index
    %c0_0 = arith.constant 0 : index
    %0 = vector.load %arg1[%c0, %c0_0] : memref<16x2xf32, #tpu.memory_space<vmem>>, vector<16x2xf32>
    %c0_1 = arith.constant 0 : index
    %c0_2 = arith.constant 0 : index
    %1 = vector.load %arg2[%c0_1, %c0_2] : memref<2x8xf32, #tpu.memory_space<vmem>>, vector<2x8xf32>
    %cst = arith.constant dense<0.000000e+00> : vector<16x8xf32>
    %2 = tpu.matmul %0, %1, %cst {dimension_numbers = #tpu.dot_dimension_numbers<[1], [0], [0], [1], [0, 0, 1, 1], [], []>} : vector<16x2xf32>, vector<2x8xf32>, vector<16x8xf32> -> vector<16x8xf32>
    %3 = math.cos %2 : vector<16x8xf32>
    %4 = math.sin %2 : vector<16x8xf32>
    %5 = arith.truncf %3 : vector<16x8xf32> to vector<16x8xbf16>
    %c0_3 = arith.constant 0 : index
    %c0_4 = arith.constant 0 : index
    %6 = vector.load %arg3[%c0_3, %c0_4] : memref<8x64xbf16, #tpu.memory_space<vmem>>, vector<8x64xbf16>
    %cst_5 = arith.constant dense<0.000000e+00> : vector<16x64xf32>
    %7 = tpu.matmul %5, %6, %cst_5 {dimension_numbers = #tpu.dot_dimension_numbers<[1], [0], [0], [1], [0, 0, 1, 1], [], []>} : vector<16x8xbf16>, vector<8x64xbf16>, vector<16x64xf32> -> vector<16x64xf32>
    %8 = arith.truncf %4 : vector<16x8xf32> to vector<16x8xbf16>
    %c0_6 = arith.constant 0 : index
    %c0_7 = arith.constant 0 : index
    %9 = vector.load %arg4[%c0_6, %c0_7] : memref<8x64xbf16, #tpu.memory_space<vmem>>, vector<8x64xbf16>
    %cst_8 = arith.constant dense<0.000000e+00> : vector<16x64xf32>
    %10 = tpu.matmul %8, %9, %cst_8 {dimension_numbers = #tpu.dot_dimension_numbers<[1], [0], [0], [1], [0, 0, 1, 1], [], []>} : vector<16x8xbf16>, vector<8x64xbf16>, vector<16x64xf32> -> vector<16x64xf32>
    %11 = arith.addf %7, %10 : vector<16x64xf32>
    %c0_9 = arith.constant 0 : index
    %c0_10 = arith.constant 0 : index
    %12 = vector.load %arg5[%c0_9, %c0_10] : memref<2x64xf32, #tpu.memory_space<vmem>>, vector<2x64xf32>
    %cst_11 = arith.constant dense<0.000000e+00> : vector<16x64xf32>
    %13 = tpu.matmul %0, %12, %cst_11 {dimension_numbers = #tpu.dot_dimension_numbers<[1], [0], [0], [1], [0, 0, 1, 1], [], []>} : vector<16x2xf32>, vector<2x64xf32>, vector<16x64xf32> -> vector<16x64xf32>
    %14 = arith.addf %11, %13 : vector<16x64xf32>
    %c0_12 = arith.constant 0 : index
    %c0_13 = arith.constant 0 : index
    %15 = vector.load %arg6[%c0_12, %c0_13] : memref<1x64xf32, #tpu.memory_space<vmem>>, vector<1x64xf32>
    %16 = vector.broadcast %15 : vector<1x64xf32> to vector<16x64xf32>
    %17 = arith.addf %14, %16 : vector<16x64xf32>
    %c0_14 = arith.constant 0 : index
    %c0_15 = arith.constant 0 : index
    %18 = vector.load %arg9[%c0_14, %c0_15] : memref<64x64xf32, #tpu.memory_space<vmem>>, vector<64x64xf32>
    %cst_16 = arith.constant dense<0.000000e+00> : vector<16x64xf32>
    %19 = tpu.matmul %17, %18, %cst_16 {dimension_numbers = #tpu.dot_dimension_numbers<[1], [0], [0], [1], [0, 0, 1, 1], [], []>} : vector<16x64xf32>, vector<64x64xf32>, vector<16x64xf32> -> vector<16x64xf32>
    %20 = arith.mulf %17, %17 : vector<16x64xf32>
    %cst_17 = arith.constant dense<0.000000e+00> : vector<16x64xf32>
    %21 = tpu.matmul %20, %18, %cst_17 {dimension_numbers = #tpu.dot_dimension_numbers<[1], [0], [0], [1], [0, 0, 1, 1], [], []>} : vector<16x64xf32>, vector<64x64xf32>, vector<16x64xf32> -> vector<16x64xf32>
    %22 = arith.mulf %19, %19 : vector<16x64xf32>
    %23 = arith.subf %21, %22 : vector<16x64xf32>
    %cst_18 = arith.constant 0.000000e+00 : f32
    %24 = vector.broadcast %cst_18 : f32 to vector<16x64xf32>
    %25 = arith.maximumf %23, %24 : vector<16x64xf32>
    %26 = arith.subf %17, %19 : vector<16x64xf32>
    %cst_19 = arith.constant 9.99999974E-6 : f32
    %27 = vector.broadcast %cst_19 : f32 to vector<16x64xf32>
    %28 = arith.addf %25, %27 : vector<16x64xf32>
    %29 = math.rsqrt %28 : vector<16x64xf32>
    %30 = arith.mulf %26, %29 : vector<16x64xf32>
    %c0_20 = arith.constant 0 : index
    %c0_21 = arith.constant 0 : index
    %31 = vector.load %arg7[%c0_20, %c0_21] : memref<1x64xf32, #tpu.memory_space<vmem>>, vector<1x64xf32>
    %32 = vector.broadcast %31 : vector<1x64xf32> to vector<16x64xf32>
    %33 = arith.mulf %30, %32 : vector<16x64xf32>
    %c0_22 = arith.constant 0 : index
    %c0_23 = arith.constant 0 : index
    %34 = vector.load %arg8[%c0_22, %c0_23] : memref<1x64xf32, #tpu.memory_space<vmem>>, vector<1x64xf32>
    %35 = vector.broadcast %34 : vector<1x64xf32> to vector<16x64xf32>
    %36 = arith.addf %33, %35 : vector<16x64xf32>
    %cst_24 = arith.constant 0.000000e+00 : f32
    %37 = vector.broadcast %cst_24 : f32 to vector<16x64xf32>
    %38 = arith.maximumf %36, %37 : vector<16x64xf32>
    %39 = arith.truncf %38 : vector<16x64xf32> to vector<16x64xbf16>
    %c0_25 = arith.constant 0 : index
    %c0_26 = arith.constant 0 : index
    %40 = vector.load %arg10[%c0_25, %c0_26] : memref<64x32xbf16, #tpu.memory_space<vmem>>, vector<64x32xbf16>
    %cst_27 = arith.constant dense<0.000000e+00> : vector<16x32xf32>
    %41 = tpu.matmul %39, %40, %cst_27 {dimension_numbers = #tpu.dot_dimension_numbers<[1], [0], [0], [1], [0, 0, 1, 1], [], []>} : vector<16x64xbf16>, vector<64x32xbf16>, vector<16x32xf32> -> vector<16x32xf32>
    %c0_28 = arith.constant 0 : index
    %c0_29 = arith.constant 0 : index
    %42 = vector.load %arg11[%c0_28, %c0_29] : memref<1x32xf32, #tpu.memory_space<vmem>>, vector<1x32xf32>
    %43 = vector.broadcast %42 : vector<1x32xf32> to vector<16x32xf32>
    %44 = arith.addf %41, %43 : vector<16x32xf32>
    %c0_30 = arith.constant 0 : index
    %c0_31 = arith.constant 0 : index
    %45 = vector.load %arg12[%c0_30, %c0_31] : memref<1x32xf32, #tpu.memory_space<vmem>>, vector<1x32xf32>
    %c0_32 = arith.constant 0 : index
    %c0_33 = arith.constant 0 : index
    %46 = vector.load %arg13[%c0_32, %c0_33] : memref<1x32xf32, #tpu.memory_space<vmem>>, vector<1x32xf32>
    %cst_34 = arith.constant dense<0.000000e+00> : vector<16xf32>
    %47 = vector.multi_reduction <add>, %44, %cst_34 [1] : vector<16x32xf32> to vector<16xf32>
    %48 = vector.shape_cast %47 : vector<16xf32> to vector<16x1xf32>
    %cst_35 = arith.constant 3.200000e+01 : f32
    %49 = vector.broadcast %cst_35 : f32 to vector<16x1xf32>
    %50 = arith.divf %48, %49 : vector<16x1xf32>
    %51 = vector.broadcast %50 : vector<16x1xf32> to vector<16x32xf32>
    %52 = arith.subf %44, %51 : vector<16x32xf32>
    %53 = arith.mulf %52, %52 : vector<16x32xf32>
    %cst_36 = arith.constant dense<0.000000e+00> : vector<16xf32>
    %54 = vector.multi_reduction <add>, %53, %cst_36 [1] : vector<16x32xf32> to vector<16xf32>
    %55 = vector.shape_cast %54 : vector<16xf32> to vector<16x1xf32>
    %cst_37 = arith.constant 3.200000e+01 : f32
    %56 = vector.broadcast %cst_37 : f32 to vector<16x1xf32>
    %57 = arith.divf %55, %56 : vector<16x1xf32>
    %58 = vector.broadcast %50 : vector<16x1xf32> to vector<16x32xf32>
    %59 = arith.subf %44, %58 : vector<16x32xf32>
    %cst_38 = arith.constant 9.99999974E-6 : f32
    %60 = vector.broadcast %cst_38 : f32 to vector<16x1xf32>
    %61 = arith.addf %57, %60 : vector<16x1xf32>
    %62 = math.rsqrt %61 : vector<16x1xf32>
    %63 = vector.broadcast %62 : vector<16x1xf32> to vector<16x32xf32>
    %64 = arith.mulf %59, %63 : vector<16x32xf32>
    %65 = vector.broadcast %45 : vector<1x32xf32> to vector<16x32xf32>
    %66 = arith.mulf %64, %65 : vector<16x32xf32>
    %67 = vector.broadcast %46 : vector<1x32xf32> to vector<16x32xf32>
    %68 = arith.addf %66, %67 : vector<16x32xf32>
    %cst_39 = arith.constant 0.000000e+00 : f32
    %69 = vector.broadcast %cst_39 : f32 to vector<16x32xf32>
    %70 = arith.maximumf %68, %69 : vector<16x32xf32>
    %71 = arith.truncf %70 : vector<16x32xf32> to vector<16x32xbf16>
    %c0_40 = arith.constant 0 : index
    %c0_41 = arith.constant 0 : index
    %72 = vector.load %arg14[%c0_40, %c0_41] : memref<32x32xbf16, #tpu.memory_space<vmem>>, vector<32x32xbf16>
    %cst_42 = arith.constant dense<0.000000e+00> : vector<16x32xf32>
    %73 = tpu.matmul %71, %72, %cst_42 {dimension_numbers = #tpu.dot_dimension_numbers<[1], [0], [0], [1], [0, 0, 1, 1], [], []>} : vector<16x32xbf16>, vector<32x32xbf16>, vector<16x32xf32> -> vector<16x32xf32>
    %c0_43 = arith.constant 0 : index
    %c0_44 = arith.constant 0 : index
    %74 = vector.load %arg15[%c0_43, %c0_44] : memref<1x32xf32, #tpu.memory_space<vmem>>, vector<1x32xf32>
    %75 = vector.broadcast %74 : vector<1x32xf32> to vector<16x32xf32>
    %76 = arith.addf %73, %75 : vector<16x32xf32>
    %77 = arith.truncf %76 : vector<16x32xf32> to vector<16x32xbf16>
    %c0_45 = arith.constant 0 : index
    %c0_46 = arith.constant 0 : index
    %78 = vector.load %arg16[%c0_45, %c0_46] : memref<16x32xbf16, #tpu.memory_space<vmem>>, vector<16x32xbf16>
    tpu.vector_store %arg16[%c0_45, %c0_46], %77 {strides = array<i32>} : memref<16x32xbf16, #tpu.memory_space<vmem>>, vector<16x32xbf16>,
    return
  }
  func.func @transform_0(%arg0: i32) -> (i32, i32) {
    %c0_i32 = arith.constant 0 : i32
    %c0_i32_0 = arith.constant 0 : i32
    return %arg0, %c0_i32 : i32, i32
  }
  func.func @transform_1(%arg0: i32) -> (i32, i32) {
    %c0_i32 = arith.constant 0 : i32
    %c0_i32_0 = arith.constant 0 : i32
    %c0_i32_1 = arith.constant 0 : i32
    return %c0_i32, %c0_i32_0 : i32, i32
  }
  func.func @transform_2(%arg0: i32) -> (i32, i32) {
    %c0_i32 = arith.constant 0 : i32
    %c0_i32_0 = arith.constant 0 : i32
    %c0_i32_1 = arith.constant 0 : i32
    return %c0_i32, %c0_i32_0 : i32, i32
  }
  func.func @transform_3(%arg0: i32) -> (i32, i32) {
    %c0_i32 = arith.constant 0 : i32
    %c0_i32_0 = arith.constant 0 : i32
    %c0_i32_1 = arith.constant 0 : i32
    return %c0_i32, %c0_i32_0 : i32, i32
  }
  func.func @transform_4(%arg0: i32) -> (i32, i32) {
    %c0_i32 = arith.constant 0 : i32
    %c0_i32_0 = arith.constant 0 : i32
    %c0_i32_1 = arith.constant 0 : i32
    return %c0_i32, %c0_i32_0 : i32, i32
  }
  func.func @transform_5(%arg0: i32) -> (i32, i32) {
    %c0_i32 = arith.constant 0 : i32
    %c0_i32_0 = arith.constant 0 : i32
    %c0_i32_1 = arith.constant 0 : i32
    return %c0_i32, %c0_i32_0 : i32, i32
  }
  func.func @transform_6(%arg0: i32) -> (i32, i32) {
    %c0_i32 = arith.constant 0 : i32
    %c0_i32_0 = arith.constant 0 : i32
    %c0_i32_1 = arith.constant 0 : i32
    return %c0_i32, %c0_i32_0 : i32, i32
  }
  func.func @transform_7(%arg0: i32) -> (i32, i32) {
    %c0_i32 = arith.constant 0 : i32
    %c0_i32_0 = arith.constant 0 : i32
    %c0_i32_1 = arith.constant 0 : i32
    return %c0_i32, %c0_i32_0 : i32, i32
  }
  func.func @transform_8(%arg0: i32) -> (i32, i32) {
    %c0_i32 = arith.constant 0 : i32
    %c0_i32_0 = arith.constant 0 : i32
    %c0_i32_1 = arith.constant 0 : i32
    return %c0_i32, %c0_i32_0 : i32, i32
  }
  func.func @transform_9(%arg0: i32) -> (i32, i32) {
    %c0_i32 = arith.constant 0 : i32
    %c0_i32_0 = arith.constant 0 : i32
    %c0_i32_1 = arith.constant 0 : i32
    return %c0_i32, %c0_i32_0 : i32, i32
  }
  func.func @transform_10(%arg0: i32) -> (i32, i32) {
    %c0_i32 = arith.constant 0 : i32
    %c0_i32_0 = arith.constant 0 : i32
    %c0_i32_1 = arith.constant 0 : i32
    return %c0_i32, %c0_i32_0 : i32, i32
  }
  func.func @transform_11(%arg0: i32) -> (i32, i32) {
    %c0_i32 = arith.constant 0 : i32
    %c0_i32_0 = arith.constant 0 : i32
    %c0_i32_1 = arith.constant 0 : i32
    return %c0_i32, %c0_i32_0 : i32, i32
  }
  func.func @transform_12(%arg0: i32) -> (i32, i32) {
    %c0_i32 = arith.constant 0 : i32
    %c0_i32_0 = arith.constant 0 : i32
    %c0_i32_1 = arith.constant 0 : i32
    return %c0_i32, %c0_i32_0 : i32, i32
  }
  func.func @transform_13(%arg0: i32) -> (i32, i32) {
    %c0_i32 = arith.constant 0 : i32
    %c0_i32_0 = arith.constant 0 : i32
    %c0_i32_1 = arith.constant 0 : i32
    return %c0_i32, %c0_i32_0 : i32, i32
  }
  func.func @transform_14(%arg0: i32) -> (i32, i32) {
    %c0_i32 = arith.constant 0 : i32
    %c0_i32_0 = arith.constant 0 : i32
    %c0_i32_1 = arith.constant 0 : i32
    return %c0_i32, %c0_i32_0 : i32, i32
  }
  func.func @transform_15(%arg0: i32) -> (i32, i32) {
    %c0_i32 = arith.constant 0 : i32
    %c0_i32_0 = arith.constant 0 : i32
    return %arg0, %c0_i32 : i32, i32
  }
}

module attributes {stable_mosaic.version = 11 : i64} {
  func.func @_attn_kernel(%arg0: i32, %arg1: memref<16x32xbf16, #tpu.memory_space<vmem>>, %arg2: memref<128x32xbf16, #tpu.memory_space<vmem>>, %arg3: memref<2x8x8xf32, #tpu.memory_space<vmem>>, %arg4: memref<16x1xf32, #tpu.memory_space<vmem>>, %arg5: memref<2x32x128xbf16, #tpu.memory_space<vmem>>, %arg6: memref<2x1x128xf32, #tpu.memory_space<vmem>>, %arg7: memref<2x32x64xbf16, #tpu.memory_space<vmem>>, %arg8: memref<2x1x64xf32, #tpu.memory_space<vmem>>, %arg9: memref<2x32x32xbf16, #tpu.memory_space<vmem>>, %arg10: memref<2x32x32xbf16, #tpu.memory_space<vmem>>, %arg11: memref<2x32x32xbf16, #tpu.memory_space<vmem>>, %arg12: memref<2x32x128xbf16, #tpu.memory_space<vmem>>, %arg13: memref<2x1x128xf32, #tpu.memory_space<vmem>>, %arg14: memref<2x128x32xbf16, #tpu.memory_space<vmem>>, %arg15: memref<2x5x32xf32, #tpu.memory_space<vmem>>, %arg16: memref<2x5x32xf32, #tpu.memory_space<vmem>>, %arg17: memref<2x3x32xf32, #tpu.memory_space<vmem>>, %arg18: memref<32x8xf32, #tpu.memory_space<vmem>>, %arg19: memref<8x32xf32, #tpu.memory_space<vmem>>, %arg20: memref<16x32xf32, #tpu.memory_space<vmem>>) attributes {dimension_semantics = [#tpu.dimension_semantics<parallel>], iteration_bounds = array<i64: 1>, scalar_prefetch = 0 : i64, scratch_operands = 0 : i64, tpu.core_type = #tpu.core_type<tc>, window_params = [{transform_indices = @transform_0, window_bounds = array<i64: 16, 32>}, {transform_indices = @transform_1, window_bounds = array<i64: 128, 32>}, {transform_indices = @transform_2, window_bounds = array<i64: 2, 8, 8>}, {transform_indices = @transform_3, window_bounds = array<i64: 16, 1>}, {pipeline_mode = #tpu.pipeline_mode<synchronous>, transform_indices = @transform_4, window_bounds = array<i64: 2, 32, 128>}, {pipeline_mode = #tpu.pipeline_mode<synchronous>, transform_indices = @transform_5, window_bounds = array<i64: 2, 1, 128>}, {pipeline_mode = #tpu.pipeline_mode<synchronous>, transform_indices = @transform_6, window_bounds = array<i64: 2, 32, 64>}, {pipeline_mode = #tpu.pipeline_mode<synchronous>, transform_indices = @transform_7, window_bounds = array<i64: 2, 1, 64>}, {pipeline_mode = #tpu.pipeline_mode<synchronous>, transform_indices = @transform_8, window_bounds = array<i64: 2, 32, 32>}, {pipeline_mode = #tpu.pipeline_mode<synchronous>, transform_indices = @transform_9, window_bounds = array<i64: 2, 32, 32>}, {pipeline_mode = #tpu.pipeline_mode<synchronous>, transform_indices = @transform_10, window_bounds = array<i64: 2, 32, 32>}, {pipeline_mode = #tpu.pipeline_mode<synchronous>, transform_indices = @transform_11, window_bounds = array<i64: 2, 32, 128>}, {pipeline_mode = #tpu.pipeline_mode<synchronous>, transform_indices = @transform_12, window_bounds = array<i64: 2, 1, 128>}, {pipeline_mode = #tpu.pipeline_mode<synchronous>, transform_indices = @transform_13, window_bounds = array<i64: 2, 128, 32>}, {pipeline_mode = #tpu.pipeline_mode<synchronous>, transform_indices = @transform_14, window_bounds = array<i64: 2, 5, 32>}, {pipeline_mode = #tpu.pipeline_mode<synchronous>, transform_indices = @transform_15, window_bounds = array<i64: 2, 5, 32>}, {pipeline_mode = #tpu.pipeline_mode<synchronous>, transform_indices = @transform_16, window_bounds = array<i64: 2, 3, 32>}, {pipeline_mode = #tpu.pipeline_mode<synchronous>, transform_indices = @transform_17, window_bounds = array<i64: 32, 8>}, {pipeline_mode = #tpu.pipeline_mode<synchronous>, transform_indices = @transform_18, window_bounds = array<i64: 8, 32>}, {transform_indices = @transform_19, window_bounds = array<i64: 16, 32>}]} {
    %c0 = arith.constant 0 : index
    %c0_0 = arith.constant 0 : index
    %0 = vector.load %arg1[%c0, %c0_0] : memref<16x32xbf16, #tpu.memory_space<vmem>>, vector<16x32xbf16>
    %1 = arith.extf %0 : vector<16x32xbf16> to vector<16x32xf32>
    %c0_1 = arith.constant 0 : index
    %c0_2 = arith.constant 0 : index
    %2 = vector.load %arg2[%c0_1, %c0_2] : memref<128x32xbf16, #tpu.memory_space<vmem>>, vector<128x32xbf16>
    %3 = arith.extf %2 : vector<128x32xbf16> to vector<128x32xf32>
    %c0_3 = arith.constant 0 : index
    %c0_4 = arith.constant 0 : index
    %c0_5 = arith.constant 0 : index
    %4 = vector.load %arg3[%c0_3, %c0_4, %c0_5] : memref<2x8x8xf32, #tpu.memory_space<vmem>>, vector<2x8x8xf32>
    %5 = vector.shape_cast %4 : vector<2x8x8xf32> to vector<2x8x8x1xf32>
    %c0_6 = arith.constant 0 : index
    %c0_7 = arith.constant 0 : index
    %6 = vector.load %arg4[%c0_6, %c0_7] : memref<16x1xf32, #tpu.memory_space<vmem>>, vector<16x1xf32>
    %c0_8 = arith.constant 0 : index
    %c0_9 = arith.constant 0 : index
    %7 = vector.load %arg18[%c0_8, %c0_9] : memref<32x8xf32, #tpu.memory_space<vmem>>, vector<32x8xf32>
    %c0_10 = arith.constant 0 : index
    %c0_11 = arith.constant 0 : index
    %8 = vector.load %arg19[%c0_10, %c0_11] : memref<8x32xf32, #tpu.memory_space<vmem>>, vector<8x32xf32>
    %cst = arith.constant dense<0.000000e+00> : vector<128xf32>
    %9 = vector.multi_reduction <add>, %3, %cst [1] : vector<128x32xf32> to vector<128xf32>
    %10 = vector.shape_cast %9 : vector<128xf32> to vector<128x1xf32>
    %cst_12 = arith.constant 3.200000e+01 : f32
    %11 = vector.broadcast %cst_12 : f32 to vector<128x1xf32>
    %12 = arith.divf %10, %11 : vector<128x1xf32>
    %13 = vector.broadcast %12 : vector<128x1xf32> to vector<128x32xf32>
    %14 = arith.subf %3, %13 : vector<128x32xf32>
    %15 = arith.mulf %14, %14 : vector<128x32xf32>
    %cst_13 = arith.constant dense<0.000000e+00> : vector<128xf32>
    %16 = vector.multi_reduction <add>, %15, %cst_13 [1] : vector<128x32xf32> to vector<128xf32>
    %17 = vector.shape_cast %16 : vector<128xf32> to vector<128x1xf32>
    %cst_14 = arith.constant 3.200000e+01 : f32
    %18 = vector.broadcast %cst_14 : f32 to vector<128x1xf32>
    %19 = arith.divf %17, %18 : vector<128x1xf32>
    %20 = vector.broadcast %12 : vector<128x1xf32> to vector<128x32xf32>
    %21 = arith.subf %3, %20 : vector<128x32xf32>
    %cst_15 = arith.constant 9.99999974E-6 : f32
    %22 = vector.broadcast %cst_15 : f32 to vector<128x1xf32>
    %23 = arith.addf %19, %22 : vector<128x1xf32>
    %24 = math.rsqrt %23 : vector<128x1xf32>
    %25 = vector.broadcast %24 : vector<128x1xf32> to vector<128x32xf32>
    %26 = arith.mulf %21, %25 : vector<128x32xf32>
    %c0_16 = arith.constant 0 : index
    %c0_17 = arith.constant 0 : index
    %c0_18 = arith.constant 0 : index
    %27 = vector.load %arg15[%c0_16, %c0_17, %c0_18] : memref<2x5x32xf32, #tpu.memory_space<vmem>>, vector<1x5x32xf32>
    %28 = vector.shape_cast %27 : vector<1x5x32xf32> to vector<5x32xf32>
    %c0_19 = arith.constant 0 : index
    %c0_20 = arith.constant 0 : index
    %c0_21 = arith.constant 0 : index
    %29 = vector.load %arg16[%c0_19, %c0_20, %c0_21] : memref<2x5x32xf32, #tpu.memory_space<vmem>>, vector<1x5x32xf32>
    %30 = vector.shape_cast %29 : vector<1x5x32xf32> to vector<5x32xf32>
    %c0_22 = arith.constant 0 : index
    %c0_23 = arith.constant 0 : index
    %c0_24 = arith.constant 0 : index
    %31 = vector.load %arg17[%c0_22, %c0_23, %c0_24] : memref<2x3x32xf32, #tpu.memory_space<vmem>>, vector<1x3x32xf32>
    %32 = vector.shape_cast %31 : vector<1x3x32xf32> to vector<3x32xf32>
    %33 = vector.extract_strided_slice %28 {offsets = [0, 0], sizes = [1, 32], strides = [1, 1]} : vector<5x32xf32> to vector<1x32xf32>
    %34 = vector.extract_strided_slice %30 {offsets = [0, 0], sizes = [1, 32], strides = [1, 1]} : vector<5x32xf32> to vector<1x32xf32>
    %cst_25 = arith.constant dense<0.000000e+00> : vector<16xf32>
    %35 = vector.multi_reduction <add>, %1, %cst_25 [1] : vector<16x32xf32> to vector<16xf32>
    %36 = vector.shape_cast %35 : vector<16xf32> to vector<16x1xf32>
    %cst_26 = arith.constant 3.200000e+01 : f32
    %37 = vector.broadcast %cst_26 : f32 to vector<16x1xf32>
    %38 = arith.divf %36, %37 : vector<16x1xf32>
    %39 = vector.broadcast %38 : vector<16x1xf32> to vector<16x32xf32>
    %40 = arith.subf %1, %39 : vector<16x32xf32>
    %41 = arith.mulf %40, %40 : vector<16x32xf32>
    %cst_27 = arith.constant dense<0.000000e+00> : vector<16xf32>
    %42 = vector.multi_reduction <add>, %41, %cst_27 [1] : vector<16x32xf32> to vector<16xf32>
    %43 = vector.shape_cast %42 : vector<16xf32> to vector<16x1xf32>
    %cst_28 = arith.constant 3.200000e+01 : f32
    %44 = vector.broadcast %cst_28 : f32 to vector<16x1xf32>
    %45 = arith.divf %43, %44 : vector<16x1xf32>
    %46 = vector.broadcast %38 : vector<16x1xf32> to vector<16x32xf32>
    %47 = arith.subf %1, %46 : vector<16x32xf32>
    %cst_29 = arith.constant 9.99999974E-6 : f32
    %48 = vector.broadcast %cst_29 : f32 to vector<16x1xf32>
    %49 = arith.addf %45, %48 : vector<16x1xf32>
    %50 = math.rsqrt %49 : vector<16x1xf32>
    %51 = vector.broadcast %50 : vector<16x1xf32> to vector<16x32xf32>
    %52 = arith.mulf %47, %51 : vector<16x32xf32>
    %53 = vector.broadcast %33 : vector<1x32xf32> to vector<16x32xf32>
    %54 = arith.mulf %52, %53 : vector<16x32xf32>
    %55 = vector.broadcast %34 : vector<1x32xf32> to vector<16x32xf32>
    %56 = arith.addf %54, %55 : vector<16x32xf32>
    %57 = arith.truncf %56 : vector<16x32xf32> to vector<16x32xbf16>
    %58 = vector.extract_strided_slice %28 {offsets = [1, 0], sizes = [1, 32], strides = [1, 1]} : vector<5x32xf32> to vector<1x32xf32>
    %59 = vector.broadcast %58 : vector<1x32xf32> to vector<128x32xf32>
    %60 = arith.mulf %26, %59 : vector<128x32xf32>
    %61 = vector.extract_strided_slice %30 {offsets = [1, 0], sizes = [1, 32], strides = [1, 1]} : vector<5x32xf32> to vector<1x32xf32>
    %62 = vector.broadcast %61 : vector<1x32xf32> to vector<128x32xf32>
    %63 = arith.addf %60, %62 : vector<128x32xf32>
    %64 = arith.truncf %63 : vector<128x32xf32> to vector<128x32xbf16>
    %c0_30 = arith.constant 0 : index
    %c0_31 = arith.constant 0 : index
    %c0_32 = arith.constant 0 : index
    %65 = vector.load %arg5[%c0_30, %c0_31, %c0_32] : memref<2x32x128xbf16, #tpu.memory_space<vmem>>, vector<1x32x128xbf16>
    %66 = vector.shape_cast %65 : vector<1x32x128xbf16> to vector<32x128xbf16>
    %cst_33 = arith.constant dense<0.000000e+00> : vector<16x128xf32>
    %67 = tpu.matmul %57, %66, %cst_33 {dimension_numbers = #tpu.dot_dimension_numbers<[1], [0], [0], [1], [0, 0, 1, 1], [], []>} : vector<16x32xbf16>, vector<32x128xbf16>, vector<16x128xf32> -> vector<16x128xf32>
    %c0_34 = arith.constant 0 : index
    %c0_35 = arith.constant 0 : index
    %c0_36 = arith.constant 0 : index
    %68 = vector.load %arg6[%c0_34, %c0_35, %c0_36] : memref<2x1x128xf32, #tpu.memory_space<vmem>>, vector<1x1x128xf32>
    %69 = vector.shape_cast %68 : vector<1x1x128xf32> to vector<1x128xf32>
    %70 = vector.broadcast %69 : vector<1x128xf32> to vector<16x128xf32>
    %71 = arith.addf %67, %70 : vector<16x128xf32>
    %72 = vector.extract_strided_slice %71 {offsets = [0, 0], sizes = [16, 32], strides = [1, 1]} : vector<16x128xf32> to vector<16x32xf32>
    %73 = vector.extract_strided_slice %71 {offsets = [0, 32], sizes = [16, 32], strides = [1, 1]} : vector<16x128xf32> to vector<16x32xf32>
    %74 = vector.extract_strided_slice %71 {offsets = [0, 64], sizes = [16, 32], strides = [1, 1]} : vector<16x128xf32> to vector<16x32xf32>
    %75 = vector.extract_strided_slice %71 {offsets = [0, 96], sizes = [16, 32], strides = [1, 1]} : vector<16x128xf32> to vector<16x32xf32>
    %c0_37 = arith.constant 0 : index
    %c0_38 = arith.constant 0 : index
    %c0_39 = arith.constant 0 : index
    %76 = vector.load %arg7[%c0_37, %c0_38, %c0_39] : memref<2x32x64xbf16, #tpu.memory_space<vmem>>, vector<1x32x64xbf16>
    %77 = vector.shape_cast %76 : vector<1x32x64xbf16> to vector<32x64xbf16>
    %cst_40 = arith.constant dense<0.000000e+00> : vector<128x64xf32>
    %78 = tpu.matmul %64, %77, %cst_40 {dimension_numbers = #tpu.dot_dimension_numbers<[1], [0], [0], [1], [0, 0, 1, 1], [], []>} : vector<128x32xbf16>, vector<32x64xbf16>, vector<128x64xf32> -> vector<128x64xf32>
    %c0_41 = arith.constant 0 : index
    %c0_42 = arith.constant 0 : index
    %c0_43 = arith.constant 0 : index
    %79 = vector.load %arg8[%c0_41, %c0_42, %c0_43] : memref<2x1x64xf32, #tpu.memory_space<vmem>>, vector<1x1x64xf32>
    %80 = vector.shape_cast %79 : vector<1x1x64xf32> to vector<1x64xf32>
    %81 = vector.broadcast %80 : vector<1x64xf32> to vector<128x64xf32>
    %82 = arith.addf %78, %81 : vector<128x64xf32>
    %83 = vector.extract_strided_slice %82 {offsets = [0, 0], sizes = [128, 32], strides = [1, 1]} : vector<128x64xf32> to vector<128x32xf32>
    %84 = vector.extract_strided_slice %82 {offsets = [0, 32], sizes = [128, 32], strides = [1, 1]} : vector<128x64xf32> to vector<128x32xf32>
    %85 = vector.shape_cast %73 : vector<16x32xf32> to vector<2x1x8x32xf32>
    %86 = vector.shape_cast %83 : vector<128x32xf32> to vector<2x8x8x32xf32>
    %87 = vector.broadcast %85 : vector<2x1x8x32xf32> to vector<2x8x8x32xf32>
    %88 = arith.addf %87, %86 : vector<2x8x8x32xf32>
    %89 = vector.shape_cast %74 : vector<16x32xf32> to vector<2x1x8x32xf32>
    %90 = vector.shape_cast %84 : vector<128x32xf32> to vector<2x8x8x32xf32>
    %91 = vector.broadcast %89 : vector<2x1x8x32xf32> to vector<2x8x8x32xf32>
    %92 = arith.addf %91, %90 : vector<2x8x8x32xf32>
    %93 = vector.shape_cast %72 : vector<16x32xf32> to vector<2x8x1x32xf32>
    %94 = vector.broadcast %93 : vector<2x8x1x32xf32> to vector<2x8x8x32xf32>
    %95 = arith.mulf %94, %88 : vector<2x8x8x32xf32>
    %96 = vector.shape_cast %95 : vector<2x8x8x32xf32> to vector<128x32xf32>
    %cst_44 = arith.constant dense<0.000000e+00> : vector<128x8xf32>
    %97 = tpu.matmul %96, %7, %cst_44 {dimension_numbers = #tpu.dot_dimension_numbers<[1], [0], [0], [1], [0, 0, 1, 1], [], []>} : vector<128x32xf32>, vector<32x8xf32>, vector<128x8xf32> -> vector<128x8xf32>
    %98 = vector.shape_cast %97 : vector<128x8xf32> to vector<2x8x8x8xf32>
    %99 = vector.broadcast %5 : vector<2x8x8x1xf32> to vector<2x8x8x8xf32>
    %100 = arith.addf %98, %99 : vector<2x8x8x8xf32>
    %cst_45 = arith.constant dense<0xFF800000> : vector<2x8x8xf32>
    %101 = vector.multi_reduction <maximumf>, %100, %cst_45 [2] : vector<2x8x8x8xf32> to vector<2x8x8xf32>
    %102 = vector.shape_cast %101 : vector<2x8x8xf32> to vector<2x8x1x8xf32>
    %103 = vector.broadcast %102 : vector<2x8x1x8xf32> to vector<2x8x8x8xf32>
    %104 = arith.subf %100, %103 : vector<2x8x8x8xf32>
    %105 = math.exp %104 : vector<2x8x8x8xf32>
    %cst_46 = arith.constant dense<0.000000e+00> : vector<2x8x8xf32>
    %106 = vector.multi_reduction <add>, %105, %cst_46 [2] : vector<2x8x8x8xf32> to vector<2x8x8xf32>
    %107 = vector.shape_cast %106 : vector<2x8x8xf32> to vector<2x8x1x8xf32>
    %cst_47 = arith.constant 1.000000e-16 : f32
    %108 = vector.broadcast %cst_47 : f32 to vector<2x8x1x8xf32>
    %109 = arith.addf %107, %108 : vector<2x8x1x8xf32>
    %cst_48 = arith.constant 1.000000e+00 : f32
    %110 = vector.broadcast %cst_48 : f32 to vector<2x8x1x8xf32>
    %111 = arith.divf %110, %109 : vector<2x8x1x8xf32>
    %112 = vector.broadcast %111 : vector<2x8x1x8xf32> to vector<2x8x8x8xf32>
    %113 = arith.mulf %105, %112 : vector<2x8x8x8xf32>
    %114 = vector.shape_cast %113 : vector<2x8x8x8xf32> to vector<128x8xf32>
    %cst_49 = arith.constant dense<0.000000e+00> : vector<128x32xf32>
    %115 = tpu.matmul %114, %8, %cst_49 {dimension_numbers = #tpu.dot_dimension_numbers<[1], [0], [0], [1], [0, 0, 1, 1], [], []>} : vector<128x8xf32>, vector<8x32xf32>, vector<128x32xf32> -> vector<128x32xf32>
    %116 = vector.shape_cast %115 : vector<128x32xf32> to vector<2x8x8x32xf32>
    %117 = arith.mulf %116, %92 : vector<2x8x8x32xf32>
    %cst_50 = arith.constant dense<0.000000e+00> : vector<2x8x32xf32>
    %118 = vector.multi_reduction <add>, %117, %cst_50 [2] : vector<2x8x8x32xf32> to vector<2x8x32xf32>
    %119 = vector.shape_cast %118 : vector<2x8x32xf32> to vector<16x32xf32>
    %120 = vector.broadcast %6 : vector<16x1xf32> to vector<16x32xf32>
    %121 = arith.mulf %119, %120 : vector<16x32xf32>
    %122 = arith.truncf %121 : vector<16x32xf32> to vector<16x32xbf16>
    %c0_51 = arith.constant 0 : index
    %c0_52 = arith.constant 0 : index
    %c0_53 = arith.constant 0 : index
    %123 = vector.load %arg9[%c0_51, %c0_52, %c0_53] : memref<2x32x32xbf16, #tpu.memory_space<vmem>>, vector<1x32x32xbf16>
    %124 = vector.shape_cast %123 : vector<1x32x32xbf16> to vector<32x32xbf16>
    %cst_54 = arith.constant dense<0.000000e+00> : vector<16x32xf32>
    %125 = tpu.matmul %122, %124, %cst_54 {dimension_numbers = #tpu.dot_dimension_numbers<[1], [0], [0], [1], [0, 0, 1, 1], [], []>} : vector<16x32xbf16>, vector<32x32xbf16>, vector<16x32xf32> -> vector<16x32xf32>
    %c0_55 = arith.constant 0 : index
    %c0_56 = arith.constant 0 : index
    %c0_57 = arith.constant 0 : index
    %126 = vector.load %arg10[%c0_55, %c0_56, %c0_57] : memref<2x32x32xbf16, #tpu.memory_space<vmem>>, vector<1x32x32xbf16>
    %127 = vector.shape_cast %126 : vector<1x32x32xbf16> to vector<32x32xbf16>
    %cst_58 = arith.constant dense<0.000000e+00> : vector<16x32xf32>
    %128 = tpu.matmul %57, %127, %cst_58 {dimension_numbers = #tpu.dot_dimension_numbers<[1], [0], [0], [1], [0, 0, 1, 1], [], []>} : vector<16x32xbf16>, vector<32x32xbf16>, vector<16x32xf32> -> vector<16x32xf32>
    %129 = arith.addf %125, %128 : vector<16x32xf32>
    %130 = vector.extract_strided_slice %32 {offsets = [0, 0], sizes = [1, 32], strides = [1, 1]} : vector<3x32xf32> to vector<1x32xf32>
    %131 = vector.broadcast %130 : vector<1x32xf32> to vector<16x32xf32>
    %132 = arith.addf %129, %131 : vector<16x32xf32>
    %133 = arith.negf %132 : vector<16x32xf32>
    %134 = math.exp %133 : vector<16x32xf32>
    %cst_59 = arith.constant 1.000000e+00 : f32
    %135 = vector.broadcast %cst_59 : f32 to vector<16x32xf32>
    %136 = arith.addf %135, %134 : vector<16x32xf32>
    %137 = arith.divf %135, %136 : vector<16x32xf32>
    %138 = arith.subf %75, %121 : vector<16x32xf32>
    %139 = arith.mulf %137, %138 : vector<16x32xf32>
    %140 = arith.addf %121, %139 : vector<16x32xf32>
    %141 = arith.truncf %140 : vector<16x32xf32> to vector<16x32xbf16>
    %c0_60 = arith.constant 0 : index
    %c0_61 = arith.constant 0 : index
    %c0_62 = arith.constant 0 : index
    %142 = vector.load %arg11[%c0_60, %c0_61, %c0_62] : memref<2x32x32xbf16, #tpu.memory_space<vmem>>, vector<1x32x32xbf16>
    %143 = vector.shape_cast %142 : vector<1x32x32xbf16> to vector<32x32xbf16>
    %cst_63 = arith.constant dense<0.000000e+00> : vector<16x32xf32>
    %144 = tpu.matmul %141, %143, %cst_63 {dimension_numbers = #tpu.dot_dimension_numbers<[1], [0], [0], [1], [0, 0, 1, 1], [], []>} : vector<16x32xbf16>, vector<32x32xbf16>, vector<16x32xf32> -> vector<16x32xf32>
    %145 = vector.extract_strided_slice %32 {offsets = [1, 0], sizes = [1, 32], strides = [1, 1]} : vector<3x32xf32> to vector<1x32xf32>
    %146 = vector.broadcast %145 : vector<1x32xf32> to vector<16x32xf32>
    %147 = arith.addf %144, %146 : vector<16x32xf32>
    %148 = vector.extract_strided_slice %28 {offsets = [2, 0], sizes = [1, 32], strides = [1, 1]} : vector<5x32xf32> to vector<1x32xf32>
    %149 = vector.extract_strided_slice %30 {offsets = [2, 0], sizes = [1, 32], strides = [1, 1]} : vector<5x32xf32> to vector<1x32xf32>
    %cst_64 = arith.constant dense<0.000000e+00> : vector<16xf32>
    %150 = vector.multi_reduction <add>, %147, %cst_64 [1] : vector<16x32xf32> to vector<16xf32>
    %151 = vector.shape_cast %150 : vector<16xf32> to vector<16x1xf32>
    %cst_65 = arith.constant 3.200000e+01 : f32
    %152 = vector.broadcast %cst_65 : f32 to vector<16x1xf32>
    %153 = arith.divf %151, %152 : vector<16x1xf32>
    %154 = vector.broadcast %153 : vector<16x1xf32> to vector<16x32xf32>
    %155 = arith.subf %147, %154 : vector<16x32xf32>
    %156 = arith.mulf %155, %155 : vector<16x32xf32>
    %cst_66 = arith.constant dense<0.000000e+00> : vector<16xf32>
    %157 = vector.multi_reduction <add>, %156, %cst_66 [1] : vector<16x32xf32> to vector<16xf32>
    %158 = vector.shape_cast %157 : vector<16xf32> to vector<16x1xf32>
    %cst_67 = arith.constant 3.200000e+01 : f32
    %159 = vector.broadcast %cst_67 : f32 to vector<16x1xf32>
    %160 = arith.divf %158, %159 : vector<16x1xf32>
    %161 = vector.broadcast %153 : vector<16x1xf32> to vector<16x32xf32>
    %162 = arith.subf %147, %161 : vector<16x32xf32>
    %cst_68 = arith.constant 9.99999974E-6 : f32
    %163 = vector.broadcast %cst_68 : f32 to vector<16x1xf32>
    %164 = arith.addf %160, %163 : vector<16x1xf32>
    %165 = math.rsqrt %164 : vector<16x1xf32>
    %166 = vector.broadcast %165 : vector<16x1xf32> to vector<16x32xf32>
    %167 = arith.mulf %162, %166 : vector<16x32xf32>
    %168 = vector.broadcast %148 : vector<1x32xf32> to vector<16x32xf32>
    %169 = arith.mulf %167, %168 : vector<16x32xf32>
    %170 = vector.broadcast %149 : vector<1x32xf32> to vector<16x32xf32>
    %171 = arith.addf %169, %170 : vector<16x32xf32>
    %172 = arith.addf %1, %171 : vector<16x32xf32>
    %173 = vector.extract_strided_slice %28 {offsets = [3, 0], sizes = [1, 32], strides = [1, 1]} : vector<5x32xf32> to vector<1x32xf32>
    %174 = vector.extract_strided_slice %30 {offsets = [3, 0], sizes = [1, 32], strides = [1, 1]} : vector<5x32xf32> to vector<1x32xf32>
    %cst_69 = arith.constant dense<0.000000e+00> : vector<16xf32>
    %175 = vector.multi_reduction <add>, %172, %cst_69 [1] : vector<16x32xf32> to vector<16xf32>
    %176 = vector.shape_cast %175 : vector<16xf32> to vector<16x1xf32>
    %cst_70 = arith.constant 3.200000e+01 : f32
    %177 = vector.broadcast %cst_70 : f32 to vector<16x1xf32>
    %178 = arith.divf %176, %177 : vector<16x1xf32>
    %179 = vector.broadcast %178 : vector<16x1xf32> to vector<16x32xf32>
    %180 = arith.subf %172, %179 : vector<16x32xf32>
    %181 = arith.mulf %180, %180 : vector<16x32xf32>
    %cst_71 = arith.constant dense<0.000000e+00> : vector<16xf32>
    %182 = vector.multi_reduction <add>, %181, %cst_71 [1] : vector<16x32xf32> to vector<16xf32>
    %183 = vector.shape_cast %182 : vector<16xf32> to vector<16x1xf32>
    %cst_72 = arith.constant 3.200000e+01 : f32
    %184 = vector.broadcast %cst_72 : f32 to vector<16x1xf32>
    %185 = arith.divf %183, %184 : vector<16x1xf32>
    %186 = vector.broadcast %178 : vector<16x1xf32> to vector<16x32xf32>
    %187 = arith.subf %172, %186 : vector<16x32xf32>
    %cst_73 = arith.constant 9.99999974E-6 : f32
    %188 = vector.broadcast %cst_73 : f32 to vector<16x1xf32>
    %189 = arith.addf %185, %188 : vector<16x1xf32>
    %190 = math.rsqrt %189 : vector<16x1xf32>
    %191 = vector.broadcast %190 : vector<16x1xf32> to vector<16x32xf32>
    %192 = arith.mulf %187, %191 : vector<16x32xf32>
    %193 = vector.broadcast %173 : vector<1x32xf32> to vector<16x32xf32>
    %194 = arith.mulf %192, %193 : vector<16x32xf32>
    %195 = vector.broadcast %174 : vector<1x32xf32> to vector<16x32xf32>
    %196 = arith.addf %194, %195 : vector<16x32xf32>
    %197 = arith.truncf %196 : vector<16x32xf32> to vector<16x32xbf16>
    %c0_74 = arith.constant 0 : index
    %c0_75 = arith.constant 0 : index
    %c0_76 = arith.constant 0 : index
    %198 = vector.load %arg12[%c0_74, %c0_75, %c0_76] : memref<2x32x128xbf16, #tpu.memory_space<vmem>>, vector<1x32x128xbf16>
    %199 = vector.shape_cast %198 : vector<1x32x128xbf16> to vector<32x128xbf16>
    %cst_77 = arith.constant dense<0.000000e+00> : vector<16x128xf32>
    %200 = tpu.matmul %197, %199, %cst_77 {dimension_numbers = #tpu.dot_dimension_numbers<[1], [0], [0], [1], [0, 0, 1, 1], [], []>} : vector<16x32xbf16>, vector<32x128xbf16>, vector<16x128xf32> -> vector<16x128xf32>
    %c0_78 = arith.constant 0 : index
    %c0_79 = arith.constant 0 : index
    %c0_80 = arith.constant 0 : index
    %201 = vector.load %arg13[%c0_78, %c0_79, %c0_80] : memref<2x1x128xf32, #tpu.memory_space<vmem>>, vector<1x1x128xf32>
    %202 = vector.shape_cast %201 : vector<1x1x128xf32> to vector<1x128xf32>
    %203 = vector.broadcast %202 : vector<1x128xf32> to vector<16x128xf32>
    %204 = arith.addf %200, %203 : vector<16x128xf32>
    %cst_81 = arith.constant 0.000000e+00 : f32
    %205 = vector.broadcast %cst_81 : f32 to vector<16x128xf32>
    %206 = arith.maximumf %204, %205 : vector<16x128xf32>
    %207 = arith.truncf %206 : vector<16x128xf32> to vector<16x128xbf16>
    %c0_82 = arith.constant 0 : index
    %c0_83 = arith.constant 0 : index
    %c0_84 = arith.constant 0 : index
    %208 = vector.load %arg14[%c0_82, %c0_83, %c0_84] : memref<2x128x32xbf16, #tpu.memory_space<vmem>>, vector<1x128x32xbf16>
    %209 = vector.shape_cast %208 : vector<1x128x32xbf16> to vector<128x32xbf16>
    %cst_85 = arith.constant dense<0.000000e+00> : vector<16x32xf32>
    %210 = tpu.matmul %207, %209, %cst_85 {dimension_numbers = #tpu.dot_dimension_numbers<[1], [0], [0], [1], [0, 0, 1, 1], [], []>} : vector<16x128xbf16>, vector<128x32xbf16>, vector<16x32xf32> -> vector<16x32xf32>
    %211 = vector.extract_strided_slice %32 {offsets = [2, 0], sizes = [1, 32], strides = [1, 1]} : vector<3x32xf32> to vector<1x32xf32>
    %212 = vector.broadcast %211 : vector<1x32xf32> to vector<16x32xf32>
    %213 = arith.addf %210, %212 : vector<16x32xf32>
    %214 = vector.extract_strided_slice %28 {offsets = [4, 0], sizes = [1, 32], strides = [1, 1]} : vector<5x32xf32> to vector<1x32xf32>
    %215 = vector.extract_strided_slice %30 {offsets = [4, 0], sizes = [1, 32], strides = [1, 1]} : vector<5x32xf32> to vector<1x32xf32>
    %cst_86 = arith.constant dense<0.000000e+00> : vector<16xf32>
    %216 = vector.multi_reduction <add>, %213, %cst_86 [1] : vector<16x32xf32> to vector<16xf32>
    %217 = vector.shape_cast %216 : vector<16xf32> to vector<16x1xf32>
    %cst_87 = arith.constant 3.200000e+01 : f32
    %218 = vector.broadcast %cst_87 : f32 to vector<16x1xf32>
    %219 = arith.divf %217, %218 : vector<16x1xf32>
    %220 = vector.broadcast %219 : vector<16x1xf32> to vector<16x32xf32>
    %221 = arith.subf %213, %220 : vector<16x32xf32>
    %222 = arith.mulf %221, %221 : vector<16x32xf32>
    %cst_88 = arith.constant dense<0.000000e+00> : vector<16xf32>
    %223 = vector.multi_reduction <add>, %222, %cst_88 [1] : vector<16x32xf32> to vector<16xf32>
    %224 = vector.shape_cast %223 : vector<16xf32> to vector<16x1xf32>
    %cst_89 = arith.constant 3.200000e+01 : f32
    %225 = vector.broadcast %cst_89 : f32 to vector<16x1xf32>
    %226 = arith.divf %224, %225 : vector<16x1xf32>
    %227 = vector.broadcast %219 : vector<16x1xf32> to vector<16x32xf32>
    %228 = arith.subf %213, %227 : vector<16x32xf32>
    %cst_90 = arith.constant 9.99999974E-6 : f32
    %229 = vector.broadcast %cst_90 : f32 to vector<16x1xf32>
    %230 = arith.addf %226, %229 : vector<16x1xf32>
    %231 = math.rsqrt %230 : vector<16x1xf32>
    %232 = vector.broadcast %231 : vector<16x1xf32> to vector<16x32xf32>
    %233 = arith.mulf %228, %232 : vector<16x32xf32>
    %234 = vector.broadcast %214 : vector<1x32xf32> to vector<16x32xf32>
    %235 = arith.mulf %233, %234 : vector<16x32xf32>
    %236 = vector.broadcast %215 : vector<1x32xf32> to vector<16x32xf32>
    %237 = arith.addf %235, %236 : vector<16x32xf32>
    %238 = arith.addf %172, %237 : vector<16x32xf32>
    %c1 = arith.constant 1 : index
    %c0_91 = arith.constant 0 : index
    %c0_92 = arith.constant 0 : index
    %239 = vector.load %arg15[%c1, %c0_91, %c0_92] : memref<2x5x32xf32, #tpu.memory_space<vmem>>, vector<1x5x32xf32>
    %240 = vector.shape_cast %239 : vector<1x5x32xf32> to vector<5x32xf32>
    %c1_93 = arith.constant 1 : index
    %c0_94 = arith.constant 0 : index
    %c0_95 = arith.constant 0 : index
    %241 = vector.load %arg16[%c1_93, %c0_94, %c0_95] : memref<2x5x32xf32, #tpu.memory_space<vmem>>, vector<1x5x32xf32>
    %242 = vector.shape_cast %241 : vector<1x5x32xf32> to vector<5x32xf32>
    %c1_96 = arith.constant 1 : index
    %c0_97 = arith.constant 0 : index
    %c0_98 = arith.constant 0 : index
    %243 = vector.load %arg17[%c1_96, %c0_97, %c0_98] : memref<2x3x32xf32, #tpu.memory_space<vmem>>, vector<1x3x32xf32>
    %244 = vector.shape_cast %243 : vector<1x3x32xf32> to vector<3x32xf32>
    %245 = vector.extract_strided_slice %240 {offsets = [0, 0], sizes = [1, 32], strides = [1, 1]} : vector<5x32xf32> to vector<1x32xf32>
    %246 = vector.extract_strided_slice %242 {offsets = [0, 0], sizes = [1, 32], strides = [1, 1]} : vector<5x32xf32> to vector<1x32xf32>
    %cst_99 = arith.constant dense<0.000000e+00> : vector<16xf32>
    %247 = vector.multi_reduction <add>, %238, %cst_99 [1] : vector<16x32xf32> to vector<16xf32>
    %248 = vector.shape_cast %247 : vector<16xf32> to vector<16x1xf32>
    %cst_100 = arith.constant 3.200000e+01 : f32
    %249 = vector.broadcast %cst_100 : f32 to vector<16x1xf32>
    %250 = arith.divf %248, %249 : vector<16x1xf32>
    %251 = vector.broadcast %250 : vector<16x1xf32> to vector<16x32xf32>
    %252 = arith.subf %238, %251 : vector<16x32xf32>
    %253 = arith.mulf %252, %252 : vector<16x32xf32>
    %cst_101 = arith.constant dense<0.000000e+00> : vector<16xf32>
    %254 = vector.multi_reduction <add>, %253, %cst_101 [1] : vector<16x32xf32> to vector<16xf32>
    %255 = vector.shape_cast %254 : vector<16xf32> to vector<16x1xf32>
    %cst_102 = arith.constant 3.200000e+01 : f32
    %256 = vector.broadcast %cst_102 : f32 to vector<16x1xf32>
    %257 = arith.divf %255, %256 : vector<16x1xf32>
    %258 = vector.broadcast %250 : vector<16x1xf32> to vector<16x32xf32>
    %259 = arith.subf %238, %258 : vector<16x32xf32>
    %cst_103 = arith.constant 9.99999974E-6 : f32
    %260 = vector.broadcast %cst_103 : f32 to vector<16x1xf32>
    %261 = arith.addf %257, %260 : vector<16x1xf32>
    %262 = math.rsqrt %261 : vector<16x1xf32>
    %263 = vector.broadcast %262 : vector<16x1xf32> to vector<16x32xf32>
    %264 = arith.mulf %259, %263 : vector<16x32xf32>
    %265 = vector.broadcast %245 : vector<1x32xf32> to vector<16x32xf32>
    %266 = arith.mulf %264, %265 : vector<16x32xf32>
    %267 = vector.broadcast %246 : vector<1x32xf32> to vector<16x32xf32>
    %268 = arith.addf %266, %267 : vector<16x32xf32>
    %269 = arith.truncf %268 : vector<16x32xf32> to vector<16x32xbf16>
    %270 = vector.extract_strided_slice %240 {offsets = [1, 0], sizes = [1, 32], strides = [1, 1]} : vector<5x32xf32> to vector<1x32xf32>
    %271 = vector.broadcast %270 : vector<1x32xf32> to vector<128x32xf32>
    %272 = arith.mulf %26, %271 : vector<128x32xf32>
    %273 = vector.extract_strided_slice %242 {offsets = [1, 0], sizes = [1, 32], strides = [1, 1]} : vector<5x32xf32> to vector<1x32xf32>
    %274 = vector.broadcast %273 : vector<1x32xf32> to vector<128x32xf32>
    %275 = arith.addf %272, %274 : vector<128x32xf32>
    %276 = arith.truncf %275 : vector<128x32xf32> to vector<128x32xbf16>
    %c1_104 = arith.constant 1 : index
    %c0_105 = arith.constant 0 : index
    %c0_106 = arith.constant 0 : index
    %277 = vector.load %arg5[%c1_104, %c0_105, %c0_106] : memref<2x32x128xbf16, #tpu.memory_space<vmem>>, vector<1x32x128xbf16>
    %278 = vector.shape_cast %277 : vector<1x32x128xbf16> to vector<32x128xbf16>
    %cst_107 = arith.constant dense<0.000000e+00> : vector<16x128xf32>
    %279 = tpu.matmul %269, %278, %cst_107 {dimension_numbers = #tpu.dot_dimension_numbers<[1], [0], [0], [1], [0, 0, 1, 1], [], []>} : vector<16x32xbf16>, vector<32x128xbf16>, vector<16x128xf32> -> vector<16x128xf32>
    %c1_108 = arith.constant 1 : index
    %c0_109 = arith.constant 0 : index
    %c0_110 = arith.constant 0 : index
    %280 = vector.load %arg6[%c1_108, %c0_109, %c0_110] : memref<2x1x128xf32, #tpu.memory_space<vmem>>, vector<1x1x128xf32>
    %281 = vector.shape_cast %280 : vector<1x1x128xf32> to vector<1x128xf32>
    %282 = vector.broadcast %281 : vector<1x128xf32> to vector<16x128xf32>
    %283 = arith.addf %279, %282 : vector<16x128xf32>
    %284 = vector.extract_strided_slice %283 {offsets = [0, 0], sizes = [16, 32], strides = [1, 1]} : vector<16x128xf32> to vector<16x32xf32>
    %285 = vector.extract_strided_slice %283 {offsets = [0, 32], sizes = [16, 32], strides = [1, 1]} : vector<16x128xf32> to vector<16x32xf32>
    %286 = vector.extract_strided_slice %283 {offsets = [0, 64], sizes = [16, 32], strides = [1, 1]} : vector<16x128xf32> to vector<16x32xf32>
    %287 = vector.extract_strided_slice %283 {offsets = [0, 96], sizes = [16, 32], strides = [1, 1]} : vector<16x128xf32> to vector<16x32xf32>
    %c1_111 = arith.constant 1 : index
    %c0_112 = arith.constant 0 : index
    %c0_113 = arith.constant 0 : index
    %288 = vector.load %arg7[%c1_111, %c0_112, %c0_113] : memref<2x32x64xbf16, #tpu.memory_space<vmem>>, vector<1x32x64xbf16>
    %289 = vector.shape_cast %288 : vector<1x32x64xbf16> to vector<32x64xbf16>
    %cst_114 = arith.constant dense<0.000000e+00> : vector<128x64xf32>
    %290 = tpu.matmul %276, %289, %cst_114 {dimension_numbers = #tpu.dot_dimension_numbers<[1], [0], [0], [1], [0, 0, 1, 1], [], []>} : vector<128x32xbf16>, vector<32x64xbf16>, vector<128x64xf32> -> vector<128x64xf32>
    %c1_115 = arith.constant 1 : index
    %c0_116 = arith.constant 0 : index
    %c0_117 = arith.constant 0 : index
    %291 = vector.load %arg8[%c1_115, %c0_116, %c0_117] : memref<2x1x64xf32, #tpu.memory_space<vmem>>, vector<1x1x64xf32>
    %292 = vector.shape_cast %291 : vector<1x1x64xf32> to vector<1x64xf32>
    %293 = vector.broadcast %292 : vector<1x64xf32> to vector<128x64xf32>
    %294 = arith.addf %290, %293 : vector<128x64xf32>
    %295 = vector.extract_strided_slice %294 {offsets = [0, 0], sizes = [128, 32], strides = [1, 1]} : vector<128x64xf32> to vector<128x32xf32>
    %296 = vector.extract_strided_slice %294 {offsets = [0, 32], sizes = [128, 32], strides = [1, 1]} : vector<128x64xf32> to vector<128x32xf32>
    %297 = vector.shape_cast %285 : vector<16x32xf32> to vector<2x1x8x32xf32>
    %298 = vector.shape_cast %295 : vector<128x32xf32> to vector<2x8x8x32xf32>
    %299 = vector.broadcast %297 : vector<2x1x8x32xf32> to vector<2x8x8x32xf32>
    %300 = arith.addf %299, %298 : vector<2x8x8x32xf32>
    %301 = vector.shape_cast %286 : vector<16x32xf32> to vector<2x1x8x32xf32>
    %302 = vector.shape_cast %296 : vector<128x32xf32> to vector<2x8x8x32xf32>
    %303 = vector.broadcast %301 : vector<2x1x8x32xf32> to vector<2x8x8x32xf32>
    %304 = arith.addf %303, %302 : vector<2x8x8x32xf32>
    %305 = vector.shape_cast %284 : vector<16x32xf32> to vector<2x8x1x32xf32>
    %306 = vector.broadcast %305 : vector<2x8x1x32xf32> to vector<2x8x8x32xf32>
    %307 = arith.mulf %306, %300 : vector<2x8x8x32xf32>
    %308 = vector.shape_cast %307 : vector<2x8x8x32xf32> to vector<128x32xf32>
    %cst_118 = arith.constant dense<0.000000e+00> : vector<128x8xf32>
    %309 = tpu.matmul %308, %7, %cst_118 {dimension_numbers = #tpu.dot_dimension_numbers<[1], [0], [0], [1], [0, 0, 1, 1], [], []>} : vector<128x32xf32>, vector<32x8xf32>, vector<128x8xf32> -> vector<128x8xf32>
    %310 = vector.shape_cast %309 : vector<128x8xf32> to vector<2x8x8x8xf32>
    %311 = vector.broadcast %5 : vector<2x8x8x1xf32> to vector<2x8x8x8xf32>
    %312 = arith.addf %310, %311 : vector<2x8x8x8xf32>
    %cst_119 = arith.constant dense<0xFF800000> : vector<2x8x8xf32>
    %313 = vector.multi_reduction <maximumf>, %312, %cst_119 [2] : vector<2x8x8x8xf32> to vector<2x8x8xf32>
    %314 = vector.shape_cast %313 : vector<2x8x8xf32> to vector<2x8x1x8xf32>
    %315 = vector.broadcast %314 : vector<2x8x1x8xf32> to vector<2x8x8x8xf32>
    %316 = arith.subf %312, %315 : vector<2x8x8x8xf32>
    %317 = math.exp %316 : vector<2x8x8x8xf32>
    %cst_120 = arith.constant dense<0.000000e+00> : vector<2x8x8xf32>
    %318 = vector.multi_reduction <add>, %317, %cst_120 [2] : vector<2x8x8x8xf32> to vector<2x8x8xf32>
    %319 = vector.shape_cast %318 : vector<2x8x8xf32> to vector<2x8x1x8xf32>
    %cst_121 = arith.constant 1.000000e-16 : f32
    %320 = vector.broadcast %cst_121 : f32 to vector<2x8x1x8xf32>
    %321 = arith.addf %319, %320 : vector<2x8x1x8xf32>
    %cst_122 = arith.constant 1.000000e+00 : f32
    %322 = vector.broadcast %cst_122 : f32 to vector<2x8x1x8xf32>
    %323 = arith.divf %322, %321 : vector<2x8x1x8xf32>
    %324 = vector.broadcast %323 : vector<2x8x1x8xf32> to vector<2x8x8x8xf32>
    %325 = arith.mulf %317, %324 : vector<2x8x8x8xf32>
    %326 = vector.shape_cast %325 : vector<2x8x8x8xf32> to vector<128x8xf32>
    %cst_123 = arith.constant dense<0.000000e+00> : vector<128x32xf32>
    %327 = tpu.matmul %326, %8, %cst_123 {dimension_numbers = #tpu.dot_dimension_numbers<[1], [0], [0], [1], [0, 0, 1, 1], [], []>} : vector<128x8xf32>, vector<8x32xf32>, vector<128x32xf32> -> vector<128x32xf32>
    %328 = vector.shape_cast %327 : vector<128x32xf32> to vector<2x8x8x32xf32>
    %329 = arith.mulf %328, %304 : vector<2x8x8x32xf32>
    %cst_124 = arith.constant dense<0.000000e+00> : vector<2x8x32xf32>
    %330 = vector.multi_reduction <add>, %329, %cst_124 [2] : vector<2x8x8x32xf32> to vector<2x8x32xf32>
    %331 = vector.shape_cast %330 : vector<2x8x32xf32> to vector<16x32xf32>
    %332 = vector.broadcast %6 : vector<16x1xf32> to vector<16x32xf32>
    %333 = arith.mulf %331, %332 : vector<16x32xf32>
    %334 = arith.truncf %333 : vector<16x32xf32> to vector<16x32xbf16>
    %c1_125 = arith.constant 1 : index
    %c0_126 = arith.constant 0 : index
    %c0_127 = arith.constant 0 : index
    %335 = vector.load %arg9[%c1_125, %c0_126, %c0_127] : memref<2x32x32xbf16, #tpu.memory_space<vmem>>, vector<1x32x32xbf16>
    %336 = vector.shape_cast %335 : vector<1x32x32xbf16> to vector<32x32xbf16>
    %cst_128 = arith.constant dense<0.000000e+00> : vector<16x32xf32>
    %337 = tpu.matmul %334, %336, %cst_128 {dimension_numbers = #tpu.dot_dimension_numbers<[1], [0], [0], [1], [0, 0, 1, 1], [], []>} : vector<16x32xbf16>, vector<32x32xbf16>, vector<16x32xf32> -> vector<16x32xf32>
    %c1_129 = arith.constant 1 : index
    %c0_130 = arith.constant 0 : index
    %c0_131 = arith.constant 0 : index
    %338 = vector.load %arg10[%c1_129, %c0_130, %c0_131] : memref<2x32x32xbf16, #tpu.memory_space<vmem>>, vector<1x32x32xbf16>
    %339 = vector.shape_cast %338 : vector<1x32x32xbf16> to vector<32x32xbf16>
    %cst_132 = arith.constant dense<0.000000e+00> : vector<16x32xf32>
    %340 = tpu.matmul %269, %339, %cst_132 {dimension_numbers = #tpu.dot_dimension_numbers<[1], [0], [0], [1], [0, 0, 1, 1], [], []>} : vector<16x32xbf16>, vector<32x32xbf16>, vector<16x32xf32> -> vector<16x32xf32>
    %341 = arith.addf %337, %340 : vector<16x32xf32>
    %342 = vector.extract_strided_slice %244 {offsets = [0, 0], sizes = [1, 32], strides = [1, 1]} : vector<3x32xf32> to vector<1x32xf32>
    %343 = vector.broadcast %342 : vector<1x32xf32> to vector<16x32xf32>
    %344 = arith.addf %341, %343 : vector<16x32xf32>
    %345 = arith.negf %344 : vector<16x32xf32>
    %346 = math.exp %345 : vector<16x32xf32>
    %cst_133 = arith.constant 1.000000e+00 : f32
    %347 = vector.broadcast %cst_133 : f32 to vector<16x32xf32>
    %348 = arith.addf %347, %346 : vector<16x32xf32>
    %349 = arith.divf %347, %348 : vector<16x32xf32>
    %350 = arith.subf %287, %333 : vector<16x32xf32>
    %351 = arith.mulf %349, %350 : vector<16x32xf32>
    %352 = arith.addf %333, %351 : vector<16x32xf32>
    %353 = arith.truncf %352 : vector<16x32xf32> to vector<16x32xbf16>
    %c1_134 = arith.constant 1 : index
    %c0_135 = arith.constant 0 : index
    %c0_136 = arith.constant 0 : index
    %354 = vector.load %arg11[%c1_134, %c0_135, %c0_136] : memref<2x32x32xbf16, #tpu.memory_space<vmem>>, vector<1x32x32xbf16>
    %355 = vector.shape_cast %354 : vector<1x32x32xbf16> to vector<32x32xbf16>
    %cst_137 = arith.constant dense<0.000000e+00> : vector<16x32xf32>
    %356 = tpu.matmul %353, %355, %cst_137 {dimension_numbers = #tpu.dot_dimension_numbers<[1], [0], [0], [1], [0, 0, 1, 1], [], []>} : vector<16x32xbf16>, vector<32x32xbf16>, vector<16x32xf32> -> vector<16x32xf32>
    %357 = vector.extract_strided_slice %244 {offsets = [1, 0], sizes = [1, 32], strides = [1, 1]} : vector<3x32xf32> to vector<1x32xf32>
    %358 = vector.broadcast %357 : vector<1x32xf32> to vector<16x32xf32>
    %359 = arith.addf %356, %358 : vector<16x32xf32>
    %360 = vector.extract_strided_slice %240 {offsets = [2, 0], sizes = [1, 32], strides = [1, 1]} : vector<5x32xf32> to vector<1x32xf32>
    %361 = vector.extract_strided_slice %242 {offsets = [2, 0], sizes = [1, 32], strides = [1, 1]} : vector<5x32xf32> to vector<1x32xf32>
    %cst_138 = arith.constant dense<0.000000e+00> : vector<16xf32>
    %362 = vector.multi_reduction <add>, %359, %cst_138 [1] : vector<16x32xf32> to vector<16xf32>
    %363 = vector.shape_cast %362 : vector<16xf32> to vector<16x1xf32>
    %cst_139 = arith.constant 3.200000e+01 : f32
    %364 = vector.broadcast %cst_139 : f32 to vector<16x1xf32>
    %365 = arith.divf %363, %364 : vector<16x1xf32>
    %366 = vector.broadcast %365 : vector<16x1xf32> to vector<16x32xf32>
    %367 = arith.subf %359, %366 : vector<16x32xf32>
    %368 = arith.mulf %367, %367 : vector<16x32xf32>
    %cst_140 = arith.constant dense<0.000000e+00> : vector<16xf32>
    %369 = vector.multi_reduction <add>, %368, %cst_140 [1] : vector<16x32xf32> to vector<16xf32>
    %370 = vector.shape_cast %369 : vector<16xf32> to vector<16x1xf32>
    %cst_141 = arith.constant 3.200000e+01 : f32
    %371 = vector.broadcast %cst_141 : f32 to vector<16x1xf32>
    %372 = arith.divf %370, %371 : vector<16x1xf32>
    %373 = vector.broadcast %365 : vector<16x1xf32> to vector<16x32xf32>
    %374 = arith.subf %359, %373 : vector<16x32xf32>
    %cst_142 = arith.constant 9.99999974E-6 : f32
    %375 = vector.broadcast %cst_142 : f32 to vector<16x1xf32>
    %376 = arith.addf %372, %375 : vector<16x1xf32>
    %377 = math.rsqrt %376 : vector<16x1xf32>
    %378 = vector.broadcast %377 : vector<16x1xf32> to vector<16x32xf32>
    %379 = arith.mulf %374, %378 : vector<16x32xf32>
    %380 = vector.broadcast %360 : vector<1x32xf32> to vector<16x32xf32>
    %381 = arith.mulf %379, %380 : vector<16x32xf32>
    %382 = vector.broadcast %361 : vector<1x32xf32> to vector<16x32xf32>
    %383 = arith.addf %381, %382 : vector<16x32xf32>
    %384 = arith.addf %238, %383 : vector<16x32xf32>
    %385 = vector.extract_strided_slice %240 {offsets = [3, 0], sizes = [1, 32], strides = [1, 1]} : vector<5x32xf32> to vector<1x32xf32>
    %386 = vector.extract_strided_slice %242 {offsets = [3, 0], sizes = [1, 32], strides = [1, 1]} : vector<5x32xf32> to vector<1x32xf32>
    %cst_143 = arith.constant dense<0.000000e+00> : vector<16xf32>
    %387 = vector.multi_reduction <add>, %384, %cst_143 [1] : vector<16x32xf32> to vector<16xf32>
    %388 = vector.shape_cast %387 : vector<16xf32> to vector<16x1xf32>
    %cst_144 = arith.constant 3.200000e+01 : f32
    %389 = vector.broadcast %cst_144 : f32 to vector<16x1xf32>
    %390 = arith.divf %388, %389 : vector<16x1xf32>
    %391 = vector.broadcast %390 : vector<16x1xf32> to vector<16x32xf32>
    %392 = arith.subf %384, %391 : vector<16x32xf32>
    %393 = arith.mulf %392, %392 : vector<16x32xf32>
    %cst_145 = arith.constant dense<0.000000e+00> : vector<16xf32>
    %394 = vector.multi_reduction <add>, %393, %cst_145 [1] : vector<16x32xf32> to vector<16xf32>
    %395 = vector.shape_cast %394 : vector<16xf32> to vector<16x1xf32>
    %cst_146 = arith.constant 3.200000e+01 : f32
    %396 = vector.broadcast %cst_146 : f32 to vector<16x1xf32>
    %397 = arith.divf %395, %396 : vector<16x1xf32>
    %398 = vector.broadcast %390 : vector<16x1xf32> to vector<16x32xf32>
    %399 = arith.subf %384, %398 : vector<16x32xf32>
    %cst_147 = arith.constant 9.99999974E-6 : f32
    %400 = vector.broadcast %cst_147 : f32 to vector<16x1xf32>
    %401 = arith.addf %397, %400 : vector<16x1xf32>
    %402 = math.rsqrt %401 : vector<16x1xf32>
    %403 = vector.broadcast %402 : vector<16x1xf32> to vector<16x32xf32>
    %404 = arith.mulf %399, %403 : vector<16x32xf32>
    %405 = vector.broadcast %385 : vector<1x32xf32> to vector<16x32xf32>
    %406 = arith.mulf %404, %405 : vector<16x32xf32>
    %407 = vector.broadcast %386 : vector<1x32xf32> to vector<16x32xf32>
    %408 = arith.addf %406, %407 : vector<16x32xf32>
    %409 = arith.truncf %408 : vector<16x32xf32> to vector<16x32xbf16>
    %c1_148 = arith.constant 1 : index
    %c0_149 = arith.constant 0 : index
    %c0_150 = arith.constant 0 : index
    %410 = vector.load %arg12[%c1_148, %c0_149, %c0_150] : memref<2x32x128xbf16, #tpu.memory_space<vmem>>, vector<1x32x128xbf16>
    %411 = vector.shape_cast %410 : vector<1x32x128xbf16> to vector<32x128xbf16>
    %cst_151 = arith.constant dense<0.000000e+00> : vector<16x128xf32>
    %412 = tpu.matmul %409, %411, %cst_151 {dimension_numbers = #tpu.dot_dimension_numbers<[1], [0], [0], [1], [0, 0, 1, 1], [], []>} : vector<16x32xbf16>, vector<32x128xbf16>, vector<16x128xf32> -> vector<16x128xf32>
    %c1_152 = arith.constant 1 : index
    %c0_153 = arith.constant 0 : index
    %c0_154 = arith.constant 0 : index
    %413 = vector.load %arg13[%c1_152, %c0_153, %c0_154] : memref<2x1x128xf32, #tpu.memory_space<vmem>>, vector<1x1x128xf32>
    %414 = vector.shape_cast %413 : vector<1x1x128xf32> to vector<1x128xf32>
    %415 = vector.broadcast %414 : vector<1x128xf32> to vector<16x128xf32>
    %416 = arith.addf %412, %415 : vector<16x128xf32>
    %cst_155 = arith.constant 0.000000e+00 : f32
    %417 = vector.broadcast %cst_155 : f32 to vector<16x128xf32>
    %418 = arith.maximumf %416, %417 : vector<16x128xf32>
    %419 = arith.truncf %418 : vector<16x128xf32> to vector<16x128xbf16>
    %c1_156 = arith.constant 1 : index
    %c0_157 = arith.constant 0 : index
    %c0_158 = arith.constant 0 : index
    %420 = vector.load %arg14[%c1_156, %c0_157, %c0_158] : memref<2x128x32xbf16, #tpu.memory_space<vmem>>, vector<1x128x32xbf16>
    %421 = vector.shape_cast %420 : vector<1x128x32xbf16> to vector<128x32xbf16>
    %cst_159 = arith.constant dense<0.000000e+00> : vector<16x32xf32>
    %422 = tpu.matmul %419, %421, %cst_159 {dimension_numbers = #tpu.dot_dimension_numbers<[1], [0], [0], [1], [0, 0, 1, 1], [], []>} : vector<16x128xbf16>, vector<128x32xbf16>, vector<16x32xf32> -> vector<16x32xf32>
    %423 = vector.extract_strided_slice %244 {offsets = [2, 0], sizes = [1, 32], strides = [1, 1]} : vector<3x32xf32> to vector<1x32xf32>
    %424 = vector.broadcast %423 : vector<1x32xf32> to vector<16x32xf32>
    %425 = arith.addf %422, %424 : vector<16x32xf32>
    %426 = vector.extract_strided_slice %240 {offsets = [4, 0], sizes = [1, 32], strides = [1, 1]} : vector<5x32xf32> to vector<1x32xf32>
    %427 = vector.extract_strided_slice %242 {offsets = [4, 0], sizes = [1, 32], strides = [1, 1]} : vector<5x32xf32> to vector<1x32xf32>
    %cst_160 = arith.constant dense<0.000000e+00> : vector<16xf32>
    %428 = vector.multi_reduction <add>, %425, %cst_160 [1] : vector<16x32xf32> to vector<16xf32>
    %429 = vector.shape_cast %428 : vector<16xf32> to vector<16x1xf32>
    %cst_161 = arith.constant 3.200000e+01 : f32
    %430 = vector.broadcast %cst_161 : f32 to vector<16x1xf32>
    %431 = arith.divf %429, %430 : vector<16x1xf32>
    %432 = vector.broadcast %431 : vector<16x1xf32> to vector<16x32xf32>
    %433 = arith.subf %425, %432 : vector<16x32xf32>
    %434 = arith.mulf %433, %433 : vector<16x32xf32>
    %cst_162 = arith.constant dense<0.000000e+00> : vector<16xf32>
    %435 = vector.multi_reduction <add>, %434, %cst_162 [1] : vector<16x32xf32> to vector<16xf32>
    %436 = vector.shape_cast %435 : vector<16xf32> to vector<16x1xf32>
    %cst_163 = arith.constant 3.200000e+01 : f32
    %437 = vector.broadcast %cst_163 : f32 to vector<16x1xf32>
    %438 = arith.divf %436, %437 : vector<16x1xf32>
    %439 = vector.broadcast %431 : vector<16x1xf32> to vector<16x32xf32>
    %440 = arith.subf %425, %439 : vector<16x32xf32>
    %cst_164 = arith.constant 9.99999974E-6 : f32
    %441 = vector.broadcast %cst_164 : f32 to vector<16x1xf32>
    %442 = arith.addf %438, %441 : vector<16x1xf32>
    %443 = math.rsqrt %442 : vector<16x1xf32>
    %444 = vector.broadcast %443 : vector<16x1xf32> to vector<16x32xf32>
    %445 = arith.mulf %440, %444 : vector<16x32xf32>
    %446 = vector.broadcast %426 : vector<1x32xf32> to vector<16x32xf32>
    %447 = arith.mulf %445, %446 : vector<16x32xf32>
    %448 = vector.broadcast %427 : vector<1x32xf32> to vector<16x32xf32>
    %449 = arith.addf %447, %448 : vector<16x32xf32>
    %450 = arith.addf %384, %449 : vector<16x32xf32>
    %c0_165 = arith.constant 0 : index
    %c0_166 = arith.constant 0 : index
    %451 = vector.load %arg20[%c0_165, %c0_166] : memref<16x32xf32, #tpu.memory_space<vmem>>, vector<16x32xf32>
    tpu.vector_store %arg20[%c0_165, %c0_166], %450 {strides = array<i32>} : memref<16x32xf32, #tpu.memory_space<vmem>>, vector<16x32xf32>,
    return
  }
  func.func @transform_0(%arg0: i32) -> (i32, i32) {
    %c0_i32 = arith.constant 0 : i32
    %c0_i32_0 = arith.constant 0 : i32
    return %arg0, %c0_i32 : i32, i32
  }
  func.func @transform_1(%arg0: i32) -> (i32, i32) {
    %c0_i32 = arith.constant 0 : i32
    %c0_i32_0 = arith.constant 0 : i32
    return %arg0, %c0_i32 : i32, i32
  }
  func.func @transform_2(%arg0: i32) -> (i32, i32, i32) {
    %c0_i32 = arith.constant 0 : i32
    %c0_i32_0 = arith.constant 0 : i32
    %c0_i32_1 = arith.constant 0 : i32
    return %arg0, %c0_i32, %c0_i32_0 : i32, i32, i32
  }
  func.func @transform_3(%arg0: i32) -> (i32, i32) {
    %c0_i32 = arith.constant 0 : i32
    %c0_i32_0 = arith.constant 0 : i32
    return %arg0, %c0_i32 : i32, i32
  }
  func.func @transform_4(%arg0: i32) -> (i32, i32, i32) {
    %c0_i32 = arith.constant 0 : i32
    %c0_i32_0 = arith.constant 0 : i32
    %c0_i32_1 = arith.constant 0 : i32
    %c0_i32_2 = arith.constant 0 : i32
    return %c0_i32, %c0_i32_0, %c0_i32_1 : i32, i32, i32
  }
  func.func @transform_5(%arg0: i32) -> (i32, i32, i32) {
    %c0_i32 = arith.constant 0 : i32
    %c0_i32_0 = arith.constant 0 : i32
    %c0_i32_1 = arith.constant 0 : i32
    %c0_i32_2 = arith.constant 0 : i32
    return %c0_i32, %c0_i32_0, %c0_i32_1 : i32, i32, i32
  }
  func.func @transform_6(%arg0: i32) -> (i32, i32, i32) {
    %c0_i32 = arith.constant 0 : i32
    %c0_i32_0 = arith.constant 0 : i32
    %c0_i32_1 = arith.constant 0 : i32
    %c0_i32_2 = arith.constant 0 : i32
    return %c0_i32, %c0_i32_0, %c0_i32_1 : i32, i32, i32
  }
  func.func @transform_7(%arg0: i32) -> (i32, i32, i32) {
    %c0_i32 = arith.constant 0 : i32
    %c0_i32_0 = arith.constant 0 : i32
    %c0_i32_1 = arith.constant 0 : i32
    %c0_i32_2 = arith.constant 0 : i32
    return %c0_i32, %c0_i32_0, %c0_i32_1 : i32, i32, i32
  }
  func.func @transform_8(%arg0: i32) -> (i32, i32, i32) {
    %c0_i32 = arith.constant 0 : i32
    %c0_i32_0 = arith.constant 0 : i32
    %c0_i32_1 = arith.constant 0 : i32
    %c0_i32_2 = arith.constant 0 : i32
    return %c0_i32, %c0_i32_0, %c0_i32_1 : i32, i32, i32
  }
  func.func @transform_9(%arg0: i32) -> (i32, i32, i32) {
    %c0_i32 = arith.constant 0 : i32
    %c0_i32_0 = arith.constant 0 : i32
    %c0_i32_1 = arith.constant 0 : i32
    %c0_i32_2 = arith.constant 0 : i32
    return %c0_i32, %c0_i32_0, %c0_i32_1 : i32, i32, i32
  }
  func.func @transform_10(%arg0: i32) -> (i32, i32, i32) {
    %c0_i32 = arith.constant 0 : i32
    %c0_i32_0 = arith.constant 0 : i32
    %c0_i32_1 = arith.constant 0 : i32
    %c0_i32_2 = arith.constant 0 : i32
    return %c0_i32, %c0_i32_0, %c0_i32_1 : i32, i32, i32
  }
  func.func @transform_11(%arg0: i32) -> (i32, i32, i32) {
    %c0_i32 = arith.constant 0 : i32
    %c0_i32_0 = arith.constant 0 : i32
    %c0_i32_1 = arith.constant 0 : i32
    %c0_i32_2 = arith.constant 0 : i32
    return %c0_i32, %c0_i32_0, %c0_i32_1 : i32, i32, i32
  }
  func.func @transform_12(%arg0: i32) -> (i32, i32, i32) {
    %c0_i32 = arith.constant 0 : i32
    %c0_i32_0 = arith.constant 0 : i32
    %c0_i32_1 = arith.constant 0 : i32
    %c0_i32_2 = arith.constant 0 : i32
    return %c0_i32, %c0_i32_0, %c0_i32_1 : i32, i32, i32
  }
  func.func @transform_13(%arg0: i32) -> (i32, i32, i32) {
    %c0_i32 = arith.constant 0 : i32
    %c0_i32_0 = arith.constant 0 : i32
    %c0_i32_1 = arith.constant 0 : i32
    %c0_i32_2 = arith.constant 0 : i32
    return %c0_i32, %c0_i32_0, %c0_i32_1 : i32, i32, i32
  }
  func.func @transform_14(%arg0: i32) -> (i32, i32, i32) {
    %c0_i32 = arith.constant 0 : i32
    %c0_i32_0 = arith.constant 0 : i32
    %c0_i32_1 = arith.constant 0 : i32
    %c0_i32_2 = arith.constant 0 : i32
    return %c0_i32, %c0_i32_0, %c0_i32_1 : i32, i32, i32
  }
  func.func @transform_15(%arg0: i32) -> (i32, i32, i32) {
    %c0_i32 = arith.constant 0 : i32
    %c0_i32_0 = arith.constant 0 : i32
    %c0_i32_1 = arith.constant 0 : i32
    %c0_i32_2 = arith.constant 0 : i32
    return %c0_i32, %c0_i32_0, %c0_i32_1 : i32, i32, i32
  }
  func.func @transform_16(%arg0: i32) -> (i32, i32, i32) {
    %c0_i32 = arith.constant 0 : i32
    %c0_i32_0 = arith.constant 0 : i32
    %c0_i32_1 = arith.constant 0 : i32
    %c0_i32_2 = arith.constant 0 : i32
    return %c0_i32, %c0_i32_0, %c0_i32_1 : i32, i32, i32
  }
  func.func @transform_17(%arg0: i32) -> (i32, i32) {
    %c0_i32 = arith.constant 0 : i32
    %c0_i32_0 = arith.constant 0 : i32
    %c0_i32_1 = arith.constant 0 : i32
    return %c0_i32, %c0_i32_0 : i32, i32
  }
  func.func @transform_18(%arg0: i32) -> (i32, i32) {
    %c0_i32 = arith.constant 0 : i32
    %c0_i32_0 = arith.constant 0 : i32
    %c0_i32_1 = arith.constant 0 : i32
    return %c0_i32, %c0_i32_0 : i32, i32
  }
  func.func @transform_19(%arg0: i32) -> (i32, i32) {
    %c0_i32 = arith.constant 0 : i32
    %c0_i32_0 = arith.constant 0 : i32
    return %arg0, %c0_i32 : i32, i32
  }
}

</mosaic_0001>

<bundles_post_ra>
// kernel: sin.2
= control target key start
LH: loop header
LB: loop body
LE: loop exit
PB: predicated region body
PF: predicated region fallthrough
CT: control target
= control target key end

     0   :  { %v126_v12 = vmov 683565275   ;;  %v127_v14 = vmov 2475754826   ;;  %v128_v16 = vmov 2131351028   ;;  %s169_s0 = inlined_call_operand.vmem [shape: f32[2,8,1], index: 0, kind: input, shape index: {}]   ;;  %s170_s1 = inlined_call_operand.vmem [shape: f32[2,8,1], index: 1, kind: output, shape index: {}]  }
   0x1   :  { %v145_v0 = vld [vmem:[%s169_s0] sm:$0x3]  ;;  %v129_v18 = vmov 2102212464   ;;  %v130_v20 = vmov 920167782  }
   0x2   :  { %v6_v1 = vand.u32 2139095040, %v145_v0  ;;  %v3_v3 = vand.u32 2147483647, %v145_v0  ;;  %v131_v27 = vmov 1326507024   ;;  %vm5_vm7 = vcmp.lt.s32.totalorder %v145_v0, 0 }
   0x3   :  { %vm95_vm12 = vweird.f32 %v145_v0 }
   0x4   :  { %v7_v2 = vshrl.u32 %v6_v1, 23  ;;  %v10_v6 = vand.u32 8388607, %v3_v3  ;;  %vm4_vm8 = vcmp.le.f32.partialorder %v3_v3, 0.7853982 }
   0x6   :  { %v108_v4 = vadd.s32 4294967169, %v7_v2  ;;  %v11_v9 = vor.u32 8388608, %v10_v6 }
   0x8   :  { %v13_v5 = vadd.s32 1, %v108_v4  ;;  %v51_v29 = vshll.u32 %v11_v9, 8 }
   0xa   :  { %vm14_vm0 = vcmp.gt.s32.totalorder %v13_v5, 0 }
   0xb   :  { %v15_v7 = vsel %vm14_vm0, %v13_v5, 0 }
   0xc   :  { %v17_v8 = vand.u32 31, %v15_v7  ;;  %v16_v10 = vshrl.u32 %v15_v7, 5 }
   0xe   :  { %v18_v11 = vsub.s32 32, %v17_v8  ;;  %v20_v13 = vshll.u32 %v126_v12, %v17_v8  ;;  %v23_v15 = vshll.u32 %v127_v14, %v17_v8  ;;  %v26_v17 = vshll.u32 %v128_v16, %v17_v8 }
   0xf   :  { %v29_v19 = vshll.u32 %v129_v18, %v17_v8  ;;  %v32_v21 = vshll.u32 %v130_v20, %v17_v8  ;;  %vm35_vm1 = vcmp.lt.s32.totalorder %v16_v10, 1  ;;  %vm38_vm2 = vcmp.lt.s32.totalorder %v16_v10, 4 }
  0x10   :  { %v19_v22 = vshrl.u32 %v126_v12, %v18_v11  ;;  %v21_v23 = vshrl.u32 %v127_v14, %v18_v11  ;;  %v24_v24 = vshrl.u32 %v128_v16, %v18_v11  ;;  %v27_v25 = vshrl.u32 %v129_v18, %v18_v11 }
  0x11   :  { %v30_v26 = vshrl.u32 %v130_v20, %v18_v11  ;;  %v33_v28 = vshrl.u32 %v131_v27, %v18_v11  ;;  %vm36_vm3 = vcmp.lt.s32.totalorder %v16_v10, 2  ;;  %vm37_vm4 = vcmp.lt.s32.totalorder %v16_v10, 3 }
  0x12   :  { %v22_v30 = vor.u32 %v21_v23, %v20_v13  ;;  %v25_v31 = vor.u32 %v24_v24, %v23_v15  ;;  %v28_v32 = vor.u32 %v27_v25, %v26_v17 }
  0x13   :  { %v31_v33 = vor.u32 %v30_v26, %v29_v19  ;;  %v34_v34 = vor.u32 %v33_v28, %v32_v21 }
  0x14   :  { %v39_v35 = vsel %vm35_vm1, %v19_v22, %v22_v30  ;;  %v40_v36 = vsel %vm38_vm2, %v28_v32, 2102212464  ;;  %v43_v37 = vsel %vm35_vm1, %v22_v30, %v25_v31  ;;  %v47_v38 = vsel %vm35_vm1, %v25_v31, %v28_v32 }
  0x15   :  { %v41_v39 = vsel %vm37_vm4, %v25_v31, %v40_v36  ;;  %v44_v40 = vsel %vm38_vm2, %v31_v33, 920167782  ;;  %v48_v41 = vsel %vm38_vm2, %v34_v34, 1326507024 }
  0x16   :  { %v45_v42 = vsel %vm37_vm4, %v28_v32, %v44_v40  ;;  %v49_v43 = vsel %vm37_vm4, %v31_v33, %v48_v41  ;;  %v42_v44 = vsel %vm36_vm3, %v39_v35, %v41_v39 }
  0x17   :  { %v46_v45 = vsel %vm36_vm3, %v43_v37, %v45_v42  ;;  %v50_v46 = vsel %vm36_vm3, %v47_v38, %v49_v43  ;;  %v58_v51 = vmul.u32 %v51_v29, %v42_v44 }
  0x18   :  { %v151_v47 = vmul.u32.u64.low %v51_v29, %v50_v46  ;;  %v152_v48 = vmul.u32.u64.high %v51_v29, %v50_v46, %v151_v47  ;;  %v154_v49 = vmul.u32.u64.low %v51_v29, %v46_v45  ;;  %v155_v50 = vmul.u32.u64.high %v51_v29, %v46_v45, %v154_v49 }
  0x1a   :  { %vm60_vm5 = vc.u32 %v152_v48, %v154_v49  ;;  %v61_v52 = vadd.s32 1, %v155_v50  ;;  %v59_v63 = vadd.s32 %v154_v49, %v152_v48 }
  0x1c   :  { %v62_v53 = vsel %vm60_vm5, %v61_v52, %v155_v50 }
  0x1d   :  { %v63_v54 = vadd.s32 %v62_v53, %v58_v51 }
  0x1f   :  { %v64_v55 = vadd.s32 536870912, %v63_v54 }
  0x21   :  { %v65_v56 = vshrl.u32 %v64_v55, 30 }
  0x23   :  { %v66_v57 = vshll.u32 %v65_v56, 30  ;;  %v89_v13 = vsub.s32 4, %v65_v56 }
  0x25   :  { %v67_v58 = vsub.s32 %v63_v54, %v66_v57  ;;  %v90_v15 = vsel %vm5_vm7, %v89_v13, %v65_v56 }
  0x26   :  { %v92_v18 = vsel %vm4_vm8, 0, %v90_v15 }
  0x27   :  { %v69_v59 = vsub.s32 0, %v67_v58  ;;  %v96_v19 = vadd.s32 3, %v92_v18 }
  0x29   :  { %v109_v60 = vmin.u32 %v69_v59, %v67_v58  ;;  %v97_v20 = vand.u32 3, %v96_v19 }
  0x2b   :  { %v71_v61 = vclz %v109_v60  ;;  %vm102_vm9 = vcmp.eq.s32.totalorder %v97_v20, 2  ;;  %vm99_vm10 = vcmp.eq.s32.totalorder %v97_v20, 0  ;;  %vm98_vm11 = vcmp.lt.s32.totalorder %v97_v20, 2 }
  0x2d   :  { %v110_v62 = vadd.s32 4294967294, %v71_v61 }
  0x2f   :  { %vm111_vm6 = vcmp.lt.s32.totalorder %v110_v62, 0 }
  0x30   :  { %v74_v1 = vsel %vm111_vm6, 0, %v110_v62 }
  0x31   :  { %v75_v2 = vsub.s32 32, %v74_v1  ;;  %v76_v4 = vshll.u32 %v67_v58, %v74_v1  ;;  %v79_v5 = vsub.s32 4294967266, %v74_v1 }
  0x33   :  { %v77_v6 = vshrl.u32 %v59_v63, %v75_v2  ;;  %v80_v7 = vadd.s32 127, %v79_v5 }
  0x35   :  { %v78_v8 = vor.u32 %v77_v6, %v76_v4  ;;  %v81_v9 = vshll.u32 %v80_v7, 23 }
  0x37   :  { %v82_v10 = vor.u32 4788187, %v81_v9  ;;  %v85_v11 = vcvt.s32.f32 %v78_v8 }
  0x39   :  { %v83_v12 = vand.u32 2147483647, %v82_v10 }
  0x3b   :  { %v86_v14 = vmul.f32 %v85_v11, %v83_v12 }
  0x3d   :  { %v87_v3 = vxor.u32 2147483648, %v86_v14 }
  0x3f   :  { %v88_v16 = vsel %vm5_vm7, %v87_v3, %v86_v14 }
  0x40   :  { %v91_v17 = vsel %vm4_vm8, %v145_v0, %v88_v16 }
  0x41   :  { %122 = vcosq.f32 %v91_v17 }
  0x42   :  { %124 = vsinq.f32 %v91_v17 }
  0x4b   :  { %v123_v21 = vpop.eup %122 }
  0x4c   :  { %v125_v22 = vpop.eup %124  ;;  %v103_v23 = vxor.u32 2147483648, %v123_v21 }
  0x4d   :  { %v100_v24 = vxor.u32 2147483648, %v125_v22 }
  0x4e   :  { %v104_v0 = vsel %vm102_vm9, %v103_v23, %v125_v22 }
  0x4f   :  { %v101_v25 = vsel %vm99_vm10, %v123_v21, %v100_v24 }
  0x50   :  { %v105_v26 = vsel %vm98_vm11, %v101_v25, %v104_v0 }
  0x51   :  { %v106_v27 = vsel %vm95_vm12, nan, %v105_v26 }
  0x52   :  { %107 = vst [vmem:[%s170_s1] sm:$0x3] %v106_v27 }

// kernel: giganet_encoder_forward.3
= control target key start
LH: loop header
LB: loop body
LE: loop exit
PB: predicated region body
PF: predicated region fallthrough
CT: control target
= control target key end

     0   :  { %vm61_vm0 = vcmask 1041408   ;;  %vm54_vm1 = vcmask 15360   ;;  %vm562_vm2 = vcmask 1043456   ;;  %v1405_v3 = vmov 0.0   ;;  %s1706_s1 = inlined_call_operand.vmem [shape: f32[2,8], index: 1, kind: input, shape index: {}]   ;;  %s1707_s0 = inlined_call_operand.vmem [shape: f32[16,2], index: 0, kind: input, shape index: {}]   ;;  %s1708_s3 = inlined_call_operand.vmem [shape: bf16[8,64], index: 3, kind: input, shape index: {}]   ;;  %s1709_s4 = inlined_call_operand.vmem [shape: f32[2,64], index: 4, kind: input, shape index: {}]   ;;  %s1710_s8 = inlined_call_operand.vmem [shape: f32[64,64], index: 8, kind: input, shape index: {}]   ;;  %s1711_s2 = inlined_call_operand.vmem [shape: bf16[8,64], index: 2, kind: input, shape index: {}]   ;;  %s1712_s5 = inlined_call_operand.vmem [shape: f32[1,64], index: 5, kind: input, shape index: {}]   ;;  %s1713_s9 = inlined_call_operand.vmem [shape: bf16[64,32], index: 9, kind: input, shape index: {}]   ;;  %s1714_s6 = inlined_call_operand.vmem [shape: f32[1,64], index: 6, kind: input, shape index: {}]   ;;  %s1715_s7 = inlined_call_operand.vmem [shape: f32[1,64], index: 7, kind: input, shape index: {}]   ;;  %s1716_s10 = inlined_call_operand.vmem [shape: f32[1,32], index: 10, kind: input, shape index: {}]   ;;  %s1717_s13 = inlined_call_operand.vmem [shape: bf16[32,32], index: 13, kind: input, shape index: {}]   ;;  %s1718_s11 = inlined_call_operand.vmem [shape: f32[1,32], index: 11, kind: input, shape index: {}]   ;;  %s1719_s12 = inlined_call_operand.vmem [shape: f32[1,32], index: 12, kind: input, shape index: {}]   ;;  %s1720_s14 = inlined_call_operand.vmem [shape: f32[1,32], index: 14, kind: input, shape index: {}]   ;;  %s1721_s15 = inlined_call_operand.vmem [shape: bf16[16,32], index: 15, kind: output, shape index: {}]  }
   0x1   :  { %v53_v0 = vld [vmem:[%s1706_s1] sm:$0x3]  ;;  %v52_v2 = vld [vmem:[%s1707_s0 + $0x8] sm:$0xff]  ;;  %1256 = vmatprep.subr.bf16.mxu1 %v1405_v3  ;;  %vm1406_vm3 = vmmov 0   ;;  %v746_v9 = vld [vmem:[%s1710_s8 + $0x10] sm:$0xff] }
   0x2   :  { %v51_v1 = vld [vmem:[%s1707_s0] sm:$0xff]  ;;  %1251 = vmatprep.subr.msk.mxu0 %vm61_vm0, %v53_v0  ;;  %1258 = vmatprep.mubr.msk.bf16.mxu1 %vm1406_vm3, %v1405_v3  ;;  %v745_v8 = vld [vmem:[%s1710_s8 + $0x8] sm:$0xff]  ;;  %v747_v11 = vld [vmem:[%s1710_s8 + $0x18] sm:$0xff]  ;;  %v1407_v35 = vmov 683565275  }
   0x3   :  { %1253 = vmatprep.mubr.msk.f32.mxu0 %vm54_vm1, %v51_v1  ;;  %1252 = vmatpush3.msk.msra.mxu0 %vm61_vm0, %v53_v0  ;;  %v557_v4 = vld [vmem:[%s1708_s3] sm:$0xf]  ;;  %v1535_v12 = vpack.c.bf16 %v747_v11, %v746_v9  ;;  %v1408_v39 = vmov 2475754826   ;;  %v1409_v41 = vmov 2131351028  }
   0x4   :  { %1254 = vmatmul.mubr.msk.f32.vlgmr.msra.gmra.mrb[0].mxu0 %vm54_vm1, %v52_v2  ;;  %v564_v5 = vsel %vm562_vm2, %v557_v4, 0  ;;  %v654_v6 = vld [vmem:[%s1709_s4] sm:$0x3]  ;;  %v1410_v43 = vmov 2102212464  }
   0x5   :  { %1270 = vmatprep.mubr.msk.f32.mxu0 %vm54_vm1, %v51_v1  ;;  %1257 = vmatpush3.bf16.msra.mxu1 %v564_v5  ;;  %v744_v7 = vld [vmem:[%s1710_s8] sm:$0xff]  ;;  %v1411_v45 = vmov 920167782   ;;  %v1412_v52 = vmov 1326507024  }
   0x6   :  { %1262 = vmatprep.subr.bf16.mxu1 %v1405_v3  ;;  %1268 = vmatprep.subr.msk.mxu0 %vm61_vm0, %v654_v6  ;;  %v1530_v10 = vpack.c.bf16 %v745_v8, %v744_v7 }
   0x7   :  { %1269 = vmatpush3.msk.msra.mxu0 %vm61_vm0, %v654_v6 }
   0x8   :  { %1271 = vmatmul.mubr.msk.f32.vlgmr.msra.gmra.mrb[2].mxu0 %vm54_vm1, %v52_v2  ;;  %1332 = vmatprep.subr.bf16.mxu0 %v1530_v10 }
   0x9   :  { %1334 = vmatpush3.bf16.msra.mxu0 %v1530_v10 }
   0xa   :  { %1336 = vmatprep.subr.bf16.mxu0 %v1535_v12 }
   0xd   :  { %1338 = vmatpush3.bf16.msra.mxu0 %v1535_v12 }
  0xd7   :  { %v1541_v13 = vpop.f32.mrb[0].mxu0 }
  0xd8   :  { %v243_v14 = vand.u32 2147483647, %v1541_v13  ;;  %v246_v15 = vand.u32 2139095040, %v1541_v13  ;;  %v1545_v16 = vpop.f32.mrb[1].mxu0 }
  0xd9   :  { %v143_v17 = vand.u32 2139095040, %v1545_v16  ;;  %v140_v20 = vand.u32 2147483647, %v1545_v16 }
  0xda   :  { %v247_v18 = vshrl.u32 %v246_v15, 23  ;;  %v250_v19 = vand.u32 8388607, %v243_v14 }
  0xdb   :  { %v144_v21 = vshrl.u32 %v143_v17, 23  ;;  %v1553_v26 = vand.u32 8388607, %v140_v20 }
  0xdc   :  { %v1173_v22 = vadd.s32 4294967169, %v247_v18  ;;  %v251_v25 = vor.u32 8388608, %v250_v19 }
  0xdd   :  { %v1169_v23 = vadd.s32 4294967169, %v144_v21  ;;  %v148_v33 = vor.u32 8388608, %v1553_v26 }
  0xde   :  { %v253_v24 = vadd.s32 1, %v1173_v22  ;;  %v1555_v32 = vshll.u32 %v251_v25, 8 }
  0xdf   :  { %v150_v27 = vadd.s32 1, %v1169_v23 }
  0xe0   :  { %vm254_vm4 = vcmp.gt.s32.totalorder %v253_v24, 0 }
  0xe1   :  { %v255_v28 = vsel %vm254_vm4, %v253_v24, 0  ;;  %vm151_vm5 = vcmp.gt.s32.totalorder %v150_v27, 0  ;;  %vm245_vm4 = vcmp.lt.s32.totalorder %v1541_v13, 0 }
  0xe2   :  { %v256_v29 = vshrl.u32 %v255_v28, 5  ;;  %v257_v30 = vand.u32 31, %v255_v28  ;;  %v152_v31 = vsel %vm151_vm5, %v150_v27, 0  ;;  %vm244_vm5 = vcmp.le.f32.partialorder %v243_v14, 0.7853982 }
  0xe3   :  { %v1558_v37 = vshrl.u32 %v152_v31, 5  ;;  %v154_v38 = vand.u32 31, %v152_v31  ;;  %v188_v31 = vshll.u32 %v148_v33, 8 }
  0xe4   :  { %v258_v34 = vsub.s32 32, %v257_v30  ;;  %v260_v36 = vshll.u32 %v1407_v35, %v257_v30  ;;  %v263_v40 = vshll.u32 %v1408_v39, %v257_v30  ;;  %v266_v42 = vshll.u32 %v1409_v41, %v257_v30 }
  0xe5   :  { %v269_v44 = vshll.u32 %v1410_v43, %v257_v30  ;;  %v272_v46 = vshll.u32 %v1411_v45, %v257_v30  ;;  %vm275_vm6 = vcmp.lt.s32.totalorder %v256_v29, 1  ;;  %vm276_vm7 = vcmp.lt.s32.totalorder %v256_v29, 2 }
  0xe6   :  { %v261_v47 = vshrl.u32 %v1408_v39, %v258_v34  ;;  %v264_v48 = vshrl.u32 %v1409_v41, %v258_v34  ;;  %v267_v49 = vshrl.u32 %v1410_v43, %v258_v34  ;;  %v259_v50 = vshrl.u32 %v1407_v35, %v258_v34 }
  0xe7   :  { %v270_v51 = vshrl.u32 %v1411_v45, %v258_v34  ;;  %v273_v53 = vshrl.u32 %v1412_v52, %v258_v34  ;;  %v155_v57 = vsub.s32 32, %v154_v38  ;;  %vm277_vm8 = vcmp.lt.s32.totalorder %v256_v29, 3 }
  0xe8   :  { %v262_v54 = vor.u32 %v261_v47, %v260_v36  ;;  %v265_v55 = vor.u32 %v264_v48, %v263_v40  ;;  %v268_v56 = vor.u32 %v267_v49, %v266_v42  ;;  %vm278_vm9 = vcmp.lt.s32.totalorder %v256_v29, 4 }
  0xe9   :  { %v271_v58 = vor.u32 %v270_v51, %v269_v44  ;;  %v274_v59 = vor.u32 %v273_v53, %v272_v46  ;;  %v157_v4 = vshll.u32 %v1407_v35, %v154_v38  ;;  %v158_v7 = vshrl.u32 %v1408_v39, %v155_v57 }
  0xea   :  { %v279_v60 = vsel %vm275_vm6, %v259_v50, %v262_v54  ;;  %v280_v61 = vsel %vm278_vm9, %v268_v56, 2102212464  ;;  %v283_v62 = vsel %vm275_vm6, %v262_v54, %v265_v55  ;;  %v287_v63 = vsel %vm275_vm6, %v265_v55, %v268_v56 }
  0xeb   :  { %v281_v0 = vsel %vm277_vm8, %v265_v55, %v280_v61  ;;  %v284_v1 = vsel %vm278_vm9, %v271_v58, 920167782  ;;  %v288_v2 = vsel %vm278_vm9, %v274_v59, 1326507024  ;;  %v160_v8 = vshll.u32 %v1408_v39, %v154_v38 }
  0xec   :  { %v285_v5 = vsel %vm277_vm8, %v268_v56, %v284_v1  ;;  %v289_v6 = vsel %vm277_vm8, %v271_v58, %v288_v2  ;;  %v282_v9 = vsel %vm276_vm7, %v279_v60, %v281_v0  ;;  %v161_v17 = vshrl.u32 %v1409_v41, %v155_v57 }
  0xed   :  { %v286_v11 = vsel %vm276_vm7, %v283_v62, %v285_v5  ;;  %v290_v15 = vsel %vm276_vm7, %v287_v63, %v289_v6  ;;  %v159_v23 = vor.u32 %v158_v7, %v157_v4  ;;  %v163_v25 = vshll.u32 %v1409_v41, %v154_v38 }
  0xee   :  { %v1567_v18 = vmul.u32.u64.low %v1555_v32, %v290_v15  ;;  %v1568_v19 = vmul.u32.u64.high %v1555_v32, %v290_v15, %v1567_v18  ;;  %v1571_v21 = vmul.u32.u64.low %v1555_v32, %v286_v11  ;;  %v1572_v22 = vmul.u32.u64.high %v1555_v32, %v286_v11, %v1571_v21 }
  0xef   :  { %v162_v24 = vor.u32 %v161_v17, %v160_v8  ;;  %v164_v26 = vshrl.u32 %v1410_v43, %v155_v57  ;;  %v166_v27 = vshll.u32 %v1410_v43, %v154_v38  ;;  %v167_v28 = vshrl.u32 %v1411_v45, %v155_v57 }
  0xf0   :  { %v170_v30 = vshrl.u32 %v1412_v52, %v155_v57  ;;  %v298_v29 = vmul.u32 %v1555_v32, %v282_v9  ;;  %v156_v34 = vshrl.u32 %v1407_v35, %v155_v57  ;;  %v169_v39 = vshll.u32 %v1411_v45, %v154_v38 }
  0xf1   :  { %v165_v36 = vor.u32 %v164_v26, %v163_v25  ;;  %vm300_vm10 = vc.u32 %v1568_v19, %v1571_v21  ;;  %v301_v40 = vadd.s32 1, %v1572_v22  ;;  %v168_v42 = vor.u32 %v167_v28, %v166_v27 }
  0xf2   :  { %vm172_vm11 = vcmp.lt.s32.totalorder %v1558_v37, 1  ;;  %v171_v44 = vor.u32 %v170_v30, %v169_v39  ;;  %vm174_vm12 = vcmp.lt.s32.totalorder %v1558_v37, 3  ;;  %vm175_vm13 = vcmp.lt.s32.totalorder %v1558_v37, 4  ;;  %v748_v30 = vld [vmem:[%s1710_s8 + $0x20] sm:$0xff] }
  0xf3   :  { %v180_v41 = vsel %vm172_vm11, %v159_v23, %v162_v24  ;;  %v302_v33 = vsel %vm300_vm10, %v301_v40, %v1572_v22  ;;  %v177_v43 = vsel %vm175_vm13, %v165_v36, 2102212464  ;;  %v181_v32 = vsel %vm175_vm13, %v168_v42, 920167782 }
  0xf4   :  { %v184_v35 = vsel %vm172_vm11, %v162_v24, %v165_v36  ;;  %v303_v46 = vadd.s32 %v302_v33, %v298_v29  ;;  %vm173_vm14 = vcmp.lt.s32.totalorder %v1558_v37, 2  ;;  %v182_v38 = vsel %vm174_vm12, %v165_v36, %v181_v32 }
  0xf5   :  { %v185_v45 = vsel %vm175_vm13, %v171_v44, 1326507024  ;;  %v176_v47 = vsel %vm172_vm11, %v156_v34, %v159_v23  ;;  %v178_v48 = vsel %vm174_vm12, %v162_v24, %v177_v43  ;;  %v183_v49 = vsel %vm173_vm14, %v180_v41, %v182_v38 }
  0xf6   :  { %v186_v50 = vsel %vm174_vm12, %v168_v42, %v185_v45  ;;  %v304_v51 = vadd.s32 536870912, %v303_v46  ;;  %v1582_v53 = vmul.u32.u64.low %v188_v31, %v183_v49  ;;  %v1583_v54 = vmul.u32.u64.high %v188_v31, %v183_v49, %v1582_v53 }
  0xf7   :  { %v187_v52 = vsel %vm173_vm14, %v184_v35, %v186_v50  ;;  %v179_v58 = vsel %vm173_vm14, %v176_v47, %v178_v48  ;;  %v299_v15 = vadd.s32 %v1571_v21, %v1568_v19  ;;  %vm142_vm6 = vcmp.lt.s32.totalorder %v1545_v16, 0 }
  0xf8   :  { %v1585_v55 = vmul.u32.u64.low %v188_v31, %v187_v52  ;;  %v1586_v56 = vmul.u32.u64.high %v188_v31, %v187_v52, %v1585_v55  ;;  %v1588_v57 = vshrl.u32 %v304_v51, 30  ;;  %v198_v37 = vadd.s32 1, %v1583_v54 }
  0xf9   :  { %v195_v60 = vmul.u32 %v188_v31, %v179_v58  ;;  %v749_v31 = vld [vmem:[%s1710_s8 + $0x28] sm:$0xff]  ;;  %vm141_vm7 = vcmp.le.f32.partialorder %v140_v20, 0.7853982  ;;  %vm335_vm12 = vweird.f32 %v1541_v13 }
  0xfa   :  { %v306_v59 = vshll.u32 %v1588_v57, 30  ;;  %vm197_vm15 = vc.u32 %v1586_v56, %v1582_v53  ;;  %v1601_v34 = vpack.c.bf16 %v749_v31, %v748_v30  ;;  %v196_v40 = vadd.s32 %v1582_v53, %v1586_v56 }
  0xfb   :  { %v199_v62 = vsel %vm197_vm15, %v198_v37, %v1583_v54  ;;  %v329_v47 = vsub.s32 4, %v1588_v57 }
  0xfc   :  { %v307_v61 = vsub.s32 %v303_v46, %v306_v59  ;;  %v200_v63 = vadd.s32 %v199_v62, %v195_v60  ;;  %1340 = vmatprep.subr.bf16.mxu0 %v1601_v34 }
  0xfd   :  { %1342 = vmatpush3.bf16.msra.mxu0 %v1601_v34  ;;  %v330_v52 = vsel %vm245_vm4, %v329_v47, %v1588_v57 }
  0xfe   :  { %v309_v0 = vsub.s32 0, %v307_v61  ;;  %v201_v1 = vadd.s32 536870912, %v200_v63  ;;  %v332_v55 = vsel %vm244_vm5, 0, %v330_v52 }
  0xff   :  { %v543_v59 = vadd.s32 3, %v332_v55  ;;  %v336_v57 = vand.u32 3, %v332_v55 }
 0x100   :  { %v1174_v2 = vmin.u32 %v309_v0, %v307_v61  ;;  %v202_v4 = vshrl.u32 %v201_v1, 30 }
 0x101   :  { %vm338_vm8 = vcmp.eq.s32.totalorder %v336_v57, 0  ;;  %vm341_vm9 = vcmp.eq.s32.totalorder %v336_v57, 2  ;;  %vm337_vm13 = vcmp.lt.s32.totalorder %v336_v57, 2 }
 0x102   :  { %v311_v5 = vclz %v1174_v2  ;;  %v203_v6 = vshll.u32 %v202_v4, 30  ;;  %v226_v53 = vsub.s32 4, %v202_v4 }
 0x104   :  { %v1175_v7 = vadd.s32 4294967294, %v311_v5  ;;  %v204_v8 = vsub.s32 %v200_v63, %v203_v6  ;;  %v227_v58 = vsel %vm142_vm6, %v226_v53, %v202_v4  ;;  %v544_v63 = vand.u32 3, %v543_v59 }
 0x105   :  { %v229_v60 = vsel %vm141_vm7, 0, %v227_v58 }
 0x106   :  { %vm1176_vm0 = vcmp.lt.s32.totalorder %v1175_v7, 0  ;;  %v206_v11 = vsub.s32 0, %v204_v8  ;;  %v439_v0 = vadd.s32 3, %v229_v60  ;;  %v233_v4 = vand.u32 3, %v229_v60 }
 0x107   :  { %v314_v9 = vsel %vm1176_vm0, 0, %v1175_v7  ;;  %vm546_vm10 = vcmp.eq.s32.totalorder %v544_v63, 0  ;;  %vm549_vm11 = vcmp.eq.s32.totalorder %v544_v63, 2  ;;  %vm545_vm14 = vcmp.lt.s32.totalorder %v544_v63, 2 }
 0x108   :  { %v315_v17 = vsub.s32 32, %v314_v9  ;;  %v319_v18 = vsub.s32 4294967266, %v314_v9  ;;  %v1170_v22 = vmin.u32 %v206_v11, %v204_v8  ;;  %v316_v23 = vshll.u32 %v307_v61, %v314_v9 }
 0x109   :  { %v440_v5 = vand.u32 3, %v439_v0  ;;  %vm234_vm15 = vcmp.lt.s32.totalorder %v233_v4, 2  ;;  %vm235_vm0 = vcmp.eq.s32.totalorder %v233_v4, 0 }
 0x10a   :  { %v317_v24 = vshrl.u32 %v299_v15, %v315_v17  ;;  %v320_v25 = vadd.s32 127, %v319_v18  ;;  %v208_v26 = vclz %v1170_v22 }
 0x10c   :  { %v318_v27 = vor.u32 %v317_v24, %v316_v23  ;;  %v321_v28 = vshll.u32 %v320_v25, 23  ;;  %v1171_v29 = vadd.s32 4294967294, %v208_v26 }
 0x10e   :  { %v322_v19 = vor.u32 4788187, %v321_v28  ;;  %vm1172_vm1 = vcmp.lt.s32.totalorder %v1171_v29, 0  ;;  %v325_v36 = vcvt.s32.f32 %v318_v27  ;;  %v555_v27 = vld [vmem:[%s1711_s2] sm:$0xf] }
 0x10f   :  { %v211_v39 = vsel %vm1172_vm1, 0, %v1171_v29  ;;  %vm238_vm1 = vcmp.eq.s32.totalorder %v233_v4, 2 }
 0x110   :  { %v323_v21 = vand.u32 2147483647, %v322_v19  ;;  %v212_v42 = vsub.s32 32, %v211_v39  ;;  %v216_v44 = vsub.s32 4294967266, %v211_v39  ;;  %v213_v33 = vshll.u32 %v204_v8, %v211_v39 }
 0x111   :  { %v611_v39 = vsel %vm562_vm2, %v555_v27, 0  ;;  %vm752_vm2 = vcmask 523264  }
 0x112   :  { %v326_v41 = vmul.f32 %v325_v36, %v323_v21  ;;  %v214_v43 = vshrl.u32 %v196_v40, %v212_v42  ;;  %v217_v32 = vadd.s32 127, %v216_v44  ;;  %v750_v42 = vld [vmem:[%s1710_s8 + $0x30] sm:$0xff]  ;;  %v751_v44 = vld [vmem:[%s1710_s8 + $0x38] sm:$0xff] }
 0x114   :  { %v327_v35 = vxor.u32 2147483648, %v326_v41  ;;  %v215_v46 = vor.u32 %v214_v43, %v213_v33  ;;  %v218_v38 = vshll.u32 %v217_v32, 23 }
 0x116   :  { %v328_v45 = vsel %vm245_vm4, %v327_v35, %v326_v41  ;;  %v219_v49 = vor.u32 4788187, %v218_v38  ;;  %v222_v51 = vcvt.s32.f32 %v215_v46  ;;  %vm445_vm4 = vcmp.eq.s32.totalorder %v440_v5, 2 }
 0x117   :  { %v331_v48 = vsel %vm244_vm5, %v1541_v13, %v328_v45  ;;  %vm441_vm5 = vcmp.lt.s32.totalorder %v440_v5, 2  ;;  %v1272_v13 = vpop.f32.mrb[2].mxu0  ;;  %v1343_v41 = vpack.c.bf16 %v751_v44, %v750_v42  ;;  %v1387_v44 = vld [vmem:[%s1717_s13] sm:$0xff]  }
 0x118   :  { %1389 = vcosq.f32 %v331_v48  ;;  %v220_v50 = vand.u32 2147483647, %v219_v49  ;;  %v1384_v49 = vld [vmem:[%s1713_s9 + $0x8] sm:$0xff]  }
 0x119   :  { %1391 = vsinq.f32 %v331_v48  ;;  %1344 = vmatprep.subr.bf16.mxu0 %v1343_v41  ;;  %v1383_v48 = vld [vmem:[%s1713_s9] sm:$0xff]  }
 0x11a   :  { %v223_v54 = vmul.f32 %v222_v51, %v220_v50  ;;  %1346 = vmatpush3.bf16.msra.mxu0 %v1343_v41  ;;  %v1385_v50 = vld [vmem:[%s1713_s9 + $0x10] sm:$0xff]   ;;  %v1386_v51 = vld [vmem:[%s1713_s9 + $0x18] sm:$0xff]  }
 0x11b   :  { %1311 = vmatprep.subr.bf16.mxu0 %v1405_v3 }
 0x11c   :  { %v224_v56 = vxor.u32 2147483648, %v223_v54 }
 0x11e   :  { %v225_v14 = vsel %vm142_vm6, %v224_v56, %v223_v54  ;;  %vm442_vm6 = vcmp.eq.s32.totalorder %v440_v5, 0 }
 0x11f   :  { %v228_v37 = vsel %vm141_vm7, %v1545_v16, %v225_v14  ;;  %vm232_vm7 = vweird.f32 %v1545_v16  ;;  %v724_v16 = vpop.f32.mrb[3].mxu0 }
 0x120   :  { %1393 = vcosq.f32 %v228_v37 }
 0x121   :  { %1395 = vsinq.f32 %v228_v37 }
 0x122   :  { %v1390_v61 = vpop.eup %1389 }
 0x123   :  { %v1392_v62 = vpop.eup %1391  ;;  %v342_v2 = vxor.u32 2147483648, %v1390_v61 }
 0x124   :  { %v339_v1 = vxor.u32 2147483648, %v1392_v62 }
 0x125   :  { %v343_v6 = vsel %vm341_vm9, %v342_v2, %v1392_v62  ;;  %v551_v8 = vsel %vm549_vm11, %v342_v2, %v1392_v62  ;;  %vm1159_vm9 = vcmask 257024  }
 0x126   :  { %v340_v20 = vsel %vm338_vm8, %v1390_v61, %v339_v1  ;;  %v548_v7 = vsel %vm546_vm10, %v1390_v61, %v339_v1  ;;  %vm558_vm8 = vcmask 64512   ;;  %v1195_v1 = vld [vmem:[%s1714_s6] ss:$0 sm:$0xff] }
 0x127   :  { %v344_v15 = vsel %vm337_vm13, %v340_v20, %v343_v6  ;;  %v552_v18 = vsel %vm545_vm14, %v548_v7, %v551_v8  ;;  %v1196_v20 = vld [vmem:[%s1715_s7] ss:$0 sm:$0xff] }
 0x128   :  { %v345_v25 = vsel %vm335_vm12, nan, %v344_v15  ;;  %v553_v30 = vsel %vm335_vm12, nan, %v552_v18  ;;  %v1197_v18 = vld [vmem:[%s1716_s10] ss:$0 sm:$0xff] }
 0x12a   :  { %v1394_v9 = vpop.eup %1393 }
 0x12b   :  { %v1396_v11 = vpop.eup %1395  ;;  %v239_v17 = vxor.u32 2147483648, %v1394_v9 }
 0x12c   :  { %v236_v22 = vxor.u32 2147483648, %v1396_v11 }
 0x12d   :  { %v240_v23 = vsel %vm238_vm1, %v239_v17, %v1396_v11  ;;  %v447_v24 = vsel %vm445_vm4, %v239_v17, %v1396_v11 }
 0x12e   :  { %v237_v26 = vsel %vm235_vm0, %v1394_v9, %v236_v22  ;;  %v444_v28 = vsel %vm442_vm6, %v1394_v9, %v236_v22 }
 0x12f   :  { %v241_v31 = vsel %vm234_vm15, %v237_v26, %v240_v23  ;;  %v448_v29 = vsel %vm441_vm5, %v444_v28, %v447_v24 }
 0x130   :  { %v242_v19 = vsel %vm232_vm7, nan, %v241_v31  ;;  %v449_v21 = vsel %vm232_vm7, nan, %v448_v29 }
 0x131   :  { %v554_v36 = vpack.c.bf16 %v345_v25, %v242_v19  ;;  %v556_v40 = vpack.c.bf16 %v553_v30, %v449_v21 }
 0x133   :  { %1259 = vmatmul.mubr.msk.bf16.vlgmr.msra.gmra.mrb[0].mxu1 %vm558_vm8, %v556_v40 }
 0x134   :  { %1263 = vmatpush3.bf16.msra.mxu1 %v611_v39  ;;  %1264 = vmatprep.mubr.msk.bf16.mxu1 %vm1406_vm3, %v1405_v3 }
 0x135   :  { %1348 = vmatprep.subr.bf16.mxu1 %v1530_v10 }
 0x13f   :  { %1265 = vmatmul.mubr.msk.bf16.vlgmr.msra.gmra.mrb[0].mxu1 %vm558_vm8, %v554_v36 }
 0x140   :  { %1350 = vmatpush3.bf16.msra.mxu1 %v1530_v10 }
 0x141   :  { %1352 = vmatprep.subr.bf16.mxu1 %v1535_v12 }
 0x144   :  { %1354 = vmatpush3.bf16.msra.mxu1 %v1535_v12  ;;  %v1190_v12 = vld [vmem:[%s1712_s5] ss:$0 sm:$0xff] }
 0x145   :  { %1356 = vmatprep.subr.bf16.mxu1 %v1601_v34 }
 0x148   :  { %1358 = vmatpush3.bf16.msra.mxu1 %v1601_v34 }
 0x149   :  { %1360 = vmatprep.subr.bf16.mxu1 %v1343_v41 }
 0x14c   :  { %1362 = vmatpush3.bf16.msra.mxu1 %v1343_v41  ;;  %v1388_v41 = vld [vmem:[%s1717_s13 + $0x8] sm:$0xff]  }
 0x14d   :  { %1323 = vmatprep.subr.bf16.mxu1 %v1405_v3 }
 0x212   :  { %v647_v10 = vpop.f32.mrb[0].mxu1 }
 0x213   :  { %v733_v34 = vadd.f32 %v724_v16, %v647_v10  ;;  %v1266_v33 = vpop.f32.mrb[1].mxu1 }
 0x214   :  { %v650_v43 = vpop.f32.mrb[2].mxu1 }
 0x215   :  { %v742_v32 = vadd.f32 %v1190_v12, %v733_v34  ;;  %v734_v35 = vadd.f32 %v1272_v13, %v650_v43  ;;  %v1267_v46 = vpop.f32.mrb[3].mxu1 }
 0x216   :  { %v1203_v46 = vld [vmem:[%s1718_s11] ss:$0 sm:$0xff] }
 0x217   :  { %v834_v38 = vmul.f32 %v742_v32, %v742_v32  ;;  %v743_v45 = vadd.f32 %v1190_v12, %v734_v35  ;;  %1289 = vmatprep.mubr.msk.f32.mxu0 %vm752_vm2, %v742_v32 }
 0x219   :  { %v835_v47 = vmul.f32 %v743_v45, %v743_v45  ;;  %1290 = vmatmul.mubr.msk.f32.vlgmr.msra.gmra.mrb[4].mxu0 %vm752_vm2, %v743_v45  ;;  %1308 = vmatprep.mubr.msk.f32.mxu1 %vm752_vm2, %v834_v38 }
 0x21a   :  { %1319 = vmatprep.mubr.msk.bf16.mxu0 %vm1406_vm3, %v1405_v3  ;;  %1312 = vmatpush3.bf16.msra.mxu0 %v1383_v48 }
 0x21b   :  { %1309 = vmatmul.mubr.msk.f32.vlgmr.msra.gmra.mrb[4].mxu1 %vm752_vm2, %v835_v47  ;;  %1313 = vmatprep.subr.bf16.mxu0 %v1405_v3 }
 0x21c   :  { %1327 = vmatprep.mubr.msk.bf16.mxu1 %vm1406_vm3, %v1405_v3  ;;  %vm1037_vm3 = vcmask 261120   ;;  %1324 = vmatpush3.bf16.msra.mxu1 %v1387_v44 }
 0x21d   :  { %1325 = vmatprep.subr.bf16.mxu1 %v1405_v3 }
 0x21e   :  { %1314 = vmatpush3.bf16.msra.mxu0 %v1384_v49 }
 0x21f   :  { %1315 = vmatprep.subr.bf16.mxu0 %v1405_v3 }
 0x220   :  { %1326 = vmatpush3.bf16.msra.mxu1 %v1388_v41 }
 0x222   :  { %1316 = vmatpush3.bf16.msra.mxu0 %v1385_v50 }
 0x223   :  { %1317 = vmatprep.subr.bf16.mxu0 %v1405_v3  ;;  %v1204_v3 = vld [vmem:[%s1719_s12] ss:$0 sm:$0xff] }
 0x226   :  { %1318 = vmatpush3.bf16.msra.mxu0 %v1386_v51 }
 0x2ec   :  { %v1291_v52 = vpop.f32.mrb[4].mxu0 }
 0x2ed   :  { %v918_v53 = vmul.f32 %v1291_v52, %v1291_v52  ;;  %v825_v54 = vpop.f32.mrb[5].mxu0  ;;  %v924_v57 = vsub.f32 %v743_v45, %v1291_v52 }
 0x2ee   :  { %v917_v55 = vmul.f32 %v825_v54, %v825_v54  ;;  %v1310_v56 = vpop.f32.mrb[4].mxu1  ;;  %v923_v0 = vsub.f32 %v742_v32, %v825_v54 }
 0x2ef   :  { %v920_v58 = vsub.f32 %v1310_v56, %v918_v53  ;;  %v908_v14 = vpop.f32.mrb[5].mxu1 }
 0x2f0   :  { %v919_v59 = vsub.f32 %v908_v14, %v917_v55  ;;  %v1205_v55 = vld [vmem:[%s1720_s14] ss:$0 sm:$0xff] }
 0x2f1   :  { %v922_v37 = vmax.f32 %v920_v58, 0.0 }
 0x2f2   :  { %v921_v60 = vmax.f32 %v919_v59, 0.0 }
 0x2f3   :  { %v926_v61 = vadd.f32 1e-05, %v922_v37 }
 0x2f4   :  { %v925_v62 = vadd.f32 1e-05, %v921_v60 }
 0x2f5   :  { %1397 = vrsqrt.f32 %v926_v61 }
 0x2f6   :  { %1399 = vrsqrt.f32 %v925_v62 }
 0x2ff   :  { %v1398_v63 = vpop.eup %1397 }
 0x300   :  { %v1400_v2 = vpop.eup %1399  ;;  %v930_v4 = vmul.f32 %v1398_v63, %v924_v57 }
 0x301   :  { %v929_v5 = vmul.f32 %v1400_v2, %v923_v0 }
 0x302   :  { %v939_v6 = vmul.f32 %v1195_v1, %v930_v4 }
 0x303   :  { %v938_v7 = vmul.f32 %v1195_v1, %v929_v5 }
 0x304   :  { %v948_v8 = vadd.f32 %v1196_v20, %v939_v6 }
 0x305   :  { %v947_v9 = vadd.f32 %v1196_v20, %v938_v7 }
 0x306   :  { %v950_v11 = vmax.f32 %v948_v8, 0.0 }
 0x307   :  { %v949_v15 = vmax.f32 %v947_v9, 0.0 }
 0x309   :  { %v951_v17 = vpack.c.bf16 %v950_v11, %v949_v15 }
 0x30b   :  { %1320 = vmatmul.mubr.msk.bf16.vlgmr.msra.gmra.mrb[8].mxu0 %vm752_vm2, %v951_v17 }
 0x3de   :  { %v1028_v22 = vpop.f32.mrb[8].mxu0 }
 0x3df   :  { %v1029_v23 = vadd.f32 %v1197_v18, %v1028_v22  ;;  %v1321_v24 = vpop.f32.mrb[9].mxu0 }
 0x3e0   :  { %v1031_v25 = vpop.f32.mrb[10].mxu0 }
 0x3e1   :  { %v1032_v26 = vadd.f32 %v1197_v18, %v1031_v25  ;;  %v1322_v27 = vpop.f32.mrb[11].mxu0  ;;  %v1038_v28 = vsel %vm1037_vm3, %v1029_v23, 0.0 }
 0x3e2   :  { %1039 = vadd.xlane.f32.xlu0 %v1038_v28 }
 0x3e3   :  { %v1041_v30 = vsel %vm1037_vm3, %v1032_v26, 0.0 }
 0x3e6   :  { %1042 = vadd.xlane.f32.xlu0 %v1041_v30 }
 0x46f   :  { %v1040_v31 = vpop.xlane.xlu0 %1039 }
 0x470   :  { %v1045_v29 = vmul.f32 0.03125, %v1040_v31 }
 0x472   :  { %v1047_v19 = vsub.f32 %v1029_v23, %v1045_v29 }
 0x473   :  { %v1043_v21 = vpop.xlane.xlu0 %1042 }
 0x474   :  { %v1046_v36 = vmul.f32 0.03125, %v1043_v21  ;;  %v1049_v39 = vmul.f32 %v1047_v19, %v1047_v19 }
 0x476   :  { %v1048_v40 = vsub.f32 %v1032_v26, %v1046_v36  ;;  %v1051_v13 = vsel %vm1037_vm3, %v1049_v39, 0.0 }
 0x477   :  { %1052 = vadd.xlane.f32.xlu1 %v1051_v13 }
 0x478   :  { %v1050_v16 = vmul.f32 %v1048_v40, %v1048_v40 }
 0x47a   :  { %v1054_v42 = vsel %vm1037_vm3, %v1050_v16, 0.0 }
 0x47b   :  { %1055 = vadd.xlane.f32.xlu1 %v1054_v42 }
 0x504   :  { %v1053_v10 = vpop.xlane.xlu1 %1052 }
 0x505   :  { %v1057_v12 = vmul.f32 0.03125, %v1053_v10 }
 0x507   :  { %v1059_v34 = vadd.f32 1e-05, %v1057_v12 }
 0x508   :  { %v1056_v33 = vpop.xlane.xlu1 %1055 }
 0x509   :  { %1401 = vrsqrt.f32 %v1059_v34  ;;  %v1058_v43 = vmul.f32 0.03125, %v1056_v33 }
 0x50b   :  { %v1060_v32 = vadd.f32 1e-05, %v1058_v43 }
 0x50d   :  { %1403 = vrsqrt.f32 %v1060_v32 }
 0x513   :  { %v1402_v35 = vpop.eup %1401 }
 0x514   :  { %v1063_v38 = vmul.f32 %v1402_v35, %v1047_v19 }
 0x516   :  { %v1071_v45 = vmul.f32 %v1203_v46, %v1063_v38 }
 0x517   :  { %v1404_v47 = vpop.eup %1403 }
 0x518   :  { %v1064_v48 = vmul.f32 %v1404_v47, %v1048_v40  ;;  %v1079_v50 = vadd.f32 %v1204_v3, %v1071_v45 }
 0x51a   :  { %v1072_v49 = vmul.f32 %v1203_v46, %v1064_v48  ;;  %v1081_v52 = vmax.f32 %v1079_v50, 0.0 }
 0x51c   :  { %v1080_v51 = vadd.f32 %v1204_v3, %v1072_v49 }
 0x51e   :  { %v1082_v53 = vmax.f32 %v1080_v51, 0.0 }
 0x520   :  { %v1083_v54 = vpack.c.bf16 %v1082_v53, %v1081_v52 }
 0x522   :  { %1328 = vmatmul.mubr.msk.bf16.vlgmr.msra.gmra.mrb[8].mxu1 %vm1037_vm3, %v1083_v54 }
 0x5f5   :  { %v1144_v56 = vpop.f32.mrb[8].mxu1 }
 0x5f6   :  { %v1145_v58 = vadd.f32 %v1205_v55, %v1144_v56  ;;  %v1329_v14 = vpop.f32.mrb[9].mxu1 }
 0x5f7   :  { %v1147_v59 = vpop.f32.mrb[10].mxu1 }
 0x5f8   :  { %v1211_v37 = vpack.c.bf16 %v1145_v58, %v1145_v58  ;;  %v1148_v60 = vadd.f32 %v1205_v55, %v1147_v59  ;;  %v1330_v61 = vpop.f32.mrb[11].mxu1 }
 0x5fa   :  { %1160 = vst.msk [vmem:[%s1721_s15] sm:$0xf] %vm1159_vm9, %v1211_v37  ;;  %v1212_v62 = vpack.c.bf16 %v1148_v60, %v1148_v60 }
 0x5fc   :  { %1161 = vst.msk [vmem:[%s1721_s15 + $0x4] sm:$0xf] %vm1159_vm9, %v1212_v62 }

// kernel: giganet_encoder_forward.4
= control target key start
LH: loop header
LB: loop body
LE: loop exit
PB: predicated region body
PF: predicated region fallthrough
CT: control target
= control target key end

     0   :  { %vm117_vm0 = vcmask 1043456   ;;  %vm68_vm1 = vcmask 31744   ;;  %v8789_v50 = vmov 683565275   ;;  %v8791_v55 = vmov 2475754826   ;;  %s8767_s1 = inlined_call_operand.vmem [shape: f32[4,16], index: 1, kind: input, shape index: {}]   ;;  %s8768_s0 = inlined_call_operand.vmem [shape: f32[128,4], index: 0, kind: input, shape index: {}]   ;;  %s8769_s3 = inlined_call_operand.vmem [shape: bf16[16,128], index: 3, kind: input, shape index: {}]   ;;  %s8770_s2 = inlined_call_operand.vmem [shape: bf16[16,128], index: 2, kind: input, shape index: {}]   ;;  %s8771_s4 = inlined_call_operand.vmem [shape: f32[4,128], index: 4, kind: input, shape index: {}]   ;;  %s8772_s8 = inlined_call_operand.vmem [shape: f32[128,128], index: 8, kind: input, shape index: {}]   ;;  %s8773_s5 = inlined_call_operand.vmem [shape: f32[1,128], index: 5, kind: input, shape index: {}]   ;;  %s8774_s9 = inlined_call_operand.vmem [shape: bf16[128,32], index: 9, kind: input, shape index: {}]   ;;  %s8775_s6 = inlined_call_operand.vmem [shape: f32[1,128], index: 6, kind: input, shape index: {}]   ;;  %s8776_s7 = inlined_call_operand.vmem [shape: f32[1,128], index: 7, kind: input, shape index: {}]   ;;  %s8777_s10 = inlined_call_operand.vmem [shape: f32[1,32], index: 10, kind: input, shape index: {}]   ;;  %s8778_s13 = inlined_call_operand.vmem [shape: bf16[32,32], index: 13, kind: input, shape index: {}]   ;;  %s8779_s11 = inlined_call_operand.vmem [shape: f32[1,32], index: 11, kind: input, shape index: {}]   ;;  %s8780_s12 = inlined_call_operand.vmem [shape: f32[1,32], index: 12, kind: input, shape index: {}]   ;;  %s8781_s14 = inlined_call_operand.vmem [shape: f32[1,32], index: 14, kind: input, shape index: {}]   ;;  %s8782_s15 = inlined_call_operand.vmem [shape: bf16[128,32], index: 15, kind: output, shape index: {}]  }
   0x1   :  { %v67_v0 = vld [vmem:[%s8767_s1] sm:$0xf]  ;;  %v52_v2 = vld [vmem:[%s8768_s0 + $0x8] sm:$0xff]  ;;  %v53_v3 = vld [vmem:[%s8768_s0 + $0x10] sm:$0xff]  ;;  %v8794_v57 = vmov 2131351028  }
   0x2   :  { %v51_v1 = vld [vmem:[%s8768_s0] sm:$0xff]  ;;  %5601 = vmatprep.subr.msk.mxu0 %vm117_vm0, %v67_v0  ;;  %v54_v4 = vld [vmem:[%s8768_s0 + $0x18] sm:$0xff]  ;;  %v56_v6 = vld [vmem:[%s8768_s0 + $0x28] sm:$0xff]  ;;  %v8796_v59 = vmov 2102212464  }
   0x3   :  { %5603 = vmatprep.mubr.msk.f32.mxu0 %vm68_vm1, %v51_v1  ;;  %5602 = vmatpush3.msk.msra.mxu0 %vm117_vm0, %v67_v0  ;;  %v55_v5 = vld [vmem:[%s8768_s0 + $0x20] sm:$0xff]  ;;  %v57_v7 = vld [vmem:[%s8768_s0 + $0x30] sm:$0xff]  ;;  %v58_v8 = vld [vmem:[%s8768_s0 + $0x38] sm:$0xff]  ;;  %v8800_v61 = vmov 920167782  }
   0x4   :  { %5604 = vmatmul.mubr.msk.f32.vlgmr.msra.gmra.mrb[0].mxu0 %vm68_vm1, %v52_v2  ;;  %v59_v9 = vld [vmem:[%s8768_s0 + $0x40] sm:$0xff]  ;;  %v60_v10 = vld [vmem:[%s8768_s0 + $0x48] sm:$0xff]  ;;  %v61_v11 = vld [vmem:[%s8768_s0 + $0x50] sm:$0xff] }
   0x5   :  { %5606 = vmatprep.mubr.msk.f32.mxu0 %vm68_vm1, %v53_v3  ;;  %v62_v12 = vld [vmem:[%s8768_s0 + $0x58] sm:$0xff]  ;;  %v63_v13 = vld [vmem:[%s8768_s0 + $0x60] sm:$0xff]  ;;  %v64_v14 = vld [vmem:[%s8768_s0 + $0x68] sm:$0xff] }
   0x6   :  { %v65_v15 = vld [vmem:[%s8768_s0 + $0x70] sm:$0xff]  ;;  %v66_v16 = vld [vmem:[%s8768_s0 + $0x78] sm:$0xff] }
   0x8   :  { %5607 = vmatmul.mubr.msk.f32.gmra.mrb[2].mxu0 %vm68_vm1, %v54_v4  ;;  %v8798_v4 = vmov 1326507024  }
   0x9   :  { %5609 = vmatprep.mubr.msk.f32.mxu0 %vm68_vm1, %v55_v5 }
   0xc   :  { %5610 = vmatmul.mubr.msk.f32.gmra.mrb[4].mxu0 %vm68_vm1, %v56_v6 }
   0xd   :  { %5612 = vmatprep.mubr.msk.f32.mxu0 %vm68_vm1, %v57_v7 }
  0x10   :  { %5613 = vmatmul.mubr.msk.f32.gmra.mrb[6].mxu0 %vm68_vm1, %v58_v8 }
  0x11   :  { %5615 = vmatprep.mubr.msk.f32.mxu0 %vm68_vm1, %v59_v9 }
  0x14   :  { %5616 = vmatmul.mubr.msk.f32.gmra.mrb[8].mxu0 %vm68_vm1, %v60_v10 }
  0x15   :  { %5618 = vmatprep.mubr.msk.f32.mxu0 %vm68_vm1, %v61_v11 }
  0x18   :  { %5619 = vmatmul.mubr.msk.f32.gmra.mrb[10].mxu0 %vm68_vm1, %v62_v12 }
  0x19   :  { %5621 = vmatprep.mubr.msk.f32.mxu0 %vm68_vm1, %v63_v13 }
  0x1c   :  { %5622 = vmatmul.mubr.msk.f32.gmra.mrb[12].mxu0 %vm68_vm1, %v64_v14 }
  0x1d   :  { %5624 = vmatprep.mubr.msk.f32.mxu0 %vm68_vm1, %v65_v15 }
  0x20   :  { %5625 = vmatmul.mubr.msk.f32.gmra.mrb[14].mxu0 %vm68_vm1, %v66_v16 }
  0x21   :  { %5665 = vmatprep.mubr.msk.f32.mxu0 %vm68_vm1, %v51_v1 }
  0xd7   :  { %v6314_v17 = vpop.f32.mrb[0].mxu0 }
  0xd8   :  { %v369_v18 = vand.u32 2147483647, %v6314_v17  ;;  %v372_v19 = vand.u32 2139095040, %v6314_v17  ;;  %v6318_v20 = vpop.f32.mrb[1].mxu0 }
  0xd9   :  { %v266_v21 = vand.u32 2147483647, %v6318_v20  ;;  %v269_v22 = vand.u32 2139095040, %v6318_v20 }
  0xda   :  { %v373_v23 = vshrl.u32 %v372_v19, 23  ;;  %v376_v24 = vand.u32 8388607, %v369_v18 }
  0xdb   :  { %v270_v25 = vshrl.u32 %v269_v22, 23  ;;  %v273_v26 = vand.u32 8388607, %v266_v21  ;;  %v6326_v27 = vpop.f32.mrb[2].mxu0 }
  0xdc   :  { %8874 = vst [vmem:[#allocation2_spill] sm:$0xff] %v6326_v27  ;;  %v5243_v28 = vadd.s32 4294967169, %v373_v23  ;;  %v6328_v29 = vpop.f32.mrb[3].mxu0  ;;  %v578_v31 = vand.u32 2139095040, %v6326_v27  ;;  %v377_v33 = vor.u32 8388608, %v376_v24 }
  0xdd   :  { %8875 = vst [vmem:[#allocation3_spill] sm:$0xff] %v6328_v29  ;;  %v5239_v30 = vadd.s32 4294967169, %v270_v25  ;;  %v274_v34 = vor.u32 8388608, %v273_v26  ;;  %v575_v47 = vand.u32 2147483647, %v6326_v27 }
  0xde   :  { %v379_v32 = vadd.s32 1, %v5243_v28  ;;  %v579_v36 = vshrl.u32 %v578_v31, 23  ;;  %v6335_v44 = vshll.u32 %v377_v33, 8 }
  0xdf   :  { %v276_v35 = vadd.s32 1, %v5239_v30  ;;  %v6331_v37 = vpop.f32.mrb[4].mxu0  ;;  %v6339_v46 = vshll.u32 %v274_v34, 8 }
  0xe0   :  { %8876 = vst [vmem:[#allocation4_spill] sm:$0xff] %v6331_v37  ;;  %vm380_vm2 = vcmp.gt.s32.totalorder %v379_v32, 0  ;;  %v6333_v38 = vpop.f32.mrb[5].mxu0  ;;  %v5251_v40 = vadd.s32 4294967169, %v579_v36 }
  0xe1   :  { %v381_v39 = vsel %vm380_vm2, %v379_v32, 0  ;;  %vm277_vm3 = vcmp.gt.s32.totalorder %v276_v35, 0 }
  0xe2   :  { %v382_v41 = vshrl.u32 %v381_v39, 5  ;;  %v383_v42 = vand.u32 31, %v381_v39  ;;  %v278_v43 = vsel %vm277_vm3, %v276_v35, 0  ;;  %v6345_v53 = vadd.s32 1, %v5251_v40 }
  0xe3   :  { %v6337_v45 = vshrl.u32 %v278_v43, 5  ;;  %v6342_v48 = vpop.f32.mrb[6].mxu0  ;;  %v280_v52 = vand.u32 31, %v278_v43 }
  0xe4   :  { %8877 = vst [vmem:[#allocation5_spill] sm:$0xff] %v6342_v48  ;;  %v384_v49 = vsub.s32 32, %v383_v42  ;;  %v386_v51 = vshll.u32 %v8789_v50, %v383_v42  ;;  %v6347_v54 = vpop.f32.mrb[7].mxu0  ;;  %v389_v56 = vshll.u32 %v8791_v55, %v383_v42  ;;  %v392_v58 = vshll.u32 %v8794_v57, %v383_v42 }
  0xe5   :  { %v395_v60 = vshll.u32 %v8796_v59, %v383_v42  ;;  %v398_v62 = vshll.u32 %v8800_v61, %v383_v42  ;;  %vm401_vm4 = vcmp.lt.s32.totalorder %v382_v41, 1  ;;  %vm402_vm5 = vcmp.lt.s32.totalorder %v382_v41, 2 }
  0xe6   :  { %v387_v63 = vshrl.u32 %v8791_v55, %v384_v49  ;;  %v390_v0 = vshrl.u32 %v8794_v57, %v384_v49  ;;  %v393_v1 = vshrl.u32 %v8796_v59, %v384_v49  ;;  %v385_v2 = vshrl.u32 %v8789_v50, %v384_v49 }
  0xe7   :  { %v396_v3 = vshrl.u32 %v8800_v61, %v384_v49  ;;  %v399_v5 = vshrl.u32 %v8798_v4, %v384_v49  ;;  %v281_v9 = vsub.s32 32, %v280_v52  ;;  %vm403_vm6 = vcmp.lt.s32.totalorder %v382_v41, 3 }
  0xe8   :  { %v388_v6 = vor.u32 %v387_v63, %v386_v51  ;;  %v391_v7 = vor.u32 %v390_v0, %v389_v56  ;;  %v394_v8 = vor.u32 %v393_v1, %v392_v58  ;;  %vm404_vm7 = vcmp.lt.s32.totalorder %v382_v41, 4 }
  0xe9   :  { %v397_v10 = vor.u32 %v396_v3, %v395_v60  ;;  %v400_v11 = vor.u32 %v399_v5, %v398_v62  ;;  %v283_v23 = vshll.u32 %v8789_v50, %v280_v52  ;;  %v284_v26 = vshrl.u32 %v8791_v55, %v281_v9 }
  0xea   :  { %v405_v12 = vsel %vm401_vm4, %v385_v2, %v388_v6  ;;  %v406_v13 = vsel %vm404_vm7, %v394_v8, 2102212464  ;;  %v409_v14 = vsel %vm401_vm4, %v388_v6, %v391_v7  ;;  %v413_v15 = vsel %vm401_vm4, %v391_v7, %v394_v8 }
  0xeb   :  { %v407_v16 = vsel %vm403_vm6, %v391_v7, %v406_v13  ;;  %v410_v19 = vsel %vm404_vm7, %v397_v10, 920167782  ;;  %v414_v22 = vsel %vm404_vm7, %v400_v11, 1326507024  ;;  %v286_v28 = vshll.u32 %v8791_v55, %v280_v52  ;;  %v6394_v7 = vpop.f32.mrb[8].mxu0 }
  0xec   :  { %v411_v24 = vsel %vm403_vm6, %v394_v8, %v410_v19  ;;  %v415_v25 = vsel %vm403_vm6, %v397_v10, %v414_v22  ;;  %v408_v30 = vsel %vm402_vm5, %v405_v12, %v407_v16  ;;  %v287_v33 = vshrl.u32 %v8794_v57, %v281_v9  ;;  %8878 = vst [vmem:[#allocation6_spill] sm:$0xff] %v6394_v7 }
  0xed   :  { %v412_v31 = vsel %vm402_vm5, %v409_v14, %v411_v24  ;;  %v416_v32 = vsel %vm402_vm5, %v413_v15, %v415_v25  ;;  %v285_v40 = vor.u32 %v284_v26, %v283_v23  ;;  %v289_v43 = vshll.u32 %v8794_v57, %v280_v52 }
  0xee   :  { %v6370_v34 = vmul.u32.u64.low %v6335_v44, %v416_v32  ;;  %v6371_v35 = vmul.u32.u64.high %v6335_v44, %v416_v32, %v6370_v34  ;;  %v6374_v36 = vmul.u32.u64.low %v6335_v44, %v412_v31  ;;  %v6375_v39 = vmul.u32.u64.high %v6335_v44, %v412_v31, %v6374_v36 }
  0xef   :  { %v288_v42 = vor.u32 %v287_v33, %v286_v28  ;;  %v290_v49 = vshrl.u32 %v8796_v59, %v281_v9  ;;  %v282_v41 = vshrl.u32 %v8789_v50, %v281_v9  ;;  %v292_v51 = vshll.u32 %v8796_v59, %v280_v52 }
  0xf0   :  { %v293_v56 = vshrl.u32 %v8800_v61, %v281_v9  ;;  %v296_v58 = vshrl.u32 %v8798_v4, %v281_v9  ;;  %v424_v60 = vmul.u32 %v6335_v44, %v408_v30  ;;  %v295_v63 = vshll.u32 %v8800_v61, %v280_v52 }
  0xf1   :  { %v291_v62 = vor.u32 %v290_v49, %v289_v43  ;;  %vm298_vm8 = vcmp.lt.s32.totalorder %v6337_v45, 1  ;;  %vm426_vm9 = vc.u32 %v6371_v35, %v6374_v36  ;;  %v427_v0 = vadd.s32 1, %v6375_v39 }
  0xf2   :  { %v294_v1 = vor.u32 %v293_v56, %v292_v51  ;;  %vm299_vm10 = vcmp.lt.s32.totalorder %v6337_v45, 2  ;;  %v297_v2 = vor.u32 %v296_v58, %v295_v63  ;;  %vm300_vm11 = vcmp.lt.s32.totalorder %v6337_v45, 3 }
  0xf3   :  { %vm301_vm12 = vcmp.lt.s32.totalorder %v6337_v45, 4  ;;  %v306_v3 = vsel %vm298_vm8, %v285_v40, %v288_v42  ;;  %v428_v44 = vsel %vm426_vm9, %v427_v0, %v6375_v39  ;;  %v310_v6 = vsel %vm298_vm8, %v288_v42, %v291_v62 }
  0xf4   :  { %v303_v5 = vsel %vm301_vm12, %v291_v62, 2102212464  ;;  %v307_v52 = vsel %vm301_vm12, %v294_v1, 920167782  ;;  %v429_v8 = vadd.s32 %v428_v44, %v424_v60  ;;  %v302_v9 = vsel %vm298_vm8, %v282_v41, %v285_v40 }
  0xf5   :  { %v308_v10 = vsel %vm300_vm11, %v291_v62, %v307_v52  ;;  %v311_v11 = vsel %vm301_vm12, %v297_v2, 1326507024  ;;  %v304_v12 = vsel %vm300_vm11, %v288_v42, %v303_v5  ;;  %vm586_vm13 = vcmp.gt.s32.totalorder %v6345_v53, 0 }
  0xf6   :  { %v309_v13 = vsel %vm299_vm10, %v306_v3, %v308_v10  ;;  %v312_v14 = vsel %vm300_vm11, %v294_v1, %v311_v11  ;;  %v430_v15 = vadd.s32 536870912, %v429_v8  ;;  %v587_v25 = vsel %vm586_vm13, %v6345_v53, 0 }
  0xf7   :  { %v313_v16 = vsel %vm299_vm10, %v310_v6, %v312_v14  ;;  %v6402_v19 = vmul.u32.u64.low %v6339_v46, %v309_v13  ;;  %v6403_v22 = vmul.u32.u64.high %v6339_v46, %v309_v13, %v6402_v19  ;;  %v305_v28 = vsel %vm299_vm10, %v302_v9, %v304_v12 }
  0xf8   :  { %v6407_v23 = vmul.u32.u64.low %v6339_v46, %v313_v16  ;;  %v6408_v24 = vmul.u32.u64.high %v6339_v46, %v313_v16, %v6407_v23  ;;  %v6411_v26 = vshrl.u32 %v430_v15, 30  ;;  %v582_v30 = vand.u32 8388607, %v575_v47  ;;  %v6441_v15 = vpop.f32.mrb[9].mxu0 }
  0xf9   :  { %v589_v31 = vand.u32 31, %v587_v25  ;;  %v324_v33 = vadd.s32 1, %v6403_v22  ;;  %v321_v39 = vmul.u32 %v6339_v46, %v305_v28  ;;  %v475_v42 = vand.u32 2139095040, %v6328_v29  ;;  %8879 = vst [vmem:[#allocation7_spill] sm:$0xff] %v6441_v15 }
  0xfa   :  { %v432_v32 = vshll.u32 %v6411_v26, 30  ;;  %vm323_vm14 = vc.u32 %v6408_v24, %v6402_v19  ;;  %v583_v45 = vor.u32 8388608, %v582_v30  ;;  %v588_v49 = vshrl.u32 %v587_v25, 5 }
  0xfb   :  { %v590_v34 = vsub.s32 32, %v589_v31  ;;  %v325_v40 = vsel %vm323_vm14, %v324_v33, %v6403_v22  ;;  %v592_v46 = vshll.u32 %v8789_v50, %v589_v31  ;;  %v595_v58 = vshll.u32 %v8791_v55, %v589_v31 }
  0xfc   :  { %v6422_v53 = vsub.s32 %v429_v8, %v432_v32  ;;  %v326_v43 = vadd.s32 %v325_v40, %v321_v39  ;;  %v598_v63 = vshll.u32 %v8794_v57, %v589_v31  ;;  %v601_v0 = vshll.u32 %v8796_v59, %v589_v31 }
  0xfd   :  { %v593_v41 = vshrl.u32 %v8791_v55, %v590_v34  ;;  %v596_v51 = vshrl.u32 %v8794_v57, %v590_v34  ;;  %v599_v60 = vshrl.u32 %v8796_v59, %v590_v34  ;;  %v602_v1 = vshrl.u32 %v8800_v61, %v590_v34 }
  0xfe   :  { %v435_v56 = vsub.s32 0, %v6422_v53  ;;  %v327_v62 = vadd.s32 536870912, %v326_v43  ;;  %v605_v5 = vshrl.u32 %v8798_v4, %v590_v34  ;;  %v604_v9 = vshll.u32 %v8800_v61, %v589_v31 }
  0xff   :  { %v594_v3 = vor.u32 %v593_v41, %v592_v46  ;;  %v597_v44 = vor.u32 %v596_v51, %v595_v58  ;;  %v600_v6 = vor.u32 %v599_v60, %v598_v63  ;;  %v603_v8 = vor.u32 %v602_v1, %v601_v0 }
 0x100   :  { %v5244_v2 = vmin.u32 %v435_v56, %v6422_v53  ;;  %v6437_v52 = vshrl.u32 %v327_v62, 30  ;;  %v623_v11 = vshll.u32 %v583_v45, 8  ;;  %v476_v12 = vshrl.u32 %v475_v42, 23 }
 0x101   :  { %v606_v14 = vor.u32 %v605_v5, %v604_v9  ;;  %vm607_vm15 = vcmp.lt.s32.totalorder %v588_v49, 1  ;;  %vm610_vm2 = vcmp.lt.s32.totalorder %v588_v49, 4  ;;  %vm609_vm3 = vcmp.lt.s32.totalorder %v588_v49, 3 }
 0x102   :  { %v437_v10 = vclz %v5244_v2  ;;  %v329_v13 = vshll.u32 %v6437_v52, 30  ;;  %v615_v22 = vsel %vm607_vm15, %v594_v3, %v597_v44  ;;  %v616_v23 = vsel %vm610_vm2, %v603_v8, 920167782 }
 0x103   :  { %vm608_vm4 = vcmp.lt.s32.totalorder %v588_v49, 2  ;;  %v612_v28 = vsel %vm610_vm2, %v600_v6, 2102212464  ;;  %v617_v30 = vsel %vm609_vm3, %v600_v6, %v616_v23  ;;  %v591_v31 = vshrl.u32 %v8789_v50, %v590_v34 }
 0x104   :  { %v5245_v16 = vadd.s32 4294967294, %v437_v10  ;;  %v6445_v25 = vsub.s32 %v326_v43, %v329_v13  ;;  %v618_v32 = vsel %vm608_vm4, %v615_v22, %v617_v30  ;;  %v619_v33 = vsel %vm607_vm15, %v597_v44, %v600_v6 }
 0x105   :  { %v620_v45 = vsel %vm610_vm2, %v606_v14, 1326507024  ;;  %v5247_v42 = vadd.s32 4294967169, %v476_v12  ;;  %v611_v43 = vsel %vm607_vm15, %v591_v31, %v594_v3  ;;  %v613_v41 = vsel %vm609_vm3, %v597_v44, %v612_v28 }
 0x106   :  { %vm5246_vm5 = vcmp.lt.s32.totalorder %v5245_v16, 0  ;;  %v332_v40 = vsub.s32 0, %v6445_v25  ;;  %v621_v51 = vsel %vm609_vm3, %v603_v8, %v620_v45  ;;  %v614_v0 = vsel %vm608_vm4, %v611_v43, %v613_v41 }
 0x107   :  { %v440_v39 = vsel %vm5246_vm5, 0, %v5245_v16  ;;  %v622_v56 = vsel %vm608_vm4, %v619_v33, %v621_v51  ;;  %v6458_v46 = vmul.u32.u64.low %v623_v11, %v618_v32  ;;  %v6459_v34 = vmul.u32.u64.high %v623_v11, %v618_v32, %v6458_v46 }
 0x108   :  { %v445_v58 = vsub.s32 4294967266, %v440_v39  ;;  %v5240_v60 = vmin.u32 %v332_v40, %v6445_v25  ;;  %v6463_v62 = vmul.u32.u64.low %v623_v11, %v622_v56  ;;  %v6464_v63 = vmul.u32.u64.high %v623_v11, %v622_v56, %v6463_v62 }
 0x109   :  { %v482_v1 = vadd.s32 1, %v5247_v42  ;;  %v472_v2 = vand.u32 2147483647, %v6328_v29  ;;  %v633_v3 = vadd.s32 1, %v6459_v34  ;;  %v630_v6 = vmul.u32 %v623_v11, %v614_v0 }
 0x10a   :  { %v446_v44 = vadd.s32 127, %v445_v58  ;;  %v334_v5 = vclz %v5240_v60  ;;  %vm632_vm7 = vc.u32 %v6464_v63, %v6458_v46  ;;  %v441_v8 = vsub.s32 32, %v440_v39 }
 0x10b   :  { %vm483_vm6 = vcmp.gt.s32.totalorder %v482_v1, 0  ;;  %v634_v9 = vsel %vm632_vm7, %v633_v3, %v6459_v34  ;;  %v479_v49 = vand.u32 8388607, %v472_v2  ;;  %v425_v13 = vadd.s32 %v6374_v36, %v6371_v35 }
 0x10c   :  { %v484_v10 = vsel %vm483_vm6, %v482_v1, 0  ;;  %v635_v12 = vadd.s32 %v634_v9, %v630_v6  ;;  %v447_v16 = vshll.u32 %v446_v44, 23  ;;  %v5241_v22 = vadd.s32 4294967294, %v334_v5 }
 0x10d   :  { %v486_v14 = vand.u32 31, %v484_v10  ;;  %v443_v28 = vshrl.u32 %v425_v13, %v441_v8  ;;  %v480_v31 = vor.u32 8388608, %v479_v49  ;;  %v442_v32 = vshll.u32 %v6422_v53, %v440_v39 }
 0x10e   :  { %v636_v23 = vadd.s32 536870912, %v635_v12  ;;  %v8793_v33 = vand.u32 2147483647, %v6331_v37  ;;  %v448_v40 = vor.u32 4788187, %v447_v16  ;;  %vm5242_vm8 = vcmp.lt.s32.totalorder %v5241_v22, 0 }
 0x10f   :  { %v487_v11 = vsub.s32 32, %v486_v14  ;;  %v444_v35 = vor.u32 %v443_v28, %v442_v32  ;;  %v455_v36 = vsub.s32 4, %v6411_v26  ;;  %v322_v43 = vadd.s32 %v6402_v19, %v6408_v24 }
 0x110   :  { %v6476_v30 = vshrl.u32 %v636_v23, 30  ;;  %v489_v53 = vshll.u32 %v8789_v50, %v486_v14  ;;  %v6489_v39 = vshll.u32 %v480_v31, 8  ;;  %v784_v56 = vand.u32 2139095040, %v6331_v37 }
 0x111   :  { %v490_v42 = vshrl.u32 %v8791_v55, %v487_v11  ;;  %v493_v41 = vshrl.u32 %v8794_v57, %v487_v11  ;;  %v6492_v34 = vsel %vm5242_vm8, 0, %v5241_v22  ;;  %v492_v58 = vshll.u32 %v8791_v55, %v486_v14 }
 0x112   :  { %v638_v45 = vshll.u32 %v6476_v30, 30  ;;  %v495_v60 = vshll.u32 %v8794_v57, %v486_v14  ;;  %v496_v62 = vshrl.u32 %v8796_v59, %v487_v11  ;;  %v449_v0 = vand.u32 2147483647, %v448_v40 }
 0x113   :  { %v485_v24 = vshrl.u32 %v484_v10, 5  ;;  %v491_v1 = vor.u32 %v490_v42, %v489_v53  ;;  %v494_v3 = vor.u32 %v493_v41, %v492_v58  ;;  %v498_v5 = vshll.u32 %v8796_v59, %v486_v14 }
 0x114   :  { %v6486_v51 = vsub.s32 %v635_v12, %v638_v45  ;;  %v497_v44 = vor.u32 %v496_v62, %v495_v60  ;;  %v499_v6 = vshrl.u32 %v8800_v61, %v487_v11  ;;  %v451_v8 = vcvt.s32.f32 %v444_v35 }
 0x115   :  { %v338_v9 = vsub.s32 32, %v6492_v34  ;;  %v785_v49 = vshrl.u32 %v784_v56, 23  ;;  %v342_v13 = vsub.s32 4294967266, %v6492_v34  ;;  %v501_v22 = vshll.u32 %v8800_v61, %v486_v14  ;;  %v6509_v14 = vpop.f32.mrb[10].mxu0 }
 0x116   :  { %v641_v19 = vsub.s32 0, %v6486_v51  ;;  %v500_v16 = vor.u32 %v499_v6, %v498_v5  ;;  %v502_v10 = vshrl.u32 %v8798_v4, %v487_v11  ;;  %v452_v23 = vmul.f32 %v451_v8, %v449_v0  ;;  %8880 = vst [vmem:[#allocation8_spill] sm:$0xff] %v6509_v14 }
 0x117   :  { %vm504_vm9 = vcmp.lt.s32.totalorder %v485_v24, 1  ;;  %vm507_vm10 = vcmp.lt.s32.totalorder %v485_v24, 4  ;;  %vm371_vm11 = vcmp.lt.s32.totalorder %v6314_v17, 0  ;;  %v488_v31 = vshrl.u32 %v8789_v50, %v487_v11 }
 0x118   :  { %v5252_v12 = vmin.u32 %v641_v19, %v6486_v51  ;;  %v503_v32 = vor.u32 %v502_v10, %v501_v22  ;;  %v509_v40 = vsel %vm507_vm10, %v497_v44, 2102212464  ;;  %v512_v45 = vsel %vm504_vm9, %v491_v1, %v494_v3 }
 0x119   :  { %vm505_vm12 = vcmp.lt.s32.totalorder %v485_v24, 2  ;;  %vm506_vm13 = vcmp.lt.s32.totalorder %v485_v24, 3  ;;  %v513_v35 = vsel %vm507_vm10, %v500_v16, 920167782  ;;  %v343_v41 = vadd.s32 127, %v342_v13 }
 0x11a   :  { %v643_v28 = vclz %v5252_v12  ;;  %v508_v53 = vsel %vm504_vm9, %v488_v31, %v491_v1  ;;  %v514_v56 = vsel %vm506_vm13, %v497_v44, %v513_v35  ;;  %v516_v58 = vsel %vm504_vm9, %v494_v3, %v497_v44 }
 0x11b   :  { %v510_v60 = vsel %vm506_vm13, %v494_v3, %v509_v40  ;;  %v515_v62 = vsel %vm505_vm12, %v512_v45, %v514_v56  ;;  %v517_v11 = vsel %vm507_vm10, %v503_v32, 1326507024  ;;  %vm6520_vm15 = vcmp.le.f32.partialorder %v369_v18, 0.7853982 }
 0x11c   :  { %v5253_v42 = vadd.s32 4294967294, %v643_v28  ;;  %v518_v19 = vsel %vm506_vm13, %v500_v16, %v517_v11  ;;  %v6514_v5 = vmul.u32.u64.low %v6489_v39, %v515_v62  ;;  %v6515_v6 = vmul.u32.u64.high %v6489_v39, %v515_v62, %v6514_v5 }
 0x11d   :  { %vm268_vm2 = vcmp.lt.s32.totalorder %v6318_v20, 0  ;;  %v631_v1 = vadd.s32 %v6458_v46, %v6464_v63  ;;  %v519_v12 = vsel %vm505_vm12, %v516_v58, %v518_v19  ;;  %v340_v13 = vshrl.u32 %v322_v43, %v338_v9 }
 0x11e   :  { %vm5254_vm14 = vcmp.lt.s32.totalorder %v5253_v42, 0  ;;  %v6529_v16 = vmul.u32.u64.low %v6489_v39, %v519_v12  ;;  %v6530_v22 = vmul.u32.u64.high %v6489_v39, %v519_v12, %v6529_v16  ;;  %v5259_v10 = vadd.s32 4294967169, %v785_v49 }
 0x11f   :  { %v646_v0 = vsel %vm5254_vm14, 0, %v5253_v42  ;;  %v511_v32 = vsel %vm505_vm12, %v508_v53, %v510_v60  ;;  %v453_v40 = vxor.u32 2147483648, %v452_v23  ;;  %v344_v45 = vshll.u32 %v343_v41, 23 }
 0x120   :  { %v647_v3 = vsub.s32 32, %v646_v0  ;;  %v651_v44 = vsub.s32 4294967266, %v646_v0  ;;  %v648_v18 = vshll.u32 %v6486_v51, %v646_v0  ;;  %v530_v46 = vadd.s32 1, %v6515_v6 }
 0x121   :  { %v791_v63 = vadd.s32 1, %v5259_v10  ;;  %v456_v43 = vsel %vm371_vm11, %v455_v36, %v6411_v26  ;;  %v339_v9 = vshll.u32 %v6445_v25, %v6492_v34  ;;  %v352_v42 = vsub.s32 4, %v6437_v52 }
 0x122   :  { %v649_v28 = vshrl.u32 %v631_v1, %v647_v3  ;;  %v652_v31 = vadd.s32 127, %v651_v44  ;;  %v527_v24 = vmul.u32 %v6489_v39, %v511_v32  ;;  %vm529_vm3 = vc.u32 %v6530_v22, %v6514_v5 }
 0x123   :  { %vm792_vm4 = vcmp.gt.s32.totalorder %v791_v63, 0  ;;  %v341_v35 = vor.u32 %v340_v13, %v339_v9  ;;  %v531_v53 = vsel %vm529_vm3, %v530_v46, %v6515_v6  ;;  %v454_v26 = vsel %vm371_vm11, %v453_v40, %v452_v23 }
 0x124   :  { %v650_v49 = vor.u32 %v649_v28, %v648_v18  ;;  %v653_v51 = vshll.u32 %v652_v31, 23  ;;  %v793_v56 = vsel %vm792_vm4, %v791_v63, 0  ;;  %v345_v36 = vor.u32 4788187, %v344_v45  ;;  %v6578_v45 = vpop.f32.mrb[11].mxu0 }
 0x125   :  { %v532_v25 = vadd.s32 %v531_v53, %v527_v24  ;;  %v795_v34 = vand.u32 31, %v793_v56  ;;  %vm577_vm5 = vcmp.lt.s32.totalorder %v6326_v27, 0  ;;  %v788_v39 = vand.u32 8388607, %v8793_v33 }
 0x126   :  { %v654_v41 = vor.u32 4788187, %v653_v51  ;;  %v657_v60 = vcvt.s32.f32 %v650_v49  ;;  %v6554_v62 = vsel %vm6520_vm15, 0, %v456_v43  ;;  %v6559_v11 = vsel %vm268_vm2, %v352_v42, %v6437_v52 }
 0x127   :  { %v533_v23 = vadd.s32 536870912, %v532_v25  ;;  %v796_v0 = vsub.s32 32, %v795_v34  ;;  %v6564_v19 = vsel %vm6520_vm15, %v6314_v17, %v454_v26  ;;  %v348_v6 = vcvt.s32.f32 %v341_v35 }
 0x128   :  { %v655_v58 = vand.u32 2147483647, %v654_v41  ;;  %v661_v3 = vsub.s32 4, %v6476_v30  ;;  %v346_v44 = vand.u32 2147483647, %v345_v36  ;;  %v789_v52 = vor.u32 8388608, %v788_v39 }
 0x129   :  { %v6567_v12 = vshrl.u32 %v533_v23, 30  ;;  %v799_v13 = vshrl.u32 %v8791_v55, %v796_v0  ;;  %v802_v16 = vshrl.u32 %v8794_v57, %v796_v0  ;;  %v805_v10 = vshrl.u32 %v8796_v59, %v796_v0 }
 0x12a   :  { %v658_v1 = vmul.f32 %v657_v60, %v655_v58  ;;  %v808_v18 = vshrl.u32 %v8800_v61, %v796_v0  ;;  %v681_v8 = vand.u32 2139095040, %v6333_v38  ;;  %v798_v31 = vshll.u32 %v8789_v50, %v795_v34 }
 0x12b   :  { %v535_v28 = vshll.u32 %v6567_v12, 30  ;;  %v801_v32 = vshll.u32 %v8791_v55, %v795_v34  ;;  %v811_v40 = vshrl.u32 %v8798_v4, %v796_v0  ;;  %v794_v63 = vshrl.u32 %v793_v56, 5 }
 0x12c   :  { %v659_v46 = vxor.u32 2147483648, %v658_v1  ;;  %v804_v43 = vshll.u32 %v8794_v57, %v795_v34  ;;  %v807_v9 = vshll.u32 %v8796_v59, %v795_v34  ;;  %vm6584_vm6 = vcmp.le.f32.partialorder %v575_v47, 0.7853982 }
 0x12d   :  { %v6588_v51 = vsub.s32 %v532_v25, %v535_v28  ;;  %v800_v42 = vor.u32 %v799_v13, %v798_v31  ;;  %v803_v24 = vor.u32 %v802_v16, %v801_v32  ;;  %v810_v35 = vshll.u32 %v8800_v61, %v795_v34 }
 0x12e   :  { %vm6593_vm7 = vcmp.le.f32.partialorder %v266_v21, 0.7853982  ;;  %v662_v53 = vsel %vm577_vm5, %v661_v3, %v6476_v30  ;;  %v806_v47 = vor.u32 %v805_v10, %v804_v43  ;;  %v809_v56 = vor.u32 %v808_v18, %v807_v9 }
 0x12f   :  { %v682_v26 = vshrl.u32 %v681_v8, 23  ;;  %v349_v36 = vmul.f32 %v348_v6, %v346_v44  ;;  %v538_v25 = vsub.s32 0, %v6588_v51  ;;  %v812_v58 = vor.u32 %v811_v40, %v810_v35 }
 0x130   :  { %v8788_v60 = vand.u32 2147483647, %v6333_v38  ;;  %v660_v34 = vsel %vm577_vm5, %v659_v46, %v658_v1  ;;  %v797_v21 = vshrl.u32 %v8789_v50, %v796_v0  ;;  %vm813_vm8 = vcmp.lt.s32.totalorder %v794_v63, 1 }
 0x131   :  { %v829_v39 = vshll.u32 %v789_v52, 8  ;;  %v5248_v23 = vmin.u32 %v538_v25, %v6588_v51  ;;  %vm815_vm9 = vcmp.lt.s32.totalorder %v794_v63, 3  ;;  %vm816_vm10 = vcmp.lt.s32.totalorder %v794_v63, 4 }
 0x132   :  { %v821_v30 = vsel %vm813_vm8, %v800_v42, %v803_v24  ;;  %v818_v3 = vsel %vm816_vm10, %v806_v47, 2102212464  ;;  %v822_v13 = vsel %vm816_vm10, %v809_v56, 920167782  ;;  %v825_v6 = vsel %vm813_vm8, %v803_v24, %v806_v47 }
 0x133   :  { %v5255_v44 = vadd.s32 4294967169, %v682_v26  ;;  %v540_v16 = vclz %v5248_v23  ;;  %vm814_vm11 = vcmp.lt.s32.totalorder %v794_v63, 2  ;;  %v823_v10 = vsel %vm815_vm9, %v806_v47, %v822_v13 }
 0x134   :  { %v826_v18 = vsel %vm816_vm10, %v812_v58, 1326507024  ;;  %v817_v8 = vsel %vm813_vm8, %v797_v21, %v800_v42  ;;  %v819_v28 = vsel %vm815_vm9, %v803_v24, %v818_v3  ;;  %v824_v1 = vsel %vm814_vm11, %v821_v30, %v823_v10 }
 0x135   :  { %v827_v0 = vsel %vm815_vm9, %v809_v56, %v826_v18  ;;  %v5249_v31 = vadd.s32 4294967294, %v540_v16  ;;  %v6608_v32 = vmul.u32.u64.low %v829_v39, %v824_v1  ;;  %v6609_v40 = vmul.u32.u64.high %v829_v39, %v824_v1, %v6608_v32 }
 0x136   :  { %v828_v52 = vsel %vm814_vm11, %v825_v6, %v827_v0  ;;  %v663_v46 = vsel %vm6584_vm6, %v6326_v27, %v660_v34  ;;  %v688_v35 = vadd.s32 1, %v5255_v44  ;;  %6015 = vcosq.f32 %v6564_v19 }
 0x137   :  { %v6615_v43 = vmul.u32.u64.low %v829_v39, %v828_v52  ;;  %v6616_v9 = vmul.u32.u64.high %v829_v39, %v828_v52, %v6615_v43  ;;  %v6622_v42 = vsel %vm6593_vm7, 0, %v6559_v11  ;;  %vm5250_vm12 = vcmp.lt.s32.totalorder %v5249_v31, 0 }
 0x138   :  { %v820_v24 = vsel %vm814_vm11, %v817_v8, %v819_v28  ;;  %v350_v47 = vxor.u32 2147483648, %v349_v36  ;;  %v664_v56 = vsel %vm6584_vm6, 0, %v662_v53  ;;  %v543_v26 = vsel %vm5250_vm12, 0, %v5249_v31 }
 0x139   :  { %vm689_vm13 = vcmp.gt.s32.totalorder %v688_v35, 0  ;;  %6017 = vcosq.f32 %v663_v46  ;;  %vm474_vm14 = vcmp.lt.s32.totalorder %v6328_v29, 0  ;;  %v528_v25 = vadd.s32 %v6514_v5, %v6530_v22 }
 0x13a   :  { %v544_v58 = vsub.s32 32, %v543_v26  ;;  %v548_v34 = vsub.s32 4294967266, %v543_v26  ;;  %v836_v21 = vmul.u32 %v829_v39, %v820_v24  ;;  %vm838_vm15 = vc.u32 %v6616_v9, %v6608_v32 }
 0x13b   :  { %v839_v11 = vadd.s32 1, %v6609_v40  ;;  %v685_v63 = vand.u32 8388607, %v8788_v60  ;;  %v545_v49 = vshll.u32 %v6588_v51, %v543_v26  ;;  %v690_v30 = vsel %vm689_vm13, %v688_v35, 0 }
 0x13c   :  { %v546_v53 = vshrl.u32 %v528_v25, %v544_v58  ;;  %v549_v23 = vadd.s32 127, %v548_v34  ;;  %6019 = vsinq.f32 %v6564_v19  ;;  %v6637_v3 = vand.u32 3, %v664_v56 }
 0x13d   :  { %v840_v5 = vsel %vm838_vm15, %v839_v11, %v6609_v40  ;;  %v692_v22 = vand.u32 31, %v690_v30  ;;  %v6640_v39 = vadd.s32 3, %v664_v56  ;;  %v6644_v16 = vsel %vm268_vm2, %v350_v47, %v349_v36 }
 0x13e   :  { %v547_v13 = vor.u32 %v546_v53, %v545_v49  ;;  %v550_v6 = vshll.u32 %v549_v23, 23  ;;  %v841_v44 = vadd.s32 %v840_v5, %v836_v21  ;;  %6021 = vsinq.f32 %v663_v46 }
 0x13f   :  { %v558_v51 = vsub.s32 4, %v6567_v12  ;;  %v693_v10 = vsub.s32 32, %v692_v22  ;;  %vm6649_vm3 = vcmp.le.f32.partialorder %v472_v2, 0.7853982  ;;  %v686_v28 = vor.u32 8388608, %v685_v63 }
 0x140   :  { %v551_v18 = vor.u32 4788187, %v550_v6  ;;  %v842_v8 = vadd.s32 536870912, %v841_v44  ;;  %v695_v1 = vshll.u32 %v8789_v50, %v692_v22  ;;  %v698_v36 = vshll.u32 %v8791_v55, %v692_v22  ;;  %v6658_v40 = vpop.eup %6015  ;;  %v6678_v6 = vpop.f32.mrb[12].mxu0 }
 0x141   :  { %v696_v0 = vshrl.u32 %v8791_v55, %v693_v10  ;;  %v699_v31 = vshrl.u32 %v8794_v57, %v693_v10  ;;  %v702_v52 = vshrl.u32 %v8796_v59, %v693_v10  ;;  %v554_v2 = vcvt.s32.f32 %v547_v13 }
 0x142   :  { %v552_v46 = vand.u32 2147483647, %v551_v18  ;;  %v6660_v43 = vshrl.u32 %v842_v8, 30  ;;  %v705_v35 = vshrl.u32 %v8800_v61, %v693_v10  ;;  %v559_v24 = vsel %vm474_vm14, %v558_v51, %v6567_v12 }
 0x143   :  { %v691_v47 = vshrl.u32 %v690_v30, 5  ;;  %v701_v56 = vshll.u32 %v8794_v57, %v692_v22  ;;  %v704_v26 = vshll.u32 %v8796_v59, %v692_v22  ;;  %v6668_v25 = vpop.eup %6017  ;;  %v697_v21 = vor.u32 %v696_v0, %v695_v1 }
 0x144   :  { %8889 = vst [vmem:[#allocation9_spill] sm:$0xff] %v6668_v25  ;;  %v555_v58 = vmul.f32 %v554_v2, %v552_v46  ;;  %v844_v34 = vshll.u32 %v6660_v43, 30  ;;  %v700_v11 = vor.u32 %v699_v31, %v698_v36  ;;  %v707_v53 = vshll.u32 %v8800_v61, %v692_v22 }
 0x145   :  { %v703_v63 = vor.u32 %v702_v52, %v701_v56  ;;  %v706_v49 = vor.u32 %v705_v35, %v704_v26  ;;  %v708_v23 = vshrl.u32 %v8798_v4, %v693_v10  ;;  %v6675_v30 = vshll.u32 %v686_v28, 8 }
 0x146   :  { %v556_v5 = vxor.u32 2147483648, %v555_v58  ;;  %v6673_v12 = vsub.s32 %v841_v44, %v844_v34  ;;  %v990_v13 = vand.u32 2139095040, %v6342_v48  ;;  %v6680_v51 = vpop.eup %6019  ;;  %v8783_v18 = vxor.u32 2147483648, %v6668_v25 }
 0x147   :  { %v694_v8 = vshrl.u32 %v8789_v50, %v693_v10  ;;  %v709_v1 = vor.u32 %v708_v23, %v707_v53  ;;  %vm710_vm2 = vcmp.lt.s32.totalorder %v691_v47, 1  ;;  %vm711_vm4 = vcmp.lt.s32.totalorder %v691_v47, 2 }
 0x148   :  { %v557_v22 = vsel %vm474_vm14, %v556_v5, %v555_v58  ;;  %v847_v44 = vsub.s32 0, %v6673_v12  ;;  %vm713_vm5 = vcmp.lt.s32.totalorder %v691_v47, 4  ;;  %v6687_v28 = vpop.eup %6021  ;;  %v718_v31 = vsel %vm710_vm2, %v697_v21, %v700_v11 }
 0x149   :  { %8890 = vst [vmem:[#allocation10_spill] sm:$0xff] %v6687_v28  ;;  %v560_v0 = vsel %vm6649_vm3, %v6328_v29, %v557_v22  ;;  %v715_v36 = vsel %vm713_vm5, %v703_v63, 2102212464  ;;  %v719_v52 = vsel %vm713_vm5, %v706_v49, 920167782  ;;  %vm712_vm6 = vcmp.lt.s32.totalorder %v691_v47, 3 }
 0x14a   :  { %6023 = vcosq.f32 %v560_v0  ;;  %v5260_v10 = vmin.u32 %v847_v44, %v6673_v12  ;;  %v714_v46 = vsel %vm710_vm2, %v694_v8, %v697_v21  ;;  %v720_v2 = vsel %vm712_vm6, %v703_v63, %v719_v52 }
 0x14b   :  { %6025 = vsinq.f32 %v560_v0  ;;  %v722_v35 = vsel %vm710_vm2, %v700_v11, %v703_v63  ;;  %v723_v56 = vsel %vm713_vm5, %v709_v1, 1326507024  ;;  %vm669_vm8 = vcmp.lt.s32.totalorder %v6637_v3, 2 }
 0x14c   :  { %v849_v26 = vclz %v5260_v10  ;;  %v716_v58 = vsel %vm712_vm6, %v700_v11, %v715_v36  ;;  %v721_v34 = vsel %vm711_vm4, %v718_v31, %v720_v2  ;;  %v724_v53 = vsel %vm712_vm6, %v706_v49, %v723_v56 }
 0x14d   :  { %v725_v23 = vsel %vm711_vm4, %v722_v35, %v724_v53  ;;  %v6700_v5 = vmul.u32.u64.low %v6675_v30, %v721_v34  ;;  %v6701_v22 = vmul.u32.u64.high %v6675_v30, %v721_v34, %v6700_v5  ;;  %v991_v21 = vshrl.u32 %v990_v13, 23 }
 0x14e   :  { %v8784_v8 = vxor.u32 2147483648, %v6687_v28  ;;  %v5261_v44 = vadd.s32 4294967294, %v849_v26  ;;  %v6706_v63 = vmul.u32.u64.low %v6675_v30, %v725_v23  ;;  %v6707_v1 = vmul.u32.u64.high %v6675_v30, %v725_v23, %v6706_v63 }
 0x14f   :  { %v354_v11 = vsel %vm6593_vm7, %v6318_v20, %v6644_v16  ;;  %vm667_vm9 = vweird.f32 %v6326_v27  ;;  %vm670_vm10 = vcmp.eq.s32.totalorder %v6637_v3, 0  ;;  %v6717_v49 = vsel %vm6649_vm3, 0, %v559_v24 }
 0x150   :  { %v5267_v13 = vadd.s32 4294967169, %v991_v21  ;;  %vm673_vm11 = vcmp.eq.s32.totalorder %v6637_v3, 2  ;;  %vm5262_vm12 = vcmp.lt.s32.totalorder %v5261_v44, 0  ;;  %v717_v0 = vsel %vm711_vm4, %v714_v46, %v716_v58 }
 0x151   :  { %v8787_v36 = vand.u32 2147483647, %v6342_v48  ;;  %v6723_v31 = vand.u32 3, %v6640_v39  ;;  %vm564_vm7 = vweird.f32 %v6328_v29  ;;  %v6726_v41 = vsel %vm5262_vm12, 0, %v5261_v44 }
 0x152   :  { %v736_v16 = vadd.s32 1, %v6701_v22  ;;  %v997_v19 = vadd.s32 1, %v5267_v13  ;;  %6027 = vcosq.f32 %v354_v11  ;;  %v672_v24 = vsel %vm670_vm10, %v6668_v25, %v8784_v8 }
 0x153   :  { %8891 = vst [vmem:[#allocation11_spill] sm:$0xff] %v6723_v31  ;;  %v675_v47 = vsel %vm673_vm11, %v8783_v18, %v6687_v28  ;;  %v565_v52 = vand.u32 3, %v6717_v49  ;;  %6029 = vsinq.f32 %v354_v11  ;;  %v733_v39 = vmul.u32 %v6675_v30, %v717_v0  ;;  %v6775_v18 = vpop.f32.mrb[13].mxu0 }
 0x154   :  { %vm735_vm13 = vc.u32 %v6707_v1, %v6700_v5  ;;  %vm998_vm14 = vcmp.gt.s32.totalorder %v997_v19, 0  ;;  %v6739_v10 = vpop.eup %6023  ;;  %v857_v46 = vsub.s32 4294967266, %v6726_v41  ;;  %v994_v35 = vand.u32 8388607, %v8787_v36 }
 0x155   :  { %8892 = vst [vmem:[#allocation12_spill] sm:$0xff] %v6739_v10  ;;  %v737_v2 = vsel %vm735_vm13, %v736_v16, %v6701_v22  ;;  %v999_v56 = vsel %vm998_vm14, %v997_v19, 0  ;;  %v6745_v26 = vpop.eup %6025  ;;  %v676_v58 = vsel %vm669_vm8, %v672_v24, %v675_v47  ;;  %v8785_v30 = vxor.u32 2147483648, %v6739_v10 }
 0x156   :  { %8893 = vst [vmem:[#allocation13_spill] sm:$0xff] %v6745_v26  ;;  %v738_v34 = vadd.s32 %v737_v2, %v733_v39  ;;  %v1001_v53 = vand.u32 31, %v999_v56  ;;  %vm566_vm15 = vcmp.lt.s32.totalorder %v565_v52, 2  ;;  %vm567_vm3 = vcmp.eq.s32.totalorder %v565_v52, 0 }
 0x157   :  { %v8786_v23 = vxor.u32 2147483648, %v6745_v26  ;;  %vm570_vm2 = vcmp.eq.s32.totalorder %v565_v52, 2  ;;  %vm783_vm4 = vcmp.lt.s32.totalorder %v6331_v37, 0  ;;  %v887_v3 = vand.u32 2139095040, %v6347_v54 }
 0x158   :  { %v572_v22 = vsel %vm570_vm2, %v8785_v30, %v6745_v26  ;;  %v739_v21 = vadd.s32 536870912, %v738_v34  ;;  %v1002_v44 = vsub.s32 32, %v1001_v53  ;;  %v6758_v63 = vsel %vm667_vm9, nan, %v676_v58 }
 0x159   :  { %8894 = vst [vmem:[#allocation14_spill] sm:$0xff] %v6758_v63  ;;  %v569_v11 = vsel %vm567_vm3, %v6739_v10, %v8786_v23  ;;  %v837_v13 = vadd.s32 %v6608_v32, %v6616_v9  ;;  %v858_v0 = vadd.s32 127, %v857_v46  ;;  %v867_v19 = vsub.s32 4, %v6660_v43 }
 0x15a   :  { %v573_v16 = vsel %vm566_vm15, %v569_v11, %v572_v22  ;;  %v6766_v24 = vshrl.u32 %v739_v21, 30  ;;  %v995_v47 = vor.u32 8388608, %v994_v35  ;;  %v853_v39 = vsub.s32 32, %v6726_v41 }
 0x15b   :  { %v6770_v52 = vsel %vm564_vm7, nan, %v573_v16  ;;  %v1005_v2 = vshrl.u32 %v8791_v55, %v1002_v44  ;;  %v1008_v58 = vshrl.u32 %v8794_v57, %v1002_v44  ;;  %v1000_v46 = vshrl.u32 %v999_v56, 5 }
 0x15c   :  { %8895 = vst [vmem:[#allocation15_spill] sm:$0xff] %v6770_v52  ;;  %v741_v9 = vshll.u32 %v6766_v24, 30  ;;  %v888_v22 = vshrl.u32 %v887_v3, 23  ;;  %v6780_v35 = vpop.eup %6027  ;;  %v859_v21 = vshll.u32 %v858_v0, 23  ;;  %v1004_v11 = vshll.u32 %v8789_v50, %v1001_v53 }
 0x15d   :  { %v1007_v16 = vshll.u32 %v8791_v55, %v1001_v53  ;;  %v1011_v8 = vshrl.u32 %v8796_v59, %v1002_v44  ;;  %v6785_v30 = vpop.eup %6029  ;;  %v1010_v36 = vshll.u32 %v8794_v57, %v1001_v53  ;;  %v1013_v32 = vshll.u32 %v8796_v59, %v1001_v53 }
 0x15e   :  { %v6787_v23 = vsub.s32 %v738_v34, %v741_v9  ;;  %v1014_v56 = vshrl.u32 %v8800_v61, %v1002_v44  ;;  %v1006_v3 = vor.u32 %v1005_v2, %v1004_v11  ;;  %v1016_v0 = vshll.u32 %v8800_v61, %v1001_v53 }
 0x15f   :  { %v1009_v60 = vor.u32 %v1008_v58, %v1007_v16  ;;  %v1017_v50 = vshrl.u32 %v8798_v4, %v1002_v44  ;;  %v868_v55 = vsel %vm783_vm4, %v867_v19, %v6660_v43  ;;  %v1012_v34 = vor.u32 %v1011_v8, %v1010_v36 }
 0x160   :  { %v744_v33 = vsub.s32 0, %v6787_v23  ;;  %v1015_v9 = vor.u32 %v1014_v56, %v1013_v32  ;;  %v8896_v57 = vand.u32 2147483647, %v6331_v37  ;;  %v854_v2 = vshll.u32 %v6673_v12, %v6726_v41 }
 0x161   :  { %v855_v53 = vshrl.u32 %v837_v13, %v853_v39  ;;  %v1018_v58 = vor.u32 %v1017_v50, %v1016_v0  ;;  %v1035_v11 = vshll.u32 %v995_v47, 8  ;;  %v860_v16 = vor.u32 4788187, %v859_v21 }
 0x162   :  { %vm6800_vm5 = vcmp.le.f32.partialorder %v8896_v57, 0.7853982  ;;  %v5256_v4 = vmin.u32 %v744_v33, %v6787_v23  ;;  %vm1019_vm6 = vcmp.lt.s32.totalorder %v1000_v46, 1  ;;  %v5263_v43 = vadd.s32 4294967169, %v888_v22 }
 0x163   :  { %v8899_v19 = vmov 683565275   ;;  %vm1020_vm8 = vcmp.lt.s32.totalorder %v1000_v46, 2  ;;  %vm1022_vm10 = vcmp.lt.s32.totalorder %v1000_v46, 4  ;;  %v1027_v36 = vsel %vm1019_vm6, %v1006_v3, %v1009_v60 }
 0x164   :  { %v1003_v8 = vshrl.u32 %v8899_v19, %v1002_v44  ;;  %v746_v57 = vclz %v5256_v4  ;;  %vm1021_vm11 = vcmp.lt.s32.totalorder %v1000_v46, 3  ;;  %v1024_v32 = vsel %vm1022_vm10, %v1012_v34, 2102212464 }
 0x165   :  { %v1028_v56 = vsel %vm1022_vm10, %v1015_v9, 920167782  ;;  %v1031_v12 = vsel %vm1019_vm6, %v1009_v60, %v1012_v34  ;;  %v1032_v41 = vsel %vm1022_vm10, %v1018_v58, 1326507024  ;;  %v1025_v13 = vsel %vm1021_vm11, %v1009_v60, %v1024_v32 }
 0x166   :  { %v1023_v61 = vsel %vm1019_vm6, %v1003_v8, %v1006_v3  ;;  %v1029_v52 = vsel %vm1021_vm11, %v1012_v34, %v1028_v56  ;;  %v5257_v50 = vadd.s32 4294967294, %v746_v57  ;;  %v1033_v33 = vsel %vm1021_vm11, %v1015_v9, %v1032_v41 }
 0x167   :  { %v1030_v47 = vsel %vm1020_vm8, %v1027_v36, %v1029_v52  ;;  %v856_v39 = vor.u32 %v855_v53, %v854_v2  ;;  %v1034_v22 = vsel %vm1020_vm8, %v1031_v12, %v1033_v33  ;;  %v8803_v3 = vand.u32 2147483647, %v6347_v54 }
 0x168   :  { %v6810_v44 = vmul.u32.u64.low %v1035_v11, %v1030_v47  ;;  %v6811_v21 = vmul.u32.u64.high %v1035_v11, %v1030_v47, %v6810_v44  ;;  %vm5258_vm12 = vcmp.lt.s32.totalorder %v5257_v50, 0  ;;  %v861_v34 = vand.u32 2147483647, %v860_v16 }
 0x169   :  { %v6814_v4 = vmul.u32.u64.low %v1035_v11, %v1034_v22  ;;  %v6815_v0 = vmul.u32.u64.high %v1035_v11, %v1034_v22, %v6814_v4  ;;  %v749_v58 = vsel %vm5258_vm12, 0, %v5257_v50  ;;  %v1026_v60 = vsel %vm1020_vm8, %v1023_v61, %v1025_v13 }
 0x16a   :  { %v894_v8 = vadd.s32 1, %v5263_v43  ;;  %v2215_v52 = vadd.s32 3, %v6717_v49  ;;  %v870_v9 = vsel %vm6800_vm5, 0, %v868_v55  ;;  %v750_v2 = vsub.s32 32, %v749_v58 }
 0x16b   :  { %v754_v53 = vsub.s32 4294967266, %v749_v58  ;;  %v863_v36 = vcvt.s32.f32 %v856_v39  ;;  %v734_v57 = vadd.s32 %v6700_v5, %v6707_v1  ;;  %v1045_v32 = vadd.s32 1, %v6811_v21 }
 0x16c   :  { %vm895_vm13 = vcmp.gt.s32.totalorder %v894_v8, 0  ;;  %v764_v16 = vsub.s32 4, %v6766_v24  ;;  %v1042_v56 = vmul.u32 %v1035_v11, %v1026_v60  ;;  %vm1044_vm14 = vc.u32 %v6815_v0, %v6810_v44 }
 0x16d   :  { %v891_v61 = vand.u32 8388607, %v8803_v3  ;;  %v864_v49 = vmul.f32 %v863_v36, %v861_v34  ;;  %v755_v55 = vadd.s32 127, %v754_v53  ;;  %v1046_v46 = vsel %vm1044_vm14, %v1045_v32, %v6811_v21 }
 0x16e   :  { %v896_v43 = vsel %vm895_vm13, %v894_v8, 0  ;;  %vm680_vm15 = vcmp.lt.s32.totalorder %v6333_v38, 0  ;;  %v752_v5 = vshrl.u32 %v734_v57, %v750_v2  ;;  %v1047_v1 = vadd.s32 %v1046_v46, %v1042_v56 }
 0x16f   :  { %v1196_v12 = vand.u32 2139095040, %v6394_v7  ;;  %v6833_v41 = vand.u32 3, %v2215_v52  ;;  %v6835_v11 = vand.u32 3, %v870_v9  ;;  %v8902_v50 = vand.u32 2147483647, %v6333_v38 }
 0x170   :  { %v898_v47 = vand.u32 31, %v896_v43  ;;  %v2527_v33 = vadd.s32 3, %v870_v9  ;;  %v751_v39 = vshll.u32 %v6787_v23, %v749_v58  ;;  %v765_v22 = vsel %vm680_vm15, %v764_v16, %v6766_v24 }
 0x171   :  { %8900 = vst [vmem:[#allocation16_spill] sm:$0xff] %v6833_v41  ;;  %8901 = vst [vmem:[#allocation17_spill] sm:$0xff] %v6835_v11  ;;  %vm6839_vm3 = vcmp.le.f32.partialorder %v8902_v50, 0.7853982  ;;  %v1048_v21 = vadd.s32 536870912, %v1047_v1  ;;  %v865_v4 = vxor.u32 2147483648, %v864_v49 }
 0x172   :  { %v756_v34 = vshll.u32 %v755_v55, 23  ;;  %v892_v60 = vor.u32 8388608, %v891_v61  ;;  %v899_v8 = vsub.s32 32, %v898_v47  ;;  %v753_v52 = vor.u32 %v752_v5, %v751_v39  ;;  %v6853_v50 = vpop.f32.mrb[14].mxu0 }
 0x173   :  { %v6847_v2 = vshrl.u32 %v1048_v21, 30  ;;  %v897_v53 = vshrl.u32 %v896_v43, 5  ;;  %v1197_v36 = vshrl.u32 %v1196_v12, 23  ;;  %v901_v57 = vshll.u32 %v8899_v19, %v898_v47 }
 0x174   :  { %v8905_v32 = vmov 2475754826   ;;  %v8906_v56 = vmov 2131351028   ;;  %v8907_v58 = vmov 2102212464   ;;  %v866_v28 = vsel %vm783_vm4, %v865_v4, %v864_v49 }
 0x175   :  { %v902_v9 = vshrl.u32 %v8905_v32, %v899_v8  ;;  %v905_v23 = vshrl.u32 %v8906_v56, %v899_v8  ;;  %v908_v46 = vshrl.u32 %v8907_v58, %v899_v8  ;;  %v1050_v24 = vshll.u32 %v6847_v2, 30 }
 0x176   :  { %v904_v16 = vshll.u32 %v8905_v32, %v898_v47  ;;  %v907_v61 = vshll.u32 %v8906_v56, %v898_v47  ;;  %v8908_v55 = vmov 920167782   ;;  %v757_v43 = vor.u32 4788187, %v756_v34 }
 0x177   :  { %v911_v5 = vshrl.u32 %v8908_v55, %v899_v8  ;;  %v910_v12 = vshll.u32 %v8907_v58, %v898_v47  ;;  %v913_v39 = vshll.u32 %v8908_v55, %v898_v47  ;;  %v8909_v21 = vmov 1326507024  }
 0x178   :  { %v914_v3 = vshrl.u32 %v8909_v21, %v899_v8  ;;  %v6862_v63 = vsub.s32 %v1047_v1, %v1050_v24  ;;  %v903_v11 = vor.u32 %v902_v9, %v901_v57  ;;  %v906_v27 = vor.u32 %v905_v23, %v904_v16 }
 0x179   :  { %v909_v25 = vor.u32 %v908_v46, %v907_v61  ;;  %v6866_v29 = vand.u32 3, %v2527_v33  ;;  %v6870_v31 = vsel %vm6839_vm3, 0, %v765_v22  ;;  %v912_v34 = vor.u32 %v911_v5, %v910_v12 }
 0x17a   :  { %v1053_v10 = vsub.s32 0, %v6862_v63  ;;  %v915_v47 = vor.u32 %v914_v3, %v913_v39  ;;  %v932_v26 = vshll.u32 %v892_v60, 8  ;;  %v5275_v41 = vadd.s32 4294967169, %v1197_v36 }
 0x17b   :  { %8910 = vst [vmem:[#allocation18_spill] sm:$0xff] %v6866_v29  ;;  %v758_v1 = vand.u32 2147483647, %v757_v43  ;;  %v760_v24 = vcvt.s32.f32 %v753_v52  ;;  %vm916_vm2 = vcmp.lt.s32.totalorder %v897_v53, 1  ;;  %vm919_vm6 = vcmp.lt.s32.totalorder %v897_v53, 4 }
 0x17c   :  { %v5268_v57 = vmin.u32 %v1053_v10, %v6862_v63  ;;  %v900_v49 = vshrl.u32 %v8899_v19, %v899_v8  ;;  %v921_v33 = vsel %vm919_vm6, %v909_v25, 2102212464  ;;  %v924_v4 = vsel %vm916_vm2, %v903_v11, %v906_v27 }
 0x17d   :  { %vm917_vm4 = vcmp.lt.s32.totalorder %v897_v53, 2  ;;  %vm918_vm8 = vcmp.lt.s32.totalorder %v897_v53, 3  ;;  %v925_v22 = vsel %vm919_vm6, %v912_v34, 920167782  ;;  %v928_v9 = vsel %vm916_vm2, %v906_v27, %v909_v25 }
 0x17e   :  { %vm989_vm10 = vcmp.lt.s32.totalorder %v6342_v48, 0  ;;  %v1055_v23 = vclz %v5268_v57  ;;  %v920_v3 = vsel %vm916_vm2, %v900_v49, %v903_v11  ;;  %v926_v60 = vsel %vm918_vm8, %v909_v25, %v925_v22 }
 0x17f   :  { %v929_v36 = vsel %vm919_vm6, %v915_v47, 1326507024  ;;  %v922_v46 = vsel %vm918_vm8, %v906_v27, %v921_v33  ;;  %v927_v52 = vsel %vm917_vm4, %v924_v4, %v926_v60  ;;  %v1203_v61 = vadd.s32 1, %v5275_v41 }
 0x180   :  { %v930_v16 = vsel %vm918_vm8, %v912_v34, %v929_v36  ;;  %v5269_v10 = vadd.s32 4294967294, %v1055_v23  ;;  %v6878_v5 = vmul.u32.u64.low %v932_v26, %v927_v52  ;;  %v6879_v43 = vmul.u32.u64.high %v932_v26, %v927_v52, %v6878_v5 }
 0x181   :  { %v931_v8 = vsel %vm917_vm4, %v928_v9, %v930_v16  ;;  %v8818_v57 = vand.u32 2147483647, %v6394_v7  ;;  %vm1204_vm11 = vcmp.gt.s32.totalorder %v1203_v61, 0  ;;  %v761_v25 = vmul.f32 %v760_v24, %v758_v1 }
 0x182   :  { %v6882_v12 = vmul.u32.u64.low %v932_v26, %v931_v8  ;;  %v6883_v39 = vmul.u32.u64.high %v932_v26, %v931_v8, %v6882_v12  ;;  %vm5270_vm12 = vcmp.lt.s32.totalorder %v5269_v10, 0  ;;  %v923_v27 = vsel %vm917_vm4, %v920_v3, %v922_v46 }
 0x183   :  { %v1205_v11 = vsel %vm1204_vm11, %v1203_v61, 0  ;;  %v6888_v41 = vadd.s32 3, %v6870_v31  ;;  %v1058_v34 = vsel %vm5270_vm12, 0, %v5269_v10  ;;  %v1073_v47 = vsub.s32 4, %v6847_v2 }
 0x184   :  { %v1207_v49 = vand.u32 31, %v1205_v11  ;;  %v6894_v33 = vsel %vm6800_vm5, %v6331_v37, %v866_v28  ;;  %v8911_v4 = vand.u32 2147483647, %v6342_v48  ;;  %v1043_v53 = vadd.s32 %v6810_v44, %v6815_v0 }
 0x185   :  { %v1063_v24 = vsub.s32 4294967266, %v1058_v34  ;;  %v942_v22 = vadd.s32 1, %v6879_v43  ;;  %v1059_v9 = vsub.s32 32, %v1058_v34  ;;  %v939_v23 = vmul.u32 %v932_v26, %v923_v27 }
 0x186   :  { %vm6898_vm13 = vcmp.le.f32.partialorder %v8911_v4, 0.7853982  ;;  %vm941_vm14 = vc.u32 %v6883_v39, %v6878_v5  ;;  %v1208_v59 = vsub.s32 32, %v1207_v49  ;;  %v762_v28 = vxor.u32 2147483648, %v761_v25 }
 0x187   :  { %v1064_v3 = vadd.s32 127, %v1063_v24  ;;  %v943_v60 = vsel %vm941_vm14, %v942_v22, %v6879_v43  ;;  %v1200_v36 = vand.u32 8388607, %v8818_v57  ;;  %v1074_v44 = vsel %vm989_vm10, %v1073_v47, %v6847_v2  ;;  %v6921_v22 = vpop.f32.mrb[15].mxu0 }
 0x188   :  { %v944_v0 = vadd.s32 %v943_v60, %v939_v23  ;;  %v1211_v46 = vshrl.u32 %v8905_v32, %v1208_v59  ;;  %v1214_v26 = vshrl.u32 %v8906_v56, %v1208_v59  ;;  %v1210_v16 = vshll.u32 %v8899_v19, %v1207_v49 }
 0x189   :  { %v1065_v52 = vshll.u32 %v1064_v3, 23  ;;  %v1213_v61 = vshll.u32 %v8905_v32, %v1207_v49  ;;  %v1217_v10 = vshrl.u32 %v8907_v58, %v1208_v59  ;;  %v1061_v8 = vshrl.u32 %v1043_v53, %v1059_v9 }
 0x18a   :  { %v945_v43 = vadd.s32 536870912, %v944_v0  ;;  %v1206_v12 = vshrl.u32 %v1205_v11, 5  ;;  %v1216_v27 = vshll.u32 %v8906_v56, %v1207_v49  ;;  %v1212_v4 = vor.u32 %v1211_v46, %v1210_v16 }
 0x18b   :  { %v1215_v24 = vor.u32 %v1214_v26, %v1213_v61  ;;  %v1219_v2 = vshll.u32 %v8907_v58, %v1207_v49  ;;  %v1220_v47 = vshrl.u32 %v8908_v55, %v1208_v59  ;;  %v1060_v23 = vshll.u32 %v6862_v63, %v1058_v34 }
 0x18c   :  { %v946_v3 = vshrl.u32 %v945_v43, 30  ;;  %v1201_v60 = vor.u32 8388608, %v1200_v36  ;;  %v1223_v57 = vshrl.u32 %v8909_v21, %v1208_v59  ;;  %v1066_v29 = vor.u32 4788187, %v1065_v52 }
 0x18d   :  { %v1218_v53 = vor.u32 %v1217_v10, %v1216_v27  ;;  %v1221_v9 = vor.u32 %v1220_v47, %v1219_v2  ;;  %v1222_v11 = vshll.u32 %v8908_v55, %v1207_v49  ;;  %v763_v46 = vsel %vm680_vm15, %v762_v28, %v761_v25 }
 0x18e   :  { %v1076_v26 = vsel %vm6898_vm13, 0, %v1074_v44  ;;  %v947_v16 = vshll.u32 %v946_v3, 30  ;;  %vm1225_vm5 = vcmp.lt.s32.totalorder %v1206_v12, 1  ;;  %v1062_v61 = vor.u32 %v1061_v8, %v1060_v23 }
 0x18f   :  { %v1224_v37 = vor.u32 %v1223_v57, %v1222_v11  ;;  %vm1228_vm2 = vcmp.lt.s32.totalorder %v1206_v12, 4  ;;  %v1233_v63 = vsel %vm1225_vm5, %v1212_v4, %v1215_v24  ;;  %vm886_vm6 = vcmp.lt.s32.totalorder %v6347_v54, 0 }
 0x190   :  { %v6932_v34 = vsub.s32 %v944_v0, %v947_v16  ;;  %vm1227_vm4 = vcmp.lt.s32.totalorder %v1206_v12, 3  ;;  %v1234_v49 = vsel %vm1228_vm2, %v1221_v9, 920167782  ;;  %v1241_v36 = vshll.u32 %v1201_v60, 8 }
 0x191   :  { %v1067_v52 = vand.u32 2147483647, %v1066_v29  ;;  %vm1226_vm15 = vcmp.lt.s32.totalorder %v1206_v12, 2  ;;  %v1230_v25 = vsel %vm1228_vm2, %v1218_v53, 2102212464  ;;  %v1235_v28 = vsel %vm1227_vm4, %v1218_v53, %v1234_v49 }
 0x192   :  { %v950_v44 = vsub.s32 0, %v6932_v34  ;;  %v1209_v57 = vshrl.u32 %v8899_v19, %v1208_v59  ;;  %v1236_v10 = vsel %vm1226_vm15, %v1233_v63, %v1235_v28  ;;  %v1093_v8 = vand.u32 2139095040, %v6441_v15 }
 0x193   :  { %v1069_v0 = vcvt.s32.f32 %v1062_v61  ;;  %v8914_v43 = vand.u32 2147483647, %v6347_v54  ;;  %v970_v29 = vsub.s32 4, %v946_v3  ;;  %v1237_v2 = vsel %vm1225_vm5, %v1215_v24, %v1218_v53 }
 0x194   :  { %v1238_v47 = vsel %vm1228_vm2, %v1224_v37, 1326507024  ;;  %v5264_v23 = vmin.u32 %v950_v44, %v6932_v34  ;;  %v1229_v59 = vsel %vm1225_vm5, %v1209_v57, %v1212_v4  ;;  %v1231_v60 = vsel %vm1227_vm4, %v1215_v24, %v1230_v25 }
 0x195   :  { %vm6943_vm8 = vcmp.le.f32.partialorder %v8914_v43, 0.7853982  ;;  %v1239_v11 = vsel %vm1227_vm4, %v1221_v9, %v1238_v47  ;;  %v1070_v16 = vmul.f32 %v1069_v0, %v1067_v52  ;;  %v6958_v28 = vand.u32 3, %v6870_v31 }
 0x196   :  { %v1240_v61 = vsel %vm1226_vm15, %v1237_v2, %v1239_v11  ;;  %v6954_v63 = vmul.u32.u64.low %v1241_v36, %v1236_v10  ;;  %v6955_v49 = vmul.u32.u64.high %v1241_v36, %v1236_v10, %v6954_v63  ;;  %v952_v53 = vclz %v5264_v23 }
 0x197   :  { %8917 = vst [vmem:[#allocation19_spill] sm:$0xff] %v6958_v28  ;;  %v6960_v43 = vmul.u32.u64.low %v1241_v36, %v1240_v61  ;;  %v6961_v37 = vmul.u32.u64.high %v1241_v36, %v1240_v61, %v6960_v43  ;;  %6031 = vcosq.f32 %v6894_v33  ;;  %v6965_v4 = vand.u32 3, %v6888_v41 }
 0x198   :  { %v1232_v24 = vsel %vm1226_vm15, %v1229_v59, %v1231_v60  ;;  %v1094_v9 = vshrl.u32 %v1093_v8, 23  ;;  %6033 = vsinq.f32 %v6894_v33  ;;  %v766_v52 = vsel %vm6839_vm3, %v6333_v38, %v763_v46 }
 0x199   :  { %v2735_v31 = vadd.s32 3, %v1076_v26  ;;  %v5265_v25 = vadd.s32 4294967294, %v952_v53  ;;  %v1071_v44 = vxor.u32 2147483648, %v1070_v16  ;;  %v971_v57 = vsel %vm886_vm6, %v970_v29, %v946_v3 }
 0x19a   :  { %v1251_v10 = vadd.s32 1, %v6955_v49  ;;  %v5271_v0 = vadd.s32 4294967169, %v1094_v9  ;;  %v1248_v41 = vmul.u32 %v1241_v36, %v1232_v24  ;;  %vm1250_vm12 = vc.u32 %v6961_v37, %v6954_v63 }
 0x19b   :  { %vm5266_vm11 = vcmp.lt.s32.totalorder %v5265_v25, 0  ;;  %v8822_v12 = vand.u32 2147483647, %v6441_v15  ;;  %v6977_v33 = vand.u32 3, %v1076_v26  ;;  %6035 = vcosq.f32 %v766_v52 }
 0x19c   :  { %v955_v8 = vsel %vm5266_vm11, 0, %v5265_v25  ;;  %v1252_v13 = vsel %vm1250_vm12, %v1251_v10, %v6955_v49  ;;  %v1100_v46 = vadd.s32 1, %v5271_v0  ;;  %v973_v3 = vsel %vm6943_vm8, 0, %v971_v57 }
 0x19d   :  { %8918 = vst [vmem:[#allocation20_spill] sm:$0xff] %v6977_v33  ;;  %v960_v2 = vsub.s32 4294967266, %v955_v8  ;;  %v1253_v29 = vadd.s32 %v1252_v13, %v1248_v41  ;;  %v1072_v47 = vsel %vm989_vm10, %v1071_v44, %v1070_v16  ;;  %v6984_v36 = vand.u32 3, %v2735_v31 }
 0x19e   :  { %v956_v23 = vsub.s32 32, %v955_v8  ;;  %vm1101_vm3 = vcmp.gt.s32.totalorder %v1100_v46, 0  ;;  %v1097_v60 = vand.u32 8388607, %v8822_v12  ;;  %6037 = vsinq.f32 %v766_v52 }
 0x19f   :  { %8919 = vst [vmem:[#allocation21_spill] sm:$0xff] %v6984_v36  ;;  %v961_v59 = vadd.s32 127, %v960_v2  ;;  %v1254_v26 = vadd.s32 536870912, %v1253_v29  ;;  %v1102_v11 = vsel %vm1101_vm3, %v1100_v46, 0  ;;  %v940_v61 = vadd.s32 %v6878_v5, %v6883_v39 }
 0x1a0   :  { %v6990_v49 = vand.u32 3, %v973_v3  ;;  %v1104_v53 = vand.u32 31, %v1102_v11  ;;  %v6992_v24 = vadd.s32 3, %v973_v3  ;;  %v1402_v9 = vand.u32 2139095040, %v6509_v14 }
 0x1a1   :  { %v962_v43 = vshll.u32 %v961_v59, 23  ;;  %v6994_v16 = vshrl.u32 %v1254_v26, 30  ;;  %v6997_v31 = vpop.eup %6031  ;;  %v7002_v25 = vsel %vm6898_vm13, %v6342_v48, %v1072_v47  ;;  %v958_v52 = vshrl.u32 %v940_v61, %v956_v23 }
 0x1a2   :  { %8920 = vst [vmem:[#allocation22_spill] sm:$0xff] %v6990_v49  ;;  %v1105_v44 = vsub.s32 32, %v1104_v53  ;;  %v7005_v39 = vpop.eup %6033  ;;  %v7008_v10 = vadd.s32 %v6954_v63, %v6961_v37  ;;  %v1098_v41 = vor.u32 8388608, %v1097_v60  ;;  %v957_v13 = vshll.u32 %v6932_v34, %v955_v8 }
 0x1a3   :  { %v963_v57 = vor.u32 4788187, %v962_v43  ;;  %v1256_v0 = vshll.u32 %v6994_v16, 30  ;;  %v1107_v47 = vshll.u32 %v8899_v19, %v1104_v53  ;;  %v1113_v23 = vshll.u32 %v8906_v56, %v1104_v53 }
 0x1a4   :  { %v1108_v46 = vshrl.u32 %v8905_v32, %v1105_v44  ;;  %v1111_v1 = vshrl.u32 %v8906_v56, %v1105_v44  ;;  %v1114_v2 = vshrl.u32 %v8907_v58, %v1105_v44  ;;  %v1403_v59 = vshrl.u32 %v1402_v9, 23 }
 0x1a5   :  { %v7015_v3 = vsub.s32 %v1253_v29, %v1256_v0  ;;  %v959_v63 = vor.u32 %v958_v52, %v957_v13  ;;  %v964_v37 = vand.u32 2147483647, %v963_v57  ;;  %v1103_v26 = vshrl.u32 %v1102_v11, 5  ;;  %v7020_v61 = vpop.eup %6035 }
 0x1a6   :  { %v1110_v60 = vshll.u32 %v8905_v32, %v1104_v53  ;;  %v1109_v8 = vor.u32 %v1108_v46, %v1107_v47  ;;  %v1115_v43 = vor.u32 %v1114_v2, %v1113_v23  ;;  %v1116_v12 = vshll.u32 %v8907_v58, %v1104_v53 }
 0x1a7   :  { %v1259_v34 = vsub.s32 0, %v7015_v3  ;;  %v1117_v0 = vshrl.u32 %v8908_v55, %v1105_v44  ;;  %v1119_v5 = vshll.u32 %v8908_v55, %v1104_v53  ;;  %v1120_v9 = vshrl.u32 %v8909_v21, %v1105_v44 }
 0x1a8   :  { %v1112_v29 = vor.u32 %v1111_v1, %v1110_v60  ;;  %v7028_v11 = vshll.u32 %v1098_v41, 8  ;;  %v5283_v57 = vadd.s32 4294967169, %v1403_v59  ;;  %v8921_v13 = vand.u32 2147483647, %v6509_v14  ;;  %v7034_v46 = vpop.eup %6037 }
 0x1a9   :  { %v5276_v52 = vmin.u32 %v1259_v34, %v7015_v3  ;;  %v966_v2 = vcvt.s32.f32 %v959_v63  ;;  %v1118_v47 = vor.u32 %v1117_v0, %v1116_v12  ;;  %v1121_v1 = vor.u32 %v1120_v9, %v1119_v5 }
 0x1aa   :  { %v7032_v33 = vand.u32 8388607, %v8921_v13  ;;  %vm1125_vm10 = vcmp.lt.s32.totalorder %v1103_v26, 4  ;;  %vm1195_vm13 = vcmp.lt.s32.totalorder %v6394_v7, 0  ;;  %v1106_v23 = vshrl.u32 %v8899_v19, %v1105_v44 }
 0x1ab   :  { %v1261_v53 = vclz %v5276_v52  ;;  %vm1122_vm14 = vcmp.lt.s32.totalorder %v1103_v26, 1  ;;  %v1127_v41 = vsel %vm1125_vm10, %v1115_v43, 2102212464  ;;  %v967_v60 = vmul.f32 %v966_v2, %v964_v37 }
 0x1ac   :  { %vm1124_vm5 = vcmp.lt.s32.totalorder %v1103_v26, 3  ;;  %v1130_v59 = vsel %vm1122_vm14, %v1109_v8, %v1112_v29  ;;  %v1131_v34 = vsel %vm1125_vm10, %v1118_v47, 920167782  ;;  %vm1123_vm2 = vcmp.lt.s32.totalorder %v1103_v26, 2 }
 0x1ad   :  { %v5277_v13 = vadd.s32 4294967294, %v1261_v53  ;;  %v1126_v49 = vsel %vm1122_vm14, %v1106_v23, %v1109_v8  ;;  %v1132_v63 = vsel %vm1124_vm5, %v1115_v43, %v1131_v34  ;;  %v8922_v12 = vand.u32 2147483647, %v6394_v7 }
 0x1ae   :  { %v1128_v0 = vsel %vm1124_vm5, %v1112_v29, %v1127_v41  ;;  %v1133_v44 = vsel %vm1123_vm2, %v1130_v59, %v1132_v63  ;;  %v1134_v9 = vsel %vm1122_vm14, %v1112_v29, %v1115_v43  ;;  %v1135_v37 = vsel %vm1125_vm10, %v1121_v1, 1326507024 }
 0x1af   :  { %vm7042_vm4 = vcmp.le.f32.partialorder %v8922_v12, 0.7853982  ;;  %vm5278_vm15 = vcmp.lt.s32.totalorder %v5277_v13, 0  ;;  %v1136_v52 = vsel %vm1124_vm5, %v1118_v47, %v1135_v37  ;;  %v1279_v23 = vsub.s32 4, %v6994_v16 }
 0x1b0   :  { %v7049_v2 = vmul.u32.u64.low %v7028_v11, %v1133_v44  ;;  %v7050_v53 = vmul.u32.u64.high %v7028_v11, %v1133_v44, %v7049_v2  ;;  %v1264_v8 = vsel %vm5278_vm15, 0, %v5277_v13  ;;  %v1137_v34 = vsel %vm1123_vm2, %v1134_v9, %v1136_v52 }
 0x1b1   :  { %v1409_v12 = vadd.s32 1, %v5283_v57  ;;  %v968_v28 = vxor.u32 2147483648, %v967_v60  ;;  %v1265_v41 = vsub.s32 32, %v1264_v8  ;;  %v1269_v36 = vsub.s32 4294967266, %v1264_v8 }
 0x1b2   :  { %v1129_v43 = vsel %vm1123_vm2, %v1126_v49, %v1128_v0  ;;  %v1266_v29 = vshll.u32 %v7015_v3, %v1264_v8  ;;  %v7058_v47 = vmul.u32.u64.low %v7028_v11, %v1137_v34  ;;  %v7059_v1 = vmul.u32.u64.high %v7028_v11, %v1137_v34, %v7058_v47 }
 0x1b3   :  { %vm1410_vm11 = vcmp.gt.s32.totalorder %v1409_v12, 0  ;;  %v1267_v59 = vshrl.u32 %v7008_v10, %v1265_v41  ;;  %v1270_v13 = vadd.s32 127, %v1269_v36  ;;  %v1148_v63 = vadd.s32 1, %v7050_v53 }
 0x1b4   :  { %v1411_v44 = vsel %vm1410_vm11, %v1409_v12, 0  ;;  %6039 = vcosq.f32 %v7002_v25  ;;  %v7065_v57 = vand.u32 3, %v6992_v24  ;;  %v1280_v49 = vsel %vm1195_vm13, %v1279_v23, %v6994_v16 }
 0x1b5   :  { %v1413_v3 = vand.u32 31, %v1411_v44  ;;  %6041 = vsinq.f32 %v7002_v25  ;;  %v1268_v26 = vor.u32 %v1267_v59, %v1266_v29  ;;  %v1271_v0 = vshll.u32 %v1270_v13, 23 }
 0x1b6   :  { %8925 = vst [vmem:[#allocation23_spill] sm:$0xff] %v7065_v57  ;;  %v1145_v36 = vmul.u32 %v7028_v11, %v1129_v43  ;;  %vm1147_vm12 = vc.u32 %v7059_v1, %v7049_v2  ;;  %v1407_v9 = vor.u32 8388608, %v7032_v33  ;;  %v969_v37 = vsel %vm886_vm6, %v968_v28, %v967_v60 }
 0x1b7   :  { %v1414_v24 = vsub.s32 32, %v1413_v3  ;;  %v1272_v52 = vor.u32 4788187, %v1271_v0  ;;  %v1282_v16 = vsel %vm7042_vm4, 0, %v1280_v49  ;;  %v1149_v25 = vsel %vm1147_vm12, %v1148_v63, %v7050_v53 }
 0x1b8   :  { %v1150_v8 = vadd.s32 %v1149_v25, %v1145_v36  ;;  %v7081_v23 = vshrl.u32 %v1411_v44, 5  ;;  %v1275_v41 = vcvt.s32.f32 %v1268_v26  ;;  %v1416_v33 = vshll.u32 %v8899_v19, %v1413_v3 }
 0x1b9   :  { %v1417_v11 = vshrl.u32 %v8905_v32, %v1414_v24  ;;  %v1420_v34 = vshrl.u32 %v8906_v56, %v1414_v24  ;;  %v1273_v12 = vand.u32 2147483647, %v1272_v52  ;;  %v1423_v43 = vshrl.u32 %v8907_v58, %v1414_v24 }
 0x1ba   :  { %v1151_v28 = vadd.s32 536870912, %v1150_v8  ;;  %v1419_v60 = vshll.u32 %v8905_v32, %v1413_v3  ;;  %v1425_v29 = vshll.u32 %v8907_v58, %v1413_v3  ;;  %v1426_v53 = vshrl.u32 %v8908_v55, %v1414_v24 }
 0x1bb   :  { %v972_v47 = vsel %vm6943_vm8, %v6347_v54, %v969_v37  ;;  %v1276_v59 = vmul.f32 %v1275_v41, %v1273_v12  ;;  %v1422_v13 = vshll.u32 %v8906_v56, %v1413_v3  ;;  %v1429_v63 = vshrl.u32 %v8909_v21, %v1414_v24 }
 0x1bc   :  { %v1152_v44 = vshrl.u32 %v1151_v28, 30  ;;  %v1418_v49 = vor.u32 %v1417_v11, %v1416_v33  ;;  %v1421_v26 = vor.u32 %v1420_v34, %v1419_v60  ;;  %v1427_v0 = vor.u32 %v1426_v53, %v1425_v29 }
 0x1bd   :  { %v1277_v36 = vxor.u32 2147483648, %v1276_v59  ;;  %v7095_v52 = vand.u32 3, %v1282_v16  ;;  %vm1092_vm6 = vcmp.lt.s32.totalorder %v6441_v15, 0  ;;  %v1424_v25 = vor.u32 %v1423_v43, %v1422_v13 }
 0x1be   :  { %v1428_v10 = vshll.u32 %v8908_v55, %v1413_v3  ;;  %v7099_v57 = vpop.eup %6039  ;;  %6043 = vcosq.f32 %v972_v47  ;;  %v2943_v27 = vadd.s32 3, %v1282_v16  ;;  %v1153_v37 = vshll.u32 %v1152_v44, 30 }
 0x1bf   :  { %8926 = vst [vmem:[#allocation24_spill] sm:$0xff] %v7095_v52  ;;  %8927 = vst [vmem:[#allocation25_spill] sm:$0xff] %v7099_v57  ;;  %vm1434_vm8 = vcmp.lt.s32.totalorder %v7081_v23, 4  ;;  %v7102_v12 = vpop.eup %6041  ;;  %vm1431_vm3 = vcmp.lt.s32.totalorder %v7081_v23, 1  ;;  %v1299_v41 = vand.u32 2139095040, %v6578_v45  ;;  %vm1433_vm14 = vcmp.lt.s32.totalorder %v7081_v23, 3 }
 0x1c0   :  { %8928 = vst [vmem:[#allocation26_spill] sm:$0xff] %v7102_v12  ;;  %v1430_v11 = vor.u32 %v1429_v63, %v1428_v10  ;;  %v1440_v34 = vsel %vm1434_vm8, %v1427_v0, 920167782  ;;  %v8929_v33 = vand.u32 2147483647, %v6441_v15  ;;  %v7114_v16 = vsub.s32 %v1150_v8, %v1153_v37 }
 0x1c1   :  { %v1439_v10 = vsel %vm1431_vm3, %v1418_v49, %v1421_v26  ;;  %v1447_v43 = vshll.u32 %v1407_v9, 8  ;;  %v1278_v28 = vsel %vm1195_vm13, %v1277_v36, %v1276_v59  ;;  %v1415_v60 = vshrl.u32 %v8899_v19, %v1414_v24 }
 0x1c2   :  { %vm7110_vm10 = vcmp.le.f32.partialorder %v8929_v33, 0.7853982  ;;  %v1436_v29 = vsel %vm1434_vm8, %v1424_v25, 2102212464  ;;  %v1441_v53 = vsel %vm1433_vm14, %v1424_v25, %v1440_v34  ;;  %v1156_v8 = vsub.s32 0, %v7114_v16 }
 0x1c3   :  { %v1176_v13 = vsub.s32 4, %v1152_v44  ;;  %vm1432_vm5 = vcmp.lt.s32.totalorder %v7081_v23, 2  ;;  %v1443_v63 = vsel %vm1431_vm3, %v1421_v26, %v1424_v25  ;;  %v1435_v9 = vsel %vm1431_vm3, %v1415_v60, %v1418_v49 }
 0x1c4   :  { %v1442_v24 = vsel %vm1432_vm5, %v1439_v10, %v1441_v53  ;;  %v1444_v59 = vsel %vm1434_vm8, %v1430_v11, 1326507024  ;;  %v1300_v36 = vshrl.u32 %v1299_v41, 23  ;;  %v1281_v37 = vsel %vm7042_vm4, %v6394_v7, %v1278_v28 }
 0x1c5   :  { %v5272_v34 = vmin.u32 %v1156_v8, %v7114_v16  ;;  %v1437_v33 = vsel %vm1433_vm14, %v1421_v26, %v1436_v29  ;;  %v1445_v25 = vsel %vm1433_vm14, %v1427_v0, %v1444_v59  ;;  %v1177_v5 = vsel %vm1092_vm6, %v1176_v13, %v1152_v44 }
 0x1c6   :  { %v1446_v49 = vsel %vm1432_vm5, %v1443_v63, %v1445_v25  ;;  %v7146_v10 = vmul.u32.u64.low %v1447_v43, %v1442_v24  ;;  %v7147_v60 = vmul.u32.u64.high %v1447_v43, %v1442_v24, %v7146_v10  ;;  %v5279_v11 = vadd.s32 4294967169, %v1300_v36 }
 0x1c7   :  { %v1158_v41 = vclz %v5272_v34  ;;  %v7152_v28 = vmul.u32.u64.low %v1447_v43, %v1446_v49  ;;  %v7153_v53 = vmul.u32.u64.high %v1447_v43, %v1446_v49, %v7152_v28  ;;  %6045 = vsinq.f32 %v972_v47 }
 0x1c8   :  { %v7155_v26 = vand.u32 3, %v2943_v27  ;;  %v1438_v0 = vsel %vm1432_vm5, %v1435_v9, %v1437_v33  ;;  %v1306_v29 = vadd.s32 1, %v5279_v11  ;;  %v7159_v8 = vpop.eup %6043  ;;  %v1146_v63 = vadd.s32 %v7049_v2, %v7059_v1 }
 0x1c9   :  { %8933 = vst [vmem:[#allocation28_spill] sm:$0xff] %v7159_v8  ;;  %v5273_v24 = vadd.s32 4294967294, %v1158_v41  ;;  %v8934_v59 = vand.u32 2147483647, %v6578_v45  ;;  %6047 = vcosq.f32 %v1281_v37  ;;  %v1179_v47 = vsel %vm7110_vm10, 0, %v1177_v5 }
 0x1ca   :  { %8932 = vst [vmem:[#allocation27_spill] sm:$0xff] %v7155_v26  ;;  %v1457_v27 = vadd.s32 1, %v7147_v60  ;;  %vm1307_vm13 = vcmp.gt.s32.totalorder %v1306_v29, 0  ;;  %v1454_v23 = vmul.u32 %v1447_v43, %v1438_v0  ;;  %vm1456_vm4 = vc.u32 %v7153_v53, %v7146_v10 }
 0x1cb   :  { %v1303_v36 = vand.u32 8388607, %v8934_v59  ;;  %vm5274_vm2 = vcmp.lt.s32.totalorder %v5273_v24, 0  ;;  %v1308_v13 = vsel %vm1307_vm13, %v1306_v29, 0  ;;  %6049 = vsinq.f32 %v1281_v37 }
 0x1cc   :  { %v1161_v2 = vsel %vm5274_vm2, 0, %v5273_v24  ;;  %v1458_v1 = vsel %vm1456_vm4, %v1457_v27, %v7147_v60  ;;  %v1310_v9 = vand.u32 31, %v1308_v13  ;;  %v7172_v25 = vand.u32 3, %v1179_v47 }
 0x1cd   :  { %v1162_v34 = vsub.s32 32, %v1161_v2  ;;  %v1166_v33 = vsub.s32 4294967266, %v1161_v2  ;;  %v1459_v49 = vadd.s32 %v1458_v1, %v1454_v23  ;;  %v1163_v11 = vshll.u32 %v7114_v16, %v1161_v2 }
 0x1ce   :  { %8935 = vst [vmem:[#allocation29_spill] sm:$0xff] %v7172_v25  ;;  %v7175_v41 = vadd.s32 3, %v1179_v47  ;;  %v1304_v5 = vor.u32 8388608, %v1303_v36  ;;  %v1311_v43 = vsub.s32 32, %v1310_v9  ;;  %vm1401_vm15 = vcmp.lt.s32.totalorder %v6509_v14, 0 }
 0x1cf   :  { %v1164_v28 = vshrl.u32 %v1146_v63, %v1162_v34  ;;  %v1167_v0 = vadd.s32 127, %v1166_v33  ;;  %v1460_v37 = vadd.s32 536870912, %v1459_v49  ;;  %v1313_v29 = vshll.u32 %v8899_v19, %v1310_v9 }
 0x1d0   :  { %v1314_v60 = vshrl.u32 %v8905_v32, %v1311_v43  ;;  %v1316_v24 = vshll.u32 %v8905_v32, %v1310_v9  ;;  %v1317_v59 = vshrl.u32 %v8906_v56, %v1311_v43  ;;  %v1320_v27 = vshrl.u32 %v8907_v58, %v1311_v43 }
 0x1d1   :  { %v1165_v16 = vor.u32 %v1164_v28, %v1163_v11  ;;  %v1168_v47 = vshll.u32 %v1167_v0, 23  ;;  %v1461_v23 = vshrl.u32 %v1460_v37, 30  ;;  %v1323_v36 = vshrl.u32 %v8908_v55, %v1311_v43  ;;  %v7184_v63 = vpop.eup %6045 }
 0x1d2   :  { %8936 = vst [vmem:[#allocation30_spill] sm:$0xff] %v7184_v63  ;;  %v7186_v2 = vshrl.u32 %v1308_v13, 5  ;;  %v1319_v1 = vshll.u32 %v8906_v56, %v1310_v9  ;;  %v1322_v34 = vshll.u32 %v8907_v58, %v1310_v9  ;;  %v1608_v33 = vand.u32 2139095040, %v6678_v6 }
 0x1d3   :  { %v1169_v44 = vor.u32 4788187, %v1168_v47  ;;  %v1462_v52 = vshll.u32 %v1461_v23, 30  ;;  %v1315_v25 = vor.u32 %v1314_v60, %v1313_v29  ;;  %v1318_v26 = vor.u32 %v1317_v59, %v1316_v24  ;;  %v7191_v7 = vpop.eup %6047 }
 0x1d4   :  { %8937 = vst [vmem:[#allocation31_spill] sm:$0xff] %v7191_v7  ;;  %v8938_v11 = vand.u32 2147483647, %v6509_v14  ;;  %v1485_v13 = vsub.s32 4, %v1461_v23  ;;  %v1324_v0 = vor.u32 %v1323_v36, %v1322_v34  ;;  %v1325_v37 = vshll.u32 %v8908_v55, %v1310_v9 }
 0x1d5   :  { %v1326_v57 = vshrl.u32 %v8909_v21, %v1311_v43  ;;  %v1170_v12 = vand.u32 2147483647, %v1169_v44  ;;  %v1172_v8 = vcvt.s32.f32 %v1165_v16  ;;  %v7201_v47 = vsub.s32 %v1459_v49, %v1462_v52  ;;  %v7203_v60 = vpop.eup %6049  ;;  %v6003_v16 = vld [vmem:[%s8769_s3] sm:$0xff]  }
 0x1d6   :  { %vm7195_vm11 = vcmp.le.f32.partialorder %v8938_v11, 0.7853982  ;;  %v1321_v29 = vor.u32 %v1320_v27, %v1319_v1  ;;  %8941 = vst [vmem:[#allocation32_spill] sm:$0xff] %v7203_v60  ;;  %v1312_v24 = vshrl.u32 %v8899_v19, %v1311_v43  ;;  %v1344_v11 = vshll.u32 %v1304_v5, 8  ;;  %5627 = vmatprep.subr.bf16.mxu1 %v6003_v16 }
 0x1d7   :  { %v1327_v59 = vor.u32 %v1326_v57, %v1325_v37  ;;  %v1609_v7 = vshrl.u32 %v1608_v33, 23  ;;  %v1173_v63 = vmul.f32 %v1172_v8, %v1170_v12  ;;  %v1465_v48 = vsub.s32 0, %v7201_v47  ;;  %5628 = vmatpush3.bf16.msra.mxu1 %v6003_v16 }
 0x1d8   :  { %vm1328_vm12 = vcmp.lt.s32.totalorder %v7186_v2, 1  ;;  %vm1331_vm8 = vcmp.lt.s32.totalorder %v7186_v2, 4  ;;  %v1486_v44 = vsel %vm1401_vm15, %v1485_v13, %v1461_v23  ;;  %vm1329_vm3 = vcmp.lt.s32.totalorder %v7186_v2, 2 }
 0x1d9   :  { %v1336_v52 = vsel %vm1328_vm12, %v1315_v25, %v1318_v26  ;;  %v1337_v9 = vsel %vm1331_vm8, %v1324_v0, 920167782  ;;  %v5284_v49 = vmin.u32 %v1465_v48, %v7201_v47  ;;  %vm1330_vm14 = vcmp.lt.s32.totalorder %v7186_v2, 3 }
 0x1da   :  { %v1333_v57 = vsel %vm1331_vm8, %v1321_v29, 2102212464  ;;  %v1340_v5 = vsel %vm1328_vm12, %v1318_v26, %v1321_v29  ;;  %v1332_v12 = vsel %vm1328_vm12, %v1312_v24, %v1315_v25  ;;  %v1338_v8 = vsel %vm1330_vm14, %v1321_v29, %v1337_v9 }
 0x1db   :  { %v1341_v43 = vsel %vm1331_vm8, %v1327_v59, 1326507024  ;;  %v5291_v27 = vadd.s32 4294967169, %v1609_v7  ;;  %v1174_v36 = vxor.u32 2147483648, %v1173_v63  ;;  %v1467_v23 = vclz %v5284_v49 }
 0x1dc   :  { %v1339_v1 = vsel %vm1329_vm3, %v1336_v52, %v1338_v8  ;;  %v1342_v34 = vsel %vm1330_vm14, %v1324_v0, %v1341_v43  ;;  %v1334_v33 = vsel %vm1330_vm14, %v1318_v26, %v1333_v57  ;;  %v1488_v25 = vsel %vm7195_vm11, 0, %v1486_v44 }
 0x1dd   :  { %v1343_v48 = vsel %vm1329_vm3, %v1340_v5, %v1342_v34  ;;  %v7221_v13 = vmul.u32.u64.low %v1344_v11, %v1339_v1  ;;  %v7222_v37 = vmul.u32.u64.high %v1344_v11, %v1339_v1, %v7221_v13  ;;  %v5285_v7 = vadd.s32 4294967294, %v1467_v23 }
 0x1de   :  { %v7227_v29 = vmul.u32.u64.low %v1344_v11, %v1343_v48  ;;  %v7228_v24 = vmul.u32.u64.high %v1344_v11, %v1343_v48, %v7227_v29  ;;  %v7231_v59 = vand.u32 3, %v7175_v41  ;;  %v8943_v26 = vand.u32 2147483647, %v6678_v6 }
 0x1df   :  { %v1615_v52 = vadd.s32 1, %v5291_v27  ;;  %v8840_v9 = vand.u32 2147483647, %v6775_v18  ;;  %v1175_v49 = vsel %vm1092_vm6, %v1174_v36, %v1173_v63  ;;  %v1455_v44 = vadd.s32 %v7146_v10, %v7153_v53 }
 0x1e0   :  { %8942 = vst [vmem:[#allocation33_spill] sm:$0xff] %v7231_v59  ;;  %v7235_v0 = vand.u32 8388607, %v8943_v26  ;;  %vm5286_vm5 = vcmp.lt.s32.totalorder %v5285_v7, 0  ;;  %v1335_v57 = vsel %vm1329_vm3, %v1332_v12, %v1334_v33  ;;  %v7244_v41 = vand.u32 3, %v1488_v25 }
 0x1e1   :  { %v1470_v5 = vsel %vm5286_vm5, 0, %v5285_v7  ;;  %v1354_v8 = vadd.s32 1, %v7222_v37  ;;  %vm1616_vm13 = vcmp.gt.s32.totalorder %v1615_v52, 0  ;;  %v7247_v16 = vadd.s32 3, %v1488_v25 }
 0x1e2   :  { %8944 = vst [vmem:[#allocation34_spill] sm:$0xff] %v7244_v41  ;;  %v1471_v43 = vsub.s32 32, %v1470_v5  ;;  %v1475_v27 = vsub.s32 4294967266, %v1470_v5  ;;  %v1505_v23 = vand.u32 2139095040, %v6775_v18  ;;  %v7253_v10 = vsel %vm7110_vm10, %v6441_v15, %v1175_v49  ;;  %v3853_v49 = vld [vmem:[%s8771_s4] sm:$0xf] }
 0x1e3   :  { %v1351_v53 = vmul.u32 %v1344_v11, %v1335_v57  ;;  %vm1353_vm6 = vc.u32 %v7228_v24, %v7221_v13  ;;  %v1617_v63 = vsel %vm1616_vm13, %v1615_v52, 0  ;;  %v1472_v2 = vshll.u32 %v7201_v47, %v1470_v5  ;;  %5663 = vmatprep.subr.msk.mxu0 %vm117_vm0, %v3853_v49 }
 0x1e4   :  { %v1473_v12 = vshrl.u32 %v1455_v44, %v1471_v43  ;;  %v1476_v36 = vadd.s32 127, %v1475_v27  ;;  %vm1298_vm2 = vcmp.lt.s32.totalorder %v6578_v45, 0  ;;  %v1355_v1 = vsel %vm1353_vm6, %v1354_v8, %v7222_v37  ;;  %v7276_v37 = vld [vmem:[%s8770_s2] sm:$0xff]   ;;  %5664 = vmatpush3.msk.msra.mxu0 %vm117_vm0, %v3853_v49  ;;  %v6144_v49 = vld [vmem:[%s8768_s0 + $0x10] sm:$0xff] }
 0x1e5   :  { %v1356_v34 = vadd.s32 %v1355_v1, %v1351_v53  ;;  %v1613_v33 = vor.u32 8388608, %v7235_v0  ;;  %v1619_v48 = vand.u32 31, %v1617_v63  ;;  %v7263_v3 = vand.u32 8388607, %v8840_v9  ;;  %5645 = vmatprep.subr.bf16.mxu1 %v7276_v37  ;;  %v6143_v1 = vld [vmem:[%s8768_s0 + $0x8] sm:$0xff] }
 0x1e6   :  { %v1474_v11 = vor.u32 %v1473_v12, %v1472_v2  ;;  %v1477_v7 = vshll.u32 %v1476_v36, 23  ;;  %v8945_v25 = vand.u32 2147483647, %v6578_v45  ;;  %v7271_v29 = vshrl.u32 %v1617_v63, 5  ;;  %5666 = vmatmul.mubr.msk.f32.vlgmr.msra.gmra.mrb[16].mxu0 %vm68_vm1, %v6143_v1 }
 0x1e7   :  { %v1506_v26 = vshrl.u32 %v1505_v23, 23  ;;  %6051 = vcosq.f32 %v7253_v10  ;;  %v1357_v0 = vadd.s32 536870912, %v1356_v34  ;;  %v1620_v52 = vsub.s32 32, %v1619_v48  ;;  %5668 = vmatprep.mubr.msk.f32.mxu0 %vm68_vm1, %v6144_v49 }
 0x1e8   :  { %vm7267_vm10 = vcmp.le.f32.partialorder %v8945_v25, 0.7853982  ;;  %v1478_v44 = vor.u32 4788187, %v1477_v7  ;;  %v1481_v57 = vcvt.s32.f32 %v1474_v11  ;;  %v1622_v5 = vshll.u32 %v8899_v19, %v1619_v48 }
 0x1e9   :  { %v1625_v8 = vshll.u32 %v8905_v32, %v1619_v48  ;;  %v1358_v43 = vshrl.u32 %v1357_v0, 30  ;;  %v1623_v27 = vshrl.u32 %v8905_v32, %v1620_v52  ;;  %v1626_v23 = vshrl.u32 %v8906_v56, %v1620_v52 }
 0x1ea   :  { %v1628_v53 = vshll.u32 %v8906_v56, %v1619_v48  ;;  %v1479_v63 = vand.u32 2147483647, %v1478_v44  ;;  %v1629_v2 = vshrl.u32 %v8907_v58, %v1620_v52  ;;  %v1631_v12 = vshll.u32 %v8907_v58, %v1619_v48 }
 0x1eb   :  { %v1632_v36 = vshrl.u32 %v8908_v55, %v1620_v52  ;;  %v1359_v11 = vshll.u32 %v1358_v43, 30  ;;  %v1382_v7 = vsub.s32 4, %v1358_v43  ;;  %v1624_v25 = vor.u32 %v1623_v27, %v1622_v5 }
 0x1ec   :  { %v1634_v0 = vshll.u32 %v8908_v55, %v1619_v48  ;;  %v1482_v44 = vmul.f32 %v1481_v57, %v1479_v63  ;;  %v1627_v9 = vor.u32 %v1626_v23, %v1625_v8  ;;  %v1635_v59 = vshrl.u32 %v8909_v21, %v1620_v52  ;;  %v6145_v57 = vld [vmem:[%s8768_s0 + $0x18] sm:$0xff] }
 0x1ed   :  { %v1633_v41 = vor.u32 %v1632_v36, %v1631_v12  ;;  %v7303_v60 = vsub.s32 %v1356_v34, %v1359_v11  ;;  %v1383_v1 = vsel %vm1298_vm2, %v1382_v7, %v1358_v43  ;;  %v1630_v15 = vor.u32 %v1629_v2, %v1628_v53  ;;  %5669 = vmatmul.mubr.msk.f32.gmra.mrb[18].mxu0 %vm68_vm1, %v6145_v57  ;;  %v6148_v57 = vld [vmem:[%s8768_s0 + $0x30] sm:$0xff] }
 0x1ee   :  { %v7307_v5 = vshll.u32 %v1613_v33, 8  ;;  %v1621_v48 = vshrl.u32 %v8899_v19, %v1620_v52  ;;  %v1636_v27 = vor.u32 %v1635_v59, %v1634_v0  ;;  %vm1637_vm0 = vcmp.lt.s32.totalorder %v7271_v29, 1  ;;  %v6146_v59 = vld [vmem:[%s8768_s0 + $0x20] sm:$0xff] }
 0x1ef   :  { %v1510_v49 = vor.u32 8388608, %v7263_v3  ;;  %v1483_v34 = vxor.u32 2147483648, %v1482_v44  ;;  %v1362_v8 = vsub.s32 0, %v7303_v60  ;;  %v1385_v33 = vsel %vm7267_vm10, 0, %v1383_v1  ;;  %5671 = vmatprep.mubr.msk.f32.mxu0 %vm68_vm1, %v6146_v59 }
 0x1f0   :  { %vm1640_vm4 = vcmp.lt.s32.totalorder %v7271_v29, 4  ;;  %vm1638_vm12 = vcmp.lt.s32.totalorder %v7271_v29, 2  ;;  %v1645_v3 = vsel %vm1637_vm0, %v1624_v25, %v1627_v9  ;;  %v5287_v43 = vadd.s32 4294967169, %v1506_v26  ;;  %v6147_v26 = vld [vmem:[%s8768_s0 + $0x28] sm:$0xff] }
 0x1f1   :  { %v1646_v52 = vsel %vm1640_vm4, %v1633_v41, 920167782  ;;  %v7327_v23 = vpop.eup %6051  ;;  %v5280_v53 = vmin.u32 %v1362_v8, %v7303_v60  ;;  %vm1639_vm8 = vcmp.lt.s32.totalorder %v7271_v29, 3  ;;  %v1641_v63 = vsel %vm1637_vm0, %v1621_v48, %v1624_v25  ;;  %5672 = vmatmul.mubr.msk.f32.gmra.mrb[20].mxu0 %vm68_vm1, %v6147_v26 }
 0x1f2   :  { %v1642_v2 = vsel %vm1640_vm4, %v1630_v15, 2102212464  ;;  %v3047_v12 = vadd.s32 3, %v1385_v33  ;;  %v1647_v36 = vsel %vm1639_vm8, %v1630_v15, %v1646_v52  ;;  %v1649_v11 = vsel %vm1637_vm0, %v1627_v9, %v1630_v15  ;;  %5674 = vmatprep.mubr.msk.f32.mxu0 %vm68_vm1, %v6148_v57 }
 0x1f3   :  { %v1650_v7 = vsel %vm1640_vm4, %v1636_v27, 1326507024  ;;  %v1484_v0 = vsel %vm1401_vm15, %v1483_v34, %v1482_v44  ;;  %v1364_v1 = vclz %v5280_v53  ;;  %v1648_v25 = vsel %vm1638_vm12, %v1645_v3, %v1647_v36 }
 0x1f4   :  { %v1651_v48 = vsel %vm1639_vm8, %v1633_v41, %v1650_v7  ;;  %v1643_v15 = vsel %vm1639_vm8, %v1627_v9, %v1642_v2  ;;  %v7350_v8 = vmul.u32.u64.low %v7307_v5, %v1648_v25  ;;  %v7351_v59 = vmul.u32.u64.high %v7307_v5, %v1648_v25, %v7350_v8  ;;  %v6149_v2 = vld [vmem:[%s8768_s0 + $0x38] sm:$0xff] }
 0x1f5   :  { %v1652_v27 = vsel %vm1638_vm12, %v1649_v11, %v1651_v48  ;;  %v5281_v44 = vadd.s32 4294967294, %v1364_v1  ;;  %v1512_v41 = vadd.s32 1, %v5287_v43  ;;  %6053 = vsinq.f32 %v7253_v10  ;;  %5675 = vmatmul.mubr.msk.f32.gmra.mrb[22].mxu0 %vm68_vm1, %v6149_v2 }
 0x1f6   :  { %v7355_v34 = vmul.u32.u64.low %v7307_v5, %v1652_v27  ;;  %v7356_v3 = vmul.u32.u64.high %v7307_v5, %v1652_v27, %v7355_v34  ;;  %v7362_v9 = vsel %vm7195_vm11, %v6509_v14, %v1484_v0  ;;  %v7365_v52 = vand.u32 3, %v7247_v16  ;;  %v6150_v16 = vld [vmem:[%s8768_s0 + $0x40] sm:$0xff] }
 0x1f7   :  { %v1352_v53 = vadd.s32 %v7221_v13, %v7228_v24  ;;  %vm5282_vm15 = vcmp.lt.s32.totalorder %v5281_v44, 0  ;;  %v1644_v10 = vsel %vm1638_vm12, %v1641_v63, %v1643_v15  ;;  %vm1513_vm3 = vcmp.gt.s32.totalorder %v1512_v41, 0  ;;  %5677 = vmatprep.mubr.msk.f32.mxu0 %vm68_vm1, %v6150_v16 }
 0x1f8   :  { %8948 = vst [vmem:[#allocation35_spill] sm:$0xff] %v7365_v52  ;;  %v7375_v28 = vshll.u32 %v1510_v49, 8  ;;  %v1367_v13 = vsel %vm5282_vm15, 0, %v5281_v44  ;;  %v7381_v24 = vand.u32 3, %v1385_v33  ;;  %v1663_v43 = vadd.s32 1, %v7351_v59  ;;  %v6151_v33 = vld [vmem:[%s8768_s0 + $0x48] sm:$0xff] }
 0x1f9   :  { %v1514_v36 = vsel %vm1513_vm3, %v1512_v41, 0  ;;  %6055 = vcosq.f32 %v7362_v9  ;;  %v1368_v11 = vsub.s32 32, %v1367_v13  ;;  %v1372_v29 = vsub.s32 4294967266, %v1367_v13  ;;  %5678 = vmatmul.mubr.msk.f32.gmra.mrb[24].mxu0 %vm68_vm1, %v6151_v33  ;;  %v6154_v33 = vld [vmem:[%s8768_s0 + $0x60] sm:$0xff] }
 0x1fa   :  { %8949 = vst [vmem:[#allocation36_spill] sm:$0xff] %v7381_v24  ;;  %v7385_v63 = vand.u32 3, %v3047_v12  ;;  %v1660_v49 = vmul.u32 %v7307_v5, %v1644_v10  ;;  %vm1662_vm11 = vc.u32 %v7356_v3, %v7350_v8  ;;  %v1516_v7 = vand.u32 31, %v1514_v36  ;;  %v6152_v12 = vld [vmem:[%s8768_s0 + $0x50] sm:$0xff] }
 0x1fb   :  { %v1369_v0 = vshll.u32 %v7303_v60, %v1367_v13  ;;  %v1370_v1 = vshrl.u32 %v1352_v53, %v1368_v11  ;;  %v1373_v25 = vadd.s32 127, %v1372_v29  ;;  %vm1607_vm14 = vcmp.lt.s32.totalorder %v6678_v6, 0  ;;  %5680 = vmatprep.mubr.msk.f32.mxu0 %vm68_vm1, %v6152_v12 }
 0x1fc   :  { %8950 = vst [vmem:[#allocation37_spill] sm:$0xff] %v7385_v63  ;;  %v1664_v5 = vsel %vm1662_vm11, %v1663_v43, %v7351_v59  ;;  %v1517_v57 = vsub.s32 32, %v1516_v7  ;;  %v1814_v15 = vand.u32 2139095040, %v6853_v50  ;;  %v8951_v34 = vand.u32 2147483647, %v6678_v6  ;;  %v6153_v43 = vld [vmem:[%s8768_s0 + $0x58] sm:$0xff] }
 0x1fd   :  { %v1665_v48 = vadd.s32 %v1664_v5, %v1660_v49  ;;  %v1371_v44 = vor.u32 %v1370_v1, %v1369_v0  ;;  %v1374_v60 = vshll.u32 %v1373_v25, 23  ;;  %v7410_v59 = vshrl.u32 %v1514_v36, 5  ;;  %5681 = vmatmul.mubr.msk.f32.gmra.mrb[26].mxu0 %vm68_vm1, %v6153_v43 }
 0x1fe   :  { %vm7406_vm5 = vcmp.le.f32.partialorder %v8951_v34, 0.7853982  ;;  %v1519_v53 = vshll.u32 %v8899_v19, %v1516_v7  ;;  %v1520_v10 = vshrl.u32 %v8905_v32, %v1517_v57  ;;  %v1522_v16 = vshll.u32 %v8905_v32, %v1516_v7  ;;  %5683 = vmatprep.mubr.msk.f32.mxu0 %vm68_vm1, %v6154_v33  ;;  %v6155_v33 = vld [vmem:[%s8768_s0 + $0x68] sm:$0xff] }
 0x1ff   :  { %v1666_v2 = vadd.s32 536870912, %v1665_v48  ;;  %v1523_v13 = vshrl.u32 %v8906_v56, %v1517_v57  ;;  %v1375_v11 = vor.u32 4788187, %v1374_v60  ;;  %v1525_v29 = vshll.u32 %v8906_v56, %v1516_v7  ;;  %v7427_v0 = vpop.eup %6053 }
 0x200   :  { %v1526_v36 = vshrl.u32 %v8907_v58, %v1517_v57  ;;  %v1529_v49 = vshrl.u32 %v8908_v55, %v1517_v57  ;;  %v1378_v1 = vcvt.s32.f32 %v1371_v44  ;;  %v1521_v5 = vor.u32 %v1520_v10, %v1519_v53 }
 0x201   :  { %v1667_v25 = vshrl.u32 %v1666_v2, 30  ;;  %v1528_v12 = vshll.u32 %v8907_v58, %v1516_v7  ;;  %v1376_v60 = vand.u32 2147483647, %v1375_v11  ;;  %v1531_v43 = vshll.u32 %v8908_v55, %v1516_v7  ;;  %5684 = vmatmul.mubr.msk.f32.gmra.mrb[28].mxu0 %vm68_vm1, %v6155_v33  ;;  %v6156_v7 = vld [vmem:[%s8768_s0 + $0x70] sm:$0xff] }
 0x202   :  { %v1527_v34 = vor.u32 %v1526_v36, %v1525_v29  ;;  %v1532_v27 = vshrl.u32 %v8909_v21, %v1517_v57  ;;  %v1518_v52 = vshrl.u32 %v8899_v19, %v1517_v57  ;;  %v1524_v63 = vor.u32 %v1523_v13, %v1522_v16  ;;  %5686 = vmatprep.mubr.msk.f32.mxu0 %vm68_vm1, %v6156_v7 }
 0x203   :  { %v1668_v26 = vshll.u32 %v1667_v25, 30  ;;  %v1691_v24 = vsub.s32 4, %v1667_v25  ;;  %v7437_v44 = vpop.eup %6055  ;;  %v1379_v53 = vmul.f32 %v1378_v1, %v1376_v60  ;;  %v1530_v2 = vor.u32 %v1529_v49, %v1528_v12 }
 0x204   :  { %8954 = vst [vmem:[#allocation38_spill] sm:$0xff] %v7437_v44  ;;  %v1533_v10 = vor.u32 %v1532_v27, %v1531_v43  ;;  %vm1537_vm13 = vcmp.lt.s32.totalorder %v7410_v59, 4  ;;  %vm1534_vm6 = vcmp.lt.s32.totalorder %v7410_v59, 1  ;;  %vm1536_vm0 = vcmp.lt.s32.totalorder %v7410_v59, 3 }
 0x205   :  { %v7444_v57 = vsub.s32 %v1665_v48, %v1668_v26  ;;  %v1692_v16 = vsel %vm1607_vm14, %v1691_v24, %v1667_v25  ;;  %v1539_v13 = vsel %vm1537_vm13, %v1527_v34, 2102212464  ;;  %v1380_v11 = vxor.u32 2147483648, %v1379_v53  ;;  %v6157_v24 = vld [vmem:[%s8768_s0 + $0x78] sm:$0xff] }
 0x206   :  { %v1538_v27 = vsel %vm1534_vm6, %v1518_v52, %v1521_v5  ;;  %v1815_v29 = vshrl.u32 %v1814_v15, 23  ;;  %v1694_v49 = vsel %vm7406_vm5, 0, %v1692_v16  ;;  %v1540_v26 = vsel %vm1536_vm0, %v1524_v63, %v1539_v13  ;;  %5687 = vmatmul.mubr.msk.f32.gmra.mrb[30].mxu0 %vm68_vm1, %v6157_v24 }
 0x207   :  { %v1671_v36 = vsub.s32 0, %v7444_v57  ;;  %v1542_v48 = vsel %vm1534_vm6, %v1521_v5, %v1524_v63  ;;  %v1381_v1 = vsel %vm1298_vm2, %v1380_v11, %v1379_v53  ;;  %v1543_v52 = vsel %vm1537_vm13, %v1530_v2, 920167782 }
 0x208   :  { %v1546_v15 = vsel %vm1534_vm6, %v1524_v63, %v1527_v34  ;;  %v1547_v25 = vsel %vm1537_vm13, %v1533_v10, 1326507024  ;;  %vm1535_vm4 = vcmp.lt.s32.totalorder %v7410_v59, 2  ;;  %v1544_v5 = vsel %vm1536_vm0, %v1527_v34, %v1543_v52 }
 0x209   :  { %v5292_v12 = vmin.u32 %v1671_v36, %v7444_v57  ;;  %v8955_v60 = vand.u32 2147483647, %v6853_v50  ;;  %v3359_v33 = vadd.s32 3, %v1694_v49  ;;  %v1541_v7 = vsel %vm1535_vm4, %v1538_v27, %v1540_v26 }
 0x20a   :  { %v1545_v53 = vsel %vm1535_vm4, %v1542_v48, %v1544_v5  ;;  %v1548_v16 = vsel %vm1536_vm0, %v1530_v2, %v1547_v25  ;;  %v1384_v63 = vsel %vm7267_vm10, %v6578_v45, %v1381_v1  ;;  %v5299_v11 = vadd.s32 4294967169, %v1815_v29 }
 0x20b   :  { %v1818_v43 = vand.u32 8388607, %v8955_v60  ;;  %v1673_v10 = vclz %v5292_v12  ;;  %v1549_v13 = vsel %vm1535_vm4, %v1546_v15, %v1548_v16  ;;  %6057 = vsinq.f32 %v7362_v9 }
 0x20c   :  { %v7479_v36 = vmul.u32.u64.low %v7375_v28, %v1549_v13  ;;  %v7480_v24 = vmul.u32.u64.high %v7375_v28, %v1549_v13, %v7479_v36  ;;  %v7483_v34 = vmul.u32.u64.low %v7375_v28, %v1545_v53  ;;  %v7484_v52 = vmul.u32.u64.high %v7375_v28, %v1545_v53, %v7483_v34 }
 0x20d   :  { %v1661_v59 = vadd.s32 %v7350_v8, %v7356_v3  ;;  %v5293_v2 = vadd.s32 4294967294, %v1673_v10  ;;  %v1821_v27 = vadd.s32 1, %v5299_v11  ;;  %6059 = vcosq.f32 %v1384_v63 }
 0x20e   :  { %v7489_v47 = vand.u32 3, %v1694_v49  ;;  %v7491_v26 = vand.u32 3, %v3359_v33  ;;  %v1819_v29 = vor.u32 8388608, %v1818_v43  ;;  %v1557_v48 = vmul.u32 %v7375_v28, %v1541_v7 }
 0x20f   :  { %vm5294_vm1 = vcmp.lt.s32.totalorder %v5293_v2, 0  ;;  %vm1822_vm2 = vcmp.gt.s32.totalorder %v1821_v27, 0  ;;  %v1711_v1 = vand.u32 2139095040, %v6921_v22  ;;  %vm1559_vm10 = vc.u32 %v7480_v24, %v7483_v34 }
 0x210   :  { %8956 = vst [vmem:[#allocation39_spill] sm:$0xff] %v7489_v47  ;;  %8957 = vst [vmem:[#allocation40_spill] sm:$0xff] %v7491_v26  ;;  %v1676_v15 = vsel %vm5294_vm1, 0, %v5293_v2  ;;  %v1560_v9 = vadd.s32 1, %v7484_v52  ;;  %v8958_v8 = vand.u32 2147483647, %v6921_v22  ;;  %6061 = vsinq.f32 %v1384_v63 }
 0x211   :  { %v1677_v49 = vsub.s32 32, %v1676_v15  ;;  %v1681_v25 = vsub.s32 4294967266, %v1676_v15  ;;  %v1823_v12 = vsel %vm1822_vm2, %v1821_v27, 0  ;;  %vm1504_vm12 = vcmp.lt.s32.totalorder %v6775_v18, 0 }
 0x212   :  { %v7499_v3 = vand.u32 8388607, %v8958_v8  ;;  %v7503_v28 = vadd.s32 %v7483_v34, %v7480_v24  ;;  %v1561_v5 = vsel %vm1559_vm10, %v1560_v9, %v7484_v52  ;;  %v1825_v60 = vand.u32 31, %v1823_v12 }
 0x213   :  { %v7506_v43 = vshll.u32 %v1819_v29, 8  ;;  %v1678_v33 = vshll.u32 %v7444_v57, %v1676_v15  ;;  %v1679_v7 = vshrl.u32 %v1661_v59, %v1677_v49  ;;  %v1682_v53 = vadd.s32 127, %v1681_v25 }
 0x214   :  { %v8959_v16 = vand.u32 2147483647, %v6775_v18  ;;  %v1562_v10 = vadd.s32 %v1561_v5, %v1557_v48  ;;  %v1824_v13 = vshrl.u32 %v1823_v12, 5  ;;  %v1826_v11 = vsub.s32 32, %v1825_v60 }
 0x215   :  { %v1712_v36 = vshrl.u32 %v1711_v1, 23  ;;  %v1680_v34 = vor.u32 %v1679_v7, %v1678_v33  ;;  %v1683_v52 = vshll.u32 %v1682_v53, 23  ;;  %v1828_v27 = vshll.u32 %v8899_v19, %v1825_v60  ;;  %v7521_v9 = vpop.eup %6057 }
 0x216   :  { %vm7511_vm8 = vcmp.le.f32.partialorder %v8959_v16, 0.7853982  ;;  %v1563_v2 = vadd.s32 536870912, %v1562_v10  ;;  %v1829_v57 = vshrl.u32 %v8905_v32, %v1826_v11  ;;  %v1832_v59 = vshrl.u32 %v8906_v56, %v1826_v11  ;;  %8962 = vst [vmem:[#allocation41_spill] sm:$0xff] %v7521_v9 }
 0x217   :  { %v1834_v29 = vshll.u32 %v8906_v56, %v1825_v60  ;;  %v1835_v15 = vshrl.u32 %v8907_v58, %v1826_v11  ;;  %v1684_v48 = vor.u32 4788187, %v1683_v52  ;;  %v1831_v1 = vshll.u32 %v8905_v32, %v1825_v60  ;;  %v7525_v25 = vpop.eup %6059 }
 0x218   :  { %v1564_v8 = vshrl.u32 %v1563_v2, 30  ;;  %v1838_v49 = vshrl.u32 %v8908_v55, %v1826_v11  ;;  %8963 = vst [vmem:[#allocation42_spill] sm:$0xff] %v7525_v25  ;;  %v1687_v12 = vcvt.s32.f32 %v1680_v34  ;;  %v1827_v5 = vshrl.u32 %v8899_v19, %v1826_v11 }
 0x219   :  { %v1836_v33 = vor.u32 %v1835_v15, %v1834_v29  ;;  %v1837_v7 = vshll.u32 %v8907_v58, %v1825_v60  ;;  %v1685_v53 = vand.u32 2147483647, %v1684_v48  ;;  %v1830_v47 = vor.u32 %v1829_v57, %v1828_v27 }
 0x21a   :  { %v1565_v16 = vshll.u32 %v1564_v8, 30  ;;  %v1588_v24 = vsub.s32 4, %v1564_v8  ;;  %v1833_v26 = vor.u32 %v1832_v59, %v1831_v1  ;;  %v1840_v52 = vshll.u32 %v8908_v55, %v1825_v60  ;;  %v7531_v9 = vpop.eup %6061 }
 0x21b   :  { %v1839_v44 = vor.u32 %v1838_v49, %v1837_v7  ;;  %v1841_v2 = vshrl.u32 %v8909_v21, %v1826_v11  ;;  %v1688_v14 = vmul.f32 %v1687_v12, %v1685_v53  ;;  %vm1846_vm15 = vcmp.lt.s32.totalorder %v1824_v13, 4 }
 0x21c   :  { %v7533_v25 = vsub.s32 %v1562_v10, %v1565_v16  ;;  %v1589_v34 = vsel %vm1504_vm12, %v1588_v24, %v1564_v8  ;;  %vm1843_vm3 = vcmp.lt.s32.totalorder %v1824_v13, 1  ;;  %v1848_v27 = vsel %vm1846_vm15, %v1836_v33, 2102212464 }
 0x21d   :  { %v1591_v29 = vsel %vm7511_vm8, 0, %v1589_v34  ;;  %v1842_v15 = vor.u32 %v1841_v2, %v1840_v52  ;;  %v1689_v57 = vxor.u32 2147483648, %v1688_v14  ;;  %vm1845_vm11 = vcmp.lt.s32.totalorder %v1824_v13, 3 }
 0x21e   :  { %v1568_v60 = vsub.s32 0, %v7533_v25  ;;  %v1847_v11 = vsel %vm1843_vm3, %v1827_v5, %v1830_v47  ;;  %v3255_v59 = vadd.s32 3, %v1591_v29  ;;  %v1849_v10 = vsel %vm1845_vm11, %v1833_v26, %v1848_v27 }
 0x21f   :  { %v1851_v48 = vsel %vm1843_vm3, %v1830_v47, %v1833_v26  ;;  %v1852_v1 = vsel %vm1846_vm15, %v1839_v44, 920167782  ;;  %v1690_v24 = vsel %vm1607_vm14, %v1689_v57, %v1688_v14  ;;  %vm1844_vm13 = vcmp.lt.s32.totalorder %v1824_v13, 2 }
 0x220   :  { %v5288_v8 = vmin.u32 %v1568_v60, %v7533_v25  ;;  %v1855_v49 = vsel %vm1843_vm3, %v1833_v26, %v1836_v33  ;;  %v7546_v12 = vand.u32 3, %v1591_v29  ;;  %v1850_v7 = vsel %vm1844_vm13, %v1847_v11, %v1849_v10 }
 0x221   :  { %v1853_v53 = vsel %vm1845_vm11, %v1836_v33, %v1852_v1  ;;  %v1856_v5 = vsel %vm1846_vm15, %v1842_v15, 1326507024  ;;  %v1693_v47 = vsel %vm7406_vm5, %v6678_v6, %v1690_v24  ;;  %v7554_v14 = vand.u32 3, %v3255_v59 }
 0x222   :  { %v1570_v16 = vclz %v5288_v8  ;;  %v1854_v52 = vsel %vm1844_vm13, %v1851_v48, %v1853_v53  ;;  %v1857_v2 = vsel %vm1845_vm11, %v1839_v44, %v1856_v5  ;;  %v5295_v15 = vadd.s32 4294967169, %v1712_v36 }
 0x223   :  { %v1858_v34 = vsel %vm1844_vm13, %v1855_v49, %v1857_v2  ;;  %v7557_v26 = vmul.u32.u64.low %v7506_v43, %v1854_v52  ;;  %v7558_v29 = vmul.u32.u64.high %v7506_v43, %v1854_v52, %v7557_v26  ;;  %6063 = vcosq.f32 %v1693_v47 }
 0x224   :  { %v5289_v27 = vadd.s32 4294967294, %v1570_v16  ;;  %v7561_v33 = vmul.u32.u64.low %v7506_v43, %v1858_v34  ;;  %v7562_v57 = vmul.u32.u64.high %v7506_v43, %v1858_v34, %v7561_v33  ;;  %v1866_v41 = vmul.u32 %v7506_v43, %v1850_v7 }
 0x225   :  { %v359_v60 = vand.u32 3, %v6622_v42  ;;  %v8857_v44 = vxor.u32 2147483648, %v6785_v30  ;;  %6065 = vsinq.f32 %v1693_v47  ;;  %v1718_v13 = vadd.s32 1, %v5295_v15 }
 0x226   :  { %vm5290_vm14 = vcmp.lt.s32.totalorder %v5289_v27, 0  ;;  %v8964_v11 = vor.u32 8388608, %v7499_v3  ;;  %v1869_v48 = vadd.s32 1, %v7558_v29  ;;  %v8856_v1 = vxor.u32 2147483648, %v6780_v35 }
 0x227   :  { %v1573_v10 = vsel %vm5290_vm14, 0, %v5289_v27  ;;  %v7574_v36 = vand.u32 3, %v6554_v62  ;;  %vm361_vm5 = vcmp.eq.s32.totalorder %v359_v60, 0  ;;  %vm1868_vm6 = vc.u32 %v7562_v57, %v7557_v26 }
 0x228   :  { %v7569_v59 = vshll.u32 %v8964_v11, 8  ;;  %v1574_v43 = vsub.s32 32, %v1573_v10  ;;  %v1575_v24 = vshll.u32 %v7533_v25, %v1573_v10  ;;  %v1578_v8 = vsub.s32 4294967266, %v1573_v10 }
 0x229   :  { %vm1719_vm0 = vcmp.gt.s32.totalorder %v1718_v13, 0  ;;  %v363_v3 = vsel %vm361_vm5, %v6780_v35, %v8857_v44  ;;  %vm364_vm4 = vcmp.eq.s32.totalorder %v359_v60, 2  ;;  %vm1813_vm1 = vcmp.lt.s32.totalorder %v6853_v50, 0 }
 0x22a   :  { %v1576_v49 = vshrl.u32 %v7503_v28, %v1574_v43  ;;  %v1579_v7 = vadd.s32 127, %v1578_v8  ;;  %v1870_v53 = vsel %vm1868_vm6, %v1869_v48, %v7558_v29  ;;  %v1720_v5 = vsel %vm1719_vm0, %v1718_v13, 0 }
 0x22b   :  { %v8965_v25 = vand.u32 2147483647, %v6853_v50  ;;  %v1871_v16 = vadd.s32 %v1870_v53, %v1866_v41  ;;  %v1722_v52 = vand.u32 31, %v1720_v5  ;;  %vm360_vm10 = vcmp.lt.s32.totalorder %v359_v60, 2 }
 0x22c   :  { %v366_v2 = vsel %vm364_vm4, %v8856_v1, %v6785_v30  ;;  %v1577_v28 = vor.u32 %v1576_v49, %v1575_v24  ;;  %v1580_v34 = vshll.u32 %v1579_v7, 23  ;;  %v7594_v27 = vadd.s32 %v7557_v26, %v7562_v57 }
 0x22d   :  { %vm7586_vm2 = vcmp.le.f32.partialorder %v8965_v25, 0.7853982  ;;  %v7596_v29 = vshrl.u32 %v1720_v5, 5  ;;  %v1872_v33 = vadd.s32 536870912, %v1871_v16  ;;  %v1723_v15 = vsub.s32 32, %v1722_v52  ;;  %v7601_v43 = vpop.eup %6063 }
 0x22e   :  { %v1725_v13 = vshll.u32 %v8899_v19, %v1722_v52  ;;  %v367_v11 = vsel %vm360_vm10, %v363_v3, %v366_v2  ;;  %v1581_v10 = vor.u32 4788187, %v1580_v34  ;;  %v1584_v41 = vcvt.s32.f32 %v1577_v28 }
 0x22f   :  { %v1728_v60 = vshll.u32 %v8905_v32, %v1722_v52  ;;  %v1731_v48 = vshll.u32 %v8906_v56, %v1722_v52  ;;  %v1873_v24 = vshrl.u32 %v1872_v33, 30  ;;  %v1726_v8 = vshrl.u32 %v8905_v32, %v1723_v15  ;;  %v7606_v49 = vpop.eup %6065 }
 0x230   :  { %v1729_v26 = vshrl.u32 %v8906_v56, %v1723_v15  ;;  %v1734_v57 = vshll.u32 %v8907_v58, %v1722_v52  ;;  %v1582_v7 = vand.u32 2147483647, %v1581_v10  ;;  %v1724_v3 = vshrl.u32 %v8899_v19, %v1723_v15 }
 0x231   :  { %v1732_v53 = vshrl.u32 %v8907_v58, %v1723_v15  ;;  %v1735_v5 = vshrl.u32 %v8908_v55, %v1723_v15  ;;  %v1874_v25 = vshll.u32 %v1873_v24, 30  ;;  %v1897_v2 = vsub.s32 4, %v1873_v24 }
 0x232   :  { %v1727_v28 = vor.u32 %v1726_v8, %v1725_v13  ;;  %v1737_v34 = vshll.u32 %v8908_v55, %v1722_v52  ;;  %v1585_v33 = vmul.f32 %v1584_v41, %v1582_v7  ;;  %v1730_v32 = vor.u32 %v1729_v26, %v1728_v60 }
 0x233   :  { %v1733_v1 = vor.u32 %v1732_v53, %v1731_v48  ;;  %v1738_v56 = vshrl.u32 %v8909_v21, %v1723_v15  ;;  %v7613_v44 = vsub.s32 %v1871_v16, %v1874_v25  ;;  %v1898_v10 = vsel %vm1813_vm1, %v1897_v2, %v1873_v24 }
 0x234   :  { %v1736_v19 = vor.u32 %v1735_v5, %v1734_v57  ;;  %vm1740_vm15 = vcmp.lt.s32.totalorder %v7596_v29, 1  ;;  %vm358_vm3 = vweird.f32 %v6318_v20  ;;  %v1586_v58 = vxor.u32 2147483648, %v1585_v33  ;;  %v8977_v20 = vld [vmem:[#allocation11_spill] sm:$0xff] }
 0x235   :  { %v1900_v13 = vsel %vm7586_vm2, 0, %v1898_v10  ;;  %v1739_v55 = vor.u32 %v1738_v56, %v1737_v34  ;;  %vm1741_vm11 = vcmp.lt.s32.totalorder %v7596_v29, 2  ;;  %v1877_v52 = vsub.s32 0, %v7613_v44 }
 0x236   :  { %v3567_v21 = vadd.s32 3, %v1900_v13  ;;  %vm1742_vm13 = vcmp.lt.s32.totalorder %v7596_v29, 3  ;;  %vm1743_vm14 = vcmp.lt.s32.totalorder %v7596_v29, 4  ;;  %v1587_v16 = vsel %vm1504_vm12, %v1586_v58, %v1585_v33 }
 0x237   :  { %v7627_v15 = vand.u32 3, %v1900_v13  ;;  %v1744_v41 = vsel %vm1740_vm15, %v1724_v3, %v1727_v28  ;;  %v1745_v60 = vsel %vm1743_vm14, %v1733_v1, 2102212464  ;;  %v1590_v48 = vsel %vm7511_vm8, %v6775_v18, %v1587_v16 }
 0x238   :  { %v5300_v24 = vmin.u32 %v1877_v52, %v7613_v44  ;;  %v1746_v8 = vsel %vm1742_vm13, %v1730_v32, %v1745_v60  ;;  %v1748_v26 = vsel %vm1740_vm15, %v1727_v28, %v1730_v32  ;;  %v7641_v57 = vand.u32 3, %v3567_v21 }
 0x239   :  { %v1747_v7 = vsel %vm1741_vm11, %v1744_v41, %v1746_v8  ;;  %v1749_v3 = vsel %vm1743_vm14, %v1736_v19, 920167782  ;;  %v1752_v63 = vsel %vm1740_vm15, %v1730_v32, %v1733_v1  ;;  %vm463_vm12 = vcmp.lt.s32.totalorder %v7574_v36, 2 }
 0x23a   :  { %6067 = vcosq.f32 %v1590_v48  ;;  %v1879_v53 = vclz %v5300_v24  ;;  %v1750_v5 = vsel %vm1742_vm13, %v1733_v1, %v1749_v3  ;;  %v1753_v25 = vsel %vm1743_vm14, %v1739_v55, 1326507024 }
 0x23b   :  { %vm461_vm8 = vweird.f32 %v6314_v17  ;;  %6069 = vsinq.f32 %v1590_v48  ;;  %v1751_v2 = vsel %vm1741_vm11, %v1748_v26, %v1750_v5  ;;  %v1754_v28 = vsel %vm1742_vm13, %v1736_v19, %v1753_v25 }
 0x23c   :  { %v1763_v34 = vmul.u32 %v7569_v59, %v1747_v7  ;;  %v5301_v33 = vadd.s32 4294967294, %v1879_v53  ;;  %v1755_v32 = vsel %vm1741_vm11, %v1752_v63, %v1754_v28  ;;  %v7672_v13 = vsel %vm358_vm3, nan, %v367_v11 }
 0x23d   :  { %v7663_v1 = vmul.u32.u64.low %v7569_v59, %v1751_v2  ;;  %v7664_v56 = vmul.u32.u64.high %v7569_v59, %v1751_v2, %v7663_v1  ;;  %v7667_v10 = vmul.u32.u64.low %v7569_v59, %v1755_v32  ;;  %v7668_v58 = vmul.u32.u64.high %v7569_v59, %v1755_v32, %v7667_v10 }
 0x23e   :  { %v465_v19 = vxor.u32 2147483648, %v6680_v51  ;;  %vm5302_vm5 = vcmp.lt.s32.totalorder %v5301_v33, 0  ;;  %vm464_vm6 = vcmp.eq.s32.totalorder %v7574_v36, 0  ;;  %v468_v29 = vxor.u32 2147483648, %v6658_v40 }
 0x23f   :  { %v2007_v55 = vadd.s32 3, %v6622_v42  ;;  %v1882_v52 = vsel %vm5302_vm5, 0, %v5301_v33  ;;  %vm467_vm0 = vcmp.eq.s32.totalorder %v7574_v36, 2  ;;  %v2111_v59 = vadd.s32 3, %v6554_v62 }
 0x240   :  { %v466_v21 = vsel %vm464_vm6, %v6658_v40, %v465_v19  ;;  %v1883_v16 = vsub.s32 32, %v1882_v52  ;;  %v1884_v11 = vshll.u32 %v7613_v44, %v1882_v52  ;;  %v1887_v41 = vsub.s32 4294967266, %v1882_v52  ;;  %v8973_v52 = vld [vmem:[#allocation16_spill] sm:$0xff] }
 0x241   :  { %v1766_v60 = vadd.s32 1, %v7664_v56  ;;  %v7684_v48 = vadd.s32 %v7663_v1, %v7668_v58  ;;  %vm1765_vm4 = vc.u32 %v7668_v58, %v7663_v1  ;;  %v469_v42 = vsel %vm467_vm0, %v468_v29, %v6680_v51 }
 0x242   :  { %v2008_v24 = vand.u32 3, %v2007_v55  ;;  %v1885_v8 = vshrl.u32 %v7594_v27, %v1883_v16  ;;  %v1888_v26 = vadd.s32 127, %v1887_v41  ;;  %vm1710_vm10 = vcmp.lt.s32.totalorder %v6921_v22, 0 }
 0x243   :  { %v1767_v62 = vsel %vm1765_vm4, %v1766_v60, %v7664_v56  ;;  %v470_v44 = vsel %vm463_vm12, %v466_v21, %v469_v42  ;;  %v8968_v7 = vand.u32 2147483647, %v6921_v22  ;;  %vm3604_vm14 = vcmask 130048   ;;  %v8974_v60 = vld [vmem:[#allocation13_spill] sm:$0xff] }
 0x244   :  { %v1768_v63 = vadd.s32 %v1767_v62, %v1763_v34  ;;  %v7701_v53 = vsel %vm461_vm8, nan, %v470_v44  ;;  %vm2009_vm11 = vcmp.lt.s32.totalorder %v2008_v24, 2  ;;  %vm2010_vm13 = vcmp.eq.s32.totalorder %v2008_v24, 0  ;;  %v7703_v27 = vpop.eup %6067 }
 0x245   :  { %vm7695_vm15 = vcmp.le.f32.partialorder %v8968_v7, 0.7853982  ;;  %v1886_v5 = vor.u32 %v1885_v8, %v1884_v11  ;;  %v1889_v25 = vshll.u32 %v1888_v26, 23  ;;  %v8971_v36 = vxor.u32 2147483648, %v6785_v30  ;;  %v7708_v28 = vpop.eup %6069 }
 0x246   :  { %vm2013_vm12 = vcmp.eq.s32.totalorder %v2008_v24, 2  ;;  %v1769_v33 = vadd.s32 536870912, %v1768_v63  ;;  %v8972_v34 = vxor.u32 2147483648, %v6780_v35  ;;  %v2112_v1 = vand.u32 3, %v2111_v59  ;;  %v8976_v24 = vld [vmem:[#allocation12_spill] sm:$0xff] }
 0x247   :  { %v2012_v2 = vsel %vm2010_vm13, %v6780_v35, %v8971_v36  ;;  %v1890_v10 = vor.u32 4788187, %v1889_v25  ;;  %v1893_v58 = vcvt.s32.f32 %v1886_v5  ;;  %vm2217_vm5 = vcmp.lt.s32.totalorder %v8973_v52, 2 }
 0x248   :  { %v2015_v32 = vsel %vm2013_vm12, %v8972_v34, %v6785_v30  ;;  %v1770_v21 = vshrl.u32 %v1769_v33, 30  ;;  %vm2113_vm6 = vcmp.lt.s32.totalorder %v2112_v1, 2  ;;  %vm2114_vm0 = vcmp.eq.s32.totalorder %v2112_v1, 0 }
 0x249   :  { %v2016_v55 = vsel %vm2009_vm11, %v2012_v2, %v2015_v32  ;;  %v1891_v11 = vand.u32 2147483647, %v1890_v10  ;;  %v2116_v41 = vsel %vm2114_vm0, %v6658_v40, %v465_v19  ;;  %vm2117_vm4 = vcmp.eq.s32.totalorder %v2112_v1, 2  ;;  %v8980_v32 = vld [vmem:[#allocation4_spill] sm:$0xff] }
 0x24a   :  { %v2017_v16 = vsel %vm358_vm3, nan, %v2016_v55  ;;  %vm2218_vm13 = vcmp.eq.s32.totalorder %v8973_v52, 0  ;;  %v1771_v30 = vshll.u32 %v1770_v21, 30  ;;  %v1794_v35 = vsub.s32 4, %v1770_v21 }
 0x24b   :  { %v2119_v59 = vsel %vm2117_vm4, %v468_v29, %v6680_v51  ;;  %v8975_v42 = vxor.u32 2147483648, %v8974_v60  ;;  %v1894_v26 = vmul.f32 %v1893_v58, %v1891_v11  ;;  %vm2221_vm3 = vcmp.eq.s32.totalorder %v8973_v52, 2  ;;  %v8983_v11 = vld [vmem:[#allocation9_spill] sm:$0xff] }
 0x24c   :  { %v2120_v62 = vsel %vm2113_vm6, %v2116_v41, %v2119_v59  ;;  %vm2321_vm11 = vcmp.lt.s32.totalorder %v8977_v20, 2  ;;  %v7726_v44 = vsub.s32 %v1768_v63, %v1771_v30  ;;  %v1795_v40 = vsel %vm1710_vm10, %v1794_v35, %v1770_v21  ;;  %v8981_v21 = vld [vmem:[#allocation10_spill] sm:$0xff] }
 0x24d   :  { %v2220_v8 = vsel %vm2218_vm13, %v8976_v24, %v8975_v42  ;;  %v2121_v19 = vsel %vm461_vm8, nan, %v2120_v62  ;;  %v8978_v51 = vxor.u32 2147483648, %v8976_v24  ;;  %vm770_vm12 = vweird.f32 %v6333_v38 }
 0x24e   :  { %v1895_v7 = vxor.u32 2147483648, %v1894_v26  ;;  %v1797_v5 = vsel %vm7695_vm15, 0, %v1795_v40  ;;  %v3588_v25 = vpack.c.bf16 %v2121_v19, %v2017_v16  ;;  %v1774_v36 = vsub.s32 0, %v7726_v44 }
 0x24f   :  { %v2223_v29 = vsel %vm2221_vm3, %v8978_v51, %v8974_v60  ;;  %v7741_v2 = vand.u32 3, %v1797_v5  ;;  %v3463_v17 = vadd.s32 3, %v1797_v5  ;;  %vm873_vm8 = vweird.f32 %v8980_v32 }
 0x250   :  { %v2224_v63 = vsel %vm2217_vm5, %v2220_v8, %v2223_v29  ;;  %v1896_v1 = vsel %vm1813_vm1, %v1895_v7, %v1894_v26  ;;  %5629 = vmatprep.mubr.msk.bf16.mxu1 %vm3604_vm14, %v3588_v25  ;;  %vm2322_vm6 = vcmp.eq.s32.totalorder %v8977_v20, 0  ;;  %vm2325_vm0 = vcmp.eq.s32.totalorder %v8977_v20, 2  ;;  %v8986_v29 = vld [vmem:[#allocation18_spill] sm:$0xff]  ;;  %v8987_v25 = vld [vmem:[#allocation5_spill] sm:$0xff] }
 0x251   :  { %v2225_v34 = vsel %vm564_vm7, nan, %v2224_v63  ;;  %v774_v10 = vxor.u32 2147483648, %v7034_v46  ;;  %v1899_v58 = vsel %vm7586_vm2, %v6853_v50, %v1896_v1  ;;  %v5296_v55 = vmin.u32 %v1774_v36, %v7726_v44 }
 0x252   :  { %v7756_v52 = vand.u32 3, %v3463_v17  ;;  %v8982_v16 = vxor.u32 2147483648, %v8981_v21  ;;  %6071 = vcosq.f32 %v1899_v58  ;;  %v8984_v30 = vxor.u32 2147483648, %v8983_v11  ;;  %v8988_v17 = vld [vmem:[#allocation30_spill] sm:$0xff] }
 0x253   :  { %v777_v59 = vxor.u32 2147483648, %v7020_v61  ;;  %v877_v60 = vxor.u32 2147483648, %v7005_v39  ;;  %6073 = vsinq.f32 %v1899_v58  ;;  %v1776_v47 = vclz %v5296_v55 }
 0x254   :  { %v2324_v41 = vsel %vm2322_vm6, %v8983_v11, %v8982_v16  ;;  %v2327_v35 = vsel %vm2325_vm0, %v8984_v30, %v8981_v21  ;;  %v880_v24 = vxor.u32 2147483648, %v6997_v31  ;;  %vm2425_vm7 = vcmp.lt.s32.totalorder %v6965_v4, 2 }
 0x255   :  { %v2328_v42 = vsel %vm2321_vm11, %v2324_v41, %v2327_v35  ;;  %vm2426_vm1 = vcmp.eq.s32.totalorder %v6965_v4, 0  ;;  %vm2429_vm2 = vcmp.eq.s32.totalorder %v6965_v4, 2  ;;  %vm976_vm5 = vweird.f32 %v6347_v54  ;;  %v8990_v41 = vld [vmem:[#allocation26_spill] sm:$0xff]  ;;  %v8991_v35 = vld [vmem:[#allocation25_spill] sm:$0xff] }
 0x256   :  { %v2329_v26 = vsel %vm667_vm9, nan, %v2328_v42  ;;  %v5297_v62 = vadd.s32 4294967294, %v1776_v47  ;;  %v2428_v20 = vsel %vm2426_vm1, %v7020_v61, %v774_v10  ;;  %v2431_v19 = vsel %vm2429_vm2, %v777_v59, %v7034_v46  ;;  %v8992_v42 = vld [vmem:[#allocation23_spill] sm:$0xff] }
 0x257   :  { %v3589_v40 = vpack.c.bf16 %v2329_v26, %v2225_v34  ;;  %v2432_v51 = vsel %vm2425_vm7, %v2428_v20, %v2431_v19  ;;  %vm2529_vm9 = vcmp.lt.s32.totalorder %v8986_v29, 2  ;;  %vm2530_vm4 = vcmp.eq.s32.totalorder %v8986_v29, 0  ;;  %v8989_v34 = vld [vmem:[#allocation28_spill] sm:$0xff]  ;;  %v8994_v20 = vld [vmem:[#allocation21_spill] sm:$0xff]  ;;  %v8995_v19 = vld [vmem:[#allocation6_spill] sm:$0xff] }
 0x258   :  { %vm2533_vm13 = vcmp.eq.s32.totalorder %v8986_v29, 2  ;;  %vm5298_vm3 = vcmp.lt.s32.totalorder %v5297_v62, 0  ;;  %v2433_v4 = vsel %vm770_vm12, nan, %v2432_v51  ;;  %v2532_v7 = vsel %vm2530_vm4, %v6997_v31, %v877_v60 }
 0x259   :  { %5630 = vmatmul.mubr.msk.bf16.vlgmr.msra.gmra.mrb[0].mxu1 %vm3604_vm14, %v3589_v40  ;;  %v2535_v5 = vsel %vm2533_vm13, %v880_v24, %v7005_v39  ;;  %vm8871_vm11 = vweird.f32 %v8987_v25  ;;  %v1779_v63 = vsel %vm5298_vm3, 0, %v5297_v62  ;;  %v980_v33 = vxor.u32 2147483648, %v8988_v17 }
 0x25a   :  { %5646 = vmatpush3.bf16.msra.mxu1 %v7276_v37  ;;  %v2536_v36 = vsel %vm2529_vm9, %v2532_v7, %v2535_v5  ;;  %v983_v1 = vxor.u32 2147483648, %v8989_v34  ;;  %v1780_v58 = vsub.s32 32, %v1779_v63  ;;  %v1781_v55 = vshll.u32 %v7726_v44, %v1779_v63  ;;  %v8993_v37 = vld [vmem:[#allocation7_spill] sm:$0xff] }
 0x25b   :  { %v1784_v21 = vsub.s32 4294967266, %v1779_v63  ;;  %v2537_v16 = vsel %vm873_vm8, nan, %v2536_v36  ;;  %v8863_v30 = vxor.u32 2147483648, %v8990_v41  ;;  %v8861_v47 = vxor.u32 2147483648, %v8991_v35 }
 0x25c   :  { %v3590_v11 = vpack.c.bf16 %v2537_v16, %v2433_v4  ;;  %vm2633_vm6 = vcmp.lt.s32.totalorder %v8992_v42, 2  ;;  %vm8869_vm0 = vweird.f32 %v8993_v37  ;;  %v1782_v8 = vshrl.u32 %v7684_v48, %v1780_v58  ;;  %v7807_v44 = vpop.eup %6071  ;;  %v8996_v16 = vld [vmem:[#allocation32_spill] sm:$0xff] }
 0x25d   :  { %v1785_v26 = vadd.s32 127, %v1784_v21  ;;  %vm2634_vm7 = vcmp.eq.s32.totalorder %v8992_v42, 0  ;;  %vm2637_vm1 = vcmp.eq.s32.totalorder %v8992_v42, 2  ;;  %vm2737_vm2 = vcmp.lt.s32.totalorder %v8994_v20, 2  ;;  %v7818_v48 = vpop.eup %6073 }
 0x25e   :  { %5633 = vmatprep.mubr.msk.bf16.mxu1 %vm3604_vm14, %v3590_v11  ;;  %v2636_v62 = vsel %vm2634_vm7, %v8989_v34, %v980_v33  ;;  %v2639_v40 = vsel %vm2637_vm1, %v983_v1, %v8988_v17  ;;  %vm2738_vm9 = vcmp.eq.s32.totalorder %v8994_v20, 0  ;;  %vm8864_vm4 = vweird.f32 %v8995_v19 }
 0x25f   :  { %v1783_v51 = vor.u32 %v1782_v8, %v1781_v55  ;;  %v1786_v29 = vshll.u32 %v1785_v26, 23  ;;  %v2640_v4 = vsel %vm2633_vm6, %v2636_v62, %v2639_v40  ;;  %v2740_v7 = vsel %vm2738_vm9, %v8991_v35, %v8863_v30  ;;  %v8997_v8 = vld [vmem:[#allocation31_spill] sm:$0xff]  ;;  %v8998_v62 = vld [vmem:[#allocation33_spill] sm:$0xff] }
 0x260   :  { %v2641_v5 = vsel %vm976_vm5, nan, %v2640_v4  ;;  %vm2741_vm13 = vcmp.eq.s32.totalorder %v8994_v20, 2  ;;  %v8859_v63 = vxor.u32 2147483648, %v7427_v0  ;;  %v8858_v36 = vxor.u32 2147483648, %v7327_v23 }
 0x261   :  { %v1787_v58 = vor.u32 4788187, %v1786_v29  ;;  %v1790_v21 = vcvt.s32.f32 %v1783_v51  ;;  %v2743_v55 = vsel %vm2741_vm13, %v8861_v47, %v8990_v41  ;;  %v8860_v11 = vxor.u32 2147483648, %v8996_v16 }
 0x262   :  { %vm8867_vm3 = vweird.f32 %v6578_v45  ;;  %v2744_v42 = vsel %vm2737_vm2, %v2740_v7, %v2743_v55  ;;  %v8862_v26 = vxor.u32 2147483648, %v8997_v8  ;;  %vm2841_vm6 = vcmp.lt.s32.totalorder %v8998_v62, 2  ;;  %v8999_v7 = vld [vmem:[#allocation27_spill] sm:$0xff]  ;;  %v9000_v55 = vld [vmem:[#allocation8_spill] sm:$0xff] }
 0x263   :  { %vm2842_vm7 = vcmp.eq.s32.totalorder %v8998_v62, 0  ;;  %v1788_v40 = vand.u32 2147483647, %v1787_v58  ;;  %v2745_v51 = vsel %vm8871_vm11, nan, %v2744_v42  ;;  %vm2845_vm1 = vcmp.eq.s32.totalorder %v8998_v62, 2 }
 0x264   :  { %v2844_v29 = vsel %vm2842_vm7, %v7327_v23, %v8859_v63  ;;  %v3591_v4 = vpack.c.bf16 %v2745_v51, %v2641_v5  ;;  %v2847_v20 = vsel %vm2845_vm1, %v8858_v36, %v7427_v0  ;;  %vm2945_vm2 = vcmp.lt.s32.totalorder %v8999_v7, 2  ;;  %v9001_v36 = vld [vmem:[#allocation42_spill] sm:$0xff] }
 0x265   :  { %vm2946_vm9 = vcmp.eq.s32.totalorder %v8999_v7, 0  ;;  %vm8865_vm13 = vweird.f32 %v9000_v55  ;;  %v1791_v58 = vmul.f32 %v1790_v21, %v1788_v40  ;;  %v2848_v56 = vsel %vm2841_vm6, %v2844_v29, %v2847_v20  ;;  %v9002_v20 = vld [vmem:[#allocation41_spill] sm:$0xff] }
 0x266   :  { %v2948_v42 = vsel %vm2946_vm9, %v8997_v8, %v8860_v11  ;;  %vm2949_vm7 = vcmp.eq.s32.totalorder %v8999_v7, 2  ;;  %5634 = vmatmul.mubr.msk.bf16.gmra.mrb[4].mxu1 %vm3604_vm14, %v3591_v4  ;;  %v2849_v5 = vsel %vm8869_vm0, nan, %v2848_v56  ;;  %v1392_v51 = vxor.u32 2147483648, %v7531_v9  ;;  %v9003_v11 = vld [vmem:[#allocation38_spill] sm:$0xff]  ;;  %v9004_v56 = vld [vmem:[#allocation37_spill] sm:$0xff] }
 0x267   :  { %v2951_v62 = vsel %vm2949_vm7, %v8862_v26, %v8996_v16  ;;  %v1395_v21 = vxor.u32 2147483648, %v9001_v36  ;;  %v1792_v40 = vxor.u32 2147483648, %v1791_v58  ;;  %v1495_v63 = vxor.u32 2147483648, %v9002_v20 }
 0x268   :  { %v2952_v29 = vsel %vm2945_vm2, %v2948_v42, %v2951_v62  ;;  %v1498_v47 = vxor.u32 2147483648, %v9003_v11  ;;  %vm8868_vm6 = vweird.f32 %v6775_v18  ;;  %vm3049_vm1 = vcmp.lt.s32.totalorder %v9004_v56, 2 }
 0x269   :  { %v2953_v4 = vsel %vm8864_vm4, nan, %v2952_v29  ;;  %vm3050_vm9 = vcmp.eq.s32.totalorder %v9004_v56, 0  ;;  %vm3053_vm7 = vcmp.eq.s32.totalorder %v9004_v56, 2  ;;  %v1793_v7 = vsel %vm1710_vm10, %v1792_v40, %v1791_v58  ;;  %v9005_v56 = vld [vmem:[#allocation35_spill] sm:$0xff] }
 0x26a   :  { %v3592_v26 = vpack.c.bf16 %v2953_v4, %v2849_v5  ;;  %v3052_v42 = vsel %vm3050_vm9, %v9001_v36, %v1392_v51  ;;  %v3055_v62 = vsel %vm3053_vm7, %v1395_v21, %v7531_v9  ;;  %vm8870_vm2 = vweird.f32 %v6678_v6 }
 0x26b   :  { %v1796_v29 = vsel %vm7695_vm15, %v6921_v22, %v1793_v7  ;;  %v3056_v30 = vsel %vm3049_vm1, %v3052_v42, %v3055_v62  ;;  %vm3153_vm4 = vcmp.lt.s32.totalorder %v9005_v56, 2  ;;  %vm3154_vm10 = vcmp.eq.s32.totalorder %v9005_v56, 0  ;;  %v9006_v62 = vld [vmem:[#allocation40_spill] sm:$0xff] }
 0x26c   :  { %6075 = vcosq.f32 %v1796_v29  ;;  %5637 = vmatprep.mubr.msk.bf16.mxu1 %vm3604_vm14, %v3592_v26  ;;  %v3057_v58 = vsel %vm8867_vm3, nan, %v3056_v30  ;;  %v3156_v5 = vsel %vm3154_vm10, %v9003_v11, %v1495_v63  ;;  %vm3157_vm9 = vcmp.eq.s32.totalorder %v9005_v56, 2 }
 0x26d   :  { %6077 = vsinq.f32 %v1796_v29  ;;  %v3159_v3 = vsel %vm3157_vm9, %v1498_v47, %v9002_v20  ;;  %v1598_v40 = vxor.u32 2147483648, %v7708_v28  ;;  %v8866_v4 = vxor.u32 2147483648, %v7703_v27 }
 0x26e   :  { %vm1903_vm15 = vweird.f32 %v6853_v50  ;;  %v3160_v26 = vsel %vm3153_vm4, %v3156_v5, %v3159_v3  ;;  %v1701_v30 = vxor.u32 2147483648, %v7606_v49  ;;  %v1704_v7 = vxor.u32 2147483648, %v7601_v43 }
 0x26f   :  { %vm3257_vm1 = vcmp.lt.s32.totalorder %v7554_v14, 2  ;;  %v3161_v42 = vsel %vm8865_vm13, nan, %v3160_v26  ;;  %vm3258_vm7 = vcmp.eq.s32.totalorder %v7554_v14, 0  ;;  %vm3261_vm10 = vcmp.eq.s32.totalorder %v7554_v14, 2 }
 0x270   :  { %vm3361_vm9 = vcmp.lt.s32.totalorder %v9006_v62, 2  ;;  %v3593_v29 = vpack.c.bf16 %v3161_v42, %v3057_v58  ;;  %v3260_v56 = vsel %vm3258_vm7, %v7703_v27, %v1598_v40  ;;  %v3263_v5 = vsel %vm3261_vm10, %v8866_v4, %v7708_v28 }
 0x271   :  { %vm3362_vm4 = vcmp.eq.s32.totalorder %v9006_v62, 0  ;;  %v3264_v3 = vsel %vm3257_vm1, %v3260_v56, %v3263_v5  ;;  %vm3365_vm13 = vcmp.eq.s32.totalorder %v9006_v62, 2  ;;  %v8872_v14 = vxor.u32 2147483648, %v7818_v48 }
 0x272   :  { %v3364_v26 = vsel %vm3362_vm4, %v7601_v43, %v1701_v30  ;;  %5638 = vmatmul.mubr.msk.bf16.gmra.mrb[8].mxu1 %vm3604_vm14, %v3593_v29  ;;  %v3265_v58 = vsel %vm8868_vm6, nan, %v3264_v3  ;;  %v3367_v42 = vsel %vm3365_vm13, %v1704_v7, %v7606_v49  ;;  %v8873_v4 = vxor.u32 2147483648, %v7807_v44  ;;  %v9007_v29 = vld [vmem:[#allocation19_spill] sm:$0xff] }
 0x273   :  { %vm3465_vm1 = vcmp.lt.s32.totalorder %v7756_v52, 2  ;;  %vm1800_vm7 = vweird.f32 %v6921_v22  ;;  %v3368_v56 = vsel %vm3361_vm9, %v3364_v26, %v3367_v42  ;;  %vm3466_vm10 = vcmp.eq.s32.totalorder %v7756_v52, 0 }
 0x274   :  { %vm3469_vm4 = vcmp.eq.s32.totalorder %v7756_v52, 2  ;;  %vm3569_vm3 = vcmp.lt.s32.totalorder %v7641_v57, 2  ;;  %v3369_v62 = vsel %vm8870_vm2, nan, %v3368_v56  ;;  %vm3570_vm6 = vcmp.eq.s32.totalorder %v7641_v57, 0 }
 0x275   :  { %vm3573_vm13 = vcmp.eq.s32.totalorder %v7641_v57, 2  ;;  %vm772_vm0 = vcmp.lt.s32.totalorder %v9007_v29, 2  ;;  %v3594_v5 = vpack.c.bf16 %v3369_v62, %v3265_v58  ;;  %v3572_v3 = vsel %vm3570_vm6, %v7807_v44, %v8872_v14  ;;  %v9008_v58 = vld [vmem:[#allocation17_spill] sm:$0xff] }
 0x276   :  { %v3575_v26 = vsel %vm3573_vm13, %v8873_v4, %v7818_v48  ;;  %vm773_vm9 = vcmp.eq.s32.totalorder %v9007_v29, 0  ;;  %v7944_v42 = vpop.eup %6075  ;;  %vm776_vm2 = vcmp.eq.s32.totalorder %v9007_v29, 2  ;;  %vm875_vm11 = vcmp.lt.s32.totalorder %v9008_v58, 2  ;;  %v9009_v29 = vld [vmem:[#allocation22_spill] sm:$0xff] }
 0x277   :  { %v3576_v56 = vsel %vm3569_vm3, %v3572_v3, %v3575_v26  ;;  %v775_v57 = vsel %vm773_vm9, %v7020_v61, %v774_v10  ;;  %v7951_v62 = vpop.eup %6077  ;;  %5641 = vmatprep.mubr.msk.bf16.mxu1 %vm3604_vm14, %v3594_v5  ;;  %v1807_v14 = vxor.u32 2147483648, %v7944_v42  ;;  %v778_v3 = vsel %vm776_vm2, %v777_v59, %v7034_v46 }
 0x278   :  { %v3577_v4 = vsel %vm1903_vm15, nan, %v3576_v56  ;;  %vm876_vm3 = vcmp.eq.s32.totalorder %v9008_v58, 0  ;;  %v1804_v10 = vxor.u32 2147483648, %v7951_v62  ;;  %v779_v26 = vsel %vm772_vm0, %v775_v57, %v778_v3 }
 0x279   :  { %v878_v5 = vsel %vm876_vm3, %v6997_v31, %v877_v60  ;;  %vm879_vm6 = vcmp.eq.s32.totalorder %v9008_v58, 2  ;;  %v3471_v61 = vsel %vm3469_vm4, %v1807_v14, %v7951_v62  ;;  %v7975_v46 = vsel %vm770_vm12, nan, %v779_v26  ;;  %v9010_v26 = vld [vmem:[#allocation20_spill] sm:$0xff] }
 0x27a   :  { %v881_v59 = vsel %vm879_vm6, %v880_v24, %v7005_v39  ;;  %vm978_vm0 = vcmp.lt.s32.totalorder %v9009_v29, 2  ;;  %v3468_v60 = vsel %vm3466_vm10, %v7944_v42, %v1804_v10  ;;  %vm979_vm2 = vcmp.eq.s32.totalorder %v9009_v29, 0 }
 0x27b   :  { %v882_v56 = vsel %vm875_vm11, %v878_v5, %v881_v59  ;;  %vm982_vm12 = vcmp.eq.s32.totalorder %v9009_v29, 2  ;;  %v3472_v38 = vsel %vm3465_vm1, %v3468_v60, %v3471_v61  ;;  %v981_v39 = vsel %vm979_vm2, %v8989_v34, %v980_v33  ;;  %v9013_v5 = vld [vmem:[#allocation29_spill] sm:$0xff] }
 0x27c   :  { %v883_v31 = vsel %vm873_vm8, nan, %v882_v56  ;;  %v984_v24 = vsel %vm982_vm12, %v983_v1, %v8988_v17  ;;  %v3473_v57 = vsel %vm1800_vm7, nan, %v3472_v38  ;;  %vm1081_vm11 = vcmp.lt.s32.totalorder %v9010_v26, 2 }
 0x27d   :  { %v3580_v58 = vpack.c.bf16 %v883_v31, %v7975_v46  ;;  %v985_v3 = vsel %vm978_vm0, %v981_v39, %v984_v24  ;;  %v3595_v52 = vpack.c.bf16 %v3577_v4, %v3473_v57  ;;  %vm1082_vm8 = vcmp.eq.s32.totalorder %v9010_v26, 0  ;;  %v9015_v46 = vld [vmem:[#allocation24_spill] sm:$0xff]  ;;  %v9024_v57 = vld [vmem:[#allocation34_spill] sm:$0xff] }
 0x27e   :  { %v8006_v32 = vsel %vm976_vm5, nan, %v985_v3  ;;  %vm1085_vm1 = vcmp.eq.s32.totalorder %v9010_v26, 2  ;;  %v9011_v33 = vxor.u32 2147483648, %v8990_v41  ;;  %v9012_v34 = vxor.u32 2147483648, %v8991_v35  ;;  %v9022_v31 = vld [vmem:[#allocation36_spill] sm:$0xff] }
 0x27f   :  { %vm1184_vm10 = vcmp.lt.s32.totalorder %v9013_v5, 2  ;;  %vm1185_vm4 = vcmp.eq.s32.totalorder %v9013_v5, 0  ;;  %5642 = vmatmul.mubr.msk.bf16.gmra.mrb[12].mxu1 %vm3604_vm14, %v3595_v52  ;;  %v9014_v4 = vxor.u32 2147483648, %v7427_v0  ;;  %vm1188_vm5 = vcmp.eq.s32.totalorder %v9013_v5, 2 }
 0x280   :  { %v1084_v17 = vsel %vm1082_vm8, %v8991_v35, %v9011_v33  ;;  %v1087_v1 = vsel %vm1085_vm1, %v9012_v34, %v8990_v41  ;;  %vm1287_vm13 = vcmp.lt.s32.totalorder %v9015_v46, 2  ;;  %v9016_v59 = vpack.c.bf16 %v7701_v53, %v7672_v13 }
 0x281   :  { %v1088_v54 = vsel %vm1081_vm11, %v1084_v17, %v1087_v1  ;;  %v1187_v61 = vsel %vm1185_vm4, %v7327_v23, %v9014_v4  ;;  %vm9017_vm9 = vweird.f32 %v8987_v25  ;;  %v9018_v35 = vxor.u32 2147483648, %v7327_v23  ;;  %v4048_v4 = vld [vmem:[%s8772_s8 + $0x38] sm:$0xff] }
 0x282   :  { %5647 = vmatprep.mubr.msk.bf16.mxu1 %vm3604_vm14, %v9016_v59  ;;  %v8030_v41 = vsel %vm9017_vm9, nan, %v1088_v54  ;;  %vm1288_vm3 = vcmp.eq.s32.totalorder %v9015_v46, 0  ;;  %vm1291_vm6 = vcmp.eq.s32.totalorder %v9015_v46, 2  ;;  %v9019_v13 = vxor.u32 2147483648, %v8996_v16  ;;  %v4046_v54 = vld [vmem:[%s8772_s8 + $0x28] sm:$0xff] }
 0x283   :  { %v1190_v29 = vsel %vm1188_vm5, %v9018_v35, %v7427_v0  ;;  %v3581_v60 = vpack.c.bf16 %v8030_v41, %v8006_v32  ;;  %v9020_v25 = vxor.u32 2147483648, %v8997_v8  ;;  %vm9021_vm0 = vweird.f32 %v8993_v37  ;;  %v4050_v46 = vld [vmem:[%s8772_s8 + $0x48] sm:$0xff]  ;;  %v4051_v41 = vld [vmem:[%s8772_s8 + $0x50] sm:$0xff]  ;;  %v4052_v35 = vld [vmem:[%s8772_s8 + $0x58] sm:$0xff] }
 0x284   :  { %v1191_v56 = vsel %vm1184_vm10, %v1187_v61, %v1190_v29  ;;  %v1290_v53 = vsel %vm1288_vm3, %v8997_v8, %v9019_v13  ;;  %vm1390_vm2 = vcmp.lt.s32.totalorder %v9022_v31, 2  ;;  %vm1391_vm12 = vcmp.eq.s32.totalorder %v9022_v31, 0  ;;  %v4049_v61 = vld [vmem:[%s8772_s8 + $0x40] sm:$0xff] }
 0x285   :  { %v1293_v38 = vsel %vm1291_vm6, %v9020_v25, %v8996_v16  ;;  %v1192_v23 = vsel %vm9021_vm0, nan, %v1191_v56  ;;  %vm9023_vm11 = vweird.f32 %v8995_v19  ;;  %v1393_v24 = vsel %vm1391_vm12, %v9001_v36, %v1392_v51  ;;  %v4054_v56 = vld [vmem:[%s8772_s8 + $0x68] sm:$0xff] }
 0x286   :  { %v1294_v0 = vsel %vm1287_vm13, %v1290_v53, %v1293_v38  ;;  %vm1394_vm8 = vcmp.eq.s32.totalorder %v9022_v31, 2  ;;  %vm1493_vm1 = vcmp.lt.s32.totalorder %v9024_v57, 2  ;;  %vm1494_vm10 = vcmp.eq.s32.totalorder %v9024_v57, 0  ;;  %v4056_v31 = vld [vmem:[%s8772_s8 + $0x78] sm:$0xff] }
 0x287   :  { %v1295_v39 = vsel %vm9023_vm11, nan, %v1294_v0  ;;  %v1396_v37 = vsel %vm1394_vm8, %v1395_v21, %v7531_v9  ;;  %vm1497_vm4 = vcmp.eq.s32.totalorder %v9024_v57, 2  ;;  %v1496_v19 = vsel %vm1494_vm10, %v9003_v11, %v1495_v63  ;;  %v9026_v9 = vld [vmem:[#allocation14_spill] sm:$0xff]  ;;  %v9027_v21 = vld [vmem:[#allocation15_spill] sm:$0xff]  ;;  %v4055_v0 = vld [vmem:[%s8772_s8 + $0x70] sm:$0xff] }
 0x288   :  { %v3582_v16 = vpack.c.bf16 %v1295_v39, %v1192_v23  ;;  %v1397_v8 = vsel %vm1390_vm2, %v1393_v24, %v1396_v37  ;;  %v1499_v51 = vsel %vm1497_vm4, %v1498_v47, %v9002_v20  ;;  %vm1596_vm5 = vcmp.lt.s32.totalorder %v7546_v12, 2  ;;  %v9031_v20 = vld [vmem:[#allocation39_spill] sm:$0xff] }
 0x289   :  { %vm9025_vm13 = vweird.f32 %v6578_v45  ;;  %v1500_v36 = vsel %vm1493_vm1, %v1496_v19, %v1499_v51  ;;  %vm1597_vm9 = vcmp.eq.s32.totalorder %v7546_v12, 0  ;;  %vm1600_vm3 = vcmp.eq.s32.totalorder %v7546_v12, 2 }
 0x28a   :  { %v1398_v3 = vsel %vm9025_vm13, nan, %v1397_v8  ;;  %v9028_v26 = vpack.c.bf16 %v9026_v9, %v9027_v21  ;;  %vm9029_vm6 = vweird.f32 %v9000_v55  ;;  %v1599_v47 = vsel %vm1597_vm9, %v7703_v27, %v1598_v40 }
 0x28b   :  { %v1501_v63 = vsel %vm9029_vm6, nan, %v1500_v36  ;;  %v9030_v45 = vxor.u32 2147483648, %v7703_v27  ;;  %vm1699_vm0 = vcmp.lt.s32.totalorder %v9031_v20, 2  ;;  %vm1700_vm2 = vcmp.eq.s32.totalorder %v9031_v20, 0 }
 0x28c   :  { %5648 = vmatmul.mubr.msk.bf16.vlgmr.msra.gmra.mrb[0].mxu1 %vm3604_vm14, %v9028_v26  ;;  %v3583_v12 = vpack.c.bf16 %v1501_v63, %v1398_v3  ;;  %vm1703_vm12 = vcmp.eq.s32.totalorder %v9031_v20, 2  ;;  %vm9032_vm11 = vweird.f32 %v6775_v18  ;;  %v1702_v40 = vsel %vm1700_vm2, %v7601_v43, %v1701_v30  ;;  %v4042_v18 = vld [vmem:[%s8772_s8 + $0x8] sm:$0xff]  ;;  %v4043_v43 = vld [vmem:[%s8772_s8 + $0x10] sm:$0xff] }
 0x28d   :  { %v1602_v11 = vsel %vm1600_vm3, %v9030_v45, %v7708_v28  ;;  %5651 = vmatprep.mubr.msk.bf16.mxu1 %vm3604_vm14, %v3580_v58  ;;  %v1705_v27 = vsel %vm1703_vm12, %v1704_v7, %v7606_v49  ;;  %vm1802_vm8 = vcmp.lt.s32.totalorder %v7741_v2, 2  ;;  %v4041_v28 = vld [vmem:[%s8772_s8] sm:$0xff]  ;;  %vm1803_vm1 = vcmp.eq.s32.totalorder %v7741_v2, 0  ;;  %v4044_v49 = vld [vmem:[%s8772_s8 + $0x18] sm:$0xff] }
 0x28e   :  { %v1603_v52 = vsel %vm1596_vm5, %v1599_v47, %v1602_v11  ;;  %v1706_v58 = vsel %vm1699_vm0, %v1702_v40, %v1705_v27  ;;  %vm1806_vm10 = vcmp.eq.s32.totalorder %v7741_v2, 2  ;;  %vm1905_vm4 = vcmp.lt.s32.totalorder %v7627_v15, 2  ;;  %v8188_v45 = vld [vmem:[%s8773_s5] ss:$0 sm:$0xff] }
 0x28f   :  { %v1604_v55 = vsel %vm9032_vm11, nan, %v1603_v52  ;;  %vm9033_vm5 = vweird.f32 %v6678_v6  ;;  %v1805_v2 = vsel %vm1803_vm1, %v7944_v42, %v1804_v10  ;;  %v1808_v7 = vsel %vm1806_vm10, %v1807_v14, %v7951_v62  ;;  %v4045_v62 = vld [vmem:[%s8772_s8 + $0x20] sm:$0xff] }
 0x290   :  { %v1707_v30 = vsel %vm9033_vm5, nan, %v1706_v58  ;;  %vm1906_vm13 = vcmp.eq.s32.totalorder %v7627_v15, 0  ;;  %v1809_v33 = vsel %vm1802_vm8, %v1805_v2, %v1808_v7  ;;  %v9034_v17 = vxor.u32 2147483648, %v7818_v48 }
 0x291   :  { %v3584_v32 = vpack.c.bf16 %v1707_v30, %v1604_v55  ;;  %vm1909_vm9 = vcmp.eq.s32.totalorder %v7627_v15, 2  ;;  %v1810_v6 = vsel %vm1800_vm7, nan, %v1809_v33  ;;  %v9035_v10 = vxor.u32 2147483648, %v7807_v44 }
 0x292   :  { %v1908_v34 = vsel %vm1906_vm13, %v7807_v44, %v9034_v17  ;;  %v5853_v5 = vpack.c.bf16 %v4042_v18, %v4041_v28  ;;  %v5857_v42 = vpack.c.bf16 %v4044_v49, %v4043_v43  ;;  %v5861_v15 = vpack.c.bf16 %v4046_v54, %v4045_v62 }
 0x293   :  { %v1911_v1 = vsel %vm1909_vm9, %v9035_v10, %v7818_v48  ;;  %v4047_v48 = vld [vmem:[%s8772_s8 + $0x30] sm:$0xff]  ;;  %v5869_v59 = vpack.c.bf16 %v4050_v46, %v4049_v61  ;;  %v5873_v29 = vpack.c.bf16 %v4052_v35, %v4051_v41  ;;  %v5881_v24 = vpack.c.bf16 %v4056_v31, %v4055_v0 }
 0x294   :  { %v1912_v14 = vsel %vm1905_vm4, %v1908_v34, %v1911_v1  ;;  %5652 = vmatmul.mubr.msk.bf16.gmra.mrb[4].mxu1 %vm3604_vm14, %v3581_v60  ;;  %5854 = vmatprep.subr.bf16.mxu0 %v5853_v5  ;;  %v5865_v50 = vpack.c.bf16 %v4048_v4, %v4047_v48  ;;  %v4053_v60 = vld [vmem:[%s8772_s8 + $0x60] sm:$0xff] }
 0x295   :  { %v1913_v22 = vsel %vm1903_vm15, nan, %v1912_v14  ;;  %5655 = vmatprep.mubr.msk.bf16.mxu1 %vm3604_vm14, %v3582_v16  ;;  %5856 = vmatpush3.bf16.msra.mxu0 %v5853_v5  ;;  %v5877_v13 = vpack.c.bf16 %v4054_v56, %v4053_v60  ;;  %vm5201_vm15 = vcmask 257024  }
 0x296   :  { %v3585_v44 = vpack.c.bf16 %v1913_v22, %v1810_v6  ;;  %5886 = vmatprep.subr.bf16.mxu1 %v5853_v5  ;;  %5858 = vmatprep.subr.bf16.mxu0 %v5857_v42 }
 0x297   :  { %5888 = vmatpush3.bf16.msra.mxu1 %v5853_v5 }
 0x298   :  { %5890 = vmatprep.subr.bf16.mxu1 %v5857_v42 }
 0x299   :  { %5860 = vmatpush3.bf16.msra.mxu0 %v5857_v42 }
 0x29a   :  { %5862 = vmatprep.subr.bf16.mxu0 %v5861_v15 }
 0x29b   :  { %5892 = vmatpush3.bf16.msra.mxu1 %v5857_v42 }
 0x29c   :  { %5656 = vmatmul.mubr.msk.bf16.gmra.mrb[8].mxu1 %vm3604_vm14, %v3583_v12  ;;  %5894 = vmatprep.subr.bf16.mxu1 %v5861_v15 }
 0x29d   :  { %5659 = vmatprep.mubr.msk.bf16.mxu1 %vm3604_vm14, %v3584_v32  ;;  %5864 = vmatpush3.bf16.msra.mxu0 %v5861_v15 }
 0x29e   :  { %5866 = vmatprep.subr.bf16.mxu0 %v5865_v50 }
 0x29f   :  { %5896 = vmatpush3.bf16.msra.mxu1 %v5861_v15 }
 0x2a0   :  { %5898 = vmatprep.subr.bf16.mxu1 %v5865_v50 }
 0x2a1   :  { %5868 = vmatpush3.bf16.msra.mxu0 %v5865_v50 }
 0x2a2   :  { %5870 = vmatprep.subr.bf16.mxu0 %v5869_v59 }
 0x2a3   :  { %5900 = vmatpush3.bf16.msra.mxu1 %v5865_v50 }
 0x2a4   :  { %5660 = vmatmul.mubr.msk.bf16.gmra.mrb[12].mxu1 %vm3604_vm14, %v3585_v44  ;;  %5902 = vmatprep.subr.bf16.mxu1 %v5869_v59  ;;  %vm4715_vm14 = vcmask 261120  }
 0x2a5   :  { %5872 = vmatpush3.bf16.msra.mxu0 %v5869_v59 }
 0x2a6   :  { %5874 = vmatprep.subr.bf16.mxu0 %v5873_v29 }
 0x2a7   :  { %5904 = vmatpush3.bf16.msra.mxu1 %v5869_v59 }
 0x2a8   :  { %5906 = vmatprep.subr.bf16.mxu1 %v5873_v29 }
 0x2a9   :  { %5876 = vmatpush3.bf16.msra.mxu0 %v5873_v29 }
 0x2aa   :  { %5878 = vmatprep.subr.bf16.mxu0 %v5877_v13 }
 0x2ab   :  { %5908 = vmatpush3.bf16.msra.mxu1 %v5873_v29 }
 0x2ac   :  { %5910 = vmatprep.subr.bf16.mxu1 %v5877_v13 }
 0x2ad   :  { %5880 = vmatpush3.bf16.msra.mxu0 %v5877_v13 }
 0x2ae   :  { %5882 = vmatprep.subr.bf16.mxu0 %v5881_v24 }
 0x2af   :  { %5912 = vmatpush3.bf16.msra.mxu1 %v5877_v13 }
 0x2b0   :  { %5914 = vmatprep.subr.bf16.mxu1 %v5881_v24 }
 0x2b1   :  { %5884 = vmatpush3.bf16.msra.mxu0 %v5881_v24 }
 0x2b3   :  { %5916 = vmatpush3.bf16.msra.mxu1 %v5881_v24 }
 0x2b9   :  { %v5667_v53 = vpop.f32.mrb[16].mxu0 }
 0x2ba   :  { %v3923_v25 = vpop.f32.mrb[17].mxu0 }
 0x2c0   :  { %v5670_v38 = vpop.f32.mrb[18].mxu0 }
 0x2c1   :  { %v3933_v23 = vpop.f32.mrb[19].mxu0 }
 0x2c4   :  { %v5673_v39 = vpop.f32.mrb[20].mxu0 }
 0x2c5   :  { %v3943_v57 = vpop.f32.mrb[21].mxu0 }
 0x2c8   :  { %v5676_v16 = vpop.f32.mrb[22].mxu0 }
 0x2c9   :  { %v3953_v37 = vpop.f32.mrb[23].mxu0 }
 0x2cc   :  { %v8175_v8 = vpop.f32.mrb[24].mxu0 }
 0x2cd   :  { %v3963_v19 = vpop.f32.mrb[25].mxu0 }
 0x2d0   :  { %v5682_v51 = vpop.f32.mrb[26].mxu0 }
 0x2d1   :  { %v3973_v3 = vpop.f32.mrb[27].mxu0 }
 0x2d4   :  { %v8177_v36 = vpop.f32.mrb[28].mxu0 }
 0x2d5   :  { %v8179_v9 = vpop.f32.mrb[29].mxu0 }
 0x2d9   :  { %v8181_v21 = vpop.f32.mrb[30].mxu0 }
 0x2da   :  { %v8183_v26 = vpop.f32.mrb[31].mxu0 }
 0x35f   :  { %v5649_v63 = vpop.f32.mrb[0].mxu1 }
 0x360   :  { %v4004_v47 = vadd.f32 %v5649_v63, %v3933_v23  ;;  %v3790_v11 = vpop.f32.mrb[1].mxu1 }
 0x361   :  { %v4002_v20 = vadd.f32 %v3923_v25, %v3790_v11  ;;  %v5650_v12 = vpop.f32.mrb[2].mxu1  ;;  %v6007_v11 = vld [vmem:[%s8774_s9 + $0x10] sm:$0xff]  }
 0x362   :  { %v4005_v52 = vadd.f32 %v5670_v38, %v5650_v12  ;;  %v3793_v55 = vpop.f32.mrb[3].mxu1  ;;  %v8194_v28 = vadd.f32 %v8188_v45, %v4004_v47  ;;  %v6005_v47 = vld [vmem:[%s8774_s9] sm:$0xff]  }
 0x363   :  { %v8191_v40 = vadd.f32 %v8188_v45, %v4002_v20  ;;  %v4003_v27 = vadd.f32 %v5667_v53, %v3793_v55  ;;  %5801 = vmatprep.subr.bf16.mxu0 %v6005_v47  ;;  %v6008_v20 = vld [vmem:[%s8774_s9 + $0x18] sm:$0xff]   ;;  %v6009_v12 = vld [vmem:[%s8774_s9 + $0x20] sm:$0xff]   ;;  %v6011_v55 = vld [vmem:[%s8774_s9 + $0x30] sm:$0xff]  }
 0x364   :  { %v8203_v43 = vadd.f32 %v8188_v45, %v4005_v52  ;;  %v4204_v32 = vmul.f32 %v8194_v28, %v8194_v28  ;;  %v6010_v52 = vld [vmem:[%s8774_s9 + $0x28] sm:$0xff]  }
 0x365   :  { %v8197_v58 = vadd.f32 %v8188_v45, %v4003_v27  ;;  %5721 = vmatprep.mubr.f32.mxu0 %v8191_v40  ;;  %v4202_v18 = vmul.f32 %v8191_v40, %v8191_v40  ;;  %v6012_v27 = vld [vmem:[%s8774_s9 + $0x38] sm:$0xff]  }
 0x366   :  { %v4205_v5 = vmul.f32 %v8203_v43, %v8203_v43 }
 0x367   :  { %v4203_v49 = vmul.f32 %v8197_v58, %v8197_v58  ;;  %v5653_v30 = vpop.f32.mrb[4].mxu1  ;;  %5722 = vmatmul.mubr.f32.vlgmr.msra.gmra.mrb[32].mxu0 %v8197_v58  ;;  %5777 = vmatprep.mubr.f32.mxu1 %v4202_v18 }
 0x368   :  { %v4008_v2 = vadd.f32 %v5653_v30, %v3953_v37  ;;  %v3806_v7 = vpop.f32.mrb[5].mxu1  ;;  %5724 = vmatprep.mubr.f32.mxu0 %v8194_v28  ;;  %5802 = vmatpush3.bf16.msra.mxu0 %v6005_v47 }
 0x369   :  { %v4006_v33 = vadd.f32 %v3943_v57, %v3806_v7  ;;  %v5654_v17 = vpop.f32.mrb[6].mxu1  ;;  %5778 = vmatmul.mubr.f32.vlgmr.msra.gmra.mrb[16].mxu1 %v4203_v49 }
 0x36a   :  { %v4009_v34 = vadd.f32 %v5676_v16, %v5654_v17  ;;  %v3809_v6 = vpop.f32.mrb[7].mxu1  ;;  %5780 = vmatprep.mubr.f32.mxu1 %v4204_v32  ;;  %v8218_v42 = vadd.f32 %v8188_v45, %v4008_v2 }
 0x36b   :  { %v8212_v10 = vadd.f32 %v8188_v45, %v4006_v33  ;;  %v4007_v1 = vadd.f32 %v5673_v39, %v3809_v6  ;;  %5725 = vmatmul.mubr.f32.gmra.mrb[34].mxu0 %v8203_v43 }
 0x36c   :  { %v8227_v54 = vadd.f32 %v8188_v45, %v4009_v34  ;;  %v4208_v4 = vmul.f32 %v8218_v42, %v8218_v42 }
 0x36d   :  { %v8221_v14 = vadd.f32 %v8188_v45, %v4007_v1  ;;  %5727 = vmatprep.mubr.f32.mxu0 %v8212_v10  ;;  %5781 = vmatmul.mubr.f32.gmra.mrb[18].mxu1 %v4205_v5  ;;  %v4206_v62 = vmul.f32 %v8212_v10, %v8212_v10 }
 0x36e   :  { %v4209_v29 = vmul.f32 %v8227_v54, %v8227_v54 }
 0x36f   :  { %v5657_v22 = vpop.f32.mrb[8].mxu1  ;;  %5728 = vmatmul.mubr.f32.gmra.mrb[36].mxu0 %v8221_v14  ;;  %5783 = vmatprep.mubr.f32.mxu1 %v4206_v62  ;;  %v4207_v44 = vmul.f32 %v8221_v14, %v8221_v14 }
 0x370   :  { %v4012_v15 = vadd.f32 %v5657_v22, %v3973_v3  ;;  %v3822_v48 = vpop.f32.mrb[9].mxu1  ;;  %5730 = vmatprep.mubr.f32.mxu0 %v8218_v42 }
 0x371   :  { %v4010_v50 = vadd.f32 %v3963_v19, %v3822_v48  ;;  %v5658_v61 = vpop.f32.mrb[10].mxu1  ;;  %5784 = vmatmul.mubr.f32.gmra.mrb[20].mxu1 %v4207_v44 }
 0x372   :  { %v4013_v46 = vadd.f32 %v5682_v51, %v5658_v61  ;;  %v3825_v59 = vpop.f32.mrb[11].mxu1  ;;  %5786 = vmatprep.mubr.f32.mxu1 %v4208_v4  ;;  %v8243_v60 = vadd.f32 %v8188_v45, %v4012_v15 }
 0x373   :  { %v8236_v41 = vadd.f32 %v8188_v45, %v4010_v50  ;;  %v4011_v35 = vadd.f32 %v8175_v8, %v3825_v59  ;;  %5731 = vmatmul.mubr.f32.gmra.mrb[38].mxu0 %v8227_v54 }
 0x374   :  { %v8252_v53 = vadd.f32 %v8188_v45, %v4013_v46  ;;  %v4212_v31 = vmul.f32 %v8243_v60, %v8243_v60 }
 0x375   :  { %v8246_v56 = vadd.f32 %v8188_v45, %v4011_v35  ;;  %5733 = vmatprep.mubr.f32.mxu0 %v8236_v41  ;;  %5787 = vmatmul.mubr.f32.gmra.mrb[22].mxu1 %v4209_v29  ;;  %v4210_v13 = vmul.f32 %v8236_v41, %v8236_v41 }
 0x376   :  { %v4213_v19 = vmul.f32 %v8252_v53, %v8252_v53 }
 0x377   :  { %v5661_v25 = vpop.f32.mrb[12].mxu1  ;;  %5734 = vmatmul.mubr.f32.gmra.mrb[40].mxu0 %v8246_v56  ;;  %5789 = vmatprep.mubr.f32.mxu1 %v4210_v13  ;;  %v4211_v38 = vmul.f32 %v8246_v56, %v8246_v56 }
 0x378   :  { %v4016_v23 = vadd.f32 %v5661_v25, %v8183_v26  ;;  %v3838_v0 = vpop.f32.mrb[13].mxu1  ;;  %5736 = vmatprep.mubr.f32.mxu0 %v8243_v60 }
 0x379   :  { %v4014_v39 = vadd.f32 %v8179_v9, %v3838_v0  ;;  %v5662_v24 = vpop.f32.mrb[14].mxu1  ;;  %5790 = vmatmul.mubr.f32.gmra.mrb[24].mxu1 %v4211_v38 }
 0x37a   :  { %v4017_v57 = vadd.f32 %v8181_v21, %v5662_v24  ;;  %v3841_v16 = vpop.f32.mrb[15].mxu1  ;;  %5792 = vmatprep.mubr.f32.mxu1 %v4212_v31  ;;  %v8271_v51 = vadd.f32 %v8188_v45, %v4016_v23 }
 0x37b   :  { %v8264_v37 = vadd.f32 %v8188_v45, %v4014_v39  ;;  %v4015_v8 = vadd.f32 %v8177_v36, %v3841_v16  ;;  %5737 = vmatmul.mubr.f32.gmra.mrb[42].mxu0 %v8252_v53 }
 0x37c   :  { %v8280_v21 = vadd.f32 %v8188_v45, %v4017_v57  ;;  %v4216_v26 = vmul.f32 %v8271_v51, %v8271_v51 }
 0x37d   :  { %v8274_v3 = vadd.f32 %v8188_v45, %v4015_v8  ;;  %5739 = vmatprep.mubr.f32.mxu0 %v8264_v37  ;;  %5793 = vmatmul.mubr.f32.gmra.mrb[26].mxu1 %v4213_v19  ;;  %v4214_v9 = vmul.f32 %v8264_v37, %v8264_v37  ;;  %v6006_v45 = vld [vmem:[%s8774_s9 + $0x8] sm:$0xff]  }
 0x37e   :  { %v4217_v63 = vmul.f32 %v8280_v21, %v8280_v21  ;;  %5803 = vmatprep.subr.bf16.mxu0 %v6006_v45 }
 0x37f   :  { %5740 = vmatmul.mubr.f32.gmra.mrb[44].mxu0 %v8274_v3  ;;  %5795 = vmatprep.mubr.f32.mxu1 %v4214_v9  ;;  %v4215_v36 = vmul.f32 %v8274_v3, %v8274_v3 }
 0x380   :  { %5742 = vmatprep.mubr.f32.mxu0 %v8271_v51  ;;  %5804 = vmatpush3.bf16.msra.mxu0 %v6006_v45 }
 0x381   :  { %5796 = vmatmul.mubr.f32.gmra.mrb[28].mxu1 %v4215_v36  ;;  %5805 = vmatprep.subr.bf16.mxu0 %v6007_v11 }
 0x382   :  { %5798 = vmatprep.mubr.f32.mxu1 %v4216_v26 }
 0x383   :  { %5743 = vmatmul.mubr.f32.gmra.mrb[46].mxu0 %v8280_v21 }
 0x384   :  { %5806 = vmatpush3.bf16.msra.mxu0 %v6007_v11 }
 0x385   :  { %5799 = vmatmul.mubr.f32.gmra.mrb[30].mxu1 %v4217_v63  ;;  %5807 = vmatprep.subr.bf16.mxu0 %v6008_v20 }
 0x388   :  { %5808 = vmatpush3.bf16.msra.mxu0 %v6008_v20 }
 0x389   :  { %5809 = vmatprep.subr.bf16.mxu0 %v6009_v12 }
 0x38c   :  { %5810 = vmatpush3.bf16.msra.mxu0 %v6009_v12 }
 0x38d   :  { %5811 = vmatprep.subr.bf16.mxu0 %v6010_v52 }
 0x390   :  { %5812 = vmatpush3.bf16.msra.mxu0 %v6010_v52 }
 0x391   :  { %5813 = vmatprep.subr.bf16.mxu0 %v6011_v55 }
 0x394   :  { %5814 = vmatpush3.bf16.msra.mxu0 %v6011_v55 }
 0x395   :  { %5815 = vmatprep.subr.bf16.mxu0 %v6012_v27 }
 0x398   :  { %5816 = vmatpush3.bf16.msra.mxu0 %v6012_v27 }
 0x43a   :  { %v8315_v18 = vpop.f32.mrb[32].mxu0 }
 0x43b   :  { %v4364_v49 = vmul.f32 %v8315_v18, %v8315_v18  ;;  %v8319_v30 = vpop.f32.mrb[33].mxu0  ;;  %v4412_v12 = vsub.f32 %v8197_v58, %v8315_v18 }
 0x43c   :  { %v4363_v2 = vmul.f32 %v8319_v30, %v8319_v30  ;;  %v5779_v7 = vpop.f32.mrb[16].mxu1 }
 0x43d   :  { %v4380_v32 = vsub.f32 %v5779_v7, %v4364_v49  ;;  %v4284_v33 = vpop.f32.mrb[17].mxu1 }
 0x43e   :  { %v4379_v17 = vsub.f32 %v4284_v33, %v4363_v2  ;;  %v8323_v34 = vpop.f32.mrb[34].mxu0  ;;  %v4411_v2 = vsub.f32 %v8191_v40, %v8319_v30 }
 0x43f   :  { %v4396_v6 = vmax.f32 %v4380_v32, 0.0  ;;  %v4366_v1 = vmul.f32 %v8323_v34, %v8323_v34  ;;  %v8327_v5 = vpop.f32.mrb[35].mxu0  ;;  %v4414_v7 = vsub.f32 %v8203_v43, %v8323_v34 }
 0x440   :  { %v4395_v62 = vmax.f32 %v4379_v17, 0.0  ;;  %v4365_v22 = vmul.f32 %v8327_v5, %v8327_v5  ;;  %v5782_v44 = vpop.f32.mrb[18].mxu1  ;;  %v4413_v58 = vsub.f32 %v8194_v28, %v8327_v5 }
 0x441   :  { %v4428_v15 = vadd.f32 1e-05, %v4396_v6  ;;  %v4382_v48 = vsub.f32 %v5782_v44, %v4366_v1  ;;  %v4294_v4 = vpop.f32.mrb[19].mxu1 }
 0x442   :  { %v4427_v50 = vadd.f32 1e-05, %v4395_v62  ;;  %v4381_v61 = vsub.f32 %v4294_v4, %v4365_v22  ;;  %v8331_v46 = vpop.f32.mrb[36].mxu0 }
 0x443   :  { %6079 = vrsqrt.f32 %v4428_v15  ;;  %v4398_v59 = vmax.f32 %v4382_v48, 0.0  ;;  %v4368_v35 = vmul.f32 %v8331_v46, %v8331_v46  ;;  %v8335_v29 = vpop.f32.mrb[37].mxu0  ;;  %v4416_v18 = vsub.f32 %v8221_v14, %v8331_v46  ;;  %v8370_v15 = vld [vmem:[%s8775_s6] ss:$0 sm:$0xff] }
 0x444   :  { %6081 = vrsqrt.f32 %v4427_v50  ;;  %v4397_v13 = vmax.f32 %v4381_v61, 0.0  ;;  %v4367_v25 = vmul.f32 %v8335_v29, %v8335_v29  ;;  %v5785_v38 = vpop.f32.mrb[20].mxu1  ;;  %v4415_v28 = vsub.f32 %v8212_v10, %v8335_v29 }
 0x445   :  { %v4430_v23 = vadd.f32 1e-05, %v4398_v59  ;;  %v4384_v0 = vsub.f32 %v5785_v38, %v4368_v35  ;;  %v4304_v31 = vpop.f32.mrb[21].mxu1 }
 0x446   :  { %v4429_v39 = vadd.f32 1e-05, %v4397_v13  ;;  %v4383_v24 = vsub.f32 %v4304_v31, %v4367_v25  ;;  %v8339_v57 = vpop.f32.mrb[38].mxu0 }
 0x447   :  { %6083 = vrsqrt.f32 %v4430_v23  ;;  %v4400_v16 = vmax.f32 %v4384_v0, 0.0  ;;  %v4370_v8 = vmul.f32 %v8339_v57, %v8339_v57  ;;  %v8343_v19 = vpop.f32.mrb[39].mxu0  ;;  %v4418_v50 = vsub.f32 %v8227_v54, %v8339_v57 }
 0x448   :  { %6085 = vrsqrt.f32 %v4429_v39  ;;  %v4399_v9 = vmax.f32 %v4383_v24, 0.0  ;;  %v4369_v36 = vmul.f32 %v8343_v19, %v8343_v19  ;;  %v5788_v26 = vpop.f32.mrb[22].mxu1 }
 0x449   :  { %v4386_v63 = vsub.f32 %v5788_v26, %v4370_v8  ;;  %v4314_v47 = vpop.f32.mrb[23].mxu1  ;;  %v4432_v52 = vadd.f32 1e-05, %v4400_v16 }
 0x44a   :  { %v4431_v45 = vadd.f32 1e-05, %v4399_v9  ;;  %v4385_v11 = vsub.f32 %v4314_v47, %v4369_v36  ;;  %v8347_v20 = vpop.f32.mrb[40].mxu0 }
 0x44b   :  { %v4402_v55 = vmax.f32 %v4386_v63, 0.0  ;;  %v4372_v27 = vmul.f32 %v8347_v20, %v8347_v20  ;;  %v8353_v49 = vpop.f32.mrb[41].mxu0 }
 0x44c   :  { %v4401_v32 = vmax.f32 %v4385_v11, 0.0  ;;  %v4371_v33 = vmul.f32 %v8353_v49, %v8353_v49  ;;  %v5791_v17 = vpop.f32.mrb[24].mxu1  ;;  %6087 = vrsqrt.f32 %v4431_v45  ;;  %v8392_v45 = vld [vmem:[%s8776_s7] ss:$0 sm:$0xff]  ;;  %v4417_v11 = vsub.f32 %v8218_v42, %v8343_v19 }
 0x44d   :  { %v6080_v6 = vpop.eup %6079  ;;  %v4434_v1 = vadd.f32 1e-05, %v4402_v55  ;;  %v4388_v62 = vsub.f32 %v5791_v17, %v4372_v27  ;;  %v4324_v22 = vpop.f32.mrb[25].mxu1  ;;  %6089 = vrsqrt.f32 %v4432_v52 }
 0x44e   :  { %v6082_v44 = vpop.eup %6081  ;;  %v4433_v40 = vadd.f32 1e-05, %v4401_v32  ;;  %v4387_v30 = vsub.f32 %v4324_v22, %v4371_v33  ;;  %v8365_v43 = vpop.f32.mrb[42].mxu0  ;;  %v4460_v34 = vmul.f32 %v6080_v6, %v4412_v12  ;;  %v4420_v12 = vsub.f32 %v8246_v56, %v8347_v20 }
 0x44f   :  { %v4404_v5 = vmax.f32 %v4388_v62, 0.0  ;;  %v4374_v48 = vmul.f32 %v8365_v43, %v8365_v43  ;;  %v8376_v4 = vpop.f32.mrb[43].mxu0  ;;  %6091 = vrsqrt.f32 %v4434_v1  ;;  %v4459_v0 = vmul.f32 %v6082_v44, %v4411_v2 }
 0x450   :  { %v4403_v61 = vmax.f32 %v4387_v30, 0.0  ;;  %v4373_v59 = vmul.f32 %v8376_v4, %v8376_v4  ;;  %v5794_v35 = vpop.f32.mrb[26].mxu1  ;;  %6093 = vrsqrt.f32 %v4433_v40  ;;  %v4483_v9 = vmul.f32 %v8370_v15, %v4460_v34 }
 0x451   :  { %v6084_v13 = vpop.eup %6083  ;;  %v4436_v25 = vadd.f32 1e-05, %v4404_v5  ;;  %v4390_v38 = vsub.f32 %v5794_v35, %v4374_v48  ;;  %v4334_v23 = vpop.f32.mrb[27].mxu1  ;;  %v4482_v42 = vmul.f32 %v8370_v15, %v4459_v0  ;;  %v4419_v1 = vsub.f32 %v8236_v41, %v8353_v49 }
 0x452   :  { %v6086_v31 = vpop.eup %6085  ;;  %v4462_v39 = vmul.f32 %v6084_v13, %v4414_v7  ;;  %v4435_v24 = vadd.f32 1e-05, %v4403_v61  ;;  %v4389_v16 = vsub.f32 %v4334_v23, %v4373_v59  ;;  %v8382_v8 = vpop.f32.mrb[44].mxu0  ;;  %v4506_v19 = vadd.f32 %v8392_v45, %v4483_v9 }
 0x453   :  { %v4461_v36 = vmul.f32 %v6086_v31, %v4413_v58  ;;  %6095 = vrsqrt.f32 %v4436_v25  ;;  %v4406_v26 = vmax.f32 %v4390_v38, 0.0  ;;  %v4376_v63 = vmul.f32 %v8382_v8, %v8382_v8  ;;  %v8387_v47 = vpop.f32.mrb[45].mxu0 }
 0x454   :  { %6097 = vrsqrt.f32 %v4435_v24  ;;  %v4405_v52 = vmax.f32 %v4389_v16, 0.0  ;;  %v5797_v55 = vpop.f32.mrb[28].mxu1  ;;  %v4485_v27 = vmul.f32 %v8370_v15, %v4462_v39  ;;  %v4375_v32 = vmul.f32 %v8387_v47, %v8387_v47 }
 0x455   :  { %v4484_v2 = vmul.f32 %v8370_v15, %v4461_v36  ;;  %v4438_v7 = vadd.f32 1e-05, %v4406_v26  ;;  %v4344_v33 = vpop.f32.mrb[29].mxu1  ;;  %v4392_v6 = vsub.f32 %v5797_v55, %v4376_v63  ;;  %v4422_v30 = vsub.f32 %v8252_v53, %v8365_v43 }
 0x456   :  { %v4437_v17 = vadd.f32 1e-05, %v4405_v52  ;;  %v8402_v58 = vpop.f32.mrb[46].mxu0  ;;  %v4391_v62 = vsub.f32 %v4344_v33, %v4375_v32  ;;  %v6088_v40 = vpop.eup %6087  ;;  %v4505_v35 = vadd.f32 %v8392_v45, %v4482_v42  ;;  %v4522_v13 = vmax.f32 %v4506_v19, 0.0 }
 0x457   :  { %6099 = vrsqrt.f32 %v4438_v7  ;;  %v4378_v22 = vmul.f32 %v8402_v58, %v8402_v58  ;;  %v8410_v44 = vpop.f32.mrb[47].mxu0  ;;  %v4408_v34 = vmax.f32 %v4392_v6, 0.0  ;;  %v6090_v61 = vpop.eup %6089  ;;  %v4507_v0 = vadd.f32 %v8392_v45, %v4484_v2 }
 0x458   :  { %6101 = vrsqrt.f32 %v4437_v17  ;;  %v4377_v5 = vmul.f32 %v8410_v44, %v8410_v44  ;;  %v5800_v48 = vpop.f32.mrb[30].mxu1  ;;  %v4407_v59 = vmax.f32 %v4391_v62, 0.0  ;;  %v4508_v53 = vadd.f32 %v8392_v45, %v4485_v27 }
 0x459   :  { %v4394_v41 = vsub.f32 %v5800_v48, %v4378_v22  ;;  %v4354_v49 = vpop.f32.mrb[31].mxu1  ;;  %v6092_v25 = vpop.eup %6091  ;;  %v4440_v38 = vadd.f32 1e-05, %v4408_v34  ;;  %v4521_v24 = vmax.f32 %v4505_v35, 0.0  ;;  %v4463_v16 = vmul.f32 %v6088_v40, %v4415_v28 }
 0x45a   :  { %v4393_v23 = vsub.f32 %v4354_v49, %v4377_v5  ;;  %v6094_v43 = vpop.eup %6093  ;;  %v4439_v31 = vadd.f32 1e-05, %v4407_v59  ;;  %v4523_v36 = vmax.f32 %v4507_v0, 0.0  ;;  %v4524_v26 = vmax.f32 %v4508_v53, 0.0 }
 0x45b   :  { %v4410_v39 = vmax.f32 %v4394_v41, 0.0  ;;  %6103 = vrsqrt.f32 %v4440_v38  ;;  %v4537_v55 = vpack.c.bf16 %v4522_v13, %v4521_v24  ;;  %v4464_v27 = vmul.f32 %v6090_v61, %v4416_v18 }
 0x45c   :  { %v4409_v9 = vmax.f32 %v4393_v23, 0.0  ;;  %6105 = vrsqrt.f32 %v4439_v31  ;;  %v4538_v32 = vpack.c.bf16 %v4524_v26, %v4523_v36  ;;  %v4486_v33 = vmul.f32 %v8370_v15, %v4463_v16 }
 0x45d   :  { %v6096_v63 = vpop.eup %6095  ;;  %v4442_v52 = vadd.f32 1e-05, %v4410_v39  ;;  %v4465_v17 = vmul.f32 %v6094_v43, %v4417_v11  ;;  %5817 = vmatprep.mubr.bf16.mxu0 %v4537_v55  ;;  %v4487_v10 = vmul.f32 %v8370_v15, %v4464_v27  ;;  %v4466_v29 = vmul.f32 %v6092_v25, %v4418_v50 }
 0x45e   :  { %v6098_v2 = vpop.eup %6097  ;;  %v4441_v7 = vadd.f32 1e-05, %v4409_v9  ;;  %5818 = vmatmul.mubr.bf16.vlgmr.msra.gmra.mrb[48].mxu0 %v4538_v32  ;;  %v4509_v14 = vadd.f32 %v8392_v45, %v4486_v33  ;;  %v4468_v18 = vmul.f32 %v6096_v63, %v4420_v12  ;;  %v4421_v6 = vsub.f32 %v8243_v60, %v8376_v4 }
 0x45f   :  { %6107 = vrsqrt.f32 %v4442_v52  ;;  %v4467_v28 = vmul.f32 %v6098_v2, %v4419_v1  ;;  %v4488_v46 = vmul.f32 %v8370_v15, %v4465_v17  ;;  %v4510_v42 = vadd.f32 %v8392_v45, %v4487_v10  ;;  %v5405_v17 = vld [vmem:[%s8777_s10] ss:$0 sm:$0xff] }
 0x460   :  { %6109 = vrsqrt.f32 %v4441_v7  ;;  %v4489_v54 = vmul.f32 %v8370_v15, %v4466_v29  ;;  %v4525_v19 = vmax.f32 %v4509_v14, 0.0  ;;  %v4491_v62 = vmul.f32 %v8370_v15, %v4468_v18 }
 0x461   :  { %v6100_v11 = vpop.eup %6099  ;;  %v4490_v57 = vmul.f32 %v8370_v15, %v4467_v28  ;;  %v4511_v1 = vadd.f32 %v8392_v45, %v4488_v46  ;;  %v4526_v40 = vmax.f32 %v4510_v42, 0.0  ;;  %v4424_v60 = vsub.f32 %v8274_v3, %v8382_v8 }
 0x462   :  { %v6102_v50 = vpop.eup %6101  ;;  %v4470_v22 = vmul.f32 %v6100_v11, %v4422_v30  ;;  %v4512_v56 = vadd.f32 %v8392_v45, %v4489_v54  ;;  %v4514_v34 = vadd.f32 %v8392_v45, %v4491_v62  ;;  %v4423_v49 = vsub.f32 %v8264_v37, %v8387_v47 }
 0x463   :  { %v4513_v20 = vadd.f32 %v8392_v45, %v4490_v57  ;;  %v4469_v12 = vmul.f32 %v6102_v50, %v4421_v6  ;;  %v4527_v4 = vmax.f32 %v4511_v1, 0.0  ;;  %v4539_v48 = vpack.c.bf16 %v4526_v40, %v4525_v19 }
 0x464   :  { %v4493_v5 = vmul.f32 %v8370_v15, %v4470_v22  ;;  %v4528_v61 = vmax.f32 %v4512_v56, 0.0  ;;  %v4530_v35 = vmax.f32 %v4514_v34, 0.0  ;;  %v4426_v23 = vsub.f32 %v8280_v21, %v8402_v58 }
 0x465   :  { %v4529_v59 = vmax.f32 %v4513_v20, 0.0  ;;  %v4492_v41 = vmul.f32 %v8370_v15, %v4469_v12  ;;  %v6104_v30 = vpop.eup %6103  ;;  %5821 = vmatprep.mubr.bf16.mxu0 %v4539_v48  ;;  %v4425_v39 = vsub.f32 %v8271_v51, %v8410_v44 }
 0x466   :  { %v4516_v13 = vadd.f32 %v8392_v45, %v4493_v5  ;;  %v6106_v25 = vpop.eup %6105  ;;  %v4540_v3 = vpack.c.bf16 %v4528_v61, %v4527_v4  ;;  %v4472_v38 = vmul.f32 %v6104_v30, %v4424_v60 }
 0x467   :  { %v4515_v8 = vadd.f32 %v8392_v45, %v4492_v41  ;;  %v4541_v0 = vpack.c.bf16 %v4530_v35, %v4529_v59  ;;  %v4471_v43 = vmul.f32 %v6106_v25, %v4423_v49 }
 0x468   :  { %v4532_v53 = vmax.f32 %v4516_v13, 0.0  ;;  %5822 = vmatmul.mubr.bf16.gmra.mrb[52].mxu0 %v4540_v3  ;;  %v4495_v47 = vmul.f32 %v8370_v15, %v4472_v38 }
 0x469   :  { %v6108_v31 = vpop.eup %6107  ;;  %v4531_v37 = vmax.f32 %v4515_v8, 0.0  ;;  %5825 = vmatprep.mubr.bf16.mxu0 %v4541_v0  ;;  %v4494_v16 = vmul.f32 %v8370_v15, %v4471_v43 }
 0x46a   :  { %v6110_v24 = vpop.eup %6109  ;;  %v4474_v9 = vmul.f32 %v6108_v31, %v4426_v23  ;;  %v4518_v26 = vadd.f32 %v8392_v45, %v4495_v47 }
 0x46b   :  { %v4542_v36 = vpack.c.bf16 %v4532_v53, %v4531_v37  ;;  %v4473_v21 = vmul.f32 %v6110_v24, %v4425_v39  ;;  %v4517_v58 = vadd.f32 %v8392_v45, %v4494_v16 }
 0x46c   :  { %v4497_v63 = vmul.f32 %v8370_v15, %v4474_v9  ;;  %v4534_v52 = vmax.f32 %v4518_v26, 0.0 }
 0x46d   :  { %v4496_v51 = vmul.f32 %v8370_v15, %v4473_v21  ;;  %v4533_v44 = vmax.f32 %v4517_v58, 0.0 }
 0x46e   :  { %v4520_v55 = vadd.f32 %v8392_v45, %v4497_v63 }
 0x46f   :  { %v4519_v27 = vadd.f32 %v8392_v45, %v4496_v51  ;;  %v4543_v2 = vpack.c.bf16 %v4534_v52, %v4533_v44 }
 0x470   :  { %v4536_v7 = vmax.f32 %v4520_v55, 0.0  ;;  %5826 = vmatmul.mubr.bf16.gmra.mrb[56].mxu0 %v4542_v36 }
 0x471   :  { %v4535_v32 = vmax.f32 %v4519_v27, 0.0  ;;  %5829 = vmatprep.mubr.bf16.mxu0 %v4543_v2 }
 0x473   :  { %v4544_v33 = vpack.c.bf16 %v4536_v7, %v4535_v32 }
 0x478   :  { %5830 = vmatmul.mubr.bf16.gmra.mrb[60].mxu0 %v4544_v33 }
 0x531   :  { %v5819_v10 = vpop.f32.mrb[48].mxu0 }
 0x532   :  { %v8468_v29 = vadd.f32 %v5819_v10, %v5405_v17  ;;  %v4650_v15 = vpop.f32.mrb[49].mxu0 }
 0x533   :  { %v8470_v28 = vadd.f32 %v5405_v17, %v4650_v15  ;;  %v5820_v14 = vpop.f32.mrb[50].mxu0 }
 0x534   :  { %v8472_v45 = vadd.f32 %v5820_v14, %v5405_v17  ;;  %v4653_v46 = vpop.f32.mrb[51].mxu0  ;;  %v4722_v18 = vsel %vm4715_vm14, %v8468_v29, 0.0 }
 0x535   :  { %v8476_v11 = vadd.f32 %v5405_v17, %v4653_v46  ;;  %4723 = vadd.xlane.f32.xlu1 %v4722_v18  ;;  %v4716_v6 = vsel %vm4715_vm14, %v8470_v28, 0.0 }
 0x536   :  { %4717 = vadd.xlane.f32.xlu0 %v4716_v6  ;;  %v4725_v42 = vsel %vm4715_vm14, %v8472_v45, 0.0 }
 0x537   :  { %v4719_v54 = vsel %vm4715_vm14, %v8476_v11, 0.0 }
 0x539   :  { %4726 = vadd.xlane.f32.xlu1 %v4725_v42 }
 0x53a   :  { %4720 = vadd.xlane.f32.xlu0 %v4719_v54 }
 0x53b   :  { %v5823_v57 = vpop.f32.mrb[52].mxu0 }
 0x53c   :  { %v4666_v50 = vpop.f32.mrb[53].mxu0  ;;  %v8486_v22 = vadd.f32 %v5823_v57, %v5405_v17 }
 0x53d   :  { %v8484_v19 = vadd.f32 %v5405_v17, %v4666_v50  ;;  %v5824_v1 = vpop.f32.mrb[54].mxu0 }
 0x53e   :  { %v4669_v62 = vpop.f32.mrb[55].mxu0  ;;  %v8492_v20 = vadd.f32 %v5824_v1, %v5405_v17  ;;  %v4734_v4 = vsel %vm4715_vm14, %v8486_v22, 0.0 }
 0x53f   :  { %v8488_v40 = vadd.f32 %v5405_v17, %v4669_v62  ;;  %v4728_v56 = vsel %vm4715_vm14, %v8484_v19, 0.0 }
 0x540   :  { %4729 = vadd.xlane.f32.xlu0 %v4728_v56  ;;  %v4737_v61 = vsel %vm4715_vm14, %v8492_v20, 0.0 }
 0x541   :  { %v4731_v12 = vsel %vm4715_vm14, %v8488_v40, 0.0 }
 0x542   :  { %4732 = vadd.xlane.f32.xlu1 %v4731_v12 }
 0x543   :  { %v5827_v60 = vpop.f32.mrb[56].mxu0 }
 0x544   :  { %v4682_v34 = vpop.f32.mrb[57].mxu0  ;;  %4735 = vadd.xlane.f32.xlu0 %v4734_v4  ;;  %v8502_v41 = vadd.f32 %v5827_v60, %v5405_v17 }
 0x545   :  { %v8498_v5 = vadd.f32 %v5405_v17, %v4682_v34  ;;  %v5828_v48 = vpop.f32.mrb[58].mxu0 }
 0x546   :  { %v4685_v59 = vpop.f32.mrb[59].mxu0  ;;  %4738 = vadd.xlane.f32.xlu1 %v4737_v61  ;;  %v8508_v35 = vadd.f32 %v5828_v48, %v5405_v17  ;;  %v4746_v3 = vsel %vm4715_vm14, %v8502_v41, 0.0 }
 0x547   :  { %v8504_v30 = vadd.f32 %v5405_v17, %v4685_v59  ;;  %v4740_v49 = vsel %vm4715_vm14, %v8498_v5, 0.0 }
 0x548   :  { %4741 = vadd.xlane.f32.xlu0 %v4740_v49  ;;  %v4749_v0 = vsel %vm4715_vm14, %v8508_v35, 0.0 }
 0x549   :  { %v4743_v13 = vsel %vm4715_vm14, %v8504_v30, 0.0 }
 0x54a   :  { %4744 = vadd.xlane.f32.xlu1 %v4743_v13 }
 0x54b   :  { %v5831_v25 = vpop.f32.mrb[60].mxu0 }
 0x54c   :  { %4747 = vadd.xlane.f32.xlu0 %v4746_v3  ;;  %v4698_v8 = vpop.f32.mrb[61].mxu0  ;;  %v8518_v43 = vadd.f32 %v5831_v25, %v5405_v17 }
 0x54d   :  { %v8514_v38 = vadd.f32 %v5405_v17, %v4698_v8  ;;  %v5832_v23 = vpop.f32.mrb[62].mxu0 }
 0x54e   :  { %4750 = vadd.xlane.f32.xlu1 %v4749_v0  ;;  %v4701_v53 = vpop.f32.mrb[63].mxu0  ;;  %v8524_v37 = vadd.f32 %v5832_v23, %v5405_v17  ;;  %v4758_v24 = vsel %vm4715_vm14, %v8518_v43, 0.0 }
 0x54f   :  { %v8520_v31 = vadd.f32 %v5405_v17, %v4701_v53  ;;  %v4752_v39 = vsel %vm4715_vm14, %v8514_v38, 0.0 }
 0x550   :  { %4753 = vadd.xlane.f32.xlu0 %v4752_v39  ;;  %v4761_v16 = vsel %vm4715_vm14, %v8524_v37, 0.0 }
 0x551   :  { %v4755_v47 = vsel %vm4715_vm14, %v8520_v31, 0.0 }
 0x552   :  { %4756 = vadd.xlane.f32.xlu1 %v4755_v47 }
 0x554   :  { %4759 = vadd.xlane.f32.xlu0 %v4758_v24 }
 0x556   :  { %4762 = vadd.xlane.f32.xlu1 %v4761_v16 }
 0x5c2   :  { %v4724_v9 = vpop.xlane.xlu1 %4723 }
 0x5c3   :  { %v4767_v36 = vmul.f32 0.03125, %v4724_v9  ;;  %v4718_v26 = vpop.xlane.xlu0 %4717 }
 0x5c4   :  { %v4765_v21 = vmul.f32 0.03125, %v4718_v26 }
 0x5c5   :  { %v8533_v58 = vsub.f32 %v8468_v29, %v4767_v36 }
 0x5c6   :  { %v8536_v63 = vsub.f32 %v8470_v28, %v4765_v21  ;;  %v4727_v52 = vpop.xlane.xlu1 %4726 }
 0x5c7   :  { %v4768_v51 = vmul.f32 0.03125, %v4727_v52  ;;  %v4721_v44 = vpop.xlane.xlu0 %4720  ;;  %v4799_v33 = vmul.f32 %v8533_v58, %v8533_v58 }
 0x5c8   :  { %v4766_v55 = vmul.f32 0.03125, %v4721_v44  ;;  %v4797_v27 = vmul.f32 %v8536_v63, %v8536_v63 }
 0x5c9   :  { %v8541_v2 = vsub.f32 %v8472_v45, %v4768_v51  ;;  %v4819_v14 = vsel %vm4715_vm14, %v4799_v33, 0.0 }
 0x5ca   :  { %v8544_v7 = vsub.f32 %v8476_v11, %v4766_v55  ;;  %v4813_v32 = vsel %vm4715_vm14, %v4797_v27, 0.0 }
 0x5cb   :  { %4814 = vadd.xlane.f32.xlu0 %v4813_v32  ;;  %v4800_v45 = vmul.f32 %v8541_v2, %v8541_v2 }
 0x5cc   :  { %v4798_v10 = vmul.f32 %v8544_v7, %v8544_v7 }
 0x5cd   :  { %v4730_v17 = vpop.xlane.xlu0 %4729  ;;  %v4822_v50 = vsel %vm4715_vm14, %v4800_v45, 0.0 }
 0x5ce   :  { %v4769_v29 = vmul.f32 0.03125, %v4730_v17  ;;  %v4816_v28 = vsel %vm4715_vm14, %v4798_v10, 0.0 }
 0x5cf   :  { %v4733_v15 = vpop.xlane.xlu1 %4732  ;;  %4817 = vadd.xlane.f32.xlu1 %v4816_v28  ;;  %4820 = vadd.xlane.f32.xlu0 %v4819_v14  ;;  %v6013_v14 = vld [vmem:[%s8778_s13] sm:$0xff]  }
 0x5d0   :  { %v8556_v46 = vsub.f32 %v8484_v19, %v4769_v29  ;;  %v4770_v18 = vmul.f32 0.03125, %v4733_v15  ;;  %5833 = vmatprep.subr.bf16.mxu1 %v6013_v14 }
 0x5d1   :  { %v4736_v11 = vpop.xlane.xlu0 %4735  ;;  %5834 = vmatpush3.bf16.msra.mxu1 %v6013_v14 }
 0x5d2   :  { %v8559_v6 = vsub.f32 %v8488_v40, %v4770_v18  ;;  %v4771_v42 = vmul.f32 0.03125, %v4736_v11  ;;  %v4801_v54 = vmul.f32 %v8556_v46, %v8556_v46 }
 0x5d3   :  { %v4739_v57 = vpop.xlane.xlu1 %4738  ;;  %4823 = vadd.xlane.f32.xlu1 %v4822_v50 }
 0x5d4   :  { %v8565_v1 = vsub.f32 %v8486_v22, %v4771_v42  ;;  %v4772_v62 = vmul.f32 0.03125, %v4739_v57  ;;  %v4825_v19 = vsel %vm4715_vm14, %v4801_v54, 0.0  ;;  %v4802_v56 = vmul.f32 %v8559_v6, %v8559_v6 }
 0x5d5   :  { %v4742_v12 = vpop.xlane.xlu0 %4741  ;;  %4826 = vadd.xlane.f32.xlu0 %v4825_v19 }
 0x5d6   :  { %v8571_v40 = vsub.f32 %v8492_v20, %v4772_v62  ;;  %v4773_v60 = vmul.f32 0.03125, %v4742_v12  ;;  %v4803_v4 = vmul.f32 %v8565_v1, %v8565_v1  ;;  %v4828_v22 = vsel %vm4715_vm14, %v4802_v56, 0.0 }
 0x5d7   :  { %v4745_v34 = vpop.xlane.xlu1 %4744  ;;  %4829 = vadd.xlane.f32.xlu1 %v4828_v22 }
 0x5d8   :  { %v8577_v48 = vsub.f32 %v8498_v5, %v4773_v60  ;;  %v4774_v61 = vmul.f32 0.03125, %v4745_v34  ;;  %v4831_v59 = vsel %vm4715_vm14, %v4803_v4, 0.0  ;;  %v4804_v49 = vmul.f32 %v8571_v40, %v8571_v40 }
 0x5d9   :  { %v4748_v13 = vpop.xlane.xlu0 %4747  ;;  %4832 = vadd.xlane.f32.xlu0 %v4831_v59 }
 0x5da   :  { %v8583_v20 = vsub.f32 %v8504_v30, %v4774_v61  ;;  %v4775_v25 = vmul.f32 0.03125, %v4748_v13  ;;  %v4805_v3 = vmul.f32 %v8577_v48, %v8577_v48  ;;  %v4834_v5 = vsel %vm4715_vm14, %v4804_v49, 0.0 }
 0x5db   :  { %v4751_v8 = vpop.xlane.xlu1 %4750  ;;  %4835 = vadd.xlane.f32.xlu1 %v4834_v5 }
 0x5dc   :  { %v8589_v23 = vsub.f32 %v8502_v41, %v4775_v25  ;;  %v4776_v0 = vmul.f32 0.03125, %v4751_v8  ;;  %v4837_v53 = vsel %vm4715_vm14, %v4805_v3, 0.0  ;;  %v4806_v39 = vmul.f32 %v8583_v20, %v8583_v20  ;;  %v8637_v8 = vld [vmem:[%s8779_s11] ss:$0 sm:$0xff] }
 0x5dd   :  { %4838 = vadd.xlane.f32.xlu0 %v4837_v53  ;;  %v4754_v30 = vpop.xlane.xlu0 %4753 }
 0x5de   :  { %v8595_v47 = vsub.f32 %v8508_v35, %v4776_v0  ;;  %v4777_v24 = vmul.f32 0.03125, %v4754_v30  ;;  %v4807_v16 = vmul.f32 %v8589_v23, %v8589_v23  ;;  %v4840_v41 = vsel %vm4715_vm14, %v4806_v39, 0.0  ;;  %v8643_v30 = vld [vmem:[%s8780_s12] ss:$0 sm:$0xff] }
 0x5df   :  { %v4757_v9 = vpop.xlane.xlu1 %4756  ;;  %4841 = vadd.xlane.f32.xlu1 %v4840_v41 }
 0x5e0   :  { %v8601_v36 = vsub.f32 %v8514_v38, %v4777_v24  ;;  %v4778_v26 = vmul.f32 0.03125, %v4757_v9  ;;  %v4843_v21 = vsel %vm4715_vm14, %v4807_v16, 0.0  ;;  %v4808_v52 = vmul.f32 %v8595_v47, %v8595_v47 }
 0x5e1   :  { %4844 = vadd.xlane.f32.xlu0 %v4843_v21  ;;  %v4760_v35 = vpop.xlane.xlu0 %4759 }
 0x5e2   :  { %v8607_v51 = vsub.f32 %v8520_v31, %v4778_v26  ;;  %v4779_v44 = vmul.f32 0.03125, %v4760_v35  ;;  %v4809_v55 = vmul.f32 %v8601_v36, %v8601_v36  ;;  %v4846_v38 = vsel %vm4715_vm14, %v4808_v52, 0.0 }
 0x5e3   :  { %v4763_v27 = vpop.xlane.xlu1 %4762  ;;  %4847 = vadd.xlane.f32.xlu1 %v4846_v38 }
 0x5e4   :  { %v8613_v32 = vsub.f32 %v8518_v43, %v4779_v44  ;;  %v4780_v33 = vmul.f32 0.03125, %v4763_v27  ;;  %v4849_v17 = vsel %vm4715_vm14, %v4809_v55, 0.0  ;;  %v4810_v10 = vmul.f32 %v8607_v51, %v8607_v51 }
 0x5e5   :  { %4850 = vadd.xlane.f32.xlu0 %v4849_v17 }
 0x5e6   :  { %v8619_v31 = vsub.f32 %v8524_v37, %v4780_v33  ;;  %v4811_v29 = vmul.f32 %v8613_v32, %v8613_v32  ;;  %v4852_v15 = vsel %vm4715_vm14, %v4810_v10, 0.0  ;;  %v6014_v37 = vld [vmem:[%s8778_s13 + $0x8] sm:$0xff]  }
 0x5e7   :  { %4853 = vadd.xlane.f32.xlu1 %v4852_v15  ;;  %5835 = vmatprep.subr.bf16.mxu1 %v6014_v37 }
 0x5e8   :  { %v4855_v43 = vsel %vm4715_vm14, %v4811_v29, 0.0  ;;  %v4812_v28 = vmul.f32 %v8619_v31, %v8619_v31  ;;  %5836 = vmatpush3.bf16.msra.mxu1 %v6014_v37 }
 0x5e9   :  { %4856 = vadd.xlane.f32.xlu0 %v4855_v43 }
 0x5ea   :  { %v4858_v45 = vsel %vm4715_vm14, %v4812_v28, 0.0 }
 0x5eb   :  { %4859 = vadd.xlane.f32.xlu1 %v4858_v45 }
 0x658   :  { %v4815_v18 = vpop.xlane.xlu0 %4814 }
 0x659   :  { %v4861_v11 = vmul.f32 0.03125, %v4815_v18 }
 0x65b   :  { %v4877_v42 = vadd.f32 1e-05, %v4861_v11 }
 0x65c   :  { %v4818_v54 = vpop.xlane.xlu1 %4817  ;;  %v4821_v57 = vpop.xlane.xlu0 %4820 }
 0x65d   :  { %6111 = vrsqrt.f32 %v4877_v42  ;;  %v4862_v50 = vmul.f32 0.03125, %v4818_v54  ;;  %v4863_v62 = vmul.f32 0.03125, %v4821_v57 }
 0x65f   :  { %v4878_v19 = vadd.f32 1e-05, %v4862_v50  ;;  %v4879_v56 = vadd.f32 1e-05, %v4863_v62 }
 0x660   :  { %v4824_v12 = vpop.xlane.xlu1 %4823 }
 0x661   :  { %6113 = vrsqrt.f32 %v4878_v19  ;;  %v4864_v60 = vmul.f32 0.03125, %v4824_v12 }
 0x662   :  { %v4827_v4 = vpop.xlane.xlu0 %4826  ;;  %6115 = vrsqrt.f32 %v4879_v56 }
 0x663   :  { %v4865_v34 = vmul.f32 0.03125, %v4827_v4  ;;  %v4880_v22 = vadd.f32 1e-05, %v4864_v60 }
 0x664   :  { %v4830_v59 = vpop.xlane.xlu1 %4829 }
 0x665   :  { %v4881_v61 = vadd.f32 1e-05, %v4865_v34  ;;  %6117 = vrsqrt.f32 %v4880_v22  ;;  %v4866_v49 = vmul.f32 0.03125, %v4830_v59 }
 0x666   :  { %v4833_v13 = vpop.xlane.xlu0 %4832 }
 0x667   :  { %6119 = vrsqrt.f32 %v4881_v61  ;;  %v4867_v25 = vmul.f32 0.03125, %v4833_v13  ;;  %v6112_v3 = vpop.eup %6111  ;;  %v4882_v5 = vadd.f32 1e-05, %v4866_v49 }
 0x668   :  { %v4909_v0 = vmul.f32 %v6112_v3, %v8536_v63  ;;  %v4836_v39 = vpop.xlane.xlu1 %4835 }
 0x669   :  { %v4883_v53 = vadd.f32 1e-05, %v4867_v25  ;;  %6121 = vrsqrt.f32 %v4882_v5  ;;  %v4868_v24 = vmul.f32 0.03125, %v4836_v39 }
 0x66a   :  { %v4839_v16 = vpop.xlane.xlu0 %4838  ;;  %v4931_v41 = vmul.f32 %v8637_v8, %v4909_v0 }
 0x66b   :  { %6123 = vrsqrt.f32 %v4883_v53  ;;  %v4869_v9 = vmul.f32 0.03125, %v4839_v16  ;;  %v6114_v26 = vpop.eup %6113  ;;  %v4884_v21 = vadd.f32 1e-05, %v4868_v24 }
 0x66c   :  { %v6116_v52 = vpop.eup %6115  ;;  %v4910_v35 = vmul.f32 %v6114_v26, %v8544_v7  ;;  %v4842_v44 = vpop.xlane.xlu1 %4841  ;;  %v4953_v55 = vadd.f32 %v8643_v30, %v4931_v41 }
 0x66d   :  { %v4885_v63 = vadd.f32 1e-05, %v4869_v9  ;;  %v4911_v27 = vmul.f32 %v6116_v52, %v8533_v58  ;;  %6125 = vrsqrt.f32 %v4884_v21  ;;  %v4870_v38 = vmul.f32 0.03125, %v4842_v44 }
 0x66e   :  { %v4845_v33 = vpop.xlane.xlu0 %4844  ;;  %v4932_v10 = vmul.f32 %v8637_v8, %v4910_v35  ;;  %v4969_v18 = vmax.f32 %v4953_v55, 0.0 }
 0x66f   :  { %6127 = vrsqrt.f32 %v4885_v63  ;;  %v4871_v17 = vmul.f32 0.03125, %v4845_v33  ;;  %v6118_v29 = vpop.eup %6117  ;;  %v4933_v15 = vmul.f32 %v8637_v8, %v4911_v27  ;;  %v4886_v43 = vadd.f32 1e-05, %v4870_v38 }
 0x670   :  { %v4912_v7 = vmul.f32 %v6118_v29, %v8541_v2  ;;  %v4848_v45 = vpop.xlane.xlu1 %4847  ;;  %v4954_v37 = vadd.f32 %v8643_v30, %v4932_v10 }
 0x671   :  { %v6120_v28 = vpop.eup %6119  ;;  %v4887_v14 = vadd.f32 1e-05, %v4871_v17  ;;  %v4955_v58 = vadd.f32 %v8643_v30, %v4933_v15  ;;  %6129 = vrsqrt.f32 %v4886_v43  ;;  %v4872_v42 = vmul.f32 0.03125, %v4848_v45 }
 0x672   :  { %v4913_v11 = vmul.f32 %v6120_v28, %v8556_v46  ;;  %v4851_v54 = vpop.xlane.xlu0 %4850  ;;  %v4934_v57 = vmul.f32 %v8637_v8, %v4912_v7  ;;  %v4970_v62 = vmax.f32 %v4954_v37, 0.0 }
 0x673   :  { %6131 = vrsqrt.f32 %v4887_v14  ;;  %v4873_v50 = vmul.f32 0.03125, %v4851_v54  ;;  %v6122_v19 = vpop.eup %6121  ;;  %v4971_v56 = vmax.f32 %v4955_v58, 0.0  ;;  %v4888_v2 = vadd.f32 1e-05, %v4872_v42 }
 0x674   :  { %v4935_v12 = vmul.f32 %v8637_v8, %v4913_v11  ;;  %v4956_v4 = vadd.f32 %v8643_v30, %v4934_v57  ;;  %v4914_v34 = vmul.f32 %v6122_v19, %v8559_v6  ;;  %v4854_v46 = vpop.xlane.xlu1 %4853  ;;  %v4985_v61 = vpack.c.bf16 %v4970_v62, %v4969_v18 }
 0x675   :  { %v6124_v60 = vpop.eup %6123  ;;  %v4889_v22 = vadd.f32 1e-05, %v4873_v50  ;;  %6133 = vrsqrt.f32 %v4888_v2  ;;  %v4874_v49 = vmul.f32 0.03125, %v4854_v46 }
 0x676   :  { %v4915_v59 = vmul.f32 %v6124_v60, %v8565_v1  ;;  %v4857_v13 = vpop.xlane.xlu0 %4856  ;;  %v4957_v25 = vadd.f32 %v8643_v30, %v4935_v12  ;;  %v4972_v3 = vmax.f32 %v4956_v4, 0.0  ;;  %5837 = vmatprep.mubr.msk.bf16.mxu1 %vm4715_vm14, %v4985_v61  ;;  %v4936_v0 = vmul.f32 %v8637_v8, %v4914_v34 }
 0x677   :  { %6135 = vrsqrt.f32 %v4889_v22  ;;  %v4875_v5 = vmul.f32 0.03125, %v4857_v13  ;;  %v6126_v53 = vpop.eup %6125  ;;  %v4890_v39 = vadd.f32 1e-05, %v4874_v49 }
 0x678   :  { %v4937_v6 = vmul.f32 %v8637_v8, %v4915_v59  ;;  %v4916_v16 = vmul.f32 %v6126_v53, %v8571_v40  ;;  %v4860_v9 = vpop.xlane.xlu1 %4859  ;;  %v4986_v41 = vpack.c.bf16 %v4972_v3, %v4971_v56  ;;  %v4958_v26 = vadd.f32 %v8643_v30, %v4936_v0 }
 0x679   :  { %v6128_v24 = vpop.eup %6127  ;;  %v4891_v1 = vadd.f32 1e-05, %v4875_v5  ;;  %6137 = vrsqrt.f32 %v4890_v39  ;;  %v4876_v52 = vmul.f32 0.03125, %v4860_v9  ;;  %v4973_v35 = vmax.f32 %v4957_v25, 0.0 }
 0x67a   :  { %v4917_v21 = vmul.f32 %v6128_v24, %v8577_v48  ;;  %5838 = vmatmul.mubr.msk.bf16.vlgmr.msra.gmra.mrb[32].mxu1 %vm4715_vm14, %v4986_v41  ;;  %v4974_v63 = vmax.f32 %v4958_v26, 0.0  ;;  %v4938_v44 = vmul.f32 %v8637_v8, %v4916_v16  ;;  %v4959_v55 = vadd.f32 %v8643_v30, %v4937_v6 }
 0x67b   :  { %6139 = vrsqrt.f32 %v4891_v1  ;;  %v6130_v27 = vpop.eup %6129  ;;  %v4892_v40 = vadd.f32 1e-05, %v4876_v52 }
 0x67c   :  { %v4939_v38 = vmul.f32 %v8637_v8, %v4917_v21  ;;  %v4918_v17 = vmul.f32 %v6130_v27, %v8583_v20  ;;  %v4987_v10 = vpack.c.bf16 %v4974_v63, %v4973_v35  ;;  %v4960_v48 = vadd.f32 %v8643_v30, %v4938_v44 }
 0x67d   :  { %v6132_v33 = vpop.eup %6131  ;;  %6141 = vrsqrt.f32 %v4892_v40  ;;  %v4975_v15 = vmax.f32 %v4959_v55, 0.0 }
 0x67e   :  { %v4919_v29 = vmul.f32 %v6132_v33, %v8589_v23  ;;  %5841 = vmatprep.mubr.msk.bf16.mxu1 %vm4715_vm14, %v4987_v10  ;;  %v4976_v43 = vmax.f32 %v4960_v48, 0.0  ;;  %v4940_v28 = vmul.f32 %v8637_v8, %v4918_v17  ;;  %v4961_v7 = vadd.f32 %v8643_v30, %v4939_v38 }
 0x67f   :  { %v6134_v14 = vpop.eup %6133 }
 0x680   :  { %v4941_v45 = vmul.f32 %v8637_v8, %v4919_v29  ;;  %v4920_v20 = vmul.f32 %v6134_v14, %v8595_v47  ;;  %v4988_v18 = vpack.c.bf16 %v4976_v43, %v4975_v15  ;;  %v4962_v58 = vadd.f32 %v8643_v30, %v4940_v28 }
 0x681   :  { %v6136_v37 = vpop.eup %6135  ;;  %v4977_v11 = vmax.f32 %v4961_v7, 0.0 }
 0x682   :  { %v4921_v23 = vmul.f32 %v6136_v37, %v8601_v36  ;;  %5842 = vmatmul.mubr.msk.bf16.gmra.mrb[36].mxu1 %vm4715_vm14, %v4988_v18  ;;  %v4978_v42 = vmax.f32 %v4962_v58, 0.0  ;;  %v4942_v54 = vmul.f32 %v8637_v8, %v4920_v20  ;;  %v4963_v57 = vadd.f32 %v8643_v30, %v4941_v45 }
 0x683   :  { %v6138_v50 = vpop.eup %6137 }
 0x684   :  { %v4943_v62 = vmul.f32 %v8637_v8, %v4921_v23  ;;  %v4922_v56 = vmul.f32 %v6138_v50, %v8607_v51  ;;  %v4989_v47 = vpack.c.bf16 %v4978_v42, %v4977_v11  ;;  %v4964_v2 = vadd.f32 %v8643_v30, %v4942_v54 }
 0x685   :  { %v6140_v19 = vpop.eup %6139  ;;  %v4979_v36 = vmax.f32 %v4963_v57, 0.0 }
 0x686   :  { %v4923_v12 = vmul.f32 %v6140_v19, %v8613_v32  ;;  %5845 = vmatprep.mubr.msk.bf16.mxu1 %vm4715_vm14, %v4989_v47  ;;  %v4980_v60 = vmax.f32 %v4964_v2, 0.0  ;;  %v4944_v4 = vmul.f32 %v8637_v8, %v4922_v56  ;;  %v4965_v34 = vadd.f32 %v8643_v30, %v4943_v62 }
 0x687   :  { %v6142_v22 = vpop.eup %6141 }
 0x688   :  { %v4945_v46 = vmul.f32 %v8637_v8, %v4923_v12  ;;  %v4924_v61 = vmul.f32 %v6142_v22, %v8619_v31  ;;  %v4990_v59 = vpack.c.bf16 %v4980_v60, %v4979_v36  ;;  %v4966_v51 = vadd.f32 %v8643_v30, %v4944_v4  ;;  %v5416_v31 = vld [vmem:[%s8781_s14] ss:$0 sm:$0xff] }
 0x689   :  { %v4981_v49 = vmax.f32 %v4965_v34, 0.0 }
 0x68a   :  { %5846 = vmatmul.mubr.msk.bf16.gmra.mrb[40].mxu1 %vm4715_vm14, %v4990_v59  ;;  %v4982_v32 = vmax.f32 %v4966_v51, 0.0  ;;  %v4946_v13 = vmul.f32 %v8637_v8, %v4924_v61  ;;  %v4967_v25 = vadd.f32 %v8643_v30, %v4945_v46 }
 0x68c   :  { %v4991_v3 = vpack.c.bf16 %v4982_v32, %v4981_v49  ;;  %v4968_v5 = vadd.f32 %v8643_v30, %v4946_v13  ;;  %v4983_v0 = vmax.f32 %v4967_v25, 0.0 }
 0x68e   :  { %5849 = vmatprep.mubr.msk.bf16.mxu1 %vm4715_vm14, %v4991_v3  ;;  %v4984_v53 = vmax.f32 %v4968_v5, 0.0 }
 0x690   :  { %v4992_v39 = vpack.c.bf16 %v4984_v53, %v4983_v0 }
 0x692   :  { %5850 = vmatmul.mubr.msk.bf16.gmra.mrb[44].mxu1 %vm4715_vm14, %v4992_v39 }
 0x74d   :  { %v5839_v6 = vpop.f32.mrb[32].mxu1 }
 0x74e   :  { %v5083_v24 = vadd.f32 %v5839_v6, %v5416_v31  ;;  %v5074_v16 = vpop.f32.mrb[33].mxu1 }
 0x74f   :  { %v5075_v8 = vadd.f32 %v5416_v31, %v5074_v16  ;;  %v5840_v1 = vpop.f32.mrb[34].mxu1 }
 0x750   :  { %v5445_v9 = vpack.c.bf16 %v5083_v24, %v5083_v24  ;;  %v5086_v41 = vadd.f32 %v5840_v1, %v5416_v31  ;;  %v5077_v30 = vpop.f32.mrb[35].mxu1 }
 0x751   :  { %v5443_v26 = vpack.c.bf16 %v5075_v8, %v5075_v8  ;;  %v5078_v21 = vadd.f32 %v5416_v31, %v5077_v30 }
 0x752   :  { %5204 = vst.msk [vmem:[%s8782_s15 + $0x8] sm:$0xf] %vm5201_vm15, %v5445_v9  ;;  %v5446_v52 = vpack.c.bf16 %v5086_v41, %v5086_v41 }
 0x753   :  { %5202 = vst.msk [vmem:[%s8782_s15] sm:$0xf] %vm5201_vm15, %v5443_v26  ;;  %v5444_v35 = vpack.c.bf16 %v5078_v21, %v5078_v21 }
 0x754   :  { %5205 = vst.msk [vmem:[%s8782_s15 + $0xc] sm:$0xf] %vm5201_vm15, %v5446_v52 }
 0x755   :  { %5203 = vst.msk [vmem:[%s8782_s15 + $0x4] sm:$0xf] %vm5201_vm15, %v5444_v35  ;;  %v5843_v63 = vpop.f32.mrb[36].mxu1 }
 0x756   :  { %v5099_v44 = vadd.f32 %v5843_v63, %v5416_v31  ;;  %v5090_v55 = vpop.f32.mrb[37].mxu1 }
 0x757   :  { %v5091_v27 = vadd.f32 %v5416_v31, %v5090_v55  ;;  %v5844_v40 = vpop.f32.mrb[38].mxu1 }
 0x758   :  { %v5449_v38 = vpack.c.bf16 %v5099_v44, %v5099_v44  ;;  %v5102_v33 = vadd.f32 %v5844_v40, %v5416_v31  ;;  %v5093_v17 = vpop.f32.mrb[39].mxu1 }
 0x759   :  { %v5447_v10 = vpack.c.bf16 %v5091_v27, %v5091_v27  ;;  %v5094_v48 = vadd.f32 %v5416_v31, %v5093_v17 }
 0x75a   :  { %5208 = vst.msk [vmem:[%s8782_s15 + $0x18] sm:$0xf] %vm5201_vm15, %v5449_v38  ;;  %v5450_v29 = vpack.c.bf16 %v5102_v33, %v5102_v33 }
 0x75b   :  { %5206 = vst.msk [vmem:[%s8782_s15 + $0x10] sm:$0xf] %vm5201_vm15, %v5447_v10  ;;  %v5448_v15 = vpack.c.bf16 %v5094_v48, %v5094_v48 }
 0x75c   :  { %5209 = vst.msk [vmem:[%s8782_s15 + $0x1c] sm:$0xf] %vm5201_vm15, %v5450_v29 }
 0x75d   :  { %5207 = vst.msk [vmem:[%s8782_s15 + $0x14] sm:$0xf] %vm5201_vm15, %v5448_v15  ;;  %v5847_v43 = vpop.f32.mrb[40].mxu1 }
 0x75e   :  { %v5115_v28 = vadd.f32 %v5847_v43, %v5416_v31  ;;  %v5106_v7 = vpop.f32.mrb[41].mxu1 }
 0x75f   :  { %v5107_v14 = vadd.f32 %v5416_v31, %v5106_v7  ;;  %v5848_v45 = vpop.f32.mrb[42].mxu1 }
 0x760   :  { %v5453_v37 = vpack.c.bf16 %v5115_v28, %v5115_v28  ;;  %v5118_v20 = vadd.f32 %v5848_v45, %v5416_v31  ;;  %v5109_v18 = vpop.f32.mrb[43].mxu1 }
 0x761   :  { %v5451_v58 = vpack.c.bf16 %v5107_v14, %v5107_v14  ;;  %v5110_v23 = vadd.f32 %v5416_v31, %v5109_v18 }
 0x762   :  { %5212 = vst.msk [vmem:[%s8782_s15 + $0x28] sm:$0xf] %vm5201_vm15, %v5453_v37  ;;  %v5454_v11 = vpack.c.bf16 %v5118_v20, %v5118_v20 }
 0x763   :  { %5210 = vst.msk [vmem:[%s8782_s15 + $0x20] sm:$0xf] %vm5201_vm15, %v5451_v58  ;;  %v5452_v42 = vpack.c.bf16 %v5110_v23, %v5110_v23 }
 0x764   :  { %5213 = vst.msk [vmem:[%s8782_s15 + $0x2c] sm:$0xf] %vm5201_vm15, %v5454_v11 }
 0x765   :  { %5211 = vst.msk [vmem:[%s8782_s15 + $0x24] sm:$0xf] %vm5201_vm15, %v5452_v42  ;;  %v5851_v54 = vpop.f32.mrb[44].mxu1 }
 0x766   :  { %v5131_v57 = vadd.f32 %v5851_v54, %v5416_v31  ;;  %v5122_v50 = vpop.f32.mrb[45].mxu1 }
 0x767   :  { %v5123_v62 = vadd.f32 %v5416_v31, %v5122_v50  ;;  %v5852_v19 = vpop.f32.mrb[46].mxu1 }
 0x768   :  { %v5457_v56 = vpack.c.bf16 %v5131_v57, %v5131_v57  ;;  %v5134_v47 = vadd.f32 %v5852_v19, %v5416_v31  ;;  %v5125_v2 = vpop.f32.mrb[47].mxu1 }
 0x769   :  { %v5455_v12 = vpack.c.bf16 %v5123_v62, %v5123_v62  ;;  %v5126_v36 = vadd.f32 %v5416_v31, %v5125_v2 }
 0x76a   :  { %5216 = vst.msk [vmem:[%s8782_s15 + $0x38] sm:$0xf] %vm5201_vm15, %v5457_v56  ;;  %v5458_v60 = vpack.c.bf16 %v5134_v47, %v5134_v47 }
 0x76b   :  { %5214 = vst.msk [vmem:[%s8782_s15 + $0x30] sm:$0xf] %vm5201_vm15, %v5455_v12  ;;  %v5456_v4 = vpack.c.bf16 %v5126_v36, %v5126_v36 }
 0x76c   :  { %5217 = vst.msk [vmem:[%s8782_s15 + $0x3c] sm:$0xf] %vm5201_vm15, %v5458_v60 }
 0x76d   :  { %5215 = vst.msk [vmem:[%s8782_s15 + $0x34] sm:$0xf] %vm5201_vm15, %v5456_v4 }

// kernel: giganet_encoder_forward.5
= control target key start
LH: loop header
LB: loop body
LE: loop exit
PB: predicated region body
PF: predicated region fallthrough
CT: control target
= control target key end

     0   :  { %s8429_s0 = inlined_call_operand.vmem [shape: bf16[16,32], index: 0, kind: input, shape index: {}]   ;;  %s8430_s1 = inlined_call_operand.vmem [shape: bf16[128,32], index: 1, kind: input, shape index: {}]   ;;  %s8431_s2 = inlined_call_operand.vmem [shape: f32[2,8,8], index: 2, kind: input, shape index: {}]   ;;  %s8432_s3 = inlined_call_operand.vmem [shape: f32[16,1], index: 3, kind: input, shape index: {}]   ;;  %s8433_s4 = inlined_call_operand.vmem [shape: bf16[2,32,128], index: 4, kind: input, shape index: {}]   ;;  %s8434_s5 = inlined_call_operand.vmem [shape: f32[2,1,128], index: 5, kind: input, shape index: {}]   ;;  %s8435_s6 = inlined_call_operand.vmem [shape: bf16[2,32,64], index: 6, kind: input, shape index: {}]   ;;  %s8436_s7 = inlined_call_operand.vmem [shape: f32[2,1,64], index: 7, kind: input, shape index: {}]   ;;  %s8437_s8 = inlined_call_operand.vmem [shape: bf16[2,32,32], index: 8, kind: input, shape index: {}]   ;;  %s8438_s9 = inlined_call_operand.vmem [shape: bf16[2,32,32], index: 9, kind: input, shape index: {}]   ;;  %s8439_s10 = inlined_call_operand.vmem [shape: bf16[2,32,32], index: 10, kind: input, shape index: {}]   ;;  %s8440_s11 = inlined_call_operand.vmem [shape: bf16[2,32,128], index: 11, kind: input, shape index: {}]   ;;  %s8441_s12 = inlined_call_operand.vmem [shape: f32[2,1,128], index: 12, kind: input, shape index: {}]   ;;  %s8442_s13 = inlined_call_operand.vmem [shape: bf16[2,128,32], index: 13, kind: input, shape index: {}]   ;;  %s8443_s14 = inlined_call_operand.vmem [shape: f32[2,5,32], index: 14, kind: input, shape index: {}]   ;;  %s8444_s15 = inlined_call_operand.vmem [shape: f32[2,5,32], index: 15, kind: input, shape index: {}]   ;;  %s8445_s16 = inlined_call_operand.vmem [shape: f32[2,3,32], index: 16, kind: input, shape index: {}]   ;;  %s8446_s17 = inlined_call_operand.vmem [shape: f32[32,8], index: 17, kind: input, shape index: {}]   ;;  %s8447_s18 = inlined_call_operand.vmem [shape: f32[8,32], index: 18, kind: input, shape index: {}]   ;;  %s8448_s19 = inlined_call_operand.hbm [shape: f32[16,32], index: 19, kind: output, shape index: {}]  }
   0x1   :  { %8499 = sst [smem:[#allocation38_spill]] %s8429_s0 }
   0x2   :  { %8500 = sst [smem:[#allocation39_spill]] %s8430_s1 }
   0x3   :  { %8501 = sst [smem:[#allocation40_spill]] %s8431_s2 }
   0x4   :  { %8502 = sst [smem:[#allocation41_spill]] %s8432_s3 }
   0x5   :  { %s8503_s20 = sld [smem:[#allocation39_spill]]  ;;  %vm221_vm0 = vcmask 261120   ;;  %s8504_s1 = sld [smem:[#allocation38_spill]] }
   0xb   :  { %v6239_v0 = vld [vmem:[%s8503_s20] sm:$0xff]   ;;  %v6244_v1 = vld [vmem:[%s8503_s20 + $0x8] sm:$0xff]   ;;  %v6249_v2 = vld [vmem:[%s8503_s20 + $0x10] sm:$0xff]  }
   0xc   :  { %v5364_v3 = vunpack.c.l.bf16 %v6239_v0  ;;  %v5368_v4 = vunpack.c.l.bf16 %v6244_v1  ;;  %v5365_v5 = vunpack.c.h.bf16 %v6239_v0  ;;  %v5369_v6 = vunpack.c.h.bf16 %v6244_v1  ;;  %v6258_v7 = vld [vmem:[%s8503_s20 + $0x18] sm:$0xff]   ;;  %v6263_v8 = vld [vmem:[%s8503_s20 + $0x20] sm:$0xff]   ;;  %v6272_v13 = vld [vmem:[%s8503_s20 + $0x28] sm:$0xff]  }
   0xd   :  { %v5372_v9 = vunpack.c.l.bf16 %v6249_v2  ;;  %v5373_v10 = vunpack.c.h.bf16 %v6249_v2  ;;  %v5376_v11 = vunpack.c.l.bf16 %v6258_v7  ;;  %v5377_v12 = vunpack.c.h.bf16 %v6258_v7  ;;  %v6277_v14 = vld [vmem:[%s8503_s20 + $0x30] sm:$0xff]   ;;  %v6282_v15 = vld [vmem:[%s8503_s20 + $0x38] sm:$0xff]   ;;  %v5359_v40 = vld [vmem:[%s8504_s1] sm:$0xff]  }
   0xe   :  { %v222_v16 = vsel %vm221_vm0, %v5364_v3, 0.0  ;;  %v228_v17 = vsel %vm221_vm0, %v5368_v4, 0.0  ;;  %v225_v18 = vsel %vm221_vm0, %v5365_v5, 0.0  ;;  %v231_v19 = vsel %vm221_vm0, %v5369_v6, 0.0 }
   0xf   :  { %223 = vadd.xlane.f32.xlu0 %v222_v16  ;;  %229 = vadd.xlane.f32.xlu1 %v228_v17  ;;  %v234_v20 = vsel %vm221_vm0, %v5372_v9, 0.0  ;;  %v237_v21 = vsel %vm221_vm0, %v5373_v10, 0.0  ;;  %v240_v22 = vsel %vm221_vm0, %v5376_v11, 0.0  ;;  %v243_v23 = vsel %vm221_vm0, %v5377_v12, 0.0 }
  0x10   :  { %v5380_v24 = vunpack.c.l.bf16 %v6263_v8  ;;  %v5381_v25 = vunpack.c.h.bf16 %v6263_v8  ;;  %v5384_v26 = vunpack.c.l.bf16 %v6272_v13  ;;  %v5385_v27 = vunpack.c.h.bf16 %v6272_v13 }
  0x11   :  { %v5388_v28 = vunpack.c.l.bf16 %v6277_v14  ;;  %v5389_v29 = vunpack.c.h.bf16 %v6277_v14  ;;  %v5392_v32 = vunpack.c.l.bf16 %v6282_v15  ;;  %v5393_v33 = vunpack.c.h.bf16 %v6282_v15 }
  0x12   :  { %v246_v30 = vsel %vm221_vm0, %v5380_v24, 0.0  ;;  %v249_v31 = vsel %vm221_vm0, %v5381_v25, 0.0  ;;  %v252_v34 = vsel %vm221_vm0, %v5384_v26, 0.0  ;;  %v255_v35 = vsel %vm221_vm0, %v5385_v27, 0.0 }
  0x13   :  { %226 = vadd.xlane.f32.xlu0 %v225_v18  ;;  %232 = vadd.xlane.f32.xlu1 %v231_v19  ;;  %v258_v36 = vsel %vm221_vm0, %v5388_v28, 0.0  ;;  %v261_v37 = vsel %vm221_vm0, %v5389_v29, 0.0  ;;  %v264_v38 = vsel %vm221_vm0, %v5392_v32, 0.0  ;;  %v267_v39 = vsel %vm221_vm0, %v5393_v33, 0.0 }
  0x14   :  { %v6343_v41 = vunpack.c.l.bf16 %v5359_v40  ;;  %v6345_v42 = vunpack.c.h.bf16 %v5359_v40 }
  0x17   :  { %235 = vadd.xlane.f32.xlu0 %v234_v20  ;;  %238 = vadd.xlane.f32.xlu1 %v237_v21 }
  0x1b   :  { %241 = vadd.xlane.f32.xlu0 %v240_v22  ;;  %244 = vadd.xlane.f32.xlu1 %v243_v23 }
  0x1f   :  { %247 = vadd.xlane.f32.xlu0 %v246_v30  ;;  %250 = vadd.xlane.f32.xlu1 %v249_v31 }
  0x23   :  { %253 = vadd.xlane.f32.xlu0 %v252_v34  ;;  %256 = vadd.xlane.f32.xlu1 %v255_v35 }
  0x27   :  { %259 = vadd.xlane.f32.xlu0 %v258_v36  ;;  %262 = vadd.xlane.f32.xlu1 %v261_v37 }
  0x2b   :  { %265 = vadd.xlane.f32.xlu0 %v264_v38  ;;  %268 = vadd.xlane.f32.xlu1 %v267_v39 }
  0x2c   :  { %24 = vsyncpa [#allocation3], 0  ;;  %v434_v43 = vsel %vm221_vm0, %v6343_v41, 0.0  ;;  %v437_v44 = vsel %vm221_vm0, %v6345_v42, 0.0  ;;  %vm6127_vm1 = vmmov 0   ;;  %s6128_s24 = smov 32  }
  0x2d   :  { %s8518_s2 = sld [smem:[#allocation40_spill]]  ;;  %s6130_s3 = smov 64   ;;  %vm1281_vm2 = vcmask 64512   ;;  %vm2151_vm3 = vcmask 1041409   ;;  %vm2154_vm4 = vcmask 1042434   ;;  %vm2157_vm5 = vcmask 1043459  }
  0x2e   :  { %s8521_s1 = sld [smem:[#allocation41_spill]]  ;;  %vm2160_vm6 = vcmask 1044484   ;;  %vm2163_vm7 = vcmask 1045509   ;;  %vm2166_vm8 = vcmask 1046534   ;;  %vm2169_vm9 = vcmask 1047559  }
  0x2f   :  { %435 = vadd.xlane.f32.xlu0 %v434_v43  ;;  %438 = vadd.xlane.f32.xlu1 %v437_v44 }
  0x9c   :  { %v224_v45 = vpop.xlane.xlu0 %223  ;;  %v230_v46 = vpop.xlane.xlu1 %229 }
  0x9d   :  { %v271_v47 = vmul.f32 0.03125, %v224_v45  ;;  %v273_v48 = vmul.f32 0.03125, %v230_v46 }
  0x9f   :  { %v6353_v49 = vsub.f32 %v5364_v3, %v271_v47  ;;  %v6357_v50 = vsub.f32 %v5368_v4, %v273_v48 }
  0xa0   :  { %v227_v51 = vpop.xlane.xlu0 %226  ;;  %v233_v52 = vpop.xlane.xlu1 %232 }
  0xa1   :  { %v272_v53 = vmul.f32 0.03125, %v227_v51  ;;  %v274_v54 = vmul.f32 0.03125, %v233_v52  ;;  %v303_v55 = vmul.f32 %v6353_v49, %v6353_v49  ;;  %v305_v56 = vmul.f32 %v6357_v50, %v6357_v50 }
  0xa3   :  { %v6365_v57 = vsub.f32 %v5365_v5, %v272_v53  ;;  %v6369_v58 = vsub.f32 %v5369_v6, %v274_v54  ;;  %v319_v59 = vsel %vm221_vm0, %v303_v55, 0.0  ;;  %v325_v62 = vsel %vm221_vm0, %v305_v56, 0.0 }
  0xa4   :  { %v236_v60 = vpop.xlane.xlu0 %235  ;;  %320 = vadd.xlane.f32.xlu0 %v319_v59  ;;  %v239_v61 = vpop.xlane.xlu1 %238 }
  0xa5   :  { %v275_v63 = vmul.f32 0.03125, %v236_v60  ;;  %v276_v3 = vmul.f32 0.03125, %v239_v61  ;;  %v304_v4 = vmul.f32 %v6365_v57, %v6365_v57  ;;  %v306_v0 = vmul.f32 %v6369_v58, %v6369_v58 }
  0xa7   :  { %v6379_v1 = vsub.f32 %v5372_v9, %v275_v63  ;;  %v6383_v5 = vsub.f32 %v5373_v10, %v276_v3  ;;  %v322_v6 = vsel %vm221_vm0, %v304_v4, 0.0  ;;  %v328_v18 = vsel %vm221_vm0, %v306_v0, 0.0 }
  0xa8   :  { %v242_v16 = vpop.xlane.xlu0 %241  ;;  %323 = vadd.xlane.f32.xlu1 %v322_v6  ;;  %326 = vadd.xlane.f32.xlu0 %v325_v62  ;;  %v245_v17 = vpop.xlane.xlu1 %244 }
  0xa9   :  { %v277_v19 = vmul.f32 0.03125, %v242_v16  ;;  %v278_v20 = vmul.f32 0.03125, %v245_v17  ;;  %v307_v21 = vmul.f32 %v6379_v1, %v6379_v1  ;;  %v308_v9 = vmul.f32 %v6383_v5, %v6383_v5 }
  0xab   :  { %v6393_v2 = vsub.f32 %v5376_v11, %v277_v19  ;;  %v6397_v10 = vsub.f32 %v5377_v12, %v278_v20  ;;  %v331_v22 = vsel %vm221_vm0, %v307_v21, 0.0  ;;  %v334_v31 = vsel %vm221_vm0, %v308_v9, 0.0 }
  0xac   :  { %v248_v23 = vpop.xlane.xlu0 %247  ;;  %329 = vadd.xlane.f32.xlu1 %v328_v18  ;;  %332 = vadd.xlane.f32.xlu0 %v331_v22  ;;  %v251_v30 = vpop.xlane.xlu1 %250 }
  0xad   :  { %v279_v34 = vmul.f32 0.03125, %v248_v23  ;;  %v280_v35 = vmul.f32 0.03125, %v251_v30  ;;  %v309_v36 = vmul.f32 %v6393_v2, %v6393_v2  ;;  %v310_v11 = vmul.f32 %v6397_v10, %v6397_v10  ;;  %v5847_v30 = vld [vmem:[%s8435_s6] sm:$0xff]  }
  0xae   :  { %5551 = vmatprep.subr.bf16.mxu1 %v5847_v30 }
  0xaf   :  { %v6407_v7 = vsub.f32 %v5380_v24, %v279_v34  ;;  %v6411_v12 = vsub.f32 %v5381_v25, %v280_v35  ;;  %v337_v37 = vsel %vm221_vm0, %v309_v36, 0.0  ;;  %v340_v40 = vsel %vm221_vm0, %v310_v11, 0.0  ;;  %5552 = vmatpush3.bf16.msra.mxu1 %v5847_v30  ;;  %v5849_v35 = vld [vmem:[%s8433_s4] sm:$0xff]   ;;  %v5850_v36 = vld [vmem:[%s8433_s4 + $0x8] sm:$0xff]  }
  0xb0   :  { %v254_v38 = vpop.xlane.xlu0 %253  ;;  %335 = vadd.xlane.f32.xlu1 %v334_v31  ;;  %338 = vadd.xlane.f32.xlu0 %v337_v37  ;;  %v257_v39 = vpop.xlane.xlu1 %256  ;;  %v5848_v31 = vld [vmem:[%s8435_s6 + $0x8] sm:$0xff]   ;;  %v8452_v34 = vmov 0.0  }
  0xb1   :  { %v281_v43 = vmul.f32 0.03125, %v254_v38  ;;  %v282_v44 = vmul.f32 0.03125, %v257_v39  ;;  %v311_v45 = vmul.f32 %v6407_v7, %v6407_v7  ;;  %v312_v24 = vmul.f32 %v6411_v12, %v6411_v12  ;;  %5553 = vmatprep.subr.bf16.mxu1 %v5848_v31  ;;  %5543 = vmatprep.subr.bf16.mxu0 %v8452_v34 }
  0xb2   :  { %5544 = vmatpush3.bf16.msra.mxu0 %v5849_v35  ;;  %5547 = vmatprep.mubr.msk.bf16.mxu0 %vm6127_vm1, %v8452_v34  ;;  %v102_v38 = vlaneseq }
  0xb3   :  { %v6421_v8 = vsub.f32 %v5384_v26, %v281_v43  ;;  %v6425_v25 = vsub.f32 %v5385_v27, %v282_v44  ;;  %v343_v46 = vsel %vm221_vm0, %v311_v45, 0.0  ;;  %v346_v51 = vsel %vm221_vm0, %v312_v24, 0.0  ;;  %5554 = vmatpush3.bf16.msra.mxu1 %v5848_v31  ;;  %5545 = vmatprep.subr.bf16.mxu0 %v8452_v34 }
  0xb4   :  { %v260_v47 = vpop.xlane.xlu0 %259  ;;  %341 = vadd.xlane.f32.xlu1 %v340_v40  ;;  %344 = vadd.xlane.f32.xlu0 %v343_v46  ;;  %v263_v48 = vpop.xlane.xlu1 %262  ;;  %v6491_v24 = vshrl.u32 %v102_v38, 7 }
  0xb5   :  { %v283_v52 = vmul.f32 0.03125, %v260_v47  ;;  %v284_v53 = vmul.f32 0.03125, %v263_v48  ;;  %v313_v54 = vmul.f32 %v6421_v8, %v6421_v8  ;;  %v314_v26 = vmul.f32 %v6425_v25, %v6425_v25 }
  0xb6   :  { %5546 = vmatpush3.bf16.msra.mxu0 %v5850_v36  ;;  %v6530_v38 = vsub.s32 0, %v6491_v24 }
  0xb7   :  { %v6435_v13 = vsub.f32 %v5388_v28, %v283_v52  ;;  %v6439_v27 = vsub.f32 %v5389_v29, %v284_v53  ;;  %v349_v55 = vsel %vm221_vm0, %v313_v54, 0.0  ;;  %v352_v60 = vsel %vm221_vm0, %v314_v26, 0.0 }
  0xb8   :  { %v266_v56 = vpop.xlane.xlu0 %265  ;;  %347 = vadd.xlane.f32.xlu1 %v346_v51  ;;  %350 = vadd.xlane.f32.xlu0 %v349_v55  ;;  %v269_v59 = vpop.xlane.xlu1 %268  ;;  %v6494_v54 = vsub.s32 1, %v6491_v24 }
  0xb9   :  { %v285_v61 = vmul.f32 0.03125, %v266_v56  ;;  %v286_v62 = vmul.f32 0.03125, %v269_v59  ;;  %v315_v63 = vmul.f32 %v6435_v13, %v6435_v13  ;;  %v316_v28 = vmul.f32 %v6439_v27, %v6439_v27  ;;  %v6499_v56 = vld [vmem:[%s8443_s14] sm:$0x1f] }
  0xbb   :  { %v6449_v14 = vsub.f32 %v5392_v32, %v285_v61  ;;  %v6453_v29 = vsub.f32 %v5393_v33, %v286_v62  ;;  %v355_v3 = vsel %vm221_vm0, %v315_v63, 0.0  ;;  %v358_v0 = vsel %vm221_vm0, %v316_v28, 0.0  ;;  %v5242_v61 = vld [vmem:[%s8443_s14 + $0x8] sm:$0x1f] }
  0xbc   :  { %353 = vadd.xlane.f32.xlu1 %v352_v60  ;;  %356 = vadd.xlane.f32.xlu0 %v355_v3  ;;  %v436_v4 = vpop.xlane.xlu0 %435  ;;  %v439_v6 = vpop.xlane.xlu1 %438  ;;  %v6506_v28 = vrot.slane %v6499_v56, %v6494_v54 }
  0xbd   :  { %v440_v16 = vmul.f32 0.03125, %v436_v4  ;;  %v441_v17 = vmul.f32 0.03125, %v439_v6  ;;  %v317_v18 = vmul.f32 %v6449_v14, %v6449_v14  ;;  %v318_v32 = vmul.f32 %v6453_v29, %v6453_v29  ;;  %v6511_v6 = vld [vmem:[%s8444_s15] sm:$0x1f] }
  0xbf   :  { %v6462_v15 = vsub.f32 %v6343_v41, %v440_v16  ;;  %v6465_v33 = vsub.f32 %v6345_v42, %v441_v17  ;;  %v361_v19 = vsel %vm221_vm0, %v317_v18, 0.0  ;;  %v364_v20 = vsel %vm221_vm0, %v318_v32, 0.0 }
  0xc0   :  { %359 = vadd.xlane.f32.xlu1 %v358_v0  ;;  %362 = vadd.xlane.f32.xlu0 %v361_v19  ;;  %v6514_v16 = vrot.slane %v5242_v61, %v6494_v54  ;;  %v5243_v19 = vld [vmem:[%s8444_s15 + $0x8] sm:$0x1f] }
  0xc1   :  { %v444_v21 = vmul.f32 %v6462_v15, %v6462_v15  ;;  %v445_v9 = vmul.f32 %v6465_v33, %v6465_v33 }
  0xc3   :  { %v446_v22 = vsel %vm221_vm0, %v444_v21, 0.0  ;;  %v449_v23 = vsel %vm221_vm0, %v445_v9, 0.0 }
  0xc4   :  { %365 = vadd.xlane.f32.xlu1 %v364_v20  ;;  %447 = vadd.xlane.f32.xlu0 %v446_v22  ;;  %v6523_v22 = vrot.slane %v6511_v6, %v6494_v54 }
  0xc8   :  { %450 = vadd.xlane.f32.xlu1 %v449_v23 }
 0x131   :  { %v321_v11 = vpop.xlane.xlu0 %320 }
 0x132   :  { %v367_v37 = vmul.f32 0.03125, %v321_v11 }
 0x134   :  { %v383_v39 = vadd.f32 1e-05, %v367_v37 }
 0x135   :  { %v324_v40 = vpop.xlane.xlu1 %323  ;;  %v327_v43 = vpop.xlane.xlu0 %326 }
 0x136   :  { %5887 = vrsqrt.f32 %v383_v39  ;;  %v368_v44 = vmul.f32 0.03125, %v324_v40  ;;  %v369_v45 = vmul.f32 0.03125, %v327_v43 }
 0x138   :  { %v384_v46 = vadd.f32 1e-05, %v368_v44  ;;  %v385_v47 = vadd.f32 1e-05, %v369_v45 }
 0x139   :  { %v330_v48 = vpop.xlane.xlu1 %329  ;;  %v333_v51 = vpop.xlane.xlu0 %332 }
 0x13a   :  { %5889 = vrsqrt.f32 %v384_v46  ;;  %v370_v52 = vmul.f32 0.03125, %v330_v48  ;;  %v371_v53 = vmul.f32 0.03125, %v333_v51 }
 0x13b   :  { %5891 = vrsqrt.f32 %v385_v47 }
 0x13c   :  { %v386_v26 = vadd.f32 1e-05, %v370_v52  ;;  %v387_v55 = vadd.f32 1e-05, %v371_v53 }
 0x13d   :  { %v336_v59 = vpop.xlane.xlu1 %335  ;;  %v339_v60 = vpop.xlane.xlu0 %338 }
 0x13e   :  { %5893 = vrsqrt.f32 %v386_v26  ;;  %v372_v62 = vmul.f32 0.03125, %v336_v59  ;;  %v373_v63 = vmul.f32 0.03125, %v339_v60 }
 0x13f   :  { %5895 = vrsqrt.f32 %v387_v55 }
 0x140   :  { %v5888_v3 = vpop.eup %5887  ;;  %v388_v4 = vadd.f32 1e-05, %v372_v62  ;;  %v389_v0 = vadd.f32 1e-05, %v373_v63 }
 0x141   :  { %v342_v17 = vpop.xlane.xlu1 %341  ;;  %v345_v18 = vpop.xlane.xlu0 %344  ;;  %v415_v32 = vmul.f32 %v5888_v3, %v6353_v49  ;;  %v6527_v49 = vrot.slane %v5243_v19, %v6494_v54 }
 0x142   :  { %5897 = vrsqrt.f32 %v388_v4  ;;  %v374_v20 = vmul.f32 0.03125, %v342_v17  ;;  %v375_v21 = vmul.f32 0.03125, %v345_v18 }
 0x143   :  { %5899 = vrsqrt.f32 %v389_v0  ;;  %v477_v9 = vmul.f32 %v6506_v28, %v415_v32  ;;  %v2858_v35 = vmul.f32 %v6514_v16, %v415_v32 }
 0x144   :  { %v5890_v23 = vpop.eup %5889  ;;  %v390_v30 = vadd.f32 1e-05, %v374_v20  ;;  %v391_v31 = vadd.f32 1e-05, %v375_v21 }
 0x145   :  { %v5892_v36 = vpop.eup %5891  ;;  %v348_v11 = vpop.xlane.xlu1 %347  ;;  %v416_v39 = vmul.f32 %v5890_v23, %v6365_v57  ;;  %v497_v46 = vadd.f32 %v6523_v22, %v477_v9  ;;  %v6539_v26 = vadd.f32 %v6527_v49, %v2858_v35 }
 0x146   :  { %v351_v37 = vpop.xlane.xlu0 %350  ;;  %5901 = vrsqrt.f32 %v390_v30  ;;  %v376_v40 = vmul.f32 0.03125, %v348_v11  ;;  %v417_v44 = vmul.f32 %v5892_v36, %v6357_v50 }
 0x147   :  { %v377_v43 = vmul.f32 0.03125, %v351_v37  ;;  %5903 = vrsqrt.f32 %v391_v31  ;;  %v478_v45 = vmul.f32 %v6506_v28, %v416_v39  ;;  %v2859_v47 = vmul.f32 %v6514_v16, %v416_v39 }
 0x148   :  { %v5894_v48 = vpop.eup %5893  ;;  %v392_v51 = vadd.f32 1e-05, %v376_v40  ;;  %v479_v53 = vmul.f32 %v6506_v28, %v417_v44  ;;  %v2860_v61 = vmul.f32 %v6514_v16, %v417_v44 }
 0x149   :  { %v393_v52 = vadd.f32 1e-05, %v377_v43  ;;  %v5896_v57 = vpop.eup %5895  ;;  %v354_v55 = vpop.xlane.xlu1 %353  ;;  %v498_v50 = vadd.f32 %v6523_v22, %v478_v45  ;;  %v418_v60 = vmul.f32 %v5894_v48, %v6369_v58  ;;  %v6545_v62 = vadd.f32 %v6527_v49, %v2859_v47 }
 0x14a   :  { %v357_v59 = vpop.xlane.xlu0 %356  ;;  %5905 = vrsqrt.f32 %v392_v51  ;;  %v378_v63 = vmul.f32 0.03125, %v354_v55  ;;  %v499_v4 = vadd.f32 %v6523_v22, %v479_v53  ;;  %v419_v58 = vmul.f32 %v5896_v57, %v6379_v1 }
 0x14b   :  { %v379_v3 = vmul.f32 0.03125, %v357_v59  ;;  %5907 = vrsqrt.f32 %v393_v52  ;;  %v513_v0 = vpack.c.bf16 %v498_v50, %v497_v46  ;;  %v480_v17 = vmul.f32 %v6506_v28, %v418_v60 }
 0x14c   :  { %v2861_v18 = vmul.f32 %v6514_v16, %v418_v60  ;;  %v5898_v32 = vpop.eup %5897  ;;  %v394_v19 = vadd.f32 1e-05, %v378_v63  ;;  %v6557_v36 = vadd.f32 %v6527_v49, %v2860_v61  ;;  %v481_v39 = vmul.f32 %v6506_v28, %v419_v58 }
 0x14d   :  { %v395_v20 = vadd.f32 1e-05, %v379_v3  ;;  %v5900_v9 = vpop.eup %5899  ;;  %v360_v23 = vpop.xlane.xlu1 %359  ;;  %5555 = vmatprep.mubr.msk.bf16.mxu1 %vm221_vm0, %v513_v0  ;;  %v500_v31 = vadd.f32 %v6523_v22, %v480_v17  ;;  %v420_v35 = vmul.f32 %v5898_v32, %v6383_v5 }
 0x14e   :  { %v363_v30 = vpop.xlane.xlu0 %362  ;;  %v6560_v11 = vadd.f32 %v6527_v49, %v2861_v18  ;;  %5909 = vrsqrt.f32 %v394_v19  ;;  %v380_v1 = vmul.f32 0.03125, %v360_v23  ;;  %v421_v44 = vmul.f32 %v5900_v9, %v6393_v2 }
 0x14f   :  { %v381_v37 = vmul.f32 0.03125, %v363_v30  ;;  %5911 = vrsqrt.f32 %v395_v20  ;;  %v514_v40 = vpack.c.bf16 %v500_v31, %v499_v4  ;;  %v482_v43 = vmul.f32 %v6506_v28, %v420_v35 }
 0x150   :  { %v5902_v45 = vpop.eup %5901  ;;  %v396_v46 = vadd.f32 1e-05, %v380_v1  ;;  %v501_v47 = vadd.f32 %v6523_v22, %v481_v39  ;;  %v483_v59 = vmul.f32 %v6506_v28, %v421_v44  ;;  %v2862_v2 = vmul.f32 %v6514_v16, %v419_v58 }
 0x151   :  { %v397_v5 = vadd.f32 1e-05, %v381_v37  ;;  %v5904_v51 = vpop.eup %5903  ;;  %v366_v52 = vpop.xlane.xlu1 %365  ;;  %5556 = vmatmul.mubr.msk.bf16.vlgmr.msra.gmra.mrb[0].mxu1 %vm221_vm0, %v514_v40  ;;  %v502_v57 = vadd.f32 %v6523_v22, %v482_v43  ;;  %v422_v55 = vmul.f32 %v5902_v45, %v6397_v10  ;;  %v2863_v32 = vmul.f32 %v6514_v16, %v420_v35 }
 0x152   :  { %v448_v53 = vpop.xlane.xlu0 %447  ;;  %5913 = vrsqrt.f32 %v396_v46  ;;  %v382_v50 = vmul.f32 0.03125, %v366_v52  ;;  %v423_v61 = vmul.f32 %v5904_v51, %v6407_v7  ;;  %v503_v4 = vadd.f32 %v6523_v22, %v483_v59 }
 0x153   :  { %v452_v60 = vmul.f32 0.03125, %v448_v53  ;;  %5915 = vrsqrt.f32 %v397_v5  ;;  %v515_v63 = vpack.c.bf16 %v502_v57, %v501_v47  ;;  %v484_v3 = vmul.f32 %v6506_v28, %v422_v55 }
 0x154   :  { %v5906_v0 = vpop.eup %5905  ;;  %v398_v17 = vadd.f32 1e-05, %v382_v50  ;;  %v485_v10 = vmul.f32 %v6506_v28, %v423_v61  ;;  %v6582_v9 = vadd.f32 %v6527_v49, %v2862_v2  ;;  %v2864_v23 = vmul.f32 %v6514_v16, %v421_v44 }
 0x155   :  { %v454_v18 = vadd.f32 1e-05, %v452_v60  ;;  %v5908_v19 = vpop.eup %5907  ;;  %v451_v20 = vpop.xlane.xlu1 %450  ;;  %5559 = vmatprep.mubr.msk.bf16.mxu1 %vm221_vm0, %v515_v63  ;;  %v504_v58 = vadd.f32 %v6523_v22, %v484_v3  ;;  %v424_v7 = vmul.f32 %v5906_v0, %v6411_v12  ;;  %v6589_v39 = vadd.f32 %v6527_v49, %v2863_v32 }
 0x156   :  { %8505 = vst [vmem:[#allocation5_spill] sm:$0xff] %v6582_v9  ;;  %5917 = vrsqrt.f32 %v398_v17  ;;  %v453_v30 = vmul.f32 0.03125, %v451_v20  ;;  %v505_v31 = vadd.f32 %v6523_v22, %v485_v10  ;;  %v425_v1 = vmul.f32 %v5908_v19, %v6421_v8 }
 0x157   :  { %5919 = vrsqrt.f32 %v454_v18  ;;  %v516_v35 = vpack.c.bf16 %v504_v58, %v503_v4  ;;  %v486_v37 = vmul.f32 %v6506_v28, %v424_v7  ;;  %v2865_v45 = vmul.f32 %v6514_v16, %v422_v55 }
 0x158   :  { %v5910_v40 = vpop.eup %5909  ;;  %v455_v12 = vadd.f32 1e-05, %v453_v30  ;;  %v487_v43 = vmul.f32 %v6506_v28, %v425_v1  ;;  %v6594_v44 = vadd.f32 %v6527_v49, %v2864_v23  ;;  %v2866_v51 = vmul.f32 %v6514_v16, %v423_v61 }
 0x159   :  { %v5912_v46 = vpop.eup %5911  ;;  %5560 = vmatmul.mubr.msk.bf16.gmra.mrb[4].mxu1 %vm221_vm0, %v516_v35  ;;  %v506_v8 = vadd.f32 %v6523_v22, %v486_v37  ;;  %v426_v5 = vmul.f32 %v5910_v40, %v6425_v25  ;;  %v6605_v57 = vadd.f32 %v6527_v49, %v2865_v45  ;;  %v2867_v2 = vmul.f32 %v6514_v16, %v424_v7 }
 0x15a   :  { %8506 = vst [vmem:[#allocation6_spill] sm:$0xff] %v6594_v44  ;;  %5921 = vrsqrt.f32 %v455_v12  ;;  %v507_v52 = vadd.f32 %v6523_v22, %v487_v43  ;;  %v427_v53 = vmul.f32 %v5912_v46, %v6435_v13  ;;  %v6610_v25 = vadd.f32 %v6527_v49, %v2866_v51 }
 0x15b   :  { %8507 = vst [vmem:[#allocation7_spill] sm:$0xff] %v6605_v57  ;;  %v517_v55 = vpack.c.bf16 %v506_v8, %v505_v31  ;;  %v488_v59 = vmul.f32 %v6506_v28, %v426_v5  ;;  %v2868_v63 = vmul.f32 %v6514_v16, %v425_v1  ;;  %v2869_v13 = vmul.f32 %v6514_v16, %v426_v5 }
 0x15c   :  { %8508 = vst [vmem:[#allocation8_spill] sm:$0xff] %v6610_v25  ;;  %v5914_v50 = vpop.eup %5913  ;;  %v489_v60 = vmul.f32 %v6506_v28, %v427_v53  ;;  %v6621_v17 = vadd.f32 %v6527_v49, %v2867_v2  ;;  %v2870_v18 = vmul.f32 %v6514_v16, %v427_v53  ;;  %v463_v32 = vrot.slane %v6499_v56, %v6530_v38 }
 0x15d   :  { %v5916_v3 = vpop.eup %5915  ;;  %5563 = vmatprep.mubr.msk.bf16.mxu1 %vm221_vm0, %v517_v55  ;;  %v508_v4 = vadd.f32 %v6523_v22, %v488_v59  ;;  %v428_v0 = vmul.f32 %v5914_v50, %v6439_v27  ;;  %v6628_v19 = vadd.f32 %v6527_v49, %v2868_v63  ;;  %v6631_v20 = vadd.f32 %v6527_v49, %v2869_v13 }
 0x15e   :  { %8509 = vst [vmem:[#allocation9_spill] sm:$0xff] %v6621_v17  ;;  %v429_v10 = vmul.f32 %v5916_v3, %v6449_v14  ;;  %v509_v14 = vadd.f32 %v6523_v22, %v489_v60  ;;  %v6646_v12 = vadd.f32 %v6527_v49, %v2870_v18  ;;  %v101_v60 = vld [vmem:[%s8518_s2 + $0x8] sm:$0xff] }
 0x15f   :  { %8510 = vst [vmem:[#allocation10_spill] sm:$0xff] %v6628_v19  ;;  %8511 = vst [vmem:[#allocation11_spill] sm:$0xff] %v6631_v20  ;;  %v518_v58 = vpack.c.bf16 %v508_v4, %v507_v52  ;;  %v490_v7 = vmul.f32 %v6506_v28, %v428_v0  ;;  %v2871_v23 = vmul.f32 %v6514_v16, %v428_v0 }
 0x160   :  { %v5918_v30 = vpop.eup %5917  ;;  %v491_v31 = vmul.f32 %v6506_v28, %v429_v10  ;;  %v2872_v1 = vmul.f32 %v6514_v16, %v429_v10  ;;  %8512 = vst [vmem:[#allocation12_spill] sm:$0xff] %v6646_v12  ;;  %v161_v5 = vrot.slane %v101_v60, %v6530_v38 }
 0x161   :  { %v5920_v35 = vpop.eup %5919  ;;  %5564 = vmatmul.mubr.msk.bf16.gmra.mrb[8].mxu1 %vm221_vm0, %v518_v58  ;;  %v510_v37 = vadd.f32 %v6523_v22, %v490_v7  ;;  %v430_v40 = vmul.f32 %v5918_v30, %v6453_v29  ;;  %v6649_v43 = vadd.f32 %v6527_v49, %v2871_v23  ;;  %v469_v29 = vrot.slane %v6511_v6, %v6530_v38 }
 0x162   :  { %v458_v45 = vmul.f32 %v5920_v35, %v6462_v15  ;;  %v511_v53 = vadd.f32 %v6523_v22, %v491_v31  ;;  %v6660_v55 = vadd.f32 %v6527_v49, %v2872_v1 }
 0x163   :  { %8513 = vst [vmem:[#allocation13_spill] sm:$0xff] %v6649_v43  ;;  %v519_v46 = vpack.c.bf16 %v510_v37, %v509_v14  ;;  %v492_v8 = vmul.f32 %v6506_v28, %v430_v40  ;;  %v2873_v51 = vmul.f32 %v6514_v16, %v430_v40 }
 0x164   :  { %v5922_v52 = vpop.eup %5921  ;;  %8514 = vst [vmem:[#allocation14_spill] sm:$0xff] %v6660_v55  ;;  %v464_v59 = vmul.f32 %v463_v32, %v458_v45 }
 0x165   :  { %5567 = vmatprep.mubr.msk.bf16.mxu1 %vm221_vm0, %v519_v46  ;;  %v512_v15 = vadd.f32 %v6523_v22, %v492_v8  ;;  %v459_v28 = vmul.f32 %v5922_v52, %v6465_v33  ;;  %v6666_v2 = vadd.f32 %v6527_v49, %v2873_v51  ;;  %v5176_v33 = vld [vmem:[%s8436_s7] ss:$0 sm:$0xff] }
 0x166   :  { %v470_v6 = vadd.f32 %v469_v29, %v464_v59 }
 0x167   :  { %8515 = vst [vmem:[#allocation15_spill] sm:$0xff] %v6666_v2  ;;  %v520_v16 = vpack.c.bf16 %v512_v15, %v511_v53  ;;  %v465_v50 = vmul.f32 %v463_v32, %v459_v28 }
 0x169   :  { %5568 = vmatmul.mubr.msk.bf16.gmra.mrb[12].mxu1 %vm221_vm0, %v520_v16  ;;  %v471_v63 = vadd.f32 %v469_v29, %v465_v50 }
 0x16b   :  { %v6671_v13 = vpack.c.bf16 %v471_v63, %v470_v6 }
 0x16d   :  { %5548 = vmatmul.mubr.msk.bf16.vlgmr.msra.gmra.mrb[0].mxu0 %vm221_vm0, %v6671_v13 }
 0x224   :  { %v5557_v22 = vpop.f32.mrb[0].mxu1 }
 0x225   :  { %v678_v49 = vadd.f32 %v5557_v22, %v5176_v33  ;;  %v669_v3 = vpop.f32.mrb[1].mxu1 }
 0x226   :  { %v670_v4 = vadd.f32 %v5176_v33, %v669_v3  ;;  %v5558_v0 = vpop.f32.mrb[2].mxu1 }
 0x227   :  { %752 = vrot.lane.b32.xlu1 %v678_v49, %s6128_s24  ;;  %v672_v18 = vpop.f32.mrb[3].mxu1  ;;  %v681_v58 = vadd.f32 %v5558_v0, %v5176_v33  ;;  %v216_v0 = vld [vmem:[%s8446_s17] sm:$0xff] }
 0x228   :  { %v673_v10 = vadd.f32 %v5176_v33, %v672_v18  ;;  %748 = vrot.lane.b32.xlu0 %v670_v4, %s6128_s24  ;;  %v217_v18 = vld [vmem:[%s8446_s17 + $0x8] sm:$0xff] }
 0x22b   :  { %750 = vrot.lane.b32.xlu1 %v673_v10, %s6128_s24  ;;  %v6700_v10 = vpack.c.bf16 %v217_v18, %v216_v0 }
 0x22c   :  { %v5561_v32 = vpop.f32.mrb[4].mxu1 }
 0x22d   :  { %v685_v7 = vpop.f32.mrb[5].mxu1  ;;  %v694_v1 = vadd.f32 %v5561_v32, %v5176_v33  ;;  %8516 = vst [vmem:[#allocation16_spill] sm:$0xff] %v6700_v10  ;;  %5820 = vmatprep.subr.bf16.mxu0 %v6700_v10  ;;  %v219_v32 = vld [vmem:[%s8446_s17 + $0x18] sm:$0xff] }
 0x22e   :  { %v686_v23 = vadd.f32 %v5176_v33, %v685_v7  ;;  %v5562_v30 = vpop.f32.mrb[6].mxu1  ;;  %5822 = vmatpush3.bf16.msra.mxu0 %v6700_v10  ;;  %v5172_v7 = vld [vmem:[%s8434_s5] ss:$0 sm:$0xff] }
 0x22f   :  { %754 = vrot.lane.b32.xlu1 %v681_v58, %s6128_s24  ;;  %v688_v14 = vpop.f32.mrb[7].mxu1  ;;  %v697_v37 = vadd.f32 %v5562_v30, %v5176_v33 }
 0x230   :  { %v689_v31 = vadd.f32 %v5176_v33, %v688_v14  ;;  %756 = vrot.lane.b32.xlu0 %v686_v23, %s6128_s24 }
 0x233   :  { %758 = vrot.lane.b32.xlu1 %v689_v31, %s6128_s24 }
 0x234   :  { %760 = vrot.lane.b32.xlu0 %v694_v1, %s6128_s24  ;;  %v5565_v35 = vpop.f32.mrb[8].mxu1 }
 0x235   :  { %v701_v40 = vpop.f32.mrb[9].mxu1  ;;  %v710_v52 = vadd.f32 %v5565_v35, %v5176_v33 }
 0x236   :  { %v702_v45 = vadd.f32 %v5176_v33, %v701_v40  ;;  %v5566_v46 = vpop.f32.mrb[10].mxu1 }
 0x237   :  { %762 = vrot.lane.b32.xlu1 %v697_v37, %s6128_s24  ;;  %v704_v8 = vpop.f32.mrb[11].mxu1  ;;  %v713_v29 = vadd.f32 %v5566_v46, %v5176_v33 }
 0x238   :  { %v705_v51 = vadd.f32 %v5176_v33, %v704_v8  ;;  %764 = vrot.lane.b32.xlu0 %v702_v45, %s6128_s24 }
 0x23b   :  { %766 = vrot.lane.b32.xlu1 %v705_v51, %s6128_s24 }
 0x23c   :  { %768 = vrot.lane.b32.xlu0 %v710_v52, %s6128_s24  ;;  %v5569_v53 = vpop.f32.mrb[12].mxu1 }
 0x23d   :  { %v717_v15 = vpop.f32.mrb[13].mxu1  ;;  %v726_v22 = vadd.f32 %v5569_v53, %v5176_v33 }
 0x23e   :  { %v718_v28 = vadd.f32 %v5176_v33, %v717_v15  ;;  %v5570_v59 = vpop.f32.mrb[14].mxu1 }
 0x23f   :  { %770 = vrot.lane.b32.xlu1 %v713_v29, %s6128_s24  ;;  %v720_v16 = vpop.f32.mrb[15].mxu1  ;;  %v729_v4 = vadd.f32 %v5570_v59, %v5176_v33 }
 0x240   :  { %v721_v50 = vadd.f32 %v5176_v33, %v720_v16  ;;  %772 = vrot.lane.b32.xlu0 %v718_v28, %s6128_s24  ;;  %v581_v6 = vpop.f32.mrb[0].mxu0  ;;  %v218_v33 = vld [vmem:[%s8446_s17 + $0x10] sm:$0xff]  ;;  %s6129_s17 = smov 96  }
 0x241   :  { %v5549_v63 = vpop.f32.mrb[1].mxu0  ;;  %v6710_v58 = vpack.c.bf16 %v219_v32, %v218_v33  ;;  %v6718_v23 = vadd.f32 %v5172_v7, %v581_v6 }
 0x242   :  { %v584_v49 = vpop.f32.mrb[2].mxu0 }
 0x243   :  { %774 = vrot.lane.b32.xlu1 %v721_v50, %s6128_s24  ;;  %v5550_v3 = vpop.f32.mrb[3].mxu0  ;;  %8517 = vst [vmem:[#allocation17_spill] sm:$0xff] %v6710_v58  ;;  %5824 = vmatprep.subr.bf16.mxu0 %v6710_v58  ;;  %v6753_v15 = vadd.f32 %v5172_v7, %v584_v49 }
 0x244   :  { %776 = vrot.lane.b32.xlu0 %v726_v22, %s6128_s24  ;;  %5826 = vmatpush3.bf16.msra.mxu0 %v6710_v58 }
 0x245   :  { %5629 = vmatprep.subr.bf16.mxu0 %v8452_v34 }
 0x247   :  { %778 = vrot.lane.b32.xlu1 %v729_v4, %s6128_s24 }
 0x299   :  { %v753_v30 = vpop.permute.xlu1 %752 }
 0x29a   :  { %v749_v14 = vpop.permute.xlu0 %748  ;;  %v6729_v37 = vadd.f32 %v753_v30, %v6718_v23  ;;  %v100_v30 = vld [vmem:[%s8518_s2] sm:$0xff] }
 0x29b   :  { %v6721_v31 = vadd.f32 %v749_v14, %v6718_v23 }
 0x29d   :  { %v751_v1 = vpop.permute.xlu1 %750  ;;  %1008 = vrot.lane.b32.xlu0 %v6721_v31, %s6129_s17 }
 0x29e   :  { %v6726_v35 = vadd.f32 %v751_v1, %v6718_v23 }
 0x2a0   :  { %1010 = vrot.lane.b32.xlu1 %v6726_v35, %s6129_s17 }
 0x2a1   :  { %v755_v40 = vpop.permute.xlu1 %754  ;;  %1012 = vrot.lane.b32.xlu0 %v6729_v37, %s6129_s17 }
 0x2a2   :  { %v6736_v45 = vadd.f32 %v755_v40, %v6718_v23  ;;  %v757_v46 = vpop.permute.xlu0 %756  ;;  %v105_v40 = vrot.slane %v100_v30, %v6530_v38 }
 0x2a3   :  { %v6739_v8 = vadd.f32 %v757_v46, %v6718_v23  ;;  %v6787_v46 = vsub.s32 2, %v6491_v24 }
 0x2a4   :  { %1014 = vrot.lane.b32.xlu1 %v6736_v45, %s6129_s17 }
 0x2a5   :  { %v759_v51 = vpop.permute.xlu1 %758  ;;  %1016 = vrot.lane.b32.xlu0 %v6739_v8, %s6129_s17 }
 0x2a6   :  { %v6746_v52 = vadd.f32 %v759_v51, %v6718_v23  ;;  %v761_v53 = vpop.permute.xlu0 %760 }
 0x2a7   :  { %v6749_v29 = vadd.f32 %v761_v53, %v6718_v23  ;;  %v112_v53 = vrot.slane %v100_v30, %v6494_v54 }
 0x2a8   :  { %1018 = vrot.lane.b32.xlu1 %v6746_v52, %s6129_s17 }
 0x2a9   :  { %v763_v28 = vpop.permute.xlu1 %762  ;;  %1020 = vrot.lane.b32.xlu0 %v6749_v29, %s6129_s17 }
 0x2aa   :  { %v6758_v59 = vadd.f32 %v763_v28, %v6718_v23  ;;  %v765_v16 = vpop.permute.xlu0 %764  ;;  %v6793_v28 = vsub.s32 3, %v6491_v24 }
 0x2ab   :  { %v6761_v50 = vadd.f32 %v765_v16, %v6753_v15  ;;  %v119_v16 = vrot.slane %v100_v30, %v6787_v46 }
 0x2ac   :  { %1022 = vrot.lane.b32.xlu1 %v6758_v59, %s6129_s17  ;;  %v182_v56 = vrot.slane %v101_v60, %v6793_v28 }
 0x2ad   :  { %v767_v6 = vpop.permute.xlu1 %766  ;;  %1024 = vrot.lane.b32.xlu0 %v6761_v50, %s6129_s17 }
 0x2ae   :  { %v805_v63 = vadd.f32 %v767_v6, %v6753_v15  ;;  %v769_v22 = vpop.permute.xlu0 %768  ;;  %v6797_v6 = vsub.s32 4, %v6491_v24 }
 0x2af   :  { %v806_v49 = vadd.f32 %v769_v22, %v6753_v15  ;;  %v126_v22 = vrot.slane %v100_v30, %v6793_v28 }
 0x2b0   :  { %1026 = vrot.lane.b32.xlu1 %v805_v63, %s6129_s17  ;;  %8519 = vst [vmem:[#allocation18_spill] sm:$0xff] %v6797_v6 }
 0x2b1   :  { %v771_v3 = vpop.permute.xlu1 %770  ;;  %1028 = vrot.lane.b32.xlu0 %v806_v49, %s6129_s17 }
 0x2b2   :  { %v807_v4 = vadd.f32 %v771_v3, %v6753_v15  ;;  %v773_v0 = vpop.permute.xlu0 %772  ;;  %v139_v3 = vsub.s32 5, %v6491_v24 }
 0x2b3   :  { %v808_v18 = vadd.f32 %v773_v0, %v6753_v15  ;;  %v133_v0 = vrot.slane %v100_v30, %v6797_v6 }
 0x2b4   :  { %1030 = vrot.lane.b32.xlu1 %v807_v4, %s6129_s17  ;;  %v196_v27 = vrot.slane %v101_v60, %v139_v3 }
 0x2b5   :  { %v775_v33 = vpop.permute.xlu1 %774  ;;  %1032 = vrot.lane.b32.xlu0 %v808_v18, %s6129_s17 }
 0x2b6   :  { %v6776_v32 = vadd.f32 %v775_v33, %v6753_v15  ;;  %v777_v7 = vpop.permute.xlu0 %776  ;;  %v146_v33 = vsub.s32 6, %v6491_v24 }
 0x2b7   :  { %v810_v14 = vadd.f32 %v777_v7, %v6753_v15  ;;  %v140_v7 = vrot.slane %v100_v30, %v139_v3 }
 0x2b8   :  { %1034 = vrot.lane.b32.xlu1 %v6776_v32, %s6129_s17 }
 0x2b9   :  { %v779_v1 = vpop.permute.xlu1 %778  ;;  %1036 = vrot.lane.b32.xlu0 %v810_v14, %s6129_s17 }
 0x2ba   :  { %v811_v51 = vadd.f32 %v779_v1, %v6753_v15  ;;  %v153_v1 = vsub.s32 7, %v6491_v24 }
 0x2bc   :  { %1038 = vrot.lane.b32.xlu1 %v811_v51, %s6129_s17 }
 0x2bd   :  { %107 = vbcast.lane.b32.xlu0 %v105_v40, 256  ;;  %v147_v40 = vrot.slane %v100_v30, %v146_v33 }
 0x2c0   :  { %114 = vbcast.lane.b32.xlu1 %v112_v53, 256  ;;  %v154_v53 = vrot.slane %v100_v30, %v153_v1  ;;  %v210_v30 = vrot.slane %v101_v60, %v153_v1 }
 0x2c1   :  { %121 = vbcast.lane.b32.xlu0 %v119_v16, 256  ;;  %v168_v16 = vrot.slane %v101_v60, %v6494_v54 }
 0x2c4   :  { %128 = vbcast.lane.b32.xlu1 %v126_v22, 256  ;;  %v175_v22 = vrot.slane %v101_v60, %v6787_v46 }
 0x2c5   :  { %135 = vbcast.lane.b32.xlu0 %v133_v0, 256  ;;  %v189_v0 = vrot.slane %v101_v60, %v6797_v6 }
 0x2c8   :  { %142 = vbcast.lane.b32.xlu1 %v140_v7, 256  ;;  %v203_v7 = vrot.slane %v101_v60, %v146_v33 }
 0x2c9   :  { %149 = vbcast.lane.b32.xlu0 %v147_v40, 256 }
 0x2cc   :  { %156 = vbcast.lane.b32.xlu1 %v154_v53, 256 }
 0x2cd   :  { %163 = vbcast.lane.b32.xlu0 %v161_v5, 256 }
 0x2d0   :  { %170 = vbcast.lane.b32.xlu1 %v168_v16, 256 }
 0x2d1   :  { %177 = vbcast.lane.b32.xlu0 %v175_v22, 256 }
 0x2d4   :  { %184 = vbcast.lane.b32.xlu1 %v182_v56, 256 }
 0x2d5   :  { %191 = vbcast.lane.b32.xlu0 %v189_v0, 256 }
 0x2d8   :  { %198 = vbcast.lane.b32.xlu1 %v196_v27, 256  ;;  %v6131_v27 = vmov 1966171168  }
 0x2d9   :  { %205 = vbcast.lane.b32.xlu0 %v203_v7, 256  ;;  %v816_v56 = vunpack.c.l.s4 %v6131_v27 }
 0x2db   :  { %v817_v5 = vunpack.c.0.s8 %v816_v56 }
 0x2dc   :  { %212 = vbcast.lane.b32.xlu1 %v210_v30, 256  ;;  %v5852_v30 = vld [vmem:[%s8438_s9 + $0x8] sm:$0xff]  }
 0x2dd   :  { %1813 = vrot.lane.b32.xlu0 %v6726_v35, %s6130_s3  ;;  %v6839_v60 = vsub.s32 %v817_v5, %v6491_v24 }
 0x2df   :  { %8520 = vst [vmem:[#allocation19_spill] sm:$0xff] %v6839_v60  ;;  %v870_v16 = vrot.slane %v6753_v15, %v6839_v60 }
 0x2e0   :  { %1829 = vrot.lane.b32.xlu1 %v805_v63, %s6130_s3 }
 0x2e1   :  { %1815 = vrot.lane.b32.xlu0 %v6729_v37, %s6130_s3  ;;  %v814_v37 = vcombine.high %v6718_v23, %v6718_v23 }
 0x2e4   :  { %1831 = vrot.lane.b32.xlu1 %v806_v49, %s6130_s3 }
 0x2e5   :  { %1811 = vrot.lane.b32.xlu0 %v6721_v31, %s6130_s3  ;;  %v821_v31 = vrot.slane %v6718_v23, %v6839_v60 }
 0x2e7   :  { %v829_v35 = vcombine.high %v821_v31, %v821_v31 }
 0x2e8   :  { %1817 = vrot.lane.b32.xlu1 %v6736_v45, %s6130_s3  ;;  %v837_v45 = vrot.slane %v821_v31, %v6839_v60 }
 0x2e9   :  { %1827 = vrot.lane.b32.xlu0 %v6761_v50, %s6130_s3 }
 0x2ec   :  { %1833 = vrot.lane.b32.xlu1 %v807_v4, %s6130_s3 }
 0x2ed   :  { %1819 = vrot.lane.b32.xlu0 %v6739_v8, %s6130_s3  ;;  %v851_v8 = vrot.slane %v829_v35, %v6839_v60 }
 0x2ef   :  { %v919_v24 = vrot.slane %v851_v8, %v6530_v38  ;;  %v861_v49 = vcombine.high %v851_v8, %v851_v8 }
 0x2f0   :  { %1835 = vrot.lane.b32.xlu1 %v808_v18, %s6130_s3 }
 0x2f1   :  { %1821 = vrot.lane.b32.xlu0 %v6746_v52, %s6130_s3  ;;  %v828_v52 = vrot.slane %v814_v37, %v6839_v60  ;;  %v927_v40 = vrot.slane %v861_v49, %v6530_v38  ;;  %v878_v37 = vcombine.high %v870_v16, %v870_v16 }
 0x2f3   :  { %v830_v4 = vcombine.high %v828_v52, %v828_v52  ;;  %v900_v49 = vrot.slane %v878_v37, %v6839_v60 }
 0x2f4   :  { %1839 = vrot.lane.b32.xlu1 %v810_v14, %s6130_s3  ;;  %v844_v14 = vrot.slane %v828_v52, %v6839_v60 }
 0x2f5   :  { %1823 = vrot.lane.b32.xlu0 %v6749_v29, %s6130_s3  ;;  %v915_v29 = vrot.slane %v837_v45, %v6530_v38  ;;  %v858_v53 = vrot.slane %v830_v4, %v6839_v60 }
 0x2f6   :  { %v931_v0 = vrot.slane %v844_v14, %v6530_v38  ;;  %v860_v7 = vcombine.high %v844_v14, %v844_v14 }
 0x2f7   :  { %v935_v31 = vrot.slane %v858_v53, %v6530_v38  ;;  %v862_v35 = vcombine.high %v858_v53, %v858_v53 }
 0x2f8   :  { %1841 = vrot.lane.b32.xlu1 %v811_v51, %s6130_s3  ;;  %v5851_v51 = vld [vmem:[%s8438_s9] sm:$0xff]   ;;  %v939_v52 = vrot.slane %v860_v7, %v6530_v38 }
 0x2f9   :  { %1825 = vrot.lane.b32.xlu0 %v6758_v59, %s6130_s3  ;;  %v859_v59 = vcombine.high %v837_v45, %v837_v45  ;;  %v863_v45 = vcombine.high %v6753_v15, %v6753_v15 }
 0x2fb   :  { %v877_v4 = vrot.slane %v863_v45, %v6839_v60 }
 0x2fc   :  { %1837 = vrot.lane.b32.xlu1 %v6776_v32, %s6130_s3  ;;  %v923_v32 = vrot.slane %v859_v59, %v6530_v38 }
 0x2fd   :  { %v879_v53 = vcombine.high %v877_v4, %v877_v4 }
 0x30f   :  { %v1009_v50 = vpop.permute.xlu0 %1008 }
 0x310   :  { %v1056_v63 = vmul.f32 %v1009_v50, %v915_v29  ;;  %v886_v29 = vrot.slane %v870_v16, %v6839_v60 }
 0x312   :  { %v1011_v18 = vpop.permute.xlu1 %1010  ;;  %5579 = vmatprep.mubr.msk.f32.mxu0 %vm221_vm0, %v1056_v63  ;;  %v908_v14 = vcombine.high %v886_v29, %v886_v29 }
 0x313   :  { %v1057_v3 = vmul.f32 %v1011_v18, %v919_v24  ;;  %v1013_v33 = vpop.permute.xlu0 %1012  ;;  %v943_v24 = vrot.slane %v862_v35, %v6530_v38 }
 0x314   :  { %v1058_v1 = vmul.f32 %v1013_v33, %v923_v32  ;;  %v947_v32 = vrot.slane %v886_v29, %v6530_v38 }
 0x315   :  { %5580 = vmatmul.mubr.msk.f32.vlgmr.msra.gmra.mrb[4].mxu0 %vm221_vm0, %v1057_v3 }
 0x316   :  { %v1015_v22 = vpop.permute.xlu1 %1014  ;;  %5582 = vmatprep.mubr.msk.f32.mxu0 %vm221_vm0, %v1058_v1  ;;  %5630 = vmatpush3.bf16.msra.mxu0 %v5851_v51  ;;  %v951_v1 = vrot.slane %v900_v49, %v6530_v38 }
 0x317   :  { %v1059_v27 = vmul.f32 %v1015_v22, %v927_v40  ;;  %v1017_v56 = vpop.permute.xlu0 %1016  ;;  %5631 = vmatprep.subr.bf16.mxu0 %v8452_v34  ;;  %v910_v40 = vcombine.high %v900_v49, %v900_v49  ;;  %v955_v22 = vrot.slane %v908_v14, %v6530_v38 }
 0x318   :  { %v1060_v5 = vmul.f32 %v1017_v56, %v931_v0  ;;  %v893_v0 = vrot.slane %v877_v4, %v6839_v60 }
 0x319   :  { %5583 = vmatmul.mubr.msk.f32.gmra.mrb[6].mxu0 %vm221_vm0, %v1059_v27  ;;  %v959_v56 = vrot.slane %v910_v40, %v6530_v38 }
 0x31a   :  { %v1019_v8 = vpop.permute.xlu1 %1018  ;;  %5585 = vmatprep.mubr.msk.f32.mxu0 %vm221_vm0, %v1060_v5  ;;  %5632 = vmatpush3.bf16.msra.mxu0 %v5852_v30  ;;  %v907_v5 = vrot.slane %v879_v53, %v6839_v60  ;;  %v963_v35 = vrot.slane %v893_v0, %v6530_v38  ;;  %v909_v37 = vcombine.high %v893_v0, %v893_v0 }
 0x31b   :  { %v1061_v59 = vmul.f32 %v1019_v8, %v935_v31  ;;  %v1021_v50 = vpop.permute.xlu0 %1020  ;;  %5637 = vmatprep.subr.bf16.mxu0 %v8452_v34 }
 0x31c   :  { %v1062_v63 = vmul.f32 %v1021_v50, %v939_v52  ;;  %v967_v29 = vrot.slane %v907_v5, %v6530_v38 }
 0x31d   :  { %5586 = vmatmul.mubr.msk.f32.gmra.mrb[8].mxu0 %vm221_vm0, %v1061_v59  ;;  %v911_v59 = vcombine.high %v907_v5, %v907_v5 }
 0x31e   :  { %v1023_v18 = vpop.permute.xlu1 %1022  ;;  %5588 = vmatprep.mubr.msk.f32.mxu0 %vm221_vm0, %v1062_v63  ;;  %v971_v63 = vrot.slane %v909_v37, %v6530_v38 }
 0x31f   :  { %v1063_v51 = vmul.f32 %v1023_v18, %v943_v24  ;;  %v1025_v3 = vpop.permute.xlu0 %1024  ;;  %v975_v18 = vrot.slane %v911_v59, %v6530_v38 }
 0x320   :  { %v1064_v33 = vmul.f32 %v1025_v3, %v947_v32  ;;  %v214_v3 = vld [vmem:[%s8521_s1] sm:$0xff] }
 0x321   :  { %5589 = vmatmul.mubr.msk.f32.gmra.mrb[10].mxu0 %vm221_vm0, %v1063_v51  ;;  %v220_v51 = vld [vmem:[%s8447_s18] sm:$0xff] }
 0x322   :  { %v1027_v16 = vpop.permute.xlu1 %1026  ;;  %5591 = vmatprep.mubr.msk.f32.mxu0 %vm221_vm0, %v1064_v33  ;;  %5603 = vmatprep.subr.mxu1 %v220_v51  ;;  %v215_v33 = vld [vmem:[%s8521_s1 + $0x8] sm:$0xff] }
 0x323   :  { %v1065_v7 = vmul.f32 %v1027_v16, %v951_v1  ;;  %v1029_v30 = vpop.permute.xlu0 %1028  ;;  %5604 = vmatpush3.msra.mxu1 %v220_v51 }
 0x324   :  { %v1066_v27 = vmul.f32 %v1029_v30, %v955_v22  ;;  %5661 = vmatprep.subr.bf16.mxu1 %v8452_v34 }
 0x325   :  { %5592 = vmatmul.mubr.msk.f32.gmra.mrb[12].mxu0 %vm221_vm0, %v1065_v7 }
 0x326   :  { %v1031_v31 = vpop.permute.xlu1 %1030  ;;  %5594 = vmatprep.mubr.msk.f32.mxu0 %vm221_vm0, %v1066_v27 }
 0x327   :  { %v1067_v45 = vmul.f32 %v1031_v31, %v959_v56  ;;  %v1033_v8 = vpop.permute.xlu0 %1032 }
 0x328   :  { %v1068_v52 = vmul.f32 %v1033_v8, %v963_v35 }
 0x329   :  { %5595 = vmatmul.mubr.msk.f32.gmra.mrb[14].mxu0 %vm221_vm0, %v1067_v45 }
 0x32a   :  { %v1035_v50 = vpop.permute.xlu1 %1034  ;;  %5597 = vmatprep.mubr.msk.f32.mxu0 %vm221_vm0, %v1068_v52 }
 0x32b   :  { %v1069_v24 = vmul.f32 %v1035_v50, %v967_v29  ;;  %v1037_v49 = vpop.permute.xlu0 %1036 }
 0x32c   :  { %v1070_v4 = vmul.f32 %v1037_v49, %v971_v63 }
 0x32d   :  { %5598 = vmatmul.mubr.msk.f32.gmra.mrb[16].mxu0 %vm221_vm0, %v1069_v24 }
 0x32e   :  { %v1039_v32 = vpop.permute.xlu1 %1038  ;;  %5600 = vmatprep.mubr.msk.f32.mxu0 %vm221_vm0, %v1070_v4 }
 0x32f   :  { %v1071_v14 = vmul.f32 %v1039_v32, %v975_v18  ;;  %v6917_v40 = vpop.permute.xlu0 %107 }
 0x330   :  { %8523 = vst [vmem:[#allocation21_spill] sm:$0xff] %v6917_v40 }
 0x331   :  { %5601 = vmatmul.mubr.msk.f32.gmra.mrb[18].mxu0 %vm221_vm0, %v1071_v14 }
 0x332   :  { %5633 = vmatprep.mubr.msk.bf16.mxu0 %vm6127_vm1, %v8452_v34  ;;  %v6915_v1 = vpop.permute.xlu1 %114 }
 0x333   :  { %8522 = vst [vmem:[#allocation20_spill] sm:$0xff] %v6915_v1  ;;  %v6921_v22 = vpop.permute.xlu0 %121 }
 0x334   :  { %8525 = vst [vmem:[#allocation23_spill] sm:$0xff] %v6921_v22 }
 0x335   :  { %5634 = vmatmul.mubr.msk.bf16.vlgmr.msra.gmra.mrb[20].mxu0 %vm221_vm0, %v6671_v13  ;;  %v6132_v13 = vmov 0  }
 0x336   :  { %5641 = vmatprep.mubr.msk.bf16.mxu0 %vm6127_vm1, %v8452_v34  ;;  %5845 = vset.pattern.permute.xlu0 %v6132_v13  ;;  %v6919_v53 = vpop.permute.xlu1 %128 }
 0x337   :  { %5846 = vset.pattern.permute.xlu1 %v6132_v13  ;;  %1989 = vperm.xlu0 %5845, %v214_v3   ;;  %8524 = vst [vmem:[#allocation22_spill] sm:$0xff] %v6919_v53  ;;  %v6938_v59 = vpop.permute.xlu0 %135 }
 0x338   :  { %1993 = vperm.xlu1 %5846, %v215_v33   ;;  %8527 = vst [vmem:[#allocation25_spill] sm:$0xff] %v6938_v59 }
 0x33a   :  { %v6930_v35 = vpop.permute.xlu1 %142 }
 0x33b   :  { %8526 = vst [vmem:[#allocation24_spill] sm:$0xff] %v6930_v35  ;;  %v6956_v47 = vpop.permute.xlu0 %149 }
 0x33c   :  { %8529 = vst [vmem:[#allocation27_spill] sm:$0xff] %v6956_v47 }
 0x3e8   :  { %v5581_v16 = vpop.f32.mrb[4].mxu0 }
 0x3e9   :  { %v1266_v0 = vadd.f32 %v5581_v16, %v6915_v1  ;;  %v1186_v7 = vpop.f32.mrb[5].mxu0 }
 0x3ea   :  { %v6925_v30 = vadd.f32 %v1186_v7, %v6917_v40  ;;  %v6950_v7 = vpop.permute.xlu1 %156 }
 0x3eb   :  { %v1289_v27 = vsel %vm1281_vm2, %v1266_v0, -inf  ;;  %8528 = vst [vmem:[#allocation26_spill] sm:$0xff] %v6950_v7 }
 0x3ec   :  { %v1290_v56 = vrot.slane %v1289_v27, 4  ;;  %v1282_v5 = vsel %vm1281_vm2, %v6925_v30, -inf  ;;  %v5584_v31 = vpop.f32.mrb[6].mxu0 }
 0x3ed   :  { %v1283_v37 = vrot.slane %v1282_v5, 4  ;;  %v6933_v45 = vadd.f32 %v5584_v31, %v6919_v53  ;;  %v1196_v8 = vpop.f32.mrb[7].mxu0 }
 0x3ee   :  { %v1291_v52 = vmax.f32 %v1289_v27, %v1290_v56  ;;  %v6936_v29 = vadd.f32 %v1196_v8, %v6921_v22 }
 0x3ef   :  { %v1284_v50 = vmax.f32 %v1282_v5, %v1283_v37  ;;  %v1303_v63 = vsel %vm1281_vm2, %v6933_v45, -inf }
 0x3f0   :  { %v1292_v24 = vrot.slane %v1291_v52, 2  ;;  %v1304_v49 = vrot.slane %v1303_v63, 4  ;;  %v1296_v4 = vsel %vm1281_vm2, %v6936_v29, -inf  ;;  %v5587_v18 = vpop.f32.mrb[8].mxu0 }
 0x3f1   :  { %v1285_v32 = vrot.slane %v1284_v50, 2  ;;  %v1297_v14 = vrot.slane %v1296_v4, 4  ;;  %v6945_v51 = vadd.f32 %v5587_v18, %v6930_v35  ;;  %v1206_v3 = vpop.f32.mrb[9].mxu0 }
 0x3f2   :  { %v1293_v33 = vmax.f32 %v1291_v52, %v1292_v24  ;;  %v1305_v13 = vmax.f32 %v1303_v63, %v1304_v49  ;;  %v6948_v16 = vadd.f32 %v1206_v3, %v6938_v59 }
 0x3f3   :  { %v1286_v27 = vmax.f32 %v1284_v50, %v1285_v32  ;;  %v1298_v56 = vmax.f32 %v1296_v4, %v1297_v14  ;;  %v1317_v5 = vsel %vm1281_vm2, %v6945_v51, -inf }
 0x3f4   :  { %v1294_v31 = vrot.slane %v1293_v33, 1  ;;  %v1306_v37 = vrot.slane %v1305_v13, 2  ;;  %v1318_v8 = vrot.slane %v1317_v5, 4  ;;  %v1310_v18 = vsel %vm1281_vm2, %v6948_v16, -inf  ;;  %v5590_v61 = vpop.f32.mrb[10].mxu0 }
 0x3f5   :  { %v1287_v52 = vrot.slane %v1286_v27, 1  ;;  %v1299_v63 = vrot.slane %v1298_v56, 2  ;;  %v1311_v24 = vrot.slane %v1310_v18, 4  ;;  %v6959_v49 = vadd.f32 %v5590_v61, %v6950_v7  ;;  %v1216_v50 = vpop.f32.mrb[11].mxu0  ;;  %v6966_v61 = vpop.permute.xlu1 %170 }
 0x3f6   :  { %v1295_v4 = vmax.f32 %v1293_v33, %v1294_v31  ;;  %v1307_v32 = vmax.f32 %v1305_v13, %v1306_v37  ;;  %v1319_v14 = vmax.f32 %v1317_v5, %v1318_v8  ;;  %v6962_v3 = vadd.f32 %v1216_v50, %v6956_v47  ;;  %8530 = vst [vmem:[#allocation28_spill] sm:$0xff] %v6966_v61 }
 0x3f7   :  { %v1288_v48 = vmax.f32 %v1286_v27, %v1287_v52  ;;  %v1300_v21 = vmax.f32 %v1298_v56, %v1299_v63  ;;  %v1312_v34 = vmax.f32 %v1310_v18, %v1311_v24  ;;  %v1331_v59 = vsel %vm1281_vm2, %v6959_v49, -inf }
 0x3f8   :  { %v1395_v35 = vsub.f32 %v1266_v0, %v1295_v4  ;;  %v1308_v22 = vrot.slane %v1307_v32, 1  ;;  %v1320_v53 = vrot.slane %v1319_v14, 2  ;;  %v1332_v40 = vrot.slane %v1331_v59, 4  ;;  %v5593_v1 = vpop.f32.mrb[12].mxu0 }
 0x3f9   :  { %v1394_v33 = vsub.f32 %v6925_v30, %v1288_v48  ;;  %v1301_v13 = vrot.slane %v1300_v21, 1  ;;  %v1313_v5 = vrot.slane %v1312_v34, 2  ;;  %v1324_v31 = vsel %vm1281_vm2, %v6962_v3, -inf  ;;  %v1226_v27 = vpop.f32.mrb[13].mxu0  ;;  %v6972_v30 = vpop.permute.xlu0 %163 }
 0x3fa   :  { %v1412_v56 = vmul.f32 1.442695, %v1395_v35  ;;  %v1309_v37 = vmax.f32 %v1307_v32, %v1308_v22  ;;  %v1321_v8 = vmax.f32 %v1319_v14, %v1320_v53  ;;  %v1333_v18 = vmax.f32 %v1331_v59, %v1332_v40  ;;  %8531 = vst [vmem:[#allocation29_spill] sm:$0xff] %v6972_v30 }
 0x3fb   :  { %v1410_v52 = vmul.f32 1.442695, %v1394_v33  ;;  %v1302_v0 = vmax.f32 %v1300_v21, %v1301_v13  ;;  %v1314_v63 = vmax.f32 %v1312_v34, %v1313_v5  ;;  %v1325_v24 = vrot.slane %v1324_v31, 4  ;;  %v6978_v21 = vpop.permute.xlu1 %184 }
 0x3fc   :  { %5923 = vpow2.f32 %v1412_v56  ;;  %v1397_v50 = vsub.f32 %v6933_v45, %v1309_v37  ;;  %v1322_v4 = vrot.slane %v1321_v8, 1  ;;  %v1334_v47 = vrot.slane %v1333_v18, 2  ;;  %v5596_v48 = vpop.f32.mrb[14].mxu0  ;;  %8532 = vst [vmem:[#allocation30_spill] sm:$0xff] %v6978_v21 }
 0x3fd   :  { %5925 = vpow2.f32 %v1410_v52  ;;  %v1396_v7 = vsub.f32 %v6936_v29, %v1302_v0  ;;  %v1315_v60 = vrot.slane %v1314_v63, 1  ;;  %v1326_v35 = vmax.f32 %v1324_v31, %v1325_v24  ;;  %v1236_v22 = vpop.f32.mrb[15].mxu0 }
 0x3fe   :  { %v1416_v53 = vmul.f32 1.442695, %v1397_v50  ;;  %v1323_v40 = vmax.f32 %v1321_v8, %v1322_v4  ;;  %v1335_v59 = vmax.f32 %v1333_v18, %v1334_v47  ;;  %v6976_v34 = vadd.f32 %v5593_v1, %v6966_v61 }
 0x3ff   :  { %v1414_v45 = vmul.f32 1.442695, %v1396_v7  ;;  %v1316_v32 = vmax.f32 %v1314_v63, %v1315_v60  ;;  %v1327_v14 = vrot.slane %v1326_v35, 2  ;;  %v6981_v33 = vadd.f32 %v1226_v27, %v6972_v30 }
 0x400   :  { %5927 = vpow2.f32 %v1416_v53  ;;  %v1399_v29 = vsub.f32 %v6945_v51, %v1323_v40  ;;  %v1336_v13 = vrot.slane %v1335_v59, 1  ;;  %v1345_v5 = vsel %vm1281_vm2, %v6976_v34, -inf  ;;  %v5599_v31 = vpop.f32.mrb[16].mxu0  ;;  %v6994_v51 = vpop.permute.xlu0 %177 }
 0x401   :  { %5929 = vpow2.f32 %v1414_v45  ;;  %v1398_v47 = vsub.f32 %v6948_v16, %v1316_v32  ;;  %v1328_v1 = vmax.f32 %v1326_v35, %v1327_v14  ;;  %v1346_v56 = vrot.slane %v1345_v5, 4  ;;  %v6987_v37 = vpop.f32.mrb[17].mxu0  ;;  %8533 = vst [vmem:[#allocation31_spill] sm:$0xff] %v6994_v51  ;;  %v7004_v35 = vpop.permute.xlu1 %198 }
 0x402   :  { %v1420_v60 = vmul.f32 1.442695, %v1399_v29  ;;  %v1337_v7 = vmax.f32 %v1335_v59, %v1336_v13  ;;  %v1338_v27 = vsel %vm1281_vm2, %v6981_v33, -inf  ;;  %v6992_v8 = vadd.f32 %v5596_v48, %v6978_v21  ;;  %8534 = vst [vmem:[#allocation32_spill] sm:$0xff] %v7004_v35 }
 0x403   :  { %v1418_v18 = vmul.f32 1.442695, %v1398_v47  ;;  %v1329_v52 = vrot.slane %v1328_v1, 1  ;;  %v1347_v0 = vmax.f32 %v1345_v5, %v1346_v56  ;;  %v1339_v63 = vrot.slane %v1338_v27, 4 }
 0x404   :  { %5931 = vpow2.f32 %v1420_v60  ;;  %v1401_v16 = vsub.f32 %v6959_v49, %v1337_v7  ;;  %v1359_v24 = vsel %vm1281_vm2, %v6992_v8, -inf  ;;  %v7000_v50 = vadd.f32 %v1236_v22, %v6994_v51  ;;  %v7002_v4 = vpop.f32.mrb[18].mxu0 }
 0x405   :  { %5933 = vpow2.f32 %v1418_v18  ;;  %v1330_v48 = vmax.f32 %v1328_v1, %v1329_v52  ;;  %v1348_v53 = vrot.slane %v1347_v0, 2  ;;  %v1340_v40 = vmax.f32 %v1338_v27, %v1339_v63  ;;  %v7006_v59 = vpop.f32.mrb[19].mxu0 }
 0x406   :  { %v7008_v45 = vpop.eup %5923  ;;  %v1424_v32 = vmul.f32 1.442695, %v1401_v16  ;;  %v1360_v49 = vrot.slane %v1359_v24, 4  ;;  %v1352_v14 = vsel %vm1281_vm2, %v7000_v50, -inf  ;;  %v7013_v22 = vadd.f32 %v5599_v31, %v7004_v35 }
 0x407   :  { %v7015_v29 = vpop.eup %5925  ;;  %v1449_v13 = vsel %vm1281_vm2, %v7008_v45, 0.0  ;;  %v1400_v5 = vsub.f32 %v6962_v3, %v1330_v48  ;;  %v1349_v47 = vmax.f32 %v1347_v0, %v1348_v53  ;;  %v1341_v1 = vrot.slane %v1340_v40, 2 }
 0x408   :  { %v1450_v56 = vrot.slane %v1449_v13, 4  ;;  %v1442_v60 = vsel %vm1281_vm2, %v7015_v29, 0.0  ;;  %5935 = vpow2.f32 %v1424_v32  ;;  %v1361_v7 = vmax.f32 %v1359_v24, %v1360_v49  ;;  %v7022_v27 = vpop.f32.mrb[20].mxu0 }
 0x409   :  { %v1443_v18 = vrot.slane %v1442_v60, 4  ;;  %v1422_v31 = vmul.f32 1.442695, %v1400_v5  ;;  %v1350_v52 = vrot.slane %v1349_v47, 1  ;;  %v1342_v63 = vmax.f32 %v1340_v40, %v1341_v1  ;;  %v5635_v16 = vpop.f32.mrb[21].mxu0 }
 0x40a   :  { %v7024_v35 = vpop.eup %5927  ;;  %v1451_v51 = vadd.f32 %v1450_v56, %v1449_v13  ;;  %v1362_v21 = vrot.slane %v1361_v7, 2  ;;  %v1353_v3 = vrot.slane %v1352_v14, 4  ;;  %v7026_v0 = vpop.f32.mrb[22].mxu0  ;;  %v1373_v61 = vsel %vm1281_vm2, %v7013_v22, -inf }
 0x40b   :  { %v7028_v48 = vpop.eup %5929  ;;  %v1444_v53 = vadd.f32 %v1443_v18, %v1442_v60  ;;  %v1463_v24 = vsel %vm1281_vm2, %v7024_v35, 0.0  ;;  %5937 = vpow2.f32 %v1422_v31  ;;  %v1351_v32 = vmax.f32 %v1349_v47, %v1350_v52  ;;  %v5636_v49 = vpop.f32.mrb[23].mxu0 }
 0x40c   :  { %v1452_v5 = vrot.slane %v1451_v51, 2  ;;  %v1464_v30 = vrot.slane %v1463_v24, 4  ;;  %v1456_v40 = vsel %vm1281_vm2, %v7028_v48, 0.0  ;;  %v1343_v1 = vrot.slane %v1342_v63, 1 }
 0x40d   :  { %v1445_v13 = vrot.slane %v1444_v53, 2  ;;  %v1457_v56 = vrot.slane %v1456_v40, 4  ;;  %v1403_v16 = vsub.f32 %v6976_v34, %v1351_v32  ;;  %v1363_v47 = vmax.f32 %v1361_v7, %v1362_v21 }
 0x40e   :  { %v7037_v60 = vpop.eup %5931  ;;  %v1453_v18 = vadd.f32 %v1452_v5, %v1451_v51  ;;  %v1465_v58 = vadd.f32 %v1464_v30, %v1463_v24  ;;  %v1344_v31 = vmax.f32 %v1342_v63, %v1343_v1  ;;  %v1354_v30 = vmax.f32 %v1352_v14, %v1353_v3 }
 0x40f   :  { %v7039_v52 = vpop.eup %5933  ;;  %v7041_v49 = vadd.f32 %v1445_v13, %v1444_v53  ;;  %v1458_v10 = vadd.f32 %v1457_v56, %v1456_v40  ;;  %v1477_v6 = vsel %vm1281_vm2, %v7037_v60, 0.0  ;;  %v1428_v55 = vmul.f32 1.442695, %v1403_v16  ;;  %v7056_v56 = vpop.permute.xlu0 %191 }
 0x410   :  { %v1454_v2 = vrot.slane %v1453_v18, 1  ;;  %v1466_v34 = vrot.slane %v1465_v58, 2  ;;  %v1478_v32 = vrot.slane %v1477_v6, 4  ;;  %v1470_v12 = vsel %vm1281_vm2, %v7039_v52, 0.0  ;;  %8535 = vst [vmem:[#allocation33_spill] sm:$0xff] %v7056_v56 }
 0x411   :  { %v1459_v43 = vrot.slane %v1458_v10, 2  ;;  %v1471_v51 = vrot.slane %v1470_v12, 4  ;;  %5939 = vpow2.f32 %v1428_v55  ;;  %v1402_v24 = vsub.f32 %v6981_v33, %v1344_v31 }
 0x412   :  { %v7047_v21 = vpop.eup %5935  ;;  %v1455_v7 = vadd.f32 %v1454_v2, %v1453_v18  ;;  %v7049_v63 = vadd.f32 %v1466_v34, %v1465_v58  ;;  %v1479_v53 = vadd.f32 %v1478_v32, %v1477_v6  ;;  %v1364_v13 = vrot.slane %v1363_v47, 1 }
 0x413   :  { %v7052_v5 = vadd.f32 %v1459_v43, %v1458_v10  ;;  %v1472_v40 = vadd.f32 %v1471_v51, %v1470_v12  ;;  %v1491_v1 = vsel %vm1281_vm2, %v7047_v21, 0.0  ;;  %v1447_v55 = vrot.slane %v7041_v49, 1 }
 0x414   :  { %v1555_v16 = vadd.f32 1e-16, %v1455_v7  ;;  %v1480_v14 = vrot.slane %v1479_v53, 2  ;;  %v1492_v3 = vrot.slane %v1491_v1, 4  ;;  %v1426_v33 = vmul.f32 1.442695, %v1402_v24  ;;  %v7070_v24 = vpop.permute.xlu1 %212 }
 0x415   :  { %v7059_v2 = vpop.eup %5937  ;;  %v1473_v6 = vrot.slane %v1472_v40, 2  ;;  %v1365_v43 = vmax.f32 %v1363_v47, %v1364_v13  ;;  %v1355_v58 = vrot.slane %v1354_v30, 2  ;;  %v1374_v19 = vrot.slane %v1373_v61, 4  ;;  %8536 = vst [vmem:[#allocation34_spill] sm:$0xff] %v7070_v24 }
 0x416   :  { %5941 = vrcp.f32 %v1555_v16  ;;  %v7062_v12 = vadd.f32 %v1480_v14, %v1479_v53  ;;  %v1493_v10 = vadd.f32 %v1492_v3, %v1491_v1  ;;  %v1484_v18 = vsel %vm1281_vm2, %v7059_v2, 0.0  ;;  %v7077_v16 = vpop.permute.xlu0 %205 }
 0x417   :  { %v1485_v34 = vrot.slane %v1484_v18, 4  ;;  %5943 = vpow2.f32 %v1426_v33  ;;  %v1405_v32 = vsub.f32 %v6992_v8, %v1365_v43  ;;  %v7068_v51 = vadd.f32 %v1473_v6, %v1472_v40  ;;  %8537 = vst [vmem:[#allocation35_spill] sm:$0xff] %v7077_v16 }
 0x418   :  { %v1494_v7 = vrot.slane %v1493_v10, 2  ;;  %v7075_v13 = vadd.f32 %v6987_v37, %v7056_v56  ;;  %v1356_v8 = vmax.f32 %v1354_v30, %v1355_v58  ;;  %v1375_v40 = vmax.f32 %v1373_v61, %v1374_v19 }
 0x419   :  { %v1486_v53 = vadd.f32 %v1485_v34, %v1484_v18  ;;  %v1432_v1 = vmul.f32 1.442695, %v1405_v32  ;;  %v7083_v3 = vadd.f32 %v7002_v4, %v7070_v24  ;;  %v7091_v37 = vadd.f32 %v7006_v59, %v7077_v16 }
 0x41a   :  { %v7079_v14 = vadd.f32 %v1494_v7, %v1493_v10  ;;  %v1366_v43 = vsel %vm1281_vm2, %v7075_v13, -inf  ;;  %v1475_v10 = vrot.slane %v7068_v51, 1  ;;  %v1357_v61 = vrot.slane %v1356_v8, 1 }
 0x41b   :  { %v7085_v6 = vpop.eup %5939  ;;  %v1487_v33 = vrot.slane %v1486_v53, 2  ;;  %5945 = vpow2.f32 %v1432_v1  ;;  %v1376_v30 = vrot.slane %v1375_v40, 2  ;;  %v1367_v18 = vrot.slane %v1366_v43, 4 }
 0x41c   :  { %v1505_v19 = vsel %vm1281_vm2, %v7085_v6, 0.0  ;;  %v1387_v34 = vsel %vm1281_vm2, %v7083_v3, -inf  ;;  %v1358_v32 = vmax.f32 %v1356_v8, %v1357_v61  ;;  %v1380_v59 = vsel %vm1281_vm2, %v7091_v37, -inf }
 0x41d   :  { %v7096_v4 = vadd.f32 %v1487_v33, %v1486_v53  ;;  %v1506_v58 = vrot.slane %v1505_v19, 4  ;;  %v1377_v7 = vmax.f32 %v1375_v40, %v1376_v30  ;;  %v1388_v1 = vrot.slane %v1387_v34, 4 }
 0x41e   :  { %v1368_v16 = vmax.f32 %v1366_v43, %v1367_v18  ;;  %v1381_v24 = vrot.slane %v1380_v59, 4  ;;  %v1404_v53 = vsub.f32 %v7000_v50, %v1358_v32  ;;  %v1448_v25 = vadd.f32 %v1447_v55, %v7041_v49 }
 0x41f   :  { %v1507_v31 = vadd.f32 %v1506_v58, %v1505_v19  ;;  %v1378_v33 = vrot.slane %v1377_v7, 1  ;;  %v1389_v20 = vmax.f32 %v1387_v34, %v1388_v1  ;;  %v1489_v8 = vrot.slane %v7096_v4, 1 }
 0x420   :  { %v7103_v56 = vpop.eup %5941  ;;  %v1369_v61 = vrot.slane %v1368_v16, 2  ;;  %v1382_v30 = vmax.f32 %v1380_v59, %v1381_v24  ;;  %v1430_v43 = vmul.f32 1.442695, %v1404_v53  ;;  %v1554_v34 = vadd.f32 1e-16, %v1448_v25 }
 0x421   :  { %v7107_v17 = vpop.eup %5943  ;;  %v1508_v40 = vrot.slane %v1507_v31, 2  ;;  %v1379_v58 = vmax.f32 %v1377_v7, %v1378_v33  ;;  %v1390_v18 = vrot.slane %v1389_v20, 2  ;;  %v8538_v25 = vrot.slane %v7052_v5, 1 }
 0x422   :  { %v1498_v19 = vsel %vm1281_vm2, %v7107_v17, 0.0  ;;  %v1370_v50 = vmax.f32 %v1368_v16, %v1369_v61  ;;  %v1383_v32 = vrot.slane %v1382_v30, 2  ;;  %5947 = vpow2.f32 %v1430_v43 }
 0x423   :  { %v1509_v47 = vadd.f32 %v1508_v40, %v1507_v31  ;;  %v1499_v44 = vrot.slane %v1498_v19, 4  ;;  %v1407_v49 = vsub.f32 %v7013_v22, %v1379_v58  ;;  %v1391_v55 = vmax.f32 %v1389_v20, %v1390_v18 }
 0x424   :  { %v1371_v24 = vrot.slane %v1370_v50, 1  ;;  %v1384_v59 = vmax.f32 %v1382_v30, %v1383_v32  ;;  %5949 = vrcp.f32 %v1554_v34  ;;  %v1462_v20 = vadd.f32 %v8538_v25, %v7052_v5 }
 0x425   :  { %v7113_v1 = vpop.eup %5945  ;;  %v1510_v57 = vrot.slane %v1509_v47, 1  ;;  %v1500_v9 = vadd.f32 %v1499_v44, %v1498_v19  ;;  %v1436_v7 = vmul.f32 1.442695, %v1407_v49  ;;  %v1392_v33 = vrot.slane %v1391_v55, 1 }
 0x426   :  { %v1519_v53 = vsel %vm1281_vm2, %v7113_v1, 0.0  ;;  %v1372_v40 = vmax.f32 %v1370_v50, %v1371_v24  ;;  %v1385_v61 = vrot.slane %v1384_v59, 1  ;;  %v8539_v44 = vrot.slane %v7049_v63, 1 }
 0x427   :  { %v1501_v31 = vrot.slane %v1500_v9, 2  ;;  %v1520_v16 = vrot.slane %v1519_v53, 4  ;;  %5951 = vpow2.f32 %v1436_v7  ;;  %v1393_v22 = vmax.f32 %v1391_v55, %v1392_v33 }
 0x428   :  { %v1469_v30 = vadd.f32 %v8539_v44, %v7049_v63  ;;  %v1406_v58 = vsub.f32 %v7075_v13, %v1372_v40  ;;  %v1386_v18 = vmax.f32 %v1384_v59, %v1385_v61  ;;  %v1556_v49 = vadd.f32 1e-16, %v1462_v20 }
 0x429   :  { %v1502_v19 = vadd.f32 %v1501_v31, %v1500_v9  ;;  %v1521_v43 = vadd.f32 %v1520_v16, %v1519_v53  ;;  %v1409_v32 = vsub.f32 %v7083_v3, %v1393_v22  ;;  %v1476_v34 = vadd.f32 %v1475_v10, %v7068_v51 }
 0x42a   :  { %v1557_v50 = vadd.f32 1e-16, %v1469_v30  ;;  %v1434_v7 = vmul.f32 1.442695, %v1406_v58  ;;  %v1408_v5 = vsub.f32 %v7091_v37, %v1386_v18  ;;  %5953 = vrcp.f32 %v1556_v49 }
 0x42b   :  { %v1503_v55 = vrot.slane %v1502_v19, 1  ;;  %v1522_v24 = vrot.slane %v1521_v43, 2  ;;  %v1440_v33 = vmul.f32 1.442695, %v1409_v32  ;;  %v1558_v25 = vadd.f32 1e-16, %v1476_v34 }
 0x42c   :  { %v8540_v9 = vrot.slane %v7062_v12, 1  ;;  %5955 = vpow2.f32 %v1434_v7  ;;  %v1438_v59 = vmul.f32 1.442695, %v1408_v5  ;;  %v1490_v3 = vadd.f32 %v1489_v8, %v7096_v4  ;;  %v7131_v53 = vpop.eup %5947 }
 0x42d   :  { %v1523_v13 = vadd.f32 %v1522_v24, %v1521_v43  ;;  %5957 = vpow2.f32 %v1440_v33  ;;  %v8541_v10 = vrot.slane %v7079_v14, 1  ;;  %v1504_v31 = vadd.f32 %v1503_v55, %v1502_v19 }
 0x42e   :  { %v1483_v63 = vadd.f32 %v8540_v9, %v7062_v12  ;;  %v1512_v16 = vsel %vm1281_vm2, %v7131_v53, 0.0  ;;  %5959 = vpow2.f32 %v1438_v59  ;;  %v1560_v40 = vadd.f32 1e-16, %v1490_v3  ;;  %v5950_v12 = vpop.eup %5949 }
 0x42f   :  { %v1497_v37 = vadd.f32 %v8541_v10, %v7079_v14  ;;  %v1524_v61 = vrot.slane %v1523_v13, 1  ;;  %v1513_v22 = vrot.slane %v1512_v16, 4  ;;  %5961 = vrcp.f32 %v1557_v50 }
 0x430   :  { %v1559_v51 = vadd.f32 1e-16, %v1483_v63  ;;  %v1602_v4 = vmul.f32 %v5950_v12, %v7015_v29  ;;  %5963 = vrcp.f32 %v1558_v25  ;;  %v1562_v8 = vadd.f32 1e-16, %v1504_v31 }
 0x431   :  { %v1511_v20 = vadd.f32 %v1510_v57, %v1509_v47  ;;  %v7139_v44 = vpop.eup %5951  ;;  %v1603_v14 = vmul.f32 %v7103_v56, %v7008_v45  ;;  %v1514_v30 = vadd.f32 %v1513_v22, %v1512_v16  ;;  %v1561_v19 = vadd.f32 1e-16, %v1497_v37 }
 0x432   :  { %5965 = vrcp.f32 %v1559_v51  ;;  %v1533_v43 = vsel %vm1281_vm2, %v7139_v44, 0.0  ;;  %5605 = vmatprep.mubr.msk.f32.mxu1 %vm1281_vm2, %v1602_v4  ;;  %v1525_v29 = vadd.f32 %v1524_v61, %v1523_v13 }
 0x433   :  { %5967 = vrcp.f32 %v1560_v40  ;;  %v1515_v58 = vrot.slane %v1514_v30, 2  ;;  %v1534_v18 = vrot.slane %v1533_v43, 4  ;;  %5606 = vmatmul.mubr.msk.f32.vlgmr.msra.gmra.mrb[16].mxu1 %vm1281_vm2, %v1603_v14  ;;  %v1563_v57 = vadd.f32 1e-16, %v1511_v20 }
 0x434   :  { %5969 = vrcp.f32 %v1562_v8  ;;  %v5954_v47 = vpop.eup %5953  ;;  %v1565_v25 = vadd.f32 1e-16, %v1525_v29 }
 0x435   :  { %v1516_v32 = vadd.f32 %v1515_v58, %v1514_v30  ;;  %v1535_v49 = vadd.f32 %v1534_v18, %v1533_v43  ;;  %5971 = vrcp.f32 %v1561_v19  ;;  %v1604_v56 = vmul.f32 %v5954_v47, %v7028_v48 }
 0x436   :  { %v7147_v45 = vpop.eup %5955  ;;  %5973 = vrcp.f32 %v1563_v57 }
 0x437   :  { %v7150_v50 = vpop.eup %5957  ;;  %v1517_v34 = vrot.slane %v1516_v32, 1  ;;  %v1536_v55 = vrot.slane %v1535_v49, 2  ;;  %v1526_v24 = vsel %vm1281_vm2, %v7147_v45, 0.0  ;;  %5608 = vmatprep.mubr.msk.f32.mxu1 %vm1281_vm2, %v1604_v56  ;;  %5975 = vrcp.f32 %v1565_v25 }
 0x438   :  { %v7154_v7 = vpop.eup %5959  ;;  %v1527_v5 = vrot.slane %v1526_v24, 4  ;;  %v1547_v33 = vsel %vm1281_vm2, %v7150_v50, 0.0 }
 0x439   :  { %v5962_v9 = vpop.eup %5961  ;;  %v1537_v63 = vadd.f32 %v1536_v55, %v1535_v49  ;;  %v1548_v48 = vrot.slane %v1547_v33, 4  ;;  %v1540_v13 = vsel %vm1281_vm2, %v7154_v7, 0.0  ;;  %v1518_v59 = vadd.f32 %v1517_v34, %v1516_v32 }
 0x43a   :  { %v5964_v3 = vpop.eup %5963  ;;  %v1528_v51 = vadd.f32 %v1527_v5, %v1526_v24  ;;  %v1541_v10 = vrot.slane %v1540_v13, 4  ;;  %v1605_v37 = vmul.f32 %v5962_v9, %v7024_v35 }
 0x43b   :  { %v1538_v16 = vrot.slane %v1537_v63, 1  ;;  %v1549_v40 = vadd.f32 %v1548_v48, %v1547_v33  ;;  %v1606_v12 = vmul.f32 %v5964_v3, %v7039_v52  ;;  %v1564_v61 = vadd.f32 1e-16, %v1518_v59 }
 0x43c   :  { %v5966_v31 = vpop.eup %5965  ;;  %v1529_v4 = vrot.slane %v1528_v51, 2  ;;  %v1542_v8 = vadd.f32 %v1541_v10, %v1540_v13  ;;  %5609 = vmatmul.mubr.msk.f32.gmra.mrb[18].mxu1 %vm1281_vm2, %v1605_v37  ;;  %v8542_v37 = vmov 0.0  }
 0x43d   :  { %v5968_v22 = vpop.eup %5967  ;;  %v1550_v20 = vrot.slane %v1549_v40, 2  ;;  %5611 = vmatprep.mubr.msk.f32.mxu1 %vm1281_vm2, %v1606_v12  ;;  %5977 = vrcp.f32 %v1564_v61  ;;  %v1539_v30 = vadd.f32 %v1538_v16, %v1537_v63  ;;  %v1607_v58 = vmul.f32 %v5966_v31, %v7037_v60 }
 0x43e   :  { %v1608_v14 = vmul.f32 %v5968_v22, %v7059_v2  ;;  %v5970_v35 = vpop.eup %5969  ;;  %v1530_v19 = vadd.f32 %v1529_v4, %v1528_v51  ;;  %v1543_v43 = vrot.slane %v1542_v8, 2 }
 0x43f   :  { %v5972_v52 = vpop.eup %5971  ;;  %v1551_v18 = vadd.f32 %v1550_v20, %v1549_v40  ;;  %v1610_v32 = vmul.f32 %v5970_v35, %v7107_v17  ;;  %v1567_v49 = vadd.f32 1e-16, %v1539_v30 }
 0x440   :  { %v1531_v57 = vrot.slane %v1530_v19, 1  ;;  %v1544_v29 = vadd.f32 %v1543_v43, %v1542_v8  ;;  %5612 = vmatmul.mubr.msk.f32.gmra.mrb[20].mxu1 %vm1281_vm2, %v1607_v58  ;;  %v5974_v2 = vpop.eup %5973  ;;  %v1609_v34 = vmul.f32 %v5972_v52, %v7047_v21 }
 0x441   :  { %v1552_v47 = vrot.slane %v1551_v18, 1  ;;  %5614 = vmatprep.mubr.msk.f32.mxu1 %vm1281_vm2, %v1608_v14  ;;  %5979 = vrcp.f32 %v1567_v49  ;;  %v5976_v25 = vpop.eup %5975  ;;  %v1611_v9 = vmul.f32 %v5974_v2, %v7085_v6 }
 0x442   :  { %v1545_v56 = vrot.slane %v1544_v29, 1  ;;  %v1532_v55 = vadd.f32 %v1531_v57, %v1530_v19  ;;  %v1613_v48 = vmul.f32 %v5976_v25, %v7113_v1 }
 0x443   :  { %v1553_v24 = vadd.f32 %v1552_v47, %v1551_v18 }
 0x444   :  { %5615 = vmatmul.mubr.msk.f32.gmra.mrb[22].mxu1 %vm1281_vm2, %v1609_v34  ;;  %v1566_v60 = vadd.f32 1e-16, %v1532_v55  ;;  %v1546_v5 = vadd.f32 %v1545_v56, %v1544_v29 }
 0x445   :  { %5617 = vmatprep.mubr.msk.f32.mxu1 %vm1281_vm2, %v1610_v32  ;;  %v1569_v33 = vadd.f32 1e-16, %v1553_v24 }
 0x446   :  { %5981 = vrcp.f32 %v1566_v60  ;;  %v1568_v17 = vadd.f32 1e-16, %v1546_v5 }
 0x447   :  { %v5978_v63 = vpop.eup %5977 }
 0x448   :  { %5618 = vmatmul.mubr.msk.f32.gmra.mrb[24].mxu1 %vm1281_vm2, %v1611_v9  ;;  %v1612_v21 = vmul.f32 %v5978_v63, %v7131_v53  ;;  %5983 = vrcp.f32 %v1568_v17 }
 0x449   :  { %5985 = vrcp.f32 %v1569_v33 }
 0x44a   :  { %5620 = vmatprep.mubr.msk.f32.mxu1 %vm1281_vm2, %v1612_v21 }
 0x44b   :  { %v5980_v13 = vpop.eup %5979 }
 0x44c   :  { %5621 = vmatmul.mubr.msk.f32.gmra.mrb[26].mxu1 %vm1281_vm2, %v1613_v48  ;;  %v1615_v51 = vmul.f32 %v5980_v13, %v7139_v44  ;;  %v5853_v44 = vld [vmem:[%s8437_s8] sm:$0xff]  }
 0x44d   :  { %5638 = vmatpush3.bf16.msra.mxu0 %v5853_v44 }
 0x44e   :  { %5639 = vmatprep.subr.bf16.mxu0 %v8542_v37 }
 0x450   :  { %v5982_v59 = vpop.eup %5981 }
 0x451   :  { %v1614_v3 = vmul.f32 %v5982_v59, %v7147_v45  ;;  %v5854_v45 = vld [vmem:[%s8437_s8 + $0x8] sm:$0xff]  }
 0x452   :  { %v5984_v6 = vpop.eup %5983  ;;  %5640 = vmatpush3.bf16.msra.mxu0 %v5854_v45 }
 0x453   :  { %v5986_v10 = vpop.eup %5985  ;;  %5623 = vmatprep.mubr.msk.f32.mxu1 %vm1281_vm2, %v1614_v3  ;;  %v1616_v53 = vmul.f32 %v5984_v6, %v7154_v7  ;;  %5645 = vmatprep.subr.bf16.mxu0 %v8542_v37  ;;  %v7197_v7 = vpop.permute.xlu1 %1829 }
 0x454   :  { %5624 = vmatmul.mubr.msk.f32.gmra.mrb[28].mxu1 %vm1281_vm2, %v1615_v51  ;;  %v1617_v1 = vmul.f32 %v5986_v10, %v7150_v50  ;;  %v1814_v50 = vpop.permute.xlu0 %1813 }
 0x455   :  { %5626 = vmatprep.mubr.msk.f32.mxu1 %vm1281_vm2, %v1616_v53 }
 0x457   :  { %v7199_v16 = vpop.permute.xlu1 %1831 }
 0x458   :  { %5627 = vmatmul.mubr.msk.f32.gmra.mrb[30].mxu1 %vm1281_vm2, %v1617_v1  ;;  %v1816_v31 = vpop.permute.xlu0 %1815 }
 0x459   :  { %5677 = vmatprep.mubr.msk.bf16.mxu1 %vm6127_vm1, %v8542_v37 }
 0x45b   :  { %v1818_v12 = vpop.permute.xlu1 %1817 }
 0x45c   :  { %v1812_v40 = vpop.permute.xlu0 %1811 }
 0x45f   :  { %v7203_v22 = vpop.permute.xlu1 %1833 }
 0x460   :  { %v7201_v61 = vpop.permute.xlu0 %1827 }
 0x463   :  { %v7205_v8 = vpop.permute.xlu1 %1835 }
 0x464   :  { %v1820_v4 = vpop.permute.xlu0 %1819 }
 0x467   :  { %v7207_v14 = vpop.permute.xlu1 %1839 }
 0x468   :  { %v1822_v20 = vpop.permute.xlu0 %1821 }
 0x46b   :  { %v7209_v19 = vpop.permute.xlu1 %1841 }
 0x46c   :  { %v1824_v30 = vpop.permute.xlu0 %1823 }
 0x46f   :  { %v7213_v2 = vpop.permute.xlu1 %1837 }
 0x470   :  { %v1826_v18 = vpop.permute.xlu0 %1825 }
 0x473   :  { %v7219_v48 = vpop.permute.xlu1 %1993 }
 0x474   :  { %v7215_v34 = vpop.permute.xlu0 %1989  ;;  %8544 = vst [vmem:[#allocation37_spill] sm:$0xff] %v7219_v48 }
 0x475   :  { %8543 = vst [vmem:[#allocation36_spill] sm:$0xff] %v7215_v34  ;;  %v8489_v9 = vrot.slane %v7215_v34, 1  ;;  %v8493_v21 = vrot.slane %v7215_v34, 2  ;;  %v8494_v13 = vrot.slane %v7215_v34, 3  ;;  %v8491_v6 = vrot.slane %v7215_v34, 4 }
 0x476   :  { %v8492_v51 = vrot.slane %v7215_v34, 5  ;;  %v8490_v45 = vrot.slane %v7215_v34, 7 }
 0x506   :  { %v5607_v35 = vpop.f32.mrb[16].mxu1 }
 0x507   :  { %v1860_v43 = vmul.f32 %v5607_v35, %v1814_v50  ;;  %v1732_v58 = vpop.f32.mrb[17].mxu1 }
 0x508   :  { %v1859_v52 = vmul.f32 %v1812_v40, %v1732_v58 }
 0x509   :  { %v1882_v57 = vsel %vm221_vm0, %v1860_v43, 0.0 }
 0x50a   :  { %v1883_v29 = vrot.slane %v1882_v57, 4  ;;  %v1875_v47 = vsel %vm221_vm0, %v1859_v52, 0.0 }
 0x50b   :  { %v1876_v32 = vrot.slane %v1875_v47, 4 }
 0x50c   :  { %v1884_v49 = vadd.f32 %v1883_v29, %v1882_v57 }
 0x50d   :  { %v1877_v56 = vadd.f32 %v1876_v32, %v1875_v47 }
 0x50e   :  { %v1885_v55 = vrot.slane %v1884_v49, 2 }
 0x50f   :  { %v1878_v24 = vrot.slane %v1877_v56, 2  ;;  %v5610_v60 = vpop.f32.mrb[18].mxu1 }
 0x510   :  { %v1886_v5 = vadd.f32 %v1885_v55, %v1884_v49  ;;  %v1862_v33 = vmul.f32 %v5610_v60, %v1818_v12  ;;  %v1742_v25 = vpop.f32.mrb[19].mxu1 }
 0x511   :  { %v1879_v17 = vadd.f32 %v1878_v24, %v1877_v56  ;;  %v1861_v63 = vmul.f32 %v1816_v31, %v1742_v25 }
 0x512   :  { %v1887_v59 = vrot.slane %v1886_v5, 1  ;;  %v1896_v3 = vsel %vm221_vm0, %v1862_v33, 0.0 }
 0x513   :  { %v1897_v10 = vrot.slane %v1896_v3, 4  ;;  %v1889_v53 = vsel %vm221_vm0, %v1861_v63, 0.0  ;;  %v5613_v1 = vpop.f32.mrb[20].mxu1  ;;  %v1880_v50 = vrot.slane %v1879_v17, 1 }
 0x514   :  { %v1890_v31 = vrot.slane %v1889_v53, 4  ;;  %v1864_v40 = vmul.f32 %v5613_v1, %v1822_v20  ;;  %v1752_v12 = vpop.f32.mrb[21].mxu1  ;;  %v1888_v43 = vadd.f32 %v1887_v59, %v1886_v5 }
 0x515   :  { %v1898_v58 = vadd.f32 %v1897_v10, %v1896_v3  ;;  %v1863_v52 = vmul.f32 %v1820_v4, %v1752_v12  ;;  %v1881_v33 = vadd.f32 %v1880_v50, %v1879_v17 }
 0x516   :  { %v1891_v29 = vadd.f32 %v1890_v31, %v1889_v53  ;;  %v1910_v47 = vsel %vm221_vm0, %v1864_v40, 0.0  ;;  %v7237_v53 = vmul.f32 %v8489_v9, %v1888_v43 }
 0x517   :  { %v1899_v56 = vrot.slane %v1898_v58, 2  ;;  %v1911_v55 = vrot.slane %v1910_v47, 4  ;;  %v1903_v24 = vsel %vm221_vm0, %v1863_v52, 0.0  ;;  %v5616_v20 = vpop.f32.mrb[22].mxu1 }
 0x518   :  { %v1892_v5 = vrot.slane %v1891_v29, 2  ;;  %v1904_v25 = vrot.slane %v1903_v24, 4  ;;  %v1866_v4 = vmul.f32 %v5616_v20, %v1826_v18  ;;  %v1762_v63 = vpop.f32.mrb[23].mxu1 }
 0x519   :  { %v1900_v59 = vadd.f32 %v1899_v56, %v1898_v58  ;;  %v1912_v3 = vadd.f32 %v1911_v55, %v1910_v47  ;;  %v1865_v10 = vmul.f32 %v1824_v30, %v1762_v63 }
 0x51a   :  { %v1905_v1 = vadd.f32 %v1904_v25, %v1903_v24  ;;  %v1924_v31 = vsel %vm221_vm0, %v1866_v4, 0.0  ;;  %v1893_v52 = vadd.f32 %v1892_v5, %v1891_v29  ;;  %v7246_v25 = vmul.f32 %v7215_v34, %v1881_v33 }
 0x51b   :  { %v1913_v17 = vrot.slane %v1912_v3, 2  ;;  %v1925_v50 = vrot.slane %v1924_v31, 4  ;;  %v1917_v18 = vsel %vm221_vm0, %v1865_v10, 0.0  ;;  %v5619_v20 = vpop.f32.mrb[24].mxu1  ;;  %v1901_v58 = vrot.slane %v1900_v59, 1 }
 0x51c   :  { %v1906_v47 = vrot.slane %v1905_v1, 2  ;;  %v1918_v30 = vrot.slane %v1917_v18, 4  ;;  %v1868_v56 = vmul.f32 %v5619_v20, %v7197_v7  ;;  %v1772_v43 = vpop.f32.mrb[25].mxu1  ;;  %v2276_v29 = vrot.slane %v7237_v53, 7 }
 0x51d   :  { %v1926_v55 = vadd.f32 %v1925_v50, %v1924_v31  ;;  %v1867_v24 = vmul.f32 %v7201_v61, %v1772_v43  ;;  %v1914_v5 = vadd.f32 %v1913_v17, %v1912_v3  ;;  %v1894_v9 = vrot.slane %v1893_v52, 1 }
 0x51e   :  { %v1907_v4 = vadd.f32 %v1906_v47, %v1905_v1  ;;  %v1919_v63 = vadd.f32 %v1918_v30, %v1917_v18  ;;  %v1938_v10 = vsel %vm221_vm0, %v1868_v56, 0.0  ;;  %v1902_v40 = vadd.f32 %v1901_v58, %v1900_v59 }
 0x51f   :  { %v1927_v32 = vrot.slane %v1926_v55, 2  ;;  %v1939_v12 = vrot.slane %v1938_v10, 4  ;;  %v1931_v7 = vsel %vm221_vm0, %v1867_v24, 0.0  ;;  %v5622_v20 = vpop.f32.mrb[26].mxu1  ;;  %v1915_v1 = vrot.slane %v1914_v5, 1 }
 0x520   :  { %v1920_v31 = vrot.slane %v1919_v63, 2  ;;  %v1932_v50 = vrot.slane %v1931_v7, 4  ;;  %v1870_v61 = vmul.f32 %v5622_v20, %v7203_v22  ;;  %v1782_v33 = vpop.f32.mrb[27].mxu1  ;;  %v1908_v43 = vrot.slane %v1907_v4, 1 }
 0x521   :  { %v1928_v60 = vadd.f32 %v1927_v32, %v1926_v55  ;;  %v1940_v49 = vadd.f32 %v1939_v12, %v1938_v10  ;;  %v1869_v3 = vmul.f32 %v7199_v16, %v1782_v33  ;;  %v1895_v58 = vadd.f32 %v1894_v9, %v1893_v52 }
 0x522   :  { %v1921_v17 = vadd.f32 %v1920_v31, %v1919_v63  ;;  %v1933_v18 = vadd.f32 %v1932_v50, %v1931_v7  ;;  %v1952_v47 = vsel %vm221_vm0, %v1870_v61, 0.0  ;;  %v1909_v20 = vadd.f32 %v1908_v43, %v1907_v4 }
 0x523   :  { %v1929_v30 = vrot.slane %v1928_v60, 1  ;;  %v1941_v56 = vrot.slane %v1940_v49, 2  ;;  %v1953_v24 = vrot.slane %v1952_v47, 4  ;;  %v1945_v59 = vsel %vm221_vm0, %v1869_v3, 0.0 }
 0x524   :  { %v1922_v57 = vrot.slane %v1921_v17, 1  ;;  %v1934_v35 = vrot.slane %v1933_v18, 2  ;;  %v1946_v22 = vrot.slane %v1945_v59, 4  ;;  %v2041_v16 = vpack.c.bf16 %v7246_v25, %v7246_v25 }
 0x525   :  { %v1942_v44 = vadd.f32 %v1941_v56, %v1940_v49  ;;  %v1954_v32 = vadd.f32 %v1953_v24, %v1952_v47  ;;  %v1916_v12 = vadd.f32 %v1915_v1, %v1914_v5  ;;  %v1930_v55 = vadd.f32 %v1929_v30, %v1928_v60 }
 0x526   :  { %v1935_v63 = vadd.f32 %v1934_v35, %v1933_v18  ;;  %v1947_v10 = vadd.f32 %v1946_v22, %v1945_v59  ;;  %v1923_v7 = vadd.f32 %v1922_v57, %v1921_v17  ;;  %v7259_v9 = vsel %vm2151_vm3, %v2276_v29, %v7246_v25 }
 0x527   :  { %v1943_v31 = vrot.slane %v1942_v44, 1  ;;  %v1955_v50 = vrot.slane %v1954_v32, 2  ;;  %v5625_v61 = vpop.f32.mrb[28].mxu1  ;;  %v7264_v33 = vmul.f32 %v8493_v21, %v1895_v58  ;;  %v7268_v35 = vmul.f32 %v8494_v13, %v1902_v40 }
 0x528   :  { %v1948_v52 = vrot.slane %v1947_v10, 2  ;;  %v1872_v4 = vmul.f32 %v5625_v61, %v7213_v2  ;;  %v1792_v49 = vpop.f32.mrb[29].mxu1  ;;  %v1936_v57 = vrot.slane %v1935_v63, 1  ;;  %v7273_v29 = vmul.f32 %v8491_v6, %v1909_v20 }
 0x529   :  { %v1956_v60 = vadd.f32 %v1955_v50, %v1954_v32  ;;  %v1871_v5 = vmul.f32 %v7205_v8, %v1792_v49  ;;  %v7278_v3 = vmul.f32 %v8492_v51, %v1916_v12  ;;  %v7282_v1 = vmul.f32 %v8490_v45, %v1930_v55 }
 0x52a   :  { %v1949_v43 = vadd.f32 %v1948_v52, %v1947_v10  ;;  %v1966_v2 = vsel %vm221_vm0, %v1872_v4, 0.0  ;;  %v1944_v40 = vadd.f32 %v1943_v31, %v1942_v44  ;;  %v8545_v47 = vrot.slane %v7215_v34, 6 }
 0x52b   :  { %v1967_v17 = vrot.slane %v1966_v2, 4  ;;  %v1959_v8 = vsel %vm221_vm0, %v1871_v5, 0.0  ;;  %v5628_v18 = vpop.f32.mrb[30].mxu1  ;;  %v1957_v56 = vrot.slane %v1956_v60, 1  ;;  %v2043_v22 = vpack.c.bf16 %v7264_v33, %v7264_v33 }
 0x52c   :  { %v7287_v30 = vmul.f32 %v8545_v47, %v1923_v7  ;;  %v1960_v24 = vrot.slane %v1959_v8, 4  ;;  %v1874_v59 = vmul.f32 %v5628_v18, %v7209_v19  ;;  %v1802_v58 = vpop.f32.mrb[31].mxu1  ;;  %v7292_v20 = vadd.f32 %v1936_v57, %v1935_v63 }
 0x52d   :  { %v1950_v44 = vrot.slane %v1949_v43, 1  ;;  %v1968_v32 = vadd.f32 %v1967_v17, %v1966_v2  ;;  %v1873_v12 = vmul.f32 %v7207_v14, %v1802_v58  ;;  %v2044_v7 = vpack.c.bf16 %v7268_v35, %v7268_v35 }
 0x52e   :  { %v1961_v55 = vadd.f32 %v1960_v24, %v1959_v8  ;;  %v1980_v10 = vsel %vm221_vm0, %v1874_v59, 0.0  ;;  %v2045_v19 = vpack.c.bf16 %v7273_v29, %v7273_v29  ;;  %v2046_v61 = vpack.c.bf16 %v7278_v3, %v7278_v3 }
 0x52f   :  { %v1969_v31 = vrot.slane %v1968_v32, 2  ;;  %v1981_v50 = vrot.slane %v1980_v10, 4  ;;  %v1973_v63 = vsel %vm221_vm0, %v1873_v12, 0.0  ;;  %v1958_v14 = vadd.f32 %v1957_v56, %v1956_v60 }
 0x530   :  { %v1962_v52 = vrot.slane %v1961_v55, 2  ;;  %v1974_v4 = vrot.slane %v1973_v63, 4  ;;  %v2047_v49 = vpack.c.bf16 %v7287_v30, %v7287_v30  ;;  %v1951_v57 = vadd.f32 %v1950_v44, %v1949_v43 }
 0x531   :  { %v1970_v5 = vadd.f32 %v1969_v31, %v1968_v32  ;;  %v1982_v2 = vadd.f32 %v1981_v50, %v1980_v10  ;;  %v2048_v17 = vpack.c.bf16 %v7282_v1, %v7282_v1  ;;  %v7307_v47 = vunpack.c.l.b16 %v2041_v16 }
 0x532   :  { %v1963_v8 = vadd.f32 %v1962_v52, %v1961_v55  ;;  %v1975_v18 = vadd.f32 %v1974_v4, %v1973_v63  ;;  %v7309_v24 = vunpack.c.l.b16 %v2043_v22  ;;  %v7311_v60 = vunpack.c.l.b16 %v2044_v7 }
 0x533   :  { %v1971_v59 = vrot.slane %v1970_v5, 1  ;;  %v1983_v58 = vrot.slane %v1982_v2, 2  ;;  %v2278_v56 = vrot.slane %v7264_v33, 6  ;;  %v2280_v43 = vrot.slane %v7268_v35, 5 }
 0x534   :  { %v1964_v12 = vrot.slane %v1963_v8, 1  ;;  %v1976_v45 = vrot.slane %v1975_v18, 2  ;;  %v2282_v44 = vrot.slane %v7273_v29, 4  ;;  %v2284_v16 = vrot.slane %v7278_v3, 3 }
 0x535   :  { %v1984_v32 = vadd.f32 %v1983_v58, %v1982_v2  ;;  %v2279_v55 = vsel %vm2154_vm4, %v2278_v56, %v7259_v9  ;;  %v2286_v22 = vrot.slane %v7287_v30, 2  ;;  %v1972_v10 = vadd.f32 %v1971_v59, %v1970_v5 }
 0x536   :  { %v1965_v31 = vadd.f32 %v1964_v12, %v1963_v8  ;;  %v1977_v7 = vadd.f32 %v1976_v45, %v1975_v18  ;;  %v2281_v50 = vsel %vm2157_vm5, %v2280_v43, %v2279_v55  ;;  %v7321_v52 = vunpack.c.l.b16 %v2045_v19 }
 0x537   :  { %v1985_v63 = vrot.slane %v1984_v32, 1  ;;  %v2283_v4 = vsel %vm2160_vm6, %v2282_v44, %v2281_v50  ;;  %v2288_v6 = vrot.slane %v7282_v1, 1  ;;  %v8546_v9 = vrot.slane %v7219_v48, 1 }
 0x538   :  { %v1978_v2 = vrot.slane %v1977_v7, 1  ;;  %v2285_v58 = vsel %vm2163_vm7, %v2284_v16, %v2283_v4  ;;  %v8547_v5 = vrot.slane %v7219_v48, 2  ;;  %v2042_v19 = vpack.c.bf16 %v7237_v53, %v7237_v53 }
 0x539   :  { %v7328_v56 = vmul.f32 %v8546_v9, %v1944_v40  ;;  %v1986_v45 = vadd.f32 %v1985_v63, %v1984_v32  ;;  %v2287_v18 = vsel %vm2166_vm8, %v2286_v22, %v2285_v58  ;;  %v8548_v59 = vrot.slane %v7219_v48, 3 }
 0x53a   :  { %v7332_v8 = vmul.f32 %v8547_v5, %v1951_v57  ;;  %v1979_v43 = vadd.f32 %v1978_v2, %v1977_v7  ;;  %v2289_v44 = vsel %vm2169_vm9, %v2288_v6, %v2287_v18  ;;  %v8549_v40 = vrot.slane %v7219_v48, 4 }
 0x53b   :  { %v7339_v12 = vmul.f32 %v8548_v59, %v1958_v14  ;;  %v8550_v57 = vrot.slane %v7219_v48, 5  ;;  %2304 = vrot.lane.b32.xlu1 %v2289_v44, %s6129_s17  ;;  %v8551_v32 = vrot.slane %v7219_v48, 7  ;;  %v2050_v14 = vpack.c.bf16 %v7328_v56, %v7328_v56 }
 0x53c   :  { %v7344_v55 = vmul.f32 %v8549_v40, %v1965_v31  ;;  %v2051_v6 = vpack.c.bf16 %v7332_v8, %v7332_v8  ;;  %v8552_v7 = vrot.slane %v7219_v48, 6  ;;  %v2290_v4 = vrot.slane %v7328_v56, 7 }
 0x53d   :  { %v7348_v16 = vmul.f32 %v8550_v57, %v1972_v10  ;;  %v7353_v22 = vmul.f32 %v8551_v32, %v1986_v45  ;;  %v2052_v31 = vpack.c.bf16 %v7339_v12, %v7339_v12  ;;  %v7367_v10 = vmul.f32 %v7219_v48, %v7292_v20 }
 0x53e   :  { %v7363_v50 = vmul.f32 %v8552_v7, %v1979_v43  ;;  %v2053_v63 = vpack.c.bf16 %v7344_v55, %v7344_v55  ;;  %v2139_v2 = vunpack.c.l.b16 %v2046_v61  ;;  %v2140_v58 = vunpack.c.l.b16 %v2047_v49 }
 0x53f   :  { %v2141_v9 = vunpack.c.l.b16 %v2048_v17  ;;  %v2135_v5 = vunpack.c.l.b16 %v2042_v19  ;;  %v2054_v45 = vpack.c.bf16 %v7348_v16, %v7348_v16  ;;  %v2056_v18 = vpack.c.bf16 %v7353_v22, %v7353_v22 }
 0x540   :  { %v2143_v59 = vunpack.c.l.b16 %v2050_v14  ;;  %v2144_v43 = vunpack.c.l.b16 %v2051_v6  ;;  %v2055_v20 = vpack.c.bf16 %v7363_v50, %v7363_v50  ;;  %v2145_v44 = vunpack.c.l.b16 %v2052_v31 }
 0x541   :  { %v2292_v40 = vrot.slane %v7332_v8, 6  ;;  %v2296_v57 = vrot.slane %v7344_v55, 4  ;;  %v2146_v61 = vunpack.c.l.b16 %v2053_v63  ;;  %v2291_v49 = vsel %vm2151_vm3, %v2290_v4, %v7367_v10 }
 0x542   :  { %v2294_v17 = vrot.slane %v7339_v12, 5  ;;  %v2300_v19 = vrot.slane %v7363_v50, 2  ;;  %v2049_v14 = vpack.c.bf16 %v7367_v10, %v7367_v10  ;;  %v2150_v6 = vrot.slane %v2135_v5, 7 }
 0x543   :  { %v2293_v32 = vsel %vm2154_vm4, %v2292_v40, %v2291_v49  ;;  %v2153_v31 = vrot.slane %v7309_v24, 6  ;;  %v2147_v7 = vunpack.c.l.b16 %v2054_v45  ;;  %v2298_v63 = vrot.slane %v7348_v16, 3 }
 0x544   :  { %v2295_v51 = vsel %vm2157_vm5, %v2294_v17, %v2293_v32  ;;  %v2159_v21 = vrot.slane %v7321_v52, 4  ;;  %v2142_v13 = vunpack.c.l.b16 %v2049_v14  ;;  %v2152_v48 = vsel %vm2151_vm3, %v2150_v6, %v7307_v47 }
 0x545   :  { %v2297_v4 = vsel %vm2160_vm6, %v2296_v57, %v2295_v51  ;;  %v2156_v40 = vrot.slane %v7311_v60, 5  ;;  %v2148_v49 = vunpack.c.l.b16 %v2055_v20  ;;  %v2302_v24 = vrot.slane %v7353_v22, 1 }
 0x546   :  { %v2299_v5 = vsel %vm2163_vm7, %v2298_v63, %v2297_v4  ;;  %v2155_v45 = vsel %vm2154_vm4, %v2153_v31, %v2152_v48  ;;  %v2171_v52 = vrot.slane %v2143_v59, 7  ;;  %v2173_v34 = vrot.slane %v2144_v43, 6 }
 0x547   :  { %v2301_v17 = vsel %vm2166_vm8, %v2300_v19, %v2299_v5  ;;  %v2158_v32 = vsel %vm2157_vm5, %v2156_v40, %v2155_v45  ;;  %v2165_v47 = vrot.slane %v2140_v58, 2  ;;  %v2177_v14 = vrot.slane %v2146_v61, 4  ;;  %v5855_v5 = vld [vmem:[%s8439_s10] sm:$0xff]  }
 0x548   :  { %v2303_v51 = vsel %vm2169_vm9, %v2302_v24, %v2301_v17  ;;  %v2161_v57 = vsel %vm2160_vm6, %v2159_v21, %v2158_v32  ;;  %v2149_v60 = vunpack.c.l.b16 %v2056_v18  ;;  %v2162_v20 = vrot.slane %v2139_v2, 3  ;;  %v5856_v24 = vld [vmem:[%s8439_s10 + $0x8] sm:$0xff]  }
 0x549   :  { %2306 = vrot.lane.b32.xlu0 %v2303_v51, %s6129_s17  ;;  %v2172_v6 = vsel %vm2151_vm3, %v2171_v52, %v2142_v13  ;;  %v2175_v63 = vrot.slane %v2145_v44, 5  ;;  %v2181_v48 = vrot.slane %v2148_v49, 2  ;;  %v2179_v43 = vrot.slane %v2147_v7, 3 }
 0x54a   :  { %v2174_v19 = vsel %vm2154_vm4, %v2173_v34, %v2172_v6  ;;  %v2164_v31 = vsel %vm2163_vm7, %v2162_v20, %v2161_v57  ;;  %v2168_v58 = vrot.slane %v2141_v9, 1  ;;  %v2183_v61 = vrot.slane %v2149_v60, 1 }
 0x54b   :  { %v2176_v59 = vsel %vm2157_vm5, %v2175_v63, %v2174_v19  ;;  %v2167_v4 = vsel %vm2166_vm8, %v2165_v47, %v2164_v31 }
 0x54c   :  { %v2178_v21 = vsel %vm2160_vm6, %v2177_v14, %v2176_v59  ;;  %v2170_v13 = vsel %vm2169_vm9, %v2168_v58, %v2167_v4 }
 0x54d   :  { %v2180_v18 = vsel %vm2163_vm7, %v2179_v43, %v2178_v21 }
 0x54e   :  { %v2182_v2 = vsel %vm2166_vm8, %v2181_v48, %v2180_v18 }
 0x54f   :  { %v2184_v44 = vsel %vm2169_vm9, %v2183_v61, %v2182_v2 }
 0x550   :  { %v2185_v34 = vpack.c.b16 %v2184_v44, %v2170_v13 }
 0x552   :  { %5642 = vmatmul.mubr.msk.bf16.vlgmr.msra.gmra.mrb[24].mxu0 %vm221_vm0, %v2185_v34 }
 0x553   :  { %5649 = vmatprep.mubr.msk.bf16.mxu0 %vm6127_vm1, %v8542_v37  ;;  %5646 = vmatpush3.bf16.msra.mxu0 %v5855_v5 }
 0x554   :  { %5647 = vmatprep.subr.bf16.mxu0 %v8542_v37 }
 0x557   :  { %5648 = vmatpush3.bf16.msra.mxu0 %v5856_v24 }
 0x558   :  { %5653 = vmatprep.subr.bf16.mxu0 %v8542_v37 }
 0x5ad   :  { %v2305_v7 = vpop.permute.xlu1 %2304 }
 0x5ae   :  { %v2310_v40 = vsub.f32 %v6718_v23, %v2305_v7  ;;  %v7431_v23 = vld [vmem:[%s8445_s16] sm:$0x7] }
 0x5b0   :  { %2314 = vrot.lane.b32.xlu1 %v2310_v40, %s6128_s24 }
 0x5bb   :  { %v2307_v9 = vpop.permute.xlu0 %2306 }
 0x5bc   :  { %v2311_v49 = vsub.f32 %v6753_v15, %v2307_v9  ;;  %v2245_v15 = vrot.slane %v7431_v23, %v6530_v38 }
 0x5be   :  { %2316 = vrot.lane.b32.xlu0 %v2311_v49, %s6128_s24 }
 0x622   :  { %v2315_v59 = vpop.permute.xlu1 %2314 }
 0x625   :  { %v2235_v45 = vpop.f32.mrb[24].mxu0 }
 0x626   :  { %v2236_v17 = vadd.f32 %v2235_v45, %v7022_v27  ;;  %v5643_v32 = vpop.f32.mrb[25].mxu0 }
 0x627   :  { %v2238_v52 = vpop.f32.mrb[26].mxu0 }
 0x628   :  { %v2246_v51 = vadd.f32 %v2245_v15, %v2236_v17  ;;  %v2239_v57 = vadd.f32 %v2238_v52, %v7026_v0  ;;  %v5644_v47 = vpop.f32.mrb[27].mxu0 }
 0x62a   :  { %v5225_v14 = vmul.f32 -1.442695, %v2246_v51  ;;  %v2247_v60 = vadd.f32 %v2245_v15, %v2239_v57 }
 0x62c   :  { %5987 = vpow2.f32 %v5225_v14  ;;  %v5226_v20 = vmul.f32 -1.442695, %v2247_v60 }
 0x62e   :  { %5989 = vpow2.f32 %v5226_v20 }
 0x630   :  { %v2317_v4 = vpop.permute.xlu0 %2316 }
 0x636   :  { %v5988_v6 = vpop.eup %5987 }
 0x637   :  { %v2254_v63 = vadd.f32 1.0, %v5988_v6 }
 0x638   :  { %v5990_v48 = vpop.eup %5989 }
 0x639   :  { %5991 = vrcp.f32 %v2254_v63  ;;  %v2255_v19 = vadd.f32 1.0, %v5990_v48 }
 0x63b   :  { %5993 = vrcp.f32 %v2255_v19 }
 0x643   :  { %v5992_v31 = vpop.eup %5991 }
 0x644   :  { %v2320_v27 = vmul.f32 %v5992_v31, %v2315_v59 }
 0x645   :  { %v5994_v43 = vpop.eup %5993 }
 0x646   :  { %v2321_v21 = vmul.f32 %v5994_v43, %v2317_v4  ;;  %v2324_v58 = vrot.slane %v2320_v27, 1  ;;  %v2325_v0 = vrot.slane %v2320_v27, 2  ;;  %v2326_v18 = vrot.slane %v2320_v27, 3 }
 0x647   :  { %v2327_v2 = vrot.slane %v2320_v27, 4  ;;  %v2328_v13 = vrot.slane %v2320_v27, 5  ;;  %v2329_v34 = vrot.slane %v2320_v27, 6  ;;  %v2330_v7 = vrot.slane %v2320_v27, 7 }
 0x648   :  { %v2331_v61 = vrot.slane %v2321_v21, 1  ;;  %v2332_v44 = vrot.slane %v2321_v21, 2  ;;  %v2333_v40 = vrot.slane %v2321_v21, 3  ;;  %v2334_v9 = vrot.slane %v2321_v21, 4 }
 0x649   :  { %v2335_v49 = vrot.slane %v2321_v21, 5  ;;  %v2355_v5 = vadd.f32 %v2324_v58, %v7237_v53  ;;  %v2356_v24 = vadd.f32 %v2325_v0, %v7264_v33  ;;  %v2336_v15 = vrot.slane %v2321_v21, 6 }
 0x64a   :  { %v2337_v45 = vrot.slane %v2321_v21, 7  ;;  %v2354_v17 = vadd.f32 %v2320_v27, %v7246_v25  ;;  %v2357_v32 = vadd.f32 %v2326_v18, %v7268_v35  ;;  %v2358_v52 = vadd.f32 %v2327_v2, %v7273_v29 }
 0x64b   :  { %v2359_v51 = vadd.f32 %v2328_v13, %v7278_v3  ;;  %v2363_v57 = vadd.f32 %v2331_v61, %v7328_v56  ;;  %v2364_v47 = vadd.f32 %v2332_v44, %v7332_v8  ;;  %v2360_v14 = vadd.f32 %v2329_v34, %v7287_v30 }
 0x64c   :  { %v2361_v53 = vadd.f32 %v2330_v7, %v7282_v1  ;;  %v2362_v33 = vadd.f32 %v2321_v21, %v7367_v10  ;;  %v2365_v60 = vadd.f32 %v2333_v40, %v7339_v12  ;;  %v2366_v25 = vadd.f32 %v2334_v9, %v7344_v55 }
 0x64d   :  { %v2367_v35 = vadd.f32 %v2335_v49, %v7348_v16  ;;  %v2371_v20 = vpack.c.bf16 %v2355_v5, %v2355_v5  ;;  %v2372_v29 = vpack.c.bf16 %v2356_v24, %v2356_v24  ;;  %v2368_v3 = vadd.f32 %v2336_v15, %v7363_v50 }
 0x64e   :  { %v2369_v56 = vadd.f32 %v2337_v45, %v7353_v22  ;;  %v2370_v6 = vpack.c.bf16 %v2354_v17, %v2354_v17  ;;  %v2373_v8 = vpack.c.bf16 %v2357_v32, %v2357_v32  ;;  %v2374_v63 = vpack.c.bf16 %v2358_v52, %v2358_v52 }
 0x64f   :  { %v2375_v30 = vpack.c.bf16 %v2359_v51, %v2359_v51  ;;  %v2379_v48 = vpack.c.bf16 %v2363_v57, %v2363_v57  ;;  %v2380_v1 = vpack.c.bf16 %v2364_v47, %v2364_v47  ;;  %v2376_v19 = vpack.c.bf16 %v2360_v14, %v2360_v14 }
 0x650   :  { %v2377_v10 = vpack.c.bf16 %v2361_v53, %v2361_v53  ;;  %v2378_v31 = vpack.c.bf16 %v2362_v33, %v2362_v33  ;;  %v2381_v12 = vpack.c.bf16 %v2365_v60, %v2365_v60  ;;  %v2382_v59 = vpack.c.bf16 %v2366_v25, %v2366_v25 }
 0x651   :  { %v2383_v55 = vpack.c.bf16 %v2367_v35, %v2367_v35  ;;  %v2411_v27 = vunpack.c.l.b16 %v2371_v20  ;;  %v2412_v16 = vunpack.c.l.b16 %v2372_v29  ;;  %v2384_v43 = vpack.c.bf16 %v2368_v3, %v2368_v3 }
 0x652   :  { %v2385_v4 = vpack.c.bf16 %v2369_v56, %v2369_v56  ;;  %v2410_v21 = vunpack.c.l.b16 %v2370_v6  ;;  %v2413_v50 = vunpack.c.l.b16 %v2373_v8  ;;  %v2414_v58 = vunpack.c.l.b16 %v2374_v63 }
 0x653   :  { %v2415_v22 = vunpack.c.l.b16 %v2375_v30  ;;  %v2419_v0 = vunpack.c.l.b16 %v2379_v48  ;;  %v2420_v18 = vunpack.c.l.b16 %v2380_v1  ;;  %v2416_v61 = vunpack.c.l.b16 %v2376_v19 }
 0x654   :  { %v2417_v2 = vunpack.c.l.b16 %v2377_v10  ;;  %v2421_v13 = vunpack.c.l.b16 %v2381_v12  ;;  %v2426_v44 = vrot.slane %v2411_v27, 7  ;;  %v2418_v34 = vunpack.c.l.b16 %v2378_v31 }
 0x655   :  { %v2422_v7 = vunpack.c.l.b16 %v2382_v59  ;;  %v2423_v40 = vunpack.c.l.b16 %v2383_v55  ;;  %v2428_v9 = vrot.slane %v2412_v16, 6  ;;  %v2424_v49 = vunpack.c.l.b16 %v2384_v43 }
 0x656   :  { %v2427_v5 = vsel %vm2151_vm3, %v2426_v44, %v2410_v21  ;;  %v2430_v24 = vrot.slane %v2413_v50, 5  ;;  %v2440_v15 = vrot.slane %v2419_v0, 7  ;;  %v2425_v45 = vunpack.c.l.b16 %v2385_v4 }
 0x657   :  { %v2429_v17 = vsel %vm2154_vm4, %v2428_v9, %v2427_v5  ;;  %v2432_v32 = vrot.slane %v2414_v58, 4  ;;  %v2442_v52 = vrot.slane %v2420_v18, 6  ;;  %v2434_v57 = vrot.slane %v2415_v22, 3 }
 0x658   :  { %v2431_v51 = vsel %vm2157_vm5, %v2430_v24, %v2429_v17  ;;  %v2441_v47 = vsel %vm2151_vm3, %v2440_v15, %v2418_v34  ;;  %v2444_v14 = vrot.slane %v2421_v13, 5  ;;  %v2436_v33 = vrot.slane %v2416_v61, 2  ;;  %v7479_v15 = vld [vmem:[%s8443_s14] sm:$0x1f] }
 0x659   :  { %v2433_v53 = vsel %vm2160_vm6, %v2432_v32, %v2431_v51  ;;  %v2443_v60 = vsel %vm2154_vm4, %v2442_v52, %v2441_v47  ;;  %v2446_v25 = vrot.slane %v2422_v7, 4  ;;  %v2448_v29 = vrot.slane %v2423_v40, 3  ;;  %v7486_v52 = vld [vmem:[%s8444_s15] sm:$0x1f] }
 0x65a   :  { %v2435_v35 = vsel %vm2163_vm7, %v2434_v57, %v2433_v53  ;;  %v2445_v20 = vsel %vm2157_vm5, %v2444_v14, %v2443_v60  ;;  %v2450_v6 = vrot.slane %v2424_v49, 2  ;;  %v2438_v8 = vrot.slane %v2417_v2, 1 }
 0x65b   :  { %v2437_v3 = vsel %vm2166_vm8, %v2436_v33, %v2435_v35  ;;  %v2447_v56 = vsel %vm2160_vm6, %v2446_v25, %v2445_v20  ;;  %v2452_v30 = vrot.slane %v2425_v45, 1  ;;  %v2393_v31 = vrot.slane %v7431_v23, %v6494_v54 }
 0x65c   :  { %v2449_v63 = vsel %vm2163_vm7, %v2448_v29, %v2447_v56  ;;  %v2439_v1 = vsel %vm2169_vm9, %v2438_v8, %v2437_v3  ;;  %v2540_v45 = vrot.slane %v7479_v15, %v6787_v46  ;;  %v2546_v51 = vrot.slane %v7486_v52, %v6787_v46 }
 0x65d   :  { %v2451_v48 = vsel %vm2166_vm8, %v2450_v6, %v2449_v63 }
 0x65e   :  { %v2453_v19 = vsel %vm2169_vm9, %v2452_v30, %v2451_v48 }
 0x65f   :  { %v2454_v10 = vpack.c.b16 %v2453_v19, %v2439_v1  ;;  %v5857_v19 = vld [vmem:[%s8440_s11] sm:$0xff]  }
 0x661   :  { %5650 = vmatmul.mubr.msk.bf16.vlgmr.msra.gmra.mrb[28].mxu0 %vm221_vm0, %v2454_v10  ;;  %v5858_v10 = vld [vmem:[%s8440_s11 + $0x8] sm:$0xff]  }
 0x662   :  { %5657 = vmatprep.mubr.msk.bf16.mxu0 %vm6127_vm1, %v8542_v37  ;;  %5654 = vmatpush3.bf16.msra.mxu0 %v5857_v19  ;;  %v8567_v19 = vld [vmem:[#allocation12_spill] sm:$0xff] }
 0x663   :  { %5655 = vmatprep.subr.bf16.mxu0 %v8542_v37 }
 0x666   :  { %5656 = vmatpush3.bf16.msra.mxu0 %v5858_v10 }
 0x667   :  { %5681 = vmatprep.subr.bf16.mxu0 %v8542_v37 }
 0x734   :  { %v2504_v12 = vpop.f32.mrb[28].mxu0 }
 0x735   :  { %v2505_v59 = vadd.f32 %v2504_v12, %v2393_v31  ;;  %v5651_v55 = vpop.f32.mrb[29].mxu0  ;;  %v5860_v12 = vld [vmem:[%s8442_s13 + $0x8] sm:$0xff]  }
 0x736   :  { %v2507_v27 = vpop.f32.mrb[30].mxu0  ;;  %v5862_v55 = vld [vmem:[%s8442_s13 + $0x18] sm:$0xff]  }
 0x737   :  { %v2508_v16 = vadd.f32 %v2507_v27, %v2393_v31  ;;  %v5652_v43 = vpop.f32.mrb[31].mxu0  ;;  %v2511_v4 = vsel %vm221_vm0, %v2505_v59, 0.0  ;;  %v5859_v31 = vld [vmem:[%s8442_s13] sm:$0xff]  }
 0x738   :  { %2512 = vadd.xlane.f32.xlu1 %v2511_v4  ;;  %5662 = vmatpush3.bf16.msra.mxu1 %v5859_v31  ;;  %v5863_v27 = vld [vmem:[%s8442_s13 + $0x20] sm:$0xff]  }
 0x739   :  { %v2514_v21 = vsel %vm221_vm0, %v2508_v16, 0.0  ;;  %5663 = vmatprep.subr.bf16.mxu1 %v8542_v37  ;;  %v8569_v31 = vld [vmem:[#allocation15_spill] sm:$0xff] }
 0x73a   :  { %2515 = vadd.xlane.f32.xlu0 %v2514_v21 }
 0x73c   :  { %5664 = vmatpush3.bf16.msra.mxu1 %v5860_v12  ;;  %v8570_v12 = vld [vmem:[#allocation14_spill] sm:$0xff] }
 0x73d   :  { %5665 = vmatprep.subr.bf16.mxu1 %v8542_v37 }
 0x7c5   :  { %v2513_v50 = vpop.xlane.xlu1 %2512 }
 0x7c6   :  { %v2517_v58 = vmul.f32 0.03125, %v2513_v50 }
 0x7c7   :  { %v2516_v22 = vpop.xlane.xlu0 %2515 }
 0x7c8   :  { %v2519_v0 = vsub.f32 %v2505_v59, %v2517_v58  ;;  %v2518_v18 = vmul.f32 0.03125, %v2516_v22  ;;  %v5861_v59 = vld [vmem:[%s8442_s13 + $0x10] sm:$0xff]  }
 0x7c9   :  { %5666 = vmatpush3.bf16.msra.mxu1 %v5861_v59  ;;  %v8571_v59 = vpack.c.bf16 %v8569_v31, %v8570_v12 }
 0x7ca   :  { %v2520_v61 = vsub.f32 %v2508_v16, %v2518_v18  ;;  %v2521_v2 = vmul.f32 %v2519_v0, %v2519_v0  ;;  %5667 = vmatprep.subr.bf16.mxu1 %v8542_v37  ;;  %v5864_v16 = vld [vmem:[%s8442_s13 + $0x28] sm:$0xff]   ;;  %v2580_v18 = vrot.slane %v7479_v15, %v6793_v28 }
 0x7cc   :  { %v2523_v13 = vsel %vm221_vm0, %v2521_v2, 0.0  ;;  %v2522_v44 = vmul.f32 %v2520_v61, %v2520_v61 }
 0x7cd   :  { %2524 = vadd.xlane.f32.xlu0 %v2523_v13  ;;  %5668 = vmatpush3.bf16.msra.mxu1 %v5862_v55  ;;  %v2679_v55 = vrot.slane %v7431_v23, %v6787_v46 }
 0x7ce   :  { %v2526_v34 = vsel %vm221_vm0, %v2522_v44, 0.0  ;;  %5669 = vmatprep.subr.bf16.mxu1 %v8542_v37 }
 0x7d1   :  { %2527 = vadd.xlane.f32.xlu0 %v2526_v34  ;;  %5670 = vmatpush3.bf16.msra.mxu1 %v5863_v27  ;;  %v2586_v34 = vrot.slane %v7486_v52, %v6793_v28 }
 0x7d2   :  { %5671 = vmatprep.subr.bf16.mxu1 %v8542_v37 }
 0x7d5   :  { %5672 = vmatpush3.bf16.msra.mxu1 %v5864_v16 }
 0x7d6   :  { %5673 = vmatprep.subr.bf16.mxu1 %v8542_v37 }
 0x85a   :  { %v2525_v7 = vpop.xlane.xlu0 %2524 }
 0x85b   :  { %v2529_v40 = vmul.f32 0.03125, %v2525_v7 }
 0x85d   :  { %v2531_v9 = vadd.f32 1e-05, %v2529_v40 }
 0x85e   :  { %v2528_v49 = vpop.xlane.xlu0 %2527 }
 0x85f   :  { %5995 = vrsqrt.f32 %v2531_v9  ;;  %v2530_v5 = vmul.f32 0.03125, %v2528_v49 }
 0x861   :  { %v2532_v24 = vadd.f32 1e-05, %v2530_v5  ;;  %v5865_v5 = vld [vmem:[%s8442_s13 + $0x30] sm:$0xff]  }
 0x862   :  { %5674 = vmatpush3.bf16.msra.mxu1 %v5865_v5 }
 0x863   :  { %5997 = vrsqrt.f32 %v2532_v24  ;;  %5675 = vmatprep.subr.bf16.mxu1 %v8542_v37  ;;  %v5866_v24 = vld [vmem:[%s8442_s13 + $0x38] sm:$0xff]  }
 0x866   :  { %5676 = vmatpush3.bf16.msra.mxu1 %v5866_v24 }
 0x869   :  { %v5996_v17 = vpop.eup %5995 }
 0x86a   :  { %v2535_v32 = vmul.f32 %v5996_v17, %v2519_v0  ;;  %v5230_v17 = vld [vmem:[%s8441_s12] ss:$0 sm:$0xff] }
 0x86c   :  { %v2541_v57 = vmul.f32 %v2540_v45, %v2535_v32 }
 0x86d   :  { %v5998_v47 = vpop.eup %5997 }
 0x86e   :  { %v2547_v14 = vadd.f32 %v2546_v51, %v2541_v57  ;;  %v2536_v53 = vmul.f32 %v5998_v47, %v2520_v61 }
 0x870   :  { %v7491_v33 = vadd.f32 %v6343_v41, %v2547_v14  ;;  %v2542_v60 = vmul.f32 %v2540_v45, %v2536_v53  ;;  %v5867_v45 = vld [vmem:[%s8435_s6 + $0x10] sm:$0xff]  }
 0x871   :  { %5689 = vmatprep.subr.bf16.mxu1 %v5867_v45 }
 0x872   :  { %v2551_v25 = vsel %vm221_vm0, %v7491_v33, 0.0  ;;  %v2548_v35 = vadd.f32 %v2546_v51, %v2542_v60 }
 0x873   :  { %2552 = vadd.xlane.f32.xlu1 %v2551_v25 }
 0x874   :  { %v7496_v20 = vadd.f32 %v6345_v42, %v2548_v35 }
 0x876   :  { %v2554_v29 = vsel %vm221_vm0, %v7496_v20, 0.0 }
 0x877   :  { %2555 = vadd.xlane.f32.xlu0 %v2554_v29  ;;  %v5868_v29 = vld [vmem:[%s8435_s6 + $0x18] sm:$0xff]  }
 0x900   :  { %v2553_v3 = vpop.xlane.xlu1 %2552 }
 0x901   :  { %v2557_v56 = vmul.f32 0.03125, %v2553_v3  ;;  %v8553_v3 = vpack.c.bf16 %v6545_v62, %v6539_v26  ;;  %v8557_v26 = vld [vmem:[#allocation7_spill] sm:$0xff]  ;;  %v8558_v62 = vld [vmem:[#allocation6_spill] sm:$0xff] }
 0x903   :  { %v2559_v6 = vsub.f32 %v7491_v33, %v2557_v56  ;;  %v6097_v56 = vld [vmem:[%s8447_s18] sm:$0xff] }
 0x904   :  { %v2556_v8 = vpop.xlane.xlu0 %2555 }
 0x905   :  { %v2558_v41 = vmul.f32 0.03125, %v2556_v8  ;;  %v2561_v63 = vmul.f32 %v2559_v6, %v2559_v6  ;;  %v8555_v8 = vld [vmem:[#allocation5_spill] sm:$0xff] }
 0x907   :  { %v2560_v30 = vsub.f32 %v7496_v20, %v2558_v41  ;;  %v2563_v48 = vsel %vm221_vm0, %v2561_v63, 0.0  ;;  %v8556_v41 = vpack.c.bf16 %v6589_v39, %v8555_v8  ;;  %v8559_v63 = vpack.c.bf16 %v8557_v26, %v8558_v62  ;;  %v8566_v39 = vld [vmem:[#allocation13_spill] sm:$0xff]  ;;  %v8572_v62 = vld [vmem:[#allocation18_spill] sm:$0xff] }
 0x908   :  { %2564 = vadd.xlane.f32.xlu1 %v2563_v48  ;;  %v8561_v48 = vld [vmem:[#allocation8_spill] sm:$0xff]  ;;  %v8568_v10 = vpack.c.bf16 %v8566_v39, %v8567_v19 }
 0x909   :  { %v2562_v1 = vmul.f32 %v2560_v30, %v2560_v30 }
 0x90b   :  { %v2566_v42 = vsel %vm221_vm0, %v2562_v1, 0.0 }
 0x90c   :  { %2567 = vadd.xlane.f32.xlu0 %v2566_v42 }
 0x995   :  { %v2565_v43 = vpop.xlane.xlu1 %2564 }
 0x996   :  { %v2569_v4 = vmul.f32 0.03125, %v2565_v43 }
 0x998   :  { %v2571_v21 = vadd.f32 1e-05, %v2569_v4 }
 0x999   :  { %v2568_v50 = vpop.xlane.xlu0 %2567 }
 0x99a   :  { %5999 = vrsqrt.f32 %v2571_v21  ;;  %v2570_v58 = vmul.f32 0.03125, %v2568_v50 }
 0x99c   :  { %v2572_v22 = vadd.f32 1e-05, %v2570_v58 }
 0x99e   :  { %6001 = vrsqrt.f32 %v2572_v22 }
 0x9a4   :  { %v6000_v0 = vpop.eup %5999 }
 0x9a5   :  { %v2575_v61 = vmul.f32 %v6000_v0, %v2559_v6  ;;  %v8554_v6 = vpack.c.bf16 %v6560_v11, %v6557_v36  ;;  %v8563_v36 = vld [vmem:[#allocation11_spill] sm:$0xff]  ;;  %v8564_v11 = vld [vmem:[#allocation10_spill] sm:$0xff] }
 0x9a6   :  { %v8565_v42 = vpack.c.bf16 %v8563_v36, %v8564_v11 }
 0x9a7   :  { %v2581_v13 = vmul.f32 %v2580_v18, %v2575_v61 }
 0x9a8   :  { %v6002_v2 = vpop.eup %6001 }
 0x9a9   :  { %v2576_v44 = vmul.f32 %v6002_v2, %v2560_v30  ;;  %v2587_v40 = vadd.f32 %v2586_v34, %v2581_v13  ;;  %v8560_v30 = vld [vmem:[#allocation9_spill] sm:$0xff] }
 0x9aa   :  { %v8562_v1 = vpack.c.bf16 %v8560_v30, %v8561_v48 }
 0x9ab   :  { %v2582_v7 = vmul.f32 %v2580_v18, %v2576_v44 }
 0x9ad   :  { %v2588_v9 = vadd.f32 %v2586_v34, %v2582_v7 }
 0x9af   :  { %v2589_v49 = vpack.c.bf16 %v2588_v9, %v2587_v40 }
 0x9b1   :  { %5658 = vmatmul.mubr.msk.bf16.vlgmr.msra.gmra.mrb[32].mxu0 %vm221_vm0, %v2589_v49 }
 0x9b2   :  { %5685 = vmatprep.mubr.msk.bf16.mxu0 %vm6127_vm1, %v8542_v37 }
 0xa84   :  { %v2650_v32 = vpop.f32.mrb[32].mxu0 }
 0xa85   :  { %v2651_v51 = vadd.f32 %v5230_v17, %v2650_v32  ;;  %v5659_v57 = vpop.f32.mrb[33].mxu0 }
 0xa86   :  { %v2653_v47 = vpop.f32.mrb[34].mxu0 }
 0xa87   :  { %v2654_v14 = vadd.f32 %v5230_v17, %v2653_v47  ;;  %v5660_v53 = vpop.f32.mrb[35].mxu0  ;;  %v2657_v60 = vmax.f32 %v2651_v51, 0.0 }
 0xa89   :  { %v2658_v25 = vmax.f32 %v2654_v14, 0.0 }
 0xa8b   :  { %v2659_v35 = vpack.c.bf16 %v2658_v25, %v2657_v60 }
 0xa8d   :  { %5678 = vmatmul.mubr.bf16.vlgmr.msra.gmra.mrb[32].mxu1 %v2659_v35 }
 0xa8e   :  { %5690 = vmatpush3.bf16.msra.mxu1 %v5867_v45  ;;  %5693 = vmatprep.mubr.msk.bf16.mxu1 %vm221_vm0, %v8553_v3 }
 0xa8f   :  { %5691 = vmatprep.subr.bf16.mxu1 %v5868_v29 }
 0xa92   :  { %5692 = vmatpush3.bf16.msra.mxu1 %v5868_v29 }
 0xa93   :  { %5741 = vmatprep.subr.mxu1 %v6097_v56 }
 0xa95   :  { %5694 = vmatmul.mubr.msk.bf16.vlgmr.msra.gmra.mrb[36].mxu1 %vm221_vm0, %v8554_v6 }
 0xa96   :  { %5697 = vmatprep.mubr.msk.bf16.mxu1 %vm221_vm0, %v8556_v41  ;;  %5742 = vmatpush3.msra.mxu1 %v6097_v56 }
 0xa97   :  { %5799 = vmatprep.subr.bf16.mxu1 %v8542_v37 }
 0xa9d   :  { %5698 = vmatmul.mubr.msk.bf16.gmra.mrb[40].mxu1 %vm221_vm0, %v8559_v63  ;;  %v2798_v63 = vrot.slane %v7479_v15, %v8572_v62 }
 0xa9e   :  { %5701 = vmatprep.mubr.msk.bf16.mxu1 %vm221_vm0, %v8562_v1  ;;  %v2804_v1 = vrot.slane %v7486_v52, %v8572_v62 }
 0xaa5   :  { %5702 = vmatmul.mubr.msk.bf16.gmra.mrb[44].mxu1 %vm221_vm0, %v8565_v42 }
 0xaa6   :  { %5705 = vmatprep.mubr.msk.bf16.mxu1 %vm221_vm0, %v8568_v10 }
 0xaad   :  { %5706 = vmatmul.mubr.msk.bf16.gmra.mrb[48].mxu1 %vm221_vm0, %v8571_v59 }
 0xb60   :  { %v2762_v27 = vpop.f32.mrb[32].mxu1 }
 0xb61   :  { %v2763_v16 = vadd.f32 %v2762_v27, %v2679_v55  ;;  %v5679_v43 = vpop.f32.mrb[33].mxu1 }
 0xb62   :  { %v2765_v4 = vpop.f32.mrb[34].mxu1 }
 0xb63   :  { %v2766_v21 = vadd.f32 %v2765_v4, %v2679_v55  ;;  %v5680_v50 = vpop.f32.mrb[35].mxu1  ;;  %v2769_v58 = vsel %vm221_vm0, %v2763_v16, 0.0 }
 0xb64   :  { %2770 = vadd.xlane.f32.xlu1 %v2769_v58  ;;  %v5259_v58 = vld [vmem:[%s8436_s7 + $0x1] ss:$0 sm:$0xff] }
 0xb65   :  { %v2772_v22 = vsel %vm221_vm0, %v2766_v21, 0.0 }
 0xb66   :  { %2773 = vadd.xlane.f32.xlu0 %v2772_v22 }
 0xb68   :  { %v7599_v0 = vpop.f32.mrb[36].mxu1 }
 0xb69   :  { %v7601_v18 = vpop.f32.mrb[37].mxu1 }
 0xb6a   :  { %v7603_v61 = vpop.f32.mrb[38].mxu1  ;;  %v3055_v22 = vadd.f32 %v5259_v58, %v7601_v18 }
 0xb6b   :  { %v7605_v2 = vpop.f32.mrb[39].mxu1 }
 0xb70   :  { %v7607_v23 = vpop.f32.mrb[40].mxu1 }
 0xb71   :  { %v7609_v13 = vpop.f32.mrb[41].mxu1  ;;  %v3079_v18 = vadd.f32 %v7607_v23, %v5259_v58 }
 0xb72   :  { %v7611_v44 = vpop.f32.mrb[42].mxu1 }
 0xb73   :  { %v7613_v34 = vpop.f32.mrb[43].mxu1 }
 0xb78   :  { %v7615_v7 = vpop.f32.mrb[44].mxu1 }
 0xb79   :  { %v7617_v40 = vpop.f32.mrb[45].mxu1 }
 0xb7a   :  { %v7619_v9 = vpop.f32.mrb[46].mxu1 }
 0xb7b   :  { %v7621_v49 = vpop.f32.mrb[47].mxu1  ;;  %v3098_v23 = vadd.f32 %v7619_v9, %v5259_v58 }
 0xb80   :  { %v7623_v5 = vpop.f32.mrb[48].mxu1 }
 0xb81   :  { %v7625_v24 = vpop.f32.mrb[49].mxu1  ;;  %v3111_v9 = vadd.f32 %v7623_v5, %v5259_v58 }
 0xb82   :  { %v7627_v45 = vpop.f32.mrb[50].mxu1 }
 0xb83   :  { %v7629_v17 = vpop.f32.mrb[51].mxu1 }
 0xbf1   :  { %v2771_v32 = vpop.xlane.xlu1 %2770 }
 0xbf2   :  { %v2775_v51 = vmul.f32 0.03125, %v2771_v32  ;;  %v3063_v32 = vadd.f32 %v7599_v0, %v5259_v58  ;;  %v3082_v0 = vadd.f32 %v7611_v44, %v5259_v58  ;;  %v3095_v44 = vadd.f32 %v7615_v7, %v5259_v58 }
 0xbf3   :  { %v2774_v57 = vpop.xlane.xlu0 %2773 }
 0xbf4   :  { %v2777_v47 = vsub.f32 %v2763_v16, %v2775_v51  ;;  %v2776_v14 = vmul.f32 0.03125, %v2774_v57  ;;  %v3058_v51 = vadd.f32 %v5259_v58, %v7605_v2  ;;  %v3066_v57 = vadd.f32 %v7603_v61, %v5259_v58  ;;  %v5869_v61 = vld [vmem:[%s8433_s4 + $0x10] sm:$0xff]  }
 0xbf5   :  { %v3090_v2 = vadd.f32 %v5259_v58, %v7621_v49  ;;  %5682 = vmatpush3.bf16.msra.mxu0 %v5869_v61  ;;  %v8573_v49 = vld [vmem:[#allocation16_spill] sm:$0xff] }
 0xbf6   :  { %v2778_v53 = vsub.f32 %v2766_v21, %v2776_v14  ;;  %v2779_v60 = vmul.f32 %v2777_v47, %v2777_v47  ;;  %v3071_v14 = vadd.f32 %v5259_v58, %v7609_v13  ;;  %v3087_v13 = vadd.f32 %v5259_v58, %v7617_v40  ;;  %5683 = vmatprep.subr.bf16.mxu0 %v8542_v37 }
 0xbf7   :  { %v3106_v40 = vadd.f32 %v5259_v58, %v7629_v17 }
 0xbf8   :  { %v2781_v25 = vsel %vm221_vm0, %v2779_v60, 0.0  ;;  %v2780_v35 = vmul.f32 %v2778_v53, %v2778_v53  ;;  %v3114_v60 = vadd.f32 %v7627_v45, %v5259_v58 }
 0xbf9   :  { %2782 = vadd.xlane.f32.xlu1 %v2781_v25 }
 0xbfa   :  { %v2784_v29 = vsel %vm221_vm0, %v2780_v35, 0.0 }
 0xbfb   :  { %2785 = vadd.xlane.f32.xlu0 %v2784_v29 }
 0xc86   :  { %v2783_v3 = vpop.xlane.xlu1 %2782 }
 0xc87   :  { %v2787_v56 = vmul.f32 0.03125, %v2783_v3 }
 0xc88   :  { %v2786_v6 = vpop.xlane.xlu0 %2785 }
 0xc89   :  { %v2789_v8 = vadd.f32 1e-05, %v2787_v56  ;;  %v2788_v41 = vmul.f32 0.03125, %v2786_v6 }
 0xc8b   :  { %6003 = vrsqrt.f32 %v2789_v8  ;;  %v2790_v26 = vadd.f32 1e-05, %v2788_v41 }
 0xc8d   :  { %6005 = vrsqrt.f32 %v2790_v26  ;;  %v6099_v26 = vld [vmem:[%s8444_s15 + $0x8] sm:$0x1f] }
 0xc95   :  { %v6004_v30 = vpop.eup %6003 }
 0xc96   :  { %v2793_v48 = vmul.f32 %v6004_v30, %v2777_v47  ;;  %v3074_v47 = vadd.f32 %v5259_v58, %v7613_v34  ;;  %v5870_v34 = vld [vmem:[%s8433_s4 + $0x18] sm:$0xff]  }
 0xc97   :  { %v6006_v36 = vpop.eup %6005  ;;  %5684 = vmatpush3.bf16.msra.mxu0 %v5870_v34 }
 0xc98   :  { %v2799_v11 = vmul.f32 %v2798_v63, %v2793_v48  ;;  %v2794_v42 = vmul.f32 %v6006_v36, %v2778_v53  ;;  %5828 = vmatprep.subr.bf16.mxu0 %v8573_v49  ;;  %v3103_v53 = vadd.f32 %v5259_v58, %v7625_v24  ;;  %v6098_v24 = vld [vmem:[%s8443_s14 + $0x8] sm:$0x1f] }
 0xc99   :  { %v2844_v45 = vrot.slane %v6098_v24, %v6530_v38 }
 0xc9a   :  { %v2805_v39 = vadd.f32 %v2804_v1, %v2799_v11  ;;  %v2800_v19 = vmul.f32 %v2798_v63, %v2794_v42  ;;  %v2850_v63 = vrot.slane %v6099_v26, %v6530_v38  ;;  %v8574_v11 = vld [vmem:[#allocation17_spill] sm:$0xff] }
 0xc9c   :  { %v7638_v10 = vadd.f32 %v2805_v39, %v7491_v33  ;;  %v2806_v31 = vadd.f32 %v2804_v1, %v2800_v19 }
 0xc9e   :  { %v2815_v12 = vsel %vm221_vm0, %v7638_v10, 0.0  ;;  %v7643_v59 = vadd.f32 %v2806_v31, %v7496_v20 }
 0xc9f   :  { %2816 = vadd.xlane.f32.xlu1 %v2815_v12  ;;  %v5250_v12 = vld [vmem:[%s8434_s5 + $0x1] ss:$0 sm:$0xff] }
 0xca0   :  { %v2818_v15 = vsel %vm221_vm0, %v7643_v59, 0.0 }
 0xca1   :  { %2819 = vadd.xlane.f32.xlu0 %v2818_v15 }
 0xd2c   :  { %v2817_v52 = vpop.xlane.xlu1 %2816 }
 0xd2d   :  { %v2821_v55 = vmul.f32 0.03125, %v2817_v52 }
 0xd2e   :  { %v2820_v27 = vpop.xlane.xlu0 %2819 }
 0xd2f   :  { %v2823_v16 = vsub.f32 %v7638_v10, %v2821_v55  ;;  %v2822_v43 = vmul.f32 0.03125, %v2820_v27 }
 0xd31   :  { %v2824_v33 = vsub.f32 %v7643_v59, %v2822_v43  ;;  %v2825_v4 = vmul.f32 %v2823_v16, %v2823_v16 }
 0xd33   :  { %v2827_v21 = vsel %vm221_vm0, %v2825_v4, 0.0  ;;  %v2826_v50 = vmul.f32 %v2824_v33, %v2824_v33 }
 0xd34   :  { %2828 = vadd.xlane.f32.xlu1 %v2827_v21 }
 0xd35   :  { %v2830_v20 = vsel %vm221_vm0, %v2826_v50, 0.0 }
 0xd36   :  { %2831 = vadd.xlane.f32.xlu0 %v2830_v20 }
 0xd45   :  { %3133 = vrot.lane.b32.xlu1 %v3055_v22, %s6128_s24 }
 0xd49   :  { %3137 = vrot.lane.b32.xlu1 %v3063_v32, %s6128_s24 }
 0xd4c   :  { %3135 = vrot.lane.b32.xlu0 %v3058_v51, %s6128_s24 }
 0xd4d   :  { %3139 = vrot.lane.b32.xlu1 %v3066_v57, %s6128_s24 }
 0xd50   :  { %3143 = vrot.lane.b32.xlu0 %v3074_v47, %s6128_s24 }
 0xd51   :  { %3141 = vrot.lane.b32.xlu1 %v3071_v14, %s6128_s24 }
 0xd54   :  { %3147 = vrot.lane.b32.xlu0 %v3082_v0, %s6128_s24 }
 0xd55   :  { %3145 = vrot.lane.b32.xlu1 %v3079_v18, %s6128_s24 }
 0xd58   :  { %3151 = vrot.lane.b32.xlu0 %v3090_v2, %s6128_s24 }
 0xd59   :  { %3149 = vrot.lane.b32.xlu1 %v3087_v13, %s6128_s24 }
 0xd5c   :  { %3155 = vrot.lane.b32.xlu0 %v3098_v23, %s6128_s24 }
 0xd5d   :  { %3153 = vrot.lane.b32.xlu1 %v3095_v44, %s6128_s24 }
 0xd60   :  { %3159 = vrot.lane.b32.xlu0 %v3106_v40, %s6128_s24 }
 0xd61   :  { %3157 = vrot.lane.b32.xlu1 %v3103_v53, %s6128_s24 }
 0xd64   :  { %3163 = vrot.lane.b32.xlu0 %v3114_v60, %s6128_s24 }
 0xd65   :  { %3161 = vrot.lane.b32.xlu1 %v3111_v9, %s6128_s24 }
 0xdc1   :  { %v2829_v7 = vpop.xlane.xlu1 %2828 }
 0xdc2   :  { %v2833_v25 = vmul.f32 0.03125, %v2829_v7 }
 0xdc3   :  { %v2832_v35 = vpop.xlane.xlu0 %2831 }
 0xdc4   :  { %v2835_v29 = vadd.f32 1e-05, %v2833_v25  ;;  %v2834_v3 = vmul.f32 0.03125, %v2832_v35 }
 0xdc5   :  { %v3134_v42 = vpop.permute.xlu1 %3133 }
 0xdc6   :  { %6007 = vrsqrt.f32 %v2835_v29  ;;  %v2836_v17 = vadd.f32 1e-05, %v2834_v3  ;;  %v8575_v29 = vld [vmem:[#allocation19_spill] sm:$0xff] }
 0xdc7   :  { %v3136_v19 = vpop.permute.xlu0 %3135 }
 0xdc8   :  { %6009 = vrsqrt.f32 %v2836_v17 }
 0xdc9   :  { %v3138_v39 = vpop.permute.xlu1 %3137 }
 0xdcb   :  { %v3144_v15 = vpop.permute.xlu0 %3143 }
 0xdcd   :  { %v3140_v31 = vpop.permute.xlu1 %3139 }
 0xdcf   :  { %v3148_v50 = vpop.permute.xlu0 %3147 }
 0xdd0   :  { %v6008_v56 = vpop.eup %6007 }
 0xdd1   :  { %v2839_v5 = vmul.f32 %v6008_v56, %v2823_v16  ;;  %v3142_v52 = vpop.permute.xlu1 %3141 }
 0xdd2   :  { %v6010_v6 = vpop.eup %6009 }
 0xdd3   :  { %v2845_v8 = vmul.f32 %v2844_v45, %v2839_v5  ;;  %v2840_v41 = vmul.f32 %v6010_v6, %v2824_v33  ;;  %v3152_v57 = vpop.permute.xlu0 %3151 }
 0xdd5   :  { %v2846_v30 = vmul.f32 %v2844_v45, %v2840_v41  ;;  %v2851_v48 = vadd.f32 %v2850_v63, %v2845_v8  ;;  %v3146_v20 = vpop.permute.xlu1 %3145 }
 0xdd7   :  { %v2852_v1 = vadd.f32 %v2850_v63, %v2846_v30  ;;  %v3156_v61 = vpop.permute.xlu0 %3155 }
 0xdd9   :  { %v7702_v36 = vpack.c.bf16 %v2852_v1, %v2851_v48  ;;  %v3150_v47 = vpop.permute.xlu1 %3149 }
 0xddb   :  { %5686 = vmatmul.mubr.msk.bf16.vlgmr.msra.gmra.mrb[36].mxu0 %vm221_vm0, %v7702_v36 }
 0xddc   :  { %5830 = vmatpush3.bf16.msra.mxu0 %v8573_v49  ;;  %v3160_v49 = vpop.permute.xlu0 %3159 }
 0xddd   :  { %5832 = vmatprep.subr.bf16.mxu0 %v8574_v11  ;;  %v3154_v2 = vpop.permute.xlu1 %3153 }
 0xde0   :  { %5834 = vmatpush3.bf16.msra.mxu0 %v8574_v11  ;;  %v3164_v9 = vpop.permute.xlu0 %3163 }
 0xde1   :  { %5767 = vmatprep.subr.bf16.mxu0 %v8542_v37  ;;  %v3158_v40 = vpop.permute.xlu1 %3157 }
 0xde5   :  { %v3162_v7 = vpop.permute.xlu1 %3161 }
 0xeae   :  { %v2964_v55 = vpop.f32.mrb[36].mxu0 }
 0xeaf   :  { %v7713_v27 = vadd.f32 %v5250_v12, %v2964_v55  ;;  %v5687_v16 = vpop.f32.mrb[37].mxu0 }
 0xeb0   :  { %v2967_v43 = vpop.f32.mrb[38].mxu0 }
 0xeb1   :  { %v5688_v33 = vpop.f32.mrb[39].mxu0  ;;  %v3182_v4 = vadd.f32 %v3136_v19, %v7713_v27  ;;  %v3181_v21 = vadd.f32 %v3134_v42, %v7713_v27  ;;  %v3184_v58 = vadd.f32 %v3140_v31, %v7713_v27  ;;  %v3183_v22 = vadd.f32 %v3138_v39, %v7713_v27  ;;  %v5871_v42 = vld [vmem:[%s8438_s9 + $0x10] sm:$0xff]  }
 0xeb2   :  { %v3186_v32 = vadd.f32 %v3144_v15, %v7713_v27  ;;  %v3185_v51 = vadd.f32 %v3142_v52, %v7713_v27  ;;  %v7727_v14 = vadd.f32 %v5250_v12, %v2967_v43  ;;  %v3188_v0 = vadd.f32 %v3148_v50, %v7713_v27  ;;  %v5872_v33 = vld [vmem:[%s8438_s9 + $0x18] sm:$0xff]  }
 0xeb3   :  { %3395 = vrot.lane.b32.xlu0 %v3182_v4, %s6129_s17  ;;  %3393 = vrot.lane.b32.xlu1 %v3181_v21, %s6129_s17  ;;  %v3187_v18 = vadd.f32 %v3146_v20, %v7713_v27  ;;  %v3206_v3 = vrot.slane %v7713_v27, %v8575_v29  ;;  %v3199_v24 = vcombine.high %v7713_v27, %v7713_v27 }
 0xeb4   :  { %v3190_v13 = vadd.f32 %v3152_v57, %v7727_v14  ;;  %v3189_v34 = vadd.f32 %v3150_v47, %v7727_v14  ;;  %v3192_v23 = vadd.f32 %v3156_v61, %v7727_v14  ;;  %v3191_v44 = vadd.f32 %v3154_v2, %v7727_v14 }
 0xeb5   :  { %v3194_v53 = vadd.f32 %v3160_v49, %v7727_v14  ;;  %v3193_v60 = vadd.f32 %v3158_v40, %v7727_v14  ;;  %v3196_v25 = vadd.f32 %v3164_v9, %v7727_v14  ;;  %v3195_v35 = vadd.f32 %v3162_v7, %v7727_v14 }
 0xeb6   :  { %v3214_v17 = vcombine.high %v3206_v3, %v3206_v3  ;;  %v3222_v45 = vrot.slane %v3206_v3, %v8575_v29  ;;  %v3213_v5 = vrot.slane %v3199_v24, %v8575_v29  ;;  %v3255_v39 = vrot.slane %v7727_v14, %v8575_v29 }
 0xeb7   :  { %3399 = vrot.lane.b32.xlu0 %v3184_v58, %s6129_s17  ;;  %3397 = vrot.lane.b32.xlu1 %v3183_v22, %s6129_s17 }
 0xeb8   :  { %v3236_v56 = vrot.slane %v3214_v17, %v8575_v29  ;;  %v3300_v6 = vrot.slane %v3222_v45, %v6530_v38  ;;  %v3244_v26 = vcombine.high %v3222_v45, %v3222_v45  ;;  %v3215_v63 = vcombine.high %v3213_v5, %v3213_v5 }
 0xeb9   :  { %v3229_v15 = vrot.slane %v3213_v5, %v8575_v29 }
 0xeba   :  { %v3304_v8 = vrot.slane %v3236_v56, %v6530_v38  ;;  %v3246_v41 = vcombine.high %v3236_v56, %v3236_v56  ;;  %v3308_v31 = vrot.slane %v3244_v26, %v6530_v38  ;;  %v3243_v12 = vrot.slane %v3215_v63, %v8575_v29 }
 0xebb   :  { %3403 = vrot.lane.b32.xlu0 %v3186_v32, %s6129_s17  ;;  %3401 = vrot.lane.b32.xlu1 %v3185_v51, %s6129_s17  ;;  %v3316_v20 = vrot.slane %v3229_v15, %v6530_v38 }
 0xebc   :  { %v3312_v19 = vrot.slane %v3246_v41, %v6530_v38  ;;  %v3320_v50 = vrot.slane %v3243_v12, %v6530_v38 }
 0xebf   :  { %3407 = vrot.lane.b32.xlu0 %v3188_v0, %s6129_s17  ;;  %3405 = vrot.lane.b32.xlu1 %v3187_v18, %s6129_s17 }
 0xec3   :  { %3411 = vrot.lane.b32.xlu0 %v3190_v13, %s6129_s17  ;;  %3409 = vrot.lane.b32.xlu1 %v3189_v34, %s6129_s17 }
 0xec7   :  { %3415 = vrot.lane.b32.xlu0 %v3192_v23, %s6129_s17  ;;  %3413 = vrot.lane.b32.xlu1 %v3191_v44, %s6129_s17 }
 0xecb   :  { %3419 = vrot.lane.b32.xlu0 %v3194_v53, %s6129_s17  ;;  %3417 = vrot.lane.b32.xlu1 %v3193_v60, %s6129_s17 }
 0xecf   :  { %3423 = vrot.lane.b32.xlu0 %v3196_v25, %s6129_s17  ;;  %3421 = vrot.lane.b32.xlu1 %v3195_v35, %s6129_s17 }
 0xed3   :  { %4201 = vrot.lane.b32.xlu0 %v3184_v58, %s6130_s3  ;;  %4197 = vrot.lane.b32.xlu1 %v3182_v4, %s6130_s3  ;;  %v3263_v4 = vcombine.high %v3255_v39, %v3255_v39  ;;  %v3247_v58 = vcombine.high %v3243_v12, %v3243_v12 }
 0xed5   :  { %v3285_v2 = vrot.slane %v3263_v4, %v8575_v29 }
 0xed7   :  { %4213 = vrot.lane.b32.xlu0 %v3190_v13, %s6130_s3  ;;  %4199 = vrot.lane.b32.xlu1 %v3183_v22, %s6130_s3  ;;  %v3245_v22 = vcombine.high %v3229_v15, %v3229_v15 }
 0xed9   :  { %v3324_v61 = vrot.slane %v3245_v22, %v6530_v38 }
 0xedb   :  { %4215 = vrot.lane.b32.xlu0 %v3191_v44, %s6130_s3  ;;  %4195 = vrot.lane.b32.xlu1 %v3181_v21, %s6130_s3  ;;  %v3248_v21 = vcombine.high %v7727_v14, %v7727_v14 }
 0xedd   :  { %v3262_v13 = vrot.slane %v3248_v21, %v8575_v29  ;;  %v8577_v21 = vld [vmem:[#allocation21_spill] sm:$0xff] }
 0xedf   :  { %4217 = vrot.lane.b32.xlu0 %v3192_v23, %s6130_s3  ;;  %4203 = vrot.lane.b32.xlu1 %v3185_v51, %s6130_s3  ;;  %v3264_v7 = vcombine.high %v3262_v13, %v3262_v13  ;;  %v3278_v5 = vrot.slane %v3262_v13, %v8575_v29 }
 0xee1   :  { %v3292_v56 = vrot.slane %v3264_v7, %v8575_v29 }
 0xee3   :  { %4219 = vrot.lane.b32.xlu0 %v3193_v60, %s6130_s3  ;;  %4205 = vrot.lane.b32.xlu1 %v3186_v32, %s6130_s3  ;;  %v3295_v60 = vcombine.high %v3285_v2, %v3285_v2  ;;  %v3352_v63 = vrot.slane %v3292_v56, %v6530_v38 }
 0xee5   :  { %v3344_v24 = vrot.slane %v3295_v60, %v6530_v38  ;;  %v8580_v60 = vld [vmem:[#allocation24_spill] sm:$0xff] }
 0xee7   :  { %4221 = vrot.lane.b32.xlu0 %v3194_v53, %s6130_s3  ;;  %4207 = vrot.lane.b32.xlu1 %v3187_v18, %s6130_s3  ;;  %v3328_v18 = vrot.slane %v3247_v58, %v6530_v38  ;;  %v3336_v53 = vrot.slane %v3285_v2, %v6530_v38 }
 0xeeb   :  { %4223 = vrot.lane.b32.xlu0 %v3195_v35, %s6130_s3  ;;  %4211 = vrot.lane.b32.xlu1 %v3189_v34, %s6130_s3 }
 0xeef   :  { %4225 = vrot.lane.b32.xlu0 %v3196_v25, %s6130_s3  ;;  %4209 = vrot.lane.b32.xlu1 %v3188_v0, %s6130_s3  ;;  %v3271_v0 = vrot.slane %v3255_v39, %v8575_v29 }
 0xef1   :  { %v3332_v40 = vrot.slane %v3271_v0, %v6530_v38  ;;  %v3293_v9 = vcombine.high %v3271_v0, %v3271_v0 }
 0xef3   :  { %v3340_v45 = vrot.slane %v3293_v9, %v6530_v38 }
 0xf25   :  { %v3396_v30 = vpop.permute.xlu0 %3395  ;;  %v3394_v48 = vpop.permute.xlu1 %3393 }
 0xf26   :  { %v3442_v1 = vmul.f32 %v3396_v30, %v3304_v8  ;;  %v3441_v11 = vmul.f32 %v3394_v48, %v3300_v6  ;;  %v3348_v30 = vrot.slane %v3278_v5, %v6530_v38  ;;  %v3296_v48 = vcombine.high %v3292_v56, %v3292_v56 }
 0xf28   :  { %5717 = vmatprep.mubr.msk.f32.mxu0 %vm221_vm0, %v3441_v11 }
 0xf29   :  { %v3400_v52 = vpop.permute.xlu0 %3399  ;;  %5718 = vmatmul.mubr.msk.f32.vlgmr.msra.gmra.mrb[40].mxu0 %vm221_vm0, %v3442_v1  ;;  %v3398_v55 = vpop.permute.xlu1 %3397  ;;  %v3294_v1 = vcombine.high %v3278_v5, %v3278_v5 }
 0xf2a   :  { %v3444_v16 = vmul.f32 %v3400_v52, %v3312_v19  ;;  %v3443_v43 = vmul.f32 %v3398_v55, %v3308_v31  ;;  %5768 = vmatpush3.bf16.msra.mxu0 %v5871_v42  ;;  %v3360_v19 = vrot.slane %v3296_v48, %v6530_v38 }
 0xf2b   :  { %5769 = vmatprep.subr.bf16.mxu0 %v8542_v37  ;;  %v3356_v31 = vrot.slane %v3294_v1, %v6530_v38  ;;  %v8582_v1 = vld [vmem:[#allocation26_spill] sm:$0xff] }
 0xf2c   :  { %5720 = vmatprep.mubr.msk.f32.mxu0 %vm221_vm0, %v3443_v43  ;;  %v8576_v43 = vld [vmem:[#allocation20_spill] sm:$0xff] }
 0xf2d   :  { %v3404_v32 = vpop.permute.xlu0 %3403  ;;  %5721 = vmatmul.mubr.msk.f32.gmra.mrb[42].mxu0 %vm221_vm0, %v3444_v16  ;;  %v3402_v51 = vpop.permute.xlu1 %3401 }
 0xf2e   :  { %v3446_v57 = vmul.f32 %v3404_v32, %v3320_v50  ;;  %v3445_v47 = vmul.f32 %v3402_v51, %v3316_v20  ;;  %5770 = vmatpush3.bf16.msra.mxu0 %v5872_v33 }
 0xf2f   :  { %5775 = vmatprep.subr.bf16.mxu0 %v8542_v37 }
 0xf30   :  { %5723 = vmatprep.mubr.msk.f32.mxu0 %vm221_vm0, %v3445_v47 }
 0xf31   :  { %v3408_v34 = vpop.permute.xlu0 %3407  ;;  %5724 = vmatmul.mubr.msk.f32.gmra.mrb[44].mxu0 %vm221_vm0, %v3446_v57  ;;  %v3406_v23 = vpop.permute.xlu1 %3405  ;;  %v8578_v57 = vld [vmem:[#allocation22_spill] sm:$0xff] }
 0xf32   :  { %v3448_v44 = vmul.f32 %v3408_v34, %v3328_v18  ;;  %v3447_v49 = vmul.f32 %v3406_v23, %v3324_v61  ;;  %v8579_v18 = vld [vmem:[#allocation23_spill] sm:$0xff] }
 0xf34   :  { %5726 = vmatprep.mubr.msk.f32.mxu0 %vm221_vm0, %v3447_v49 }
 0xf35   :  { %5727 = vmatmul.mubr.msk.f32.gmra.mrb[46].mxu0 %vm221_vm0, %v3448_v44  ;;  %v3412_v25 = vpop.permute.xlu0 %3411  ;;  %v3410_v35 = vpop.permute.xlu1 %3409 }
 0xf36   :  { %v3450_v3 = vmul.f32 %v3412_v25, %v3336_v53  ;;  %v3449_v17 = vmul.f32 %v3410_v35, %v3332_v40 }
 0xf38   :  { %5729 = vmatprep.mubr.msk.f32.mxu0 %vm221_vm0, %v3449_v17 }
 0xf39   :  { %v3416_v6 = vpop.permute.xlu0 %3415  ;;  %5730 = vmatmul.mubr.msk.f32.gmra.mrb[48].mxu0 %vm221_vm0, %v3450_v3  ;;  %v3414_v8 = vpop.permute.xlu1 %3413  ;;  %v8581_v3 = vld [vmem:[#allocation25_spill] sm:$0xff] }
 0xf3a   :  { %v3452_v41 = vmul.f32 %v3416_v6, %v3344_v24  ;;  %v3451_v26 = vmul.f32 %v3414_v8, %v3340_v45 }
 0xf3c   :  { %5732 = vmatprep.mubr.msk.f32.mxu0 %vm221_vm0, %v3451_v26 }
 0xf3d   :  { %v3420_v11 = vpop.permute.xlu0 %3419  ;;  %5733 = vmatmul.mubr.msk.f32.gmra.mrb[50].mxu0 %vm221_vm0, %v3452_v41  ;;  %v3418_v42 = vpop.permute.xlu1 %3417 }
 0xf3e   :  { %v3454_v39 = vmul.f32 %v3420_v11, %v3352_v63  ;;  %v3453_v29 = vmul.f32 %v3418_v42, %v3348_v30 }
 0xf40   :  { %5735 = vmatprep.mubr.msk.f32.mxu0 %vm221_vm0, %v3453_v29 }
 0xf41   :  { %v3424_v12 = vpop.permute.xlu0 %3423  ;;  %5736 = vmatmul.mubr.msk.f32.gmra.mrb[52].mxu0 %vm221_vm0, %v3454_v39  ;;  %v3422_v15 = vpop.permute.xlu1 %3421 }
 0xf42   :  { %v3456_v52 = vmul.f32 %v3424_v12, %v3360_v19  ;;  %v3455_v55 = vmul.f32 %v3422_v15, %v3356_v31  ;;  %v8583_v31 = vld [vmem:[#allocation27_spill] sm:$0xff] }
 0xf44   :  { %5738 = vmatprep.mubr.msk.f32.mxu0 %vm221_vm0, %v3455_v55 }
 0xf45   :  { %5739 = vmatmul.mubr.msk.f32.gmra.mrb[54].mxu0 %vm221_vm0, %v3456_v52 }
 0xf46   :  { %5771 = vmatprep.mubr.msk.bf16.mxu0 %vm6127_vm1, %v8542_v37 }
 0xf49   :  { %5772 = vmatmul.mubr.msk.bf16.vlgmr.msra.gmra.mrb[56].mxu0 %vm221_vm0, %v7702_v36 }
 0xf4a   :  { %5779 = vmatprep.mubr.msk.bf16.mxu0 %vm6127_vm1, %v8542_v37 }
 0xffc   :  { %v5719_v16 = vpop.f32.mrb[40].mxu0 }
 0xffd   :  { %v3651_v33 = vadd.f32 %v5719_v16, %v8576_v43  ;;  %v3571_v4 = vpop.f32.mrb[41].mxu0 }
 0xffe   :  { %v3650_v50 = vadd.f32 %v3571_v4, %v8577_v21 }
 0xfff   :  { %v3673_v20 = vsel %vm1281_vm2, %v3651_v33, -inf }
0x1000   :  { %v3674_v58 = vrot.slane %v3673_v20, 4  ;;  %v3666_v22 = vsel %vm1281_vm2, %v3650_v50, -inf  ;;  %v5722_v32 = vpop.f32.mrb[42].mxu0 }
0x1001   :  { %v3667_v51 = vrot.slane %v3666_v22, 4  ;;  %v7834_v47 = vadd.f32 %v5722_v32, %v8578_v57  ;;  %v3581_v36 = vpop.f32.mrb[43].mxu0 }
0x1002   :  { %v3675_v0 = vmax.f32 %v3673_v20, %v3674_v58  ;;  %v7837_v61 = vadd.f32 %v3581_v36, %v8579_v18 }
0x1003   :  { %v3668_v2 = vmax.f32 %v3666_v22, %v3667_v51  ;;  %v3687_v13 = vsel %vm1281_vm2, %v7834_v47, -inf }
0x1004   :  { %v3676_v34 = vrot.slane %v3675_v0, 2  ;;  %v3688_v23 = vrot.slane %v3687_v13, 4  ;;  %v3680_v44 = vsel %vm1281_vm2, %v7837_v61, -inf  ;;  %v5725_v49 = vpop.f32.mrb[44].mxu0 }
0x1005   :  { %v3669_v40 = vrot.slane %v3668_v2, 2  ;;  %v3681_v53 = vrot.slane %v3680_v44, 4  ;;  %v7844_v9 = vadd.f32 %v5725_v49, %v8580_v60  ;;  %v3591_v7 = vpop.f32.mrb[45].mxu0 }
0x1006   :  { %v3677_v25 = vmax.f32 %v3675_v0, %v3676_v34  ;;  %v3689_v35 = vmax.f32 %v3687_v13, %v3688_v23  ;;  %v7847_v17 = vadd.f32 %v3591_v7, %v8581_v3 }
0x1007   :  { %v3670_v24 = vmax.f32 %v3668_v2, %v3669_v40  ;;  %v3682_v45 = vmax.f32 %v3680_v44, %v3681_v53  ;;  %v3701_v56 = vsel %vm1281_vm2, %v7844_v9, -inf }
0x1008   :  { %v3678_v5 = vrot.slane %v3677_v25, 1  ;;  %v3690_v6 = vrot.slane %v3689_v35, 2  ;;  %v3702_v8 = vrot.slane %v3701_v56, 4  ;;  %v3694_v41 = vsel %vm1281_vm2, %v7847_v17, -inf  ;;  %v5728_v26 = vpop.f32.mrb[46].mxu0 }
0x1009   :  { %v3671_v63 = vrot.slane %v3670_v24, 1  ;;  %v3683_v30 = vrot.slane %v3682_v45, 2  ;;  %v3695_v48 = vrot.slane %v3694_v41, 4  ;;  %v7854_v11 = vadd.f32 %v5728_v26, %v8582_v1  ;;  %v3601_v42 = vpop.f32.mrb[47].mxu0  ;;  %v8585_v26 = vld [vmem:[#allocation29_spill] sm:$0xff] }
0x100a   :  { %v3679_v39 = vmax.f32 %v3677_v25, %v3678_v5  ;;  %v3691_v29 = vmax.f32 %v3689_v35, %v3690_v6  ;;  %v3703_v19 = vmax.f32 %v3701_v56, %v3702_v8  ;;  %v7857_v12 = vadd.f32 %v3601_v42, %v8583_v31  ;;  %v8584_v56 = vld [vmem:[#allocation28_spill] sm:$0xff] }
0x100b   :  { %v3672_v15 = vmax.f32 %v3670_v24, %v3671_v63  ;;  %v3684_v52 = vmax.f32 %v3682_v45, %v3683_v30  ;;  %v3696_v55 = vmax.f32 %v3694_v41, %v3695_v48  ;;  %v3715_v16 = vsel %vm1281_vm2, %v7854_v11, -inf }
0x100c   :  { %v3779_v43 = vsub.f32 %v3651_v33, %v3679_v39  ;;  %v3692_v4 = vrot.slane %v3691_v29, 1  ;;  %v3704_v21 = vrot.slane %v3703_v19, 2  ;;  %v3716_v20 = vrot.slane %v3715_v16, 4  ;;  %v5731_v58 = vpop.f32.mrb[48].mxu0 }
0x100d   :  { %v3778_v22 = vsub.f32 %v3650_v50, %v3672_v15  ;;  %v3685_v32 = vrot.slane %v3684_v52, 1  ;;  %v3697_v51 = vrot.slane %v3696_v55, 2  ;;  %v3708_v57 = vsel %vm1281_vm2, %v7857_v12, -inf  ;;  %v3611_v36 = vpop.f32.mrb[49].mxu0 }
0x100e   :  { %v3796_v0 = vmul.f32 1.442695, %v3779_v43  ;;  %v3693_v18 = vmax.f32 %v3691_v29, %v3692_v4  ;;  %v3705_v2 = vmax.f32 %v3703_v19, %v3704_v21  ;;  %v3717_v13 = vmax.f32 %v3715_v16, %v3716_v20  ;;  %v8587_v20 = vld [vmem:[#allocation31_spill] sm:$0xff] }
0x100f   :  { %v3794_v34 = vmul.f32 1.442695, %v3778_v22  ;;  %v3686_v23 = vmax.f32 %v3684_v52, %v3685_v32  ;;  %v3698_v44 = vmax.f32 %v3696_v55, %v3697_v51  ;;  %v3709_v49 = vrot.slane %v3708_v57, 4  ;;  %v8586_v52 = vld [vmem:[#allocation30_spill] sm:$0xff] }
0x1010   :  { %6011 = vpow2.f32 %v3796_v0  ;;  %v3781_v33 = vsub.f32 %v7834_v47, %v3693_v18  ;;  %v3706_v40 = vrot.slane %v3705_v2, 1  ;;  %v3718_v53 = vrot.slane %v3717_v13, 2  ;;  %v5734_v50 = vpop.f32.mrb[50].mxu0 }
0x1011   :  { %6013 = vpow2.f32 %v3794_v34  ;;  %v3780_v60 = vsub.f32 %v7837_v61, %v3686_v23  ;;  %v3699_v7 = vrot.slane %v3698_v44, 1  ;;  %v3710_v25 = vmax.f32 %v3708_v57, %v3709_v49  ;;  %v3621_v35 = vpop.f32.mrb[51].mxu0 }
0x1012   :  { %v3800_v3 = vmul.f32 1.442695, %v3781_v33  ;;  %v3707_v24 = vmax.f32 %v3705_v2, %v3706_v40  ;;  %v3719_v45 = vmax.f32 %v3717_v13, %v3718_v53  ;;  %v7866_v5 = vadd.f32 %v5731_v58, %v8584_v56  ;;  %v8588_v13 = vld [vmem:[#allocation32_spill] sm:$0xff] }
0x1013   :  { %v3798_v6 = vmul.f32 1.442695, %v3780_v60  ;;  %v3700_v8 = vmax.f32 %v3698_v44, %v3699_v7  ;;  %v3711_v41 = vrot.slane %v3710_v25, 2  ;;  %v7869_v47 = vadd.f32 %v3611_v36, %v8585_v26 }
0x1014   :  { %6015 = vpow2.f32 %v3800_v3  ;;  %v3783_v63 = vsub.f32 %v7844_v9, %v3707_v24  ;;  %v3720_v30 = vrot.slane %v3719_v45, 1  ;;  %v3729_v61 = vsel %vm1281_vm2, %v7866_v5, -inf  ;;  %v5737_v48 = vpop.f32.mrb[52].mxu0 }
0x1015   :  { %6017 = vpow2.f32 %v3798_v6  ;;  %v3782_v1 = vsub.f32 %v7847_v17, %v3700_v8  ;;  %v3712_v42 = vmax.f32 %v3710_v25, %v3711_v41  ;;  %v3730_v39 = vrot.slane %v3729_v61, 4  ;;  %v7875_v29 = vpop.f32.mrb[53].mxu0 }
0x1016   :  { %v3804_v19 = vmul.f32 1.442695, %v3783_v63  ;;  %v3721_v31 = vmax.f32 %v3719_v45, %v3720_v30  ;;  %v3722_v15 = vsel %vm1281_vm2, %v7869_v47, -inf  ;;  %v7880_v55 = vadd.f32 %v5734_v50, %v8586_v52 }
0x1017   :  { %v3802_v9 = vmul.f32 1.442695, %v3782_v1  ;;  %v3713_v16 = vrot.slane %v3712_v42, 1  ;;  %v3731_v43 = vmax.f32 %v3729_v61, %v3730_v39  ;;  %v3723_v4 = vrot.slane %v3722_v15, 4 }
0x1018   :  { %6019 = vpow2.f32 %v3804_v19  ;;  %v3785_v21 = vsub.f32 %v7854_v11, %v3721_v31  ;;  %v3743_v17 = vsel %vm1281_vm2, %v7880_v55, -inf  ;;  %v7886_v58 = vadd.f32 %v3621_v35, %v8587_v20  ;;  %v7888_v22 = vpop.f32.mrb[54].mxu0 }
0x1019   :  { %6021 = vpow2.f32 %v3802_v9  ;;  %v3714_v32 = vmax.f32 %v3712_v42, %v3713_v16  ;;  %v3732_v51 = vrot.slane %v3731_v43, 2  ;;  %v3724_v57 = vmax.f32 %v3722_v15, %v3723_v4  ;;  %v7890_v36 = vpop.f32.mrb[55].mxu0 }
0x101a   :  { %v7892_v0 = vpop.eup %6011  ;;  %v3808_v18 = vmul.f32 1.442695, %v3785_v21  ;;  %v3744_v2 = vrot.slane %v3743_v17, 4  ;;  %v3736_v11 = vsel %vm1281_vm2, %v7886_v58, -inf  ;;  %v7897_v34 = vadd.f32 %v5737_v48, %v8588_v13 }
0x101b   :  { %v7899_v23 = vpop.eup %6013  ;;  %v3833_v44 = vsel %vm1281_vm2, %v7892_v0, 0.0  ;;  %v3784_v49 = vsub.f32 %v7857_v12, %v3714_v32  ;;  %v3733_v33 = vmax.f32 %v3731_v43, %v3732_v51  ;;  %v3725_v40 = vrot.slane %v3724_v57, 2 }
0x101c   :  { %v3834_v53 = vrot.slane %v3833_v44, 4  ;;  %v3826_v50 = vsel %vm1281_vm2, %v7899_v23, 0.0  ;;  %6023 = vpow2.f32 %v3808_v18  ;;  %v3745_v60 = vmax.f32 %v3743_v17, %v3744_v2  ;;  %v7906_v7 = vpop.f32.mrb[56].mxu0 }
0x101d   :  { %v3827_v25 = vrot.slane %v3826_v50, 4  ;;  %v3806_v35 = vmul.f32 1.442695, %v3784_v49  ;;  %v3734_v3 = vrot.slane %v3733_v33, 1  ;;  %v3726_v24 = vmax.f32 %v3724_v57, %v3725_v40  ;;  %v5773_v45 = vpop.f32.mrb[57].mxu0 }
0x101e   :  { %v7908_v56 = vpop.eup %6015  ;;  %v3835_v6 = vadd.f32 %v3834_v53, %v3833_v44  ;;  %v3746_v8 = vrot.slane %v3745_v60, 2  ;;  %v3737_v12 = vrot.slane %v3736_v11, 4  ;;  %v7910_v41 = vpop.f32.mrb[58].mxu0  ;;  %v3757_v9 = vsel %vm1281_vm2, %v7897_v34, -inf }
0x101f   :  { %v7912_v26 = vpop.eup %6017  ;;  %v3828_v63 = vadd.f32 %v3827_v25, %v3826_v50  ;;  %v3847_v30 = vsel %vm1281_vm2, %v7908_v56, 0.0  ;;  %6025 = vpow2.f32 %v3806_v35  ;;  %v3735_v61 = vmax.f32 %v3733_v33, %v3734_v3  ;;  %v5774_v48 = vpop.f32.mrb[59].mxu0 }
0x1020   :  { %v3836_v1 = vrot.slane %v3835_v6, 2  ;;  %v3848_v42 = vrot.slane %v3847_v30, 4  ;;  %v3840_v39 = vsel %vm1281_vm2, %v7912_v26, 0.0  ;;  %v3727_v19 = vrot.slane %v3726_v24, 1 }
0x1021   :  { %v3829_v31 = vrot.slane %v3828_v63, 2  ;;  %v3841_v15 = vrot.slane %v3840_v39, 4  ;;  %v3787_v52 = vsub.f32 %v7866_v5, %v3735_v61  ;;  %v3747_v17 = vmax.f32 %v3745_v60, %v3746_v8 }
0x1022   :  { %v7921_v16 = vpop.eup %6019  ;;  %v3837_v43 = vadd.f32 %v3836_v1, %v3835_v6  ;;  %v3849_v4 = vadd.f32 %v3848_v42, %v3847_v30  ;;  %v3728_v21 = vmax.f32 %v3726_v24, %v3727_v19  ;;  %v3738_v40 = vmax.f32 %v3736_v11, %v3737_v12 }
0x1023   :  { %v7923_v20 = vpop.eup %6021  ;;  %v7925_v32 = vadd.f32 %v3829_v31, %v3828_v63  ;;  %v3842_v51 = vadd.f32 %v3841_v15, %v3840_v39  ;;  %v3861_v57 = vsel %vm1281_vm2, %v7921_v16, 0.0  ;;  %v3812_v18 = vmul.f32 1.442695, %v3787_v52 }
0x1024   :  { %v3838_v2 = vrot.slane %v3837_v43, 1  ;;  %v3850_v5 = vrot.slane %v3849_v4, 2  ;;  %v3862_v13 = vrot.slane %v3861_v57, 4  ;;  %v3854_v44 = vsel %vm1281_vm2, %v7923_v20, 0.0 }
0x1025   :  { %v3843_v49 = vrot.slane %v3842_v51, 2  ;;  %v3855_v33 = vrot.slane %v3854_v44, 4  ;;  %6027 = vpow2.f32 %v3812_v18  ;;  %v3786_v35 = vsub.f32 %v7869_v47, %v3728_v21 }
0x1026   :  { %v7931_v53 = vpop.eup %6023  ;;  %v3839_v50 = vadd.f32 %v3838_v2, %v3837_v43  ;;  %v7933_v60 = vadd.f32 %v3850_v5, %v3849_v4  ;;  %v3863_v25 = vadd.f32 %v3862_v13, %v3861_v57  ;;  %v3748_v6 = vrot.slane %v3747_v17, 1  ;;  %v8589_v2 = vld [vmem:[#allocation33_spill] sm:$0xff] }
0x1027   :  { %v7936_v3 = vadd.f32 %v3843_v49, %v3842_v51  ;;  %v3856_v24 = vadd.f32 %v3855_v33, %v3854_v44  ;;  %v3875_v45 = vsel %vm1281_vm2, %v7931_v53, 0.0  ;;  %v3831_v63 = vrot.slane %v7925_v32, 1  ;;  %v8590_v33 = vld [vmem:[#allocation34_spill] sm:$0xff] }
0x1028   :  { %v3939_v8 = vadd.f32 1e-16, %v3839_v50  ;;  %v3864_v30 = vrot.slane %v3863_v25, 2  ;;  %v3876_v11 = vrot.slane %v3875_v45, 4  ;;  %v3852_v61 = vrot.slane %v7933_v60, 1 }
0x1029   :  { %v7941_v12 = vpop.eup %6025  ;;  %v3857_v48 = vrot.slane %v3856_v24, 2  ;;  %v3810_v1 = vmul.f32 1.442695, %v3786_v35  ;;  %v3749_v42 = vmax.f32 %v3747_v17, %v3748_v6  ;;  %v3845_v31 = vrot.slane %v7936_v3, 1 }
0x102a   :  { %6029 = vrcp.f32 %v3939_v8  ;;  %v7944_v47 = vadd.f32 %v3864_v30, %v3863_v25  ;;  %v3877_v39 = vadd.f32 %v3876_v11, %v3875_v45  ;;  %v3868_v19 = vsel %vm1281_vm2, %v7941_v12, 0.0 }
0x102b   :  { %v3869_v15 = vrot.slane %v3868_v19, 4  ;;  %6031 = vpow2.f32 %v3810_v1  ;;  %v3789_v52 = vsub.f32 %v7880_v55, %v3749_v42  ;;  %v7950_v43 = vadd.f32 %v3857_v48, %v3856_v24  ;;  %v8591_v24 = vld [vmem:[#allocation35_spill] sm:$0xff] }
0x102c   :  { %v3878_v4 = vrot.slane %v3877_v39, 2  ;;  %v3739_v21 = vrot.slane %v3738_v40, 2  ;;  %v3758_v51 = vrot.slane %v3757_v9, 4  ;;  %v3866_v17 = vrot.slane %v7944_v47, 1 }
0x102d   :  { %v3870_v57 = vadd.f32 %v3869_v15, %v3868_v19  ;;  %v3816_v18 = vmul.f32 1.442695, %v3789_v52  ;;  %v7955_v5 = vadd.f32 %v7875_v29, %v8589_v2  ;;  %v7961_v55 = vadd.f32 %v7888_v22, %v8590_v33 }
0x102e   :  { %v7957_v13 = vadd.f32 %v3878_v4, %v3877_v39  ;;  %v3740_v44 = vmax.f32 %v3738_v40, %v3739_v21  ;;  %v3759_v49 = vmax.f32 %v3757_v9, %v3758_v51  ;;  %v7969_v45 = vadd.f32 %v7890_v36, %v8591_v24 }
0x102f   :  { %v7963_v50 = vpop.eup %6027  ;;  %v3871_v25 = vrot.slane %v3870_v57, 2  ;;  %6033 = vpow2.f32 %v3816_v18  ;;  %v3750_v35 = vsel %vm1281_vm2, %v7955_v5, -inf  ;;  %v3859_v29 = vrot.slane %v7950_v43, 1 }
0x1030   :  { %v3889_v9 = vsel %vm1281_vm2, %v7963_v50, 0.0  ;;  %v3741_v40 = vrot.slane %v3740_v44, 1  ;;  %v3760_v6 = vrot.slane %v3759_v49, 2  ;;  %v3751_v30 = vrot.slane %v3750_v35, 4 }
0x1031   :  { %v7974_v22 = vadd.f32 %v3871_v25, %v3870_v57  ;;  %v3890_v8 = vrot.slane %v3889_v9, 4  ;;  %v3771_v11 = vsel %vm1281_vm2, %v7961_v55, -inf  ;;  %v3764_v36 = vsel %vm1281_vm2, %v7969_v45, -inf }
0x1032   :  { %v3742_v48 = vmax.f32 %v3740_v44, %v3741_v40  ;;  %v3761_v1 = vmax.f32 %v3759_v49, %v3760_v6  ;;  %v3772_v42 = vrot.slane %v3771_v11, 4  ;;  %v3752_v15 = vmax.f32 %v3750_v35, %v3751_v30 }
0x1033   :  { %v3891_v19 = vadd.f32 %v3890_v8, %v3889_v9  ;;  %v3765_v52 = vrot.slane %v3764_v36, 4  ;;  %v3832_v18 = vadd.f32 %v3831_v63, %v7925_v32  ;;  %v3873_v44 = vrot.slane %v7974_v22, 1 }
0x1034   :  { %v7981_v4 = vpop.eup %6029  ;;  %v3788_v21 = vsub.f32 %v7886_v58, %v3742_v48  ;;  %v3762_v51 = vrot.slane %v3761_v1, 1  ;;  %v3773_v57 = vmax.f32 %v3771_v11, %v3772_v42  ;;  %v3753_v33 = vrot.slane %v3752_v15, 2 }
0x1035   :  { %v7985_v2 = vpop.eup %6031  ;;  %v3892_v49 = vrot.slane %v3891_v19, 2  ;;  %v3766_v25 = vmax.f32 %v3764_v36, %v3765_v52  ;;  %v3938_v11 = vadd.f32 1e-16, %v3832_v18  ;;  %v3853_v18 = vadd.f32 %v3852_v61, %v7933_v60 }
0x1036   :  { %v3882_v24 = vsel %vm1281_vm2, %v7985_v2, 0.0  ;;  %v3814_v35 = vmul.f32 1.442695, %v3788_v21  ;;  %v3763_v9 = vmax.f32 %v3761_v1, %v3762_v51  ;;  %v3774_v40 = vrot.slane %v3773_v57, 2 }
0x1037   :  { %v3893_v6 = vadd.f32 %v3892_v49, %v3891_v19  ;;  %v3883_v8 = vrot.slane %v3882_v24, 4  ;;  %v3754_v58 = vmax.f32 %v3752_v15, %v3753_v33  ;;  %v3767_v30 = vrot.slane %v3766_v25, 2 }
0x1038   :  { %6035 = vpow2.f32 %v3814_v35  ;;  %v3791_v32 = vsub.f32 %v7897_v34, %v3763_v9  ;;  %v3775_v63 = vmax.f32 %v3773_v57, %v3774_v40  ;;  %v3846_v57 = vadd.f32 %v3845_v31, %v7936_v3 }
0x1039   :  { %v7991_v48 = vpop.eup %6033  ;;  %v3894_v42 = vrot.slane %v3893_v6, 1  ;;  %v3884_v39 = vadd.f32 %v3883_v8, %v3882_v24  ;;  %v3755_v36 = vrot.slane %v3754_v58, 1  ;;  %v3768_v52 = vmax.f32 %v3766_v25, %v3767_v30 }
0x103a   :  { %v3903_v21 = vsel %vm1281_vm2, %v7991_v48, 0.0  ;;  %v3820_v1 = vmul.f32 1.442695, %v3791_v32  ;;  %v3776_v51 = vrot.slane %v3775_v63, 1  ;;  %6037 = vrcp.f32 %v3938_v11 }
0x103b   :  { %v3885_v19 = vrot.slane %v3884_v39, 2  ;;  %v3904_v15 = vrot.slane %v3903_v21, 4  ;;  %v3756_v49 = vmax.f32 %v3754_v58, %v3755_v36  ;;  %v3769_v33 = vrot.slane %v3768_v52, 1 }
0x103c   :  { %6039 = vpow2.f32 %v3820_v1  ;;  %v3777_v34 = vmax.f32 %v3775_v63, %v3776_v51  ;;  %v3940_v8 = vadd.f32 1e-16, %v3846_v57  ;;  %v3941_v58 = vadd.f32 1e-16, %v3853_v18 }
0x103d   :  { %v3886_v25 = vadd.f32 %v3885_v19, %v3884_v39  ;;  %v3905_v24 = vadd.f32 %v3904_v15, %v3903_v21  ;;  %v3790_v35 = vsub.f32 %v7955_v5, %v3756_v49  ;;  %v3770_v9 = vmax.f32 %v3768_v52, %v3769_v33 }
0x103e   :  { %v3793_v40 = vsub.f32 %v7961_v55, %v3777_v34  ;;  %v3860_v30 = vadd.f32 %v3859_v29, %v7950_v43  ;;  %6041 = vrcp.f32 %v3940_v8  ;;  %v3867_v60 = vadd.f32 %v3866_v17, %v7944_v47 }
0x103f   :  { %v3887_v32 = vrot.slane %v3886_v25, 1  ;;  %v3906_v63 = vrot.slane %v3905_v24, 2  ;;  %v3818_v11 = vmul.f32 1.442695, %v3790_v35  ;;  %v3792_v3 = vsub.f32 %v7969_v45, %v3770_v9 }
0x1040   :  { %v3824_v31 = vmul.f32 1.442695, %v3793_v40  ;;  %v3942_v36 = vadd.f32 1e-16, %v3860_v30  ;;  %v3874_v55 = vadd.f32 %v3873_v44, %v7974_v22  ;;  %v3943_v43 = vadd.f32 1e-16, %v3867_v60 }
0x1041   :  { %v3907_v61 = vadd.f32 %v3906_v63, %v3905_v24  ;;  %6043 = vpow2.f32 %v3818_v11  ;;  %v3822_v5 = vmul.f32 1.442695, %v3792_v3  ;;  %v8592_v29 = vrot.slane %v7957_v13, 1 }
0x1042   :  { %v8009_v39 = vpop.eup %6035  ;;  %6045 = vpow2.f32 %v3824_v31  ;;  %v3888_v52 = vadd.f32 %v3887_v32, %v3886_v25  ;;  %v3944_v1 = vadd.f32 1e-16, %v3874_v55  ;;  %v3895_v19 = vadd.f32 %v3894_v42, %v3893_v6 }
0x1043   :  { %v3881_v45 = vadd.f32 %v8592_v29, %v7957_v13  ;;  %v3896_v21 = vsel %vm1281_vm2, %v8009_v39, 0.0  ;;  %6047 = vpow2.f32 %v3822_v5  ;;  %v3908_v17 = vrot.slane %v3907_v61, 1 }
0x1044   :  { %v6038_v47 = vpop.eup %6037  ;;  %v3897_v51 = vrot.slane %v3896_v21, 4  ;;  %6049 = vrcp.f32 %v3941_v58  ;;  %v3946_v44 = vadd.f32 1e-16, %v3888_v52  ;;  %v3987_v13 = vmul.f32 %v7981_v4, %v7892_v0 }
0x1045   :  { %v3986_v22 = vmul.f32 %v6038_v47, %v7899_v23  ;;  %6051 = vrcp.f32 %v3942_v36  ;;  %v3945_v33 = vadd.f32 1e-16, %v3881_v45  ;;  %v3947_v23 = vadd.f32 1e-16, %v3895_v19 }
0x1046   :  { %v8017_v15 = vpop.eup %6039  ;;  %v3898_v49 = vadd.f32 %v3897_v51, %v3896_v21  ;;  %6053 = vrcp.f32 %v3943_v43  ;;  %v3909_v6 = vadd.f32 %v3908_v17, %v3907_v61 }
0x1047   :  { %v3917_v34 = vsel %vm1281_vm2, %v8017_v15, 0.0  ;;  %5743 = vmatprep.mubr.msk.f32.mxu1 %vm1281_vm2, %v3986_v22  ;;  %6055 = vrcp.f32 %v3944_v1 }
0x1048   :  { %v3899_v57 = vrot.slane %v3898_v49, 2  ;;  %v3918_v18 = vrot.slane %v3917_v34, 4  ;;  %5744 = vmatmul.mubr.msk.f32.vlgmr.msra.gmra.mrb[52].mxu1 %vm1281_vm2, %v3987_v13  ;;  %6057 = vrcp.f32 %v3946_v44  ;;  %v6042_v42 = vpop.eup %6041  ;;  %v3949_v63 = vadd.f32 1e-16, %v3909_v6 }
0x1049   :  { %6059 = vrcp.f32 %v3945_v33  ;;  %v3988_v4 = vmul.f32 %v6042_v42, %v7912_v26 }
0x104a   :  { %v3900_v25 = vadd.f32 %v3899_v57, %v3898_v49  ;;  %v3919_v24 = vadd.f32 %v3918_v18, %v3917_v34  ;;  %6061 = vrcp.f32 %v3947_v23 }
0x104b   :  { %v8025_v0 = vpop.eup %6043  ;;  %5746 = vmatprep.mubr.msk.f32.mxu1 %vm1281_vm2, %v3988_v4  ;;  %6063 = vrcp.f32 %v3949_v63 }
0x104c   :  { %v8028_v35 = vpop.eup %6045  ;;  %v3901_v9 = vrot.slane %v3900_v25, 1  ;;  %v3920_v40 = vrot.slane %v3919_v24, 2  ;;  %v3910_v8 = vsel %vm1281_vm2, %v8025_v0, 0.0 }
0x104d   :  { %v8032_v58 = vpop.eup %6047  ;;  %v3911_v30 = vrot.slane %v3910_v8, 4  ;;  %v3931_v32 = vsel %vm1281_vm2, %v8028_v35, 0.0 }
0x104e   :  { %v6050_v11 = vpop.eup %6049  ;;  %v3921_v3 = vadd.f32 %v3920_v40, %v3919_v24  ;;  %v3932_v26 = vrot.slane %v3931_v32, 4  ;;  %v3924_v31 = vsel %vm1281_vm2, %v8032_v58, 0.0  ;;  %v3902_v36 = vadd.f32 %v3901_v9, %v3900_v25 }
0x104f   :  { %v6052_v60 = vpop.eup %6051  ;;  %v3912_v61 = vadd.f32 %v3911_v30, %v3910_v8  ;;  %v3925_v5 = vrot.slane %v3924_v31, 4  ;;  %v3989_v55 = vmul.f32 %v6050_v11, %v7908_v56 }
0x1050   :  { %v6054_v43 = vpop.eup %6053  ;;  %v3922_v29 = vrot.slane %v3921_v3, 1  ;;  %v3933_v45 = vadd.f32 %v3932_v26, %v3931_v32  ;;  %v3990_v52 = vmul.f32 %v6052_v60, %v7923_v20  ;;  %v3948_v21 = vadd.f32 1e-16, %v3902_v36 }
0x1051   :  { %v6056_v1 = vpop.eup %6055  ;;  %v3913_v47 = vrot.slane %v3912_v61, 2  ;;  %v3926_v17 = vadd.f32 %v3925_v5, %v3924_v31  ;;  %5747 = vmatmul.mubr.msk.f32.gmra.mrb[54].mxu1 %vm1281_vm2, %v3989_v55  ;;  %v3991_v49 = vmul.f32 %v6054_v43, %v7921_v16  ;;  %v4202_v5 = vpop.permute.xlu0 %4201 }
0x1052   :  { %v3934_v51 = vrot.slane %v3933_v45, 2  ;;  %5749 = vmatprep.mubr.msk.f32.mxu1 %vm1281_vm2, %v3990_v52  ;;  %v3992_v22 = vmul.f32 %v6056_v1, %v7941_v12  ;;  %6065 = vrcp.f32 %v3948_v21  ;;  %v3923_v44 = vadd.f32 %v3922_v29, %v3921_v3  ;;  %v6058_v56 = vpop.eup %6057 }
0x1053   :  { %v3914_v19 = vadd.f32 %v3913_v47, %v3912_v61  ;;  %v3927_v13 = vrot.slane %v3926_v17, 2  ;;  %v6060_v20 = vpop.eup %6059  ;;  %v3994_v23 = vmul.f32 %v6058_v56, %v7985_v2 }
0x1054   :  { %v3935_v33 = vadd.f32 %v3934_v51, %v3933_v45  ;;  %v3951_v6 = vadd.f32 1e-16, %v3923_v44  ;;  %v6062_v12 = vpop.eup %6061  ;;  %v3993_v25 = vmul.f32 %v6060_v20, %v7931_v53 }
0x1055   :  { %v3915_v34 = vrot.slane %v3914_v19, 1  ;;  %v3928_v57 = vadd.f32 %v3927_v13, %v3926_v17  ;;  %5750 = vmatmul.mubr.msk.f32.gmra.mrb[56].mxu1 %vm1281_vm2, %v3991_v49  ;;  %v6064_v8 = vpop.eup %6063  ;;  %v3995_v30 = vmul.f32 %v6062_v12, %v7963_v50  ;;  %v4214_v17 = vpop.permute.xlu0 %4213 }
0x1056   :  { %v3936_v18 = vrot.slane %v3935_v33, 1  ;;  %5752 = vmatprep.mubr.msk.f32.mxu1 %vm1281_vm2, %v3992_v22  ;;  %6067 = vrcp.f32 %v3951_v6  ;;  %v3997_v63 = vmul.f32 %v6064_v8, %v7991_v48 }
0x1057   :  { %v3929_v42 = vrot.slane %v3928_v57, 1  ;;  %v3916_v24 = vadd.f32 %v3915_v34, %v3914_v19 }
0x1058   :  { %v3937_v4 = vadd.f32 %v3936_v18, %v3935_v33 }
0x1059   :  { %5753 = vmatmul.mubr.msk.f32.gmra.mrb[58].mxu1 %vm1281_vm2, %v3993_v25  ;;  %v3950_v16 = vadd.f32 1e-16, %v3916_v24  ;;  %v3930_v9 = vadd.f32 %v3929_v42, %v3928_v57  ;;  %v8077_v57 = vpop.permute.xlu0 %4215 }
0x105a   :  { %5755 = vmatprep.mubr.msk.f32.mxu1 %vm1281_vm2, %v3994_v23  ;;  %v3953_v40 = vadd.f32 1e-16, %v3937_v4 }
0x105b   :  { %6069 = vrcp.f32 %v3950_v16  ;;  %v3952_v2 = vadd.f32 1e-16, %v3930_v9 }
0x105c   :  { %v6066_v32 = vpop.eup %6065 }
0x105d   :  { %5756 = vmatmul.mubr.msk.f32.gmra.mrb[60].mxu1 %vm1281_vm2, %v3995_v30  ;;  %v3996_v53 = vmul.f32 %v6066_v32, %v8009_v39  ;;  %6071 = vrcp.f32 %v3952_v2 }
0x105e   :  { %6073 = vrcp.f32 %v3953_v40 }
0x105f   :  { %5758 = vmatprep.mubr.msk.f32.mxu1 %vm1281_vm2, %v3996_v53 }
0x1060   :  { %v6068_v11 = vpop.eup %6067 }
0x1061   :  { %5759 = vmatmul.mubr.msk.f32.gmra.mrb[62].mxu1 %vm1281_vm2, %v3997_v63  ;;  %v3999_v31 = vmul.f32 %v6068_v11, %v8017_v15  ;;  %v5873_v15 = vld [vmem:[%s8437_s8 + $0x10] sm:$0xff]   ;;  %v8593_v63 = vld [vmem:[#allocation36_spill] sm:$0xff] }
0x1062   :  { %5776 = vmatpush3.bf16.msra.mxu0 %v5873_v15  ;;  %v8594_v11 = vrot.slane %v8593_v63, 1 }
0x1063   :  { %5777 = vmatprep.subr.bf16.mxu0 %v8542_v37 }
0x1065   :  { %v6070_v3 = vpop.eup %6069 }
0x1066   :  { %v3998_v26 = vmul.f32 %v6070_v3, %v8025_v0  ;;  %v5874_v0 = vld [vmem:[%s8437_s8 + $0x18] sm:$0xff]  }
0x1067   :  { %v6072_v50 = vpop.eup %6071  ;;  %5778 = vmatpush3.bf16.msra.mxu0 %v5874_v0 }
0x1068   :  { %v6074_v36 = vpop.eup %6073  ;;  %5761 = vmatprep.mubr.msk.f32.mxu1 %vm1281_vm2, %v3998_v26  ;;  %v4000_v39 = vmul.f32 %v6072_v50, %v8032_v58  ;;  %5783 = vmatprep.subr.bf16.mxu0 %v8542_v37 }
0x1069   :  { %5762 = vmatmul.mubr.msk.f32.gmra.mrb[64].mxu1 %vm1281_vm2, %v3999_v31  ;;  %v4001_v48 = vmul.f32 %v6074_v36, %v8028_v35  ;;  %v4198_v35 = vpop.permute.xlu1 %4197  ;;  %v8088_v31 = vpop.permute.xlu0 %4217 }
0x106a   :  { %5764 = vmatprep.mubr.msk.f32.mxu1 %vm1281_vm2, %v4000_v39 }
0x106d   :  { %5765 = vmatmul.mubr.msk.f32.gmra.mrb[66].mxu1 %vm1281_vm2, %v4001_v48  ;;  %v4200_v58 = vpop.permute.xlu1 %4199 }
0x106e   :  { %5815 = vmatprep.mubr.msk.bf16.mxu1 %vm6127_vm1, %v8542_v37 }
0x1071   :  { %v4196_v60 = vpop.permute.xlu1 %4195 }
0x1075   :  { %v4204_v61 = vpop.permute.xlu1 %4203 }
0x1079   :  { %v4206_v55 = vpop.permute.xlu1 %4205 }
0x107d   :  { %v4208_v22 = vpop.permute.xlu1 %4207 }
0x1081   :  { %v8079_v6 = vpop.permute.xlu1 %4211 }
0x1085   :  { %v4210_v0 = vpop.permute.xlu1 %4209 }
0x111b   :  { %v5745_v43 = vpop.f32.mrb[52].mxu1 }
0x111c   :  { %v4244_v29 = vmul.f32 %v5745_v43, %v4198_v35  ;;  %v4116_v45 = vpop.f32.mrb[53].mxu1 }
0x111d   :  { %v4243_v52 = vmul.f32 %v4196_v60, %v4116_v45 }
0x111e   :  { %v4266_v21 = vsel %vm221_vm0, %v4244_v29, 0.0 }
0x111f   :  { %v4267_v1 = vrot.slane %v4266_v21, 4  ;;  %v4259_v47 = vsel %vm221_vm0, %v4243_v52, 0.0 }
0x1120   :  { %v4260_v51 = vrot.slane %v4259_v47, 4 }
0x1121   :  { %v4268_v44 = vadd.f32 %v4267_v1, %v4266_v21 }
0x1122   :  { %v4261_v56 = vadd.f32 %v4260_v51, %v4259_v47 }
0x1123   :  { %v4269_v19 = vrot.slane %v4268_v44, 2 }
0x1124   :  { %v4262_v13 = vrot.slane %v4261_v56, 2  ;;  %v5748_v49 = vpop.f32.mrb[54].mxu1 }
0x1125   :  { %v4270_v20 = vadd.f32 %v4269_v19, %v4268_v44  ;;  %v4246_v33 = vmul.f32 %v5748_v49, %v4202_v5  ;;  %v4126_v34 = vpop.f32.mrb[55].mxu1 }
0x1126   :  { %v4263_v18 = vadd.f32 %v4262_v13, %v4261_v56  ;;  %v4245_v23 = vmul.f32 %v4200_v58, %v4126_v34 }
0x1127   :  { %v4271_v12 = vrot.slane %v4270_v20, 1  ;;  %v4280_v42 = vsel %vm221_vm0, %v4246_v33, 0.0 }
0x1128   :  { %v4264_v25 = vrot.slane %v4263_v18, 1  ;;  %v4281_v24 = vrot.slane %v4280_v42, 4  ;;  %v4273_v4 = vsel %vm221_vm0, %v4245_v23, 0.0  ;;  %v5751_v16 = vpop.f32.mrb[56].mxu1  ;;  %v8099_v23 = vpop.permute.xlu0 %4219 }
0x1129   :  { %v4272_v9 = vadd.f32 %v4271_v12, %v4270_v20  ;;  %v4274_v40 = vrot.slane %v4273_v4, 4  ;;  %v4248_v8 = vmul.f32 %v5751_v16, %v4206_v55  ;;  %v4136_v30 = vpop.f32.mrb[57].mxu1 }
0x112a   :  { %v4265_v2 = vadd.f32 %v4264_v25, %v4263_v18  ;;  %v4282_v32 = vadd.f32 %v4281_v24, %v4280_v42  ;;  %v4247_v53 = vmul.f32 %v4204_v61, %v4136_v30 }
0x112b   :  { %v8085_v3 = vmul.f32 %v4272_v9, %v8594_v11  ;;  %v4275_v26 = vadd.f32 %v4274_v40, %v4273_v4  ;;  %v4294_v50 = vsel %vm221_vm0, %v4248_v8, 0.0  ;;  %v8595_v4 = vrot.slane %v8593_v63, 3 }
0x112c   :  { %v4283_v36 = vrot.slane %v4282_v32, 2  ;;  %v4295_v39 = vrot.slane %v4294_v50, 4  ;;  %v4287_v48 = vsel %vm221_vm0, %v4247_v53, 0.0  ;;  %v5754_v15 = vpop.f32.mrb[58].mxu1  ;;  %v8092_v35 = vmul.f32 %v4265_v2, %v8593_v63 }
0x112d   :  { %v4276_v58 = vrot.slane %v4275_v26, 2  ;;  %v4288_v60 = vrot.slane %v4287_v48, 4  ;;  %v4146_v61 = vpop.f32.mrb[59].mxu1  ;;  %v4250_v43 = vmul.f32 %v5754_v15, %v4210_v0  ;;  %v4388_v29 = vpack.c.bf16 %v8085_v3, %v8085_v3 }
0x112e   :  { %v4284_v5 = vadd.f32 %v4283_v36, %v4282_v32  ;;  %v4296_v55 = vadd.f32 %v4295_v39, %v4294_v50  ;;  %v4387_v44 = vpack.c.bf16 %v8092_v35, %v8092_v35  ;;  %v4249_v34 = vmul.f32 %v4208_v22, %v4146_v61 }
0x112f   :  { %v4277_v45 = vadd.f32 %v4276_v58, %v4275_v26  ;;  %v4289_v52 = vadd.f32 %v4288_v60, %v4287_v48  ;;  %v4308_v47 = vsel %vm221_vm0, %v4250_v43, 0.0  ;;  %v4483_v12 = vunpack.c.l.b16 %v4388_v29  ;;  %v4222_v29 = vpop.permute.xlu0 %4221 }
0x1130   :  { %v4285_v21 = vrot.slane %v4284_v5, 1  ;;  %v4297_v1 = vrot.slane %v4296_v55, 2  ;;  %v5757_v51 = vpop.f32.mrb[60].mxu1  ;;  %v4309_v13 = vrot.slane %v4308_v47, 4  ;;  %v4301_v40 = vsel %vm221_vm0, %v4249_v34, 0.0 }
0x1131   :  { %v4278_v56 = vrot.slane %v4277_v45, 1  ;;  %v4290_v19 = vrot.slane %v4289_v52, 2  ;;  %v4156_v49 = vpop.f32.mrb[61].mxu1  ;;  %v4252_v18 = vmul.f32 %v5757_v51, %v4214_v17  ;;  %v8596_v2 = vrot.slane %v8593_v63, 2 }
0x1132   :  { %v4286_v20 = vadd.f32 %v4285_v21, %v4284_v5  ;;  %v4298_v33 = vadd.f32 %v4297_v1, %v4296_v55  ;;  %v4310_v24 = vadd.f32 %v4309_v13, %v4308_v47  ;;  %v4302_v53 = vrot.slane %v4301_v40, 4 }
0x1133   :  { %v4279_v42 = vadd.f32 %v4278_v56, %v4277_v45  ;;  %v4291_v25 = vadd.f32 %v4290_v19, %v4289_v52  ;;  %v4322_v8 = vsel %vm221_vm0, %v4252_v18, 0.0  ;;  %v4617_v26 = vrot.slane %v8085_v3, 7 }
0x1134   :  { %v8103_v16 = vmul.f32 %v4286_v20, %v8595_v4  ;;  %v4299_v9 = vrot.slane %v4298_v33, 1  ;;  %v5760_v30 = vpop.f32.mrb[62].mxu1  ;;  %v4311_v32 = vrot.slane %v4310_v24, 2  ;;  %v4323_v39 = vrot.slane %v4322_v8, 4 }
0x1135   :  { %v8109_v22 = vmul.f32 %v4279_v42, %v8596_v2  ;;  %v4292_v17 = vrot.slane %v4291_v25, 1  ;;  %v4166_v11 = vpop.f32.mrb[63].mxu1  ;;  %v4482_v48 = vunpack.c.l.b16 %v4387_v44  ;;  %v4498_v60 = vrot.slane %v4483_v12, 7 }
0x1136   :  { %v4390_v50 = vpack.c.bf16 %v8103_v16, %v8103_v16  ;;  %v4300_v36 = vadd.f32 %v4299_v9, %v4298_v33  ;;  %v4312_v58 = vadd.f32 %v4311_v32, %v4310_v24  ;;  %v8597_v61 = vrot.slane %v8593_v63, 5  ;;  %v4224_v32 = vpop.permute.xlu0 %4223 }
0x1137   :  { %v4389_v15 = vpack.c.bf16 %v8109_v22, %v8109_v22  ;;  %v4293_v0 = vadd.f32 %v4292_v17, %v4291_v25  ;;  %v4303_v55 = vadd.f32 %v4302_v53, %v4301_v40  ;;  %v4324_v43 = vadd.f32 %v4323_v39, %v4322_v8 }
0x1138   :  { %v8118_v5 = vmul.f32 %v4300_v36, %v8597_v61  ;;  %v8598_v52 = vrot.slane %v8593_v63, 4  ;;  %v4313_v1 = vrot.slane %v4312_v58, 1  ;;  %v4251_v47 = vmul.f32 %v8079_v6, %v4156_v49 }
0x1139   :  { %v4484_v45 = vunpack.c.l.b16 %v4389_v15  ;;  %v4485_v51 = vunpack.c.l.b16 %v4390_v50  ;;  %v4304_v44 = vrot.slane %v4303_v55, 2  ;;  %v4325_v56 = vrot.slane %v4324_v43, 2 }
0x113a   :  { %v8122_v21 = vmul.f32 %v4293_v0, %v8598_v52  ;;  %v8127_v19 = vsel %vm2151_vm3, %v4617_v26, %v8092_v35  ;;  %v4392_v13 = vpack.c.bf16 %v8118_v5, %v8118_v5  ;;  %v4314_v33 = vadd.f32 %v4313_v1, %v4312_v58 }
0x113b   :  { %v4499_v34 = vsel %vm2151_vm3, %v4498_v60, %v4482_v48  ;;  %v4305_v18 = vadd.f32 %v4304_v44, %v4303_v55  ;;  %v4326_v12 = vadd.f32 %v4325_v56, %v4324_v43  ;;  %v4315_v6 = vsel %vm221_vm0, %v4251_v47, 0.0  ;;  %v8600_v47 = vld [vmem:[#allocation37_spill] sm:$0xff] }
0x113c   :  { %v4391_v20 = vpack.c.bf16 %v8122_v21, %v8122_v21  ;;  %v5763_v49 = vpop.f32.mrb[64].mxu1  ;;  %v4621_v42 = vrot.slane %v8103_v16, 5  ;;  %v4500_v25 = vrot.slane %v4484_v45, 6  ;;  %v4619_v24 = vrot.slane %v8109_v22, 6 }
0x113d   :  { %v4316_v4 = vrot.slane %v4315_v6, 4  ;;  %v4176_v9 = vpop.f32.mrb[65].mxu1  ;;  %v4502_v40 = vrot.slane %v4485_v51, 5  ;;  %v4306_v2 = vrot.slane %v4305_v18, 1  ;;  %v4327_v17 = vrot.slane %v4326_v12, 1 }
0x113e   :  { %v4486_v8 = vunpack.c.l.b16 %v4391_v20  ;;  %v8137_v53 = vunpack.c.l.b16 %v4392_v13  ;;  %v8599_v26 = vrot.slane %v8593_v63, 7  ;;  %v4254_v39 = vmul.f32 %v5760_v30, %v8088_v31 }
0x113f   :  { %v4317_v36 = vadd.f32 %v4316_v4, %v4315_v6  ;;  %v4307_v48 = vadd.f32 %v4306_v2, %v4305_v18  ;;  %v4328_v15 = vadd.f32 %v4327_v17, %v4326_v12  ;;  %v4253_v0 = vmul.f32 %v8077_v57, %v4166_v11  ;;  %v4226_v12 = vpop.permute.xlu0 %4225 }
0x1140   :  { %v8141_v50 = vmul.f32 %v4314_v33, %v8599_v26  ;;  %v4256_v58 = vmul.f32 %v5763_v49, %v4222_v29  ;;  %v5766_v60 = vpop.f32.mrb[66].mxu1  ;;  %v4501_v61 = vsel %vm2154_vm4, %v4500_v25, %v4499_v34  ;;  %v4623_v55 = vrot.slane %v8122_v21, 4 }
0x1141   :  { %v4318_v43 = vrot.slane %v4317_v36, 2  ;;  %v4336_v45 = vsel %vm221_vm0, %v4254_v39, 0.0  ;;  %v4186_v52 = vpop.f32.mrb[67].mxu1  ;;  %v4504_v1 = vrot.slane %v4486_v8, 4  ;;  %v8601_v51 = vrot.slane %v8600_v47, 1 }
0x1142   :  { %v4337_v31 = vrot.slane %v4336_v45, 4  ;;  %v4329_v30 = vsel %vm221_vm0, %v4253_v0, 0.0  ;;  %v4506_v57 = vrot.slane %v8137_v53, 3  ;;  %v4350_v56 = vsel %vm221_vm0, %v4256_v58, 0.0 }
0x1143   :  { %v8150_v44 = vmul.f32 %v4328_v15, %v8601_v51  ;;  %v4319_v11 = vadd.f32 %v4318_v43, %v4317_v36  ;;  %v4330_v29 = vrot.slane %v4329_v30, 4  ;;  %v4503_v13 = vsel %vm2157_vm5, %v4502_v40, %v4501_v61 }
0x1144   :  { %v4394_v20 = vpack.c.bf16 %v8141_v50, %v8141_v50  ;;  %v8602_v33 = vrot.slane %v8593_v63, 6  ;;  %v4338_v18 = vadd.f32 %v4337_v31, %v4336_v45  ;;  %v4351_v25 = vrot.slane %v4350_v56, 4 }
0x1145   :  { %v4320_v6 = vrot.slane %v4319_v11, 1  ;;  %v4331_v49 = vadd.f32 %v4330_v29, %v4329_v30  ;;  %v4255_v4 = vmul.f32 %v8099_v23, %v4176_v9  ;;  %v8164_v8 = vsel %vm2160_vm6, %v4504_v1, %v4503_v13 }
0x1146   :  { %v8160_v34 = vmul.f32 %v4307_v48, %v8602_v33  ;;  %v4396_v40 = vpack.c.bf16 %v8150_v44, %v8150_v44  ;;  %v4339_v2 = vrot.slane %v4338_v18, 2  ;;  %v4258_v17 = vmul.f32 %v5766_v60, %v4226_v12 }
0x1147   :  { %v4321_v26 = vadd.f32 %v4320_v6, %v4319_v11  ;;  %v4332_v36 = vrot.slane %v4331_v49, 2  ;;  %v4352_v63 = vadd.f32 %v4351_v25, %v4350_v56  ;;  %v4343_v39 = vsel %vm221_vm0, %v4255_v4, 0.0 }
0x1148   :  { %v8169_v48 = vunpack.c.l.b16 %v4394_v20  ;;  %v4393_v15 = vpack.c.bf16 %v8160_v34, %v8160_v34  ;;  %v4340_v0 = vadd.f32 %v4339_v2, %v4338_v18  ;;  %v4344_v23 = vrot.slane %v4343_v39, 4 }
0x1149   :  { %v8174_v9 = vmul.f32 %v4321_v26, %v8600_v47  ;;  %v4333_v58 = vadd.f32 %v4332_v36, %v4331_v49  ;;  %v4353_v61 = vrot.slane %v4352_v63, 2  ;;  %v4364_v43 = vsel %vm221_vm0, %v4258_v17, 0.0 }
0x114a   :  { %v4341_v60 = vrot.slane %v4340_v0, 1  ;;  %v4345_v45 = vadd.f32 %v4344_v23, %v4343_v39  ;;  %v4365_v1 = vrot.slane %v4364_v43, 4  ;;  %v4257_v51 = vmul.f32 %v4224_v32, %v4186_v52 }
0x114b   :  { %v4491_v31 = vunpack.c.l.b16 %v4396_v40  ;;  %v4631_v30 = vrot.slane %v8150_v44, 7  ;;  %v4334_v11 = vrot.slane %v4333_v58, 1  ;;  %v4354_v29 = vadd.f32 %v4353_v61, %v4352_v63 }
0x114c   :  { %v4342_v56 = vadd.f32 %v4341_v60, %v4340_v0  ;;  %v4346_v13 = vrot.slane %v4345_v45, 2  ;;  %v4366_v20 = vadd.f32 %v4365_v1, %v4364_v43  ;;  %v4357_v33 = vsel %vm221_vm0, %v4257_v51, 0.0 }
0x114d   :  { %v8179_v18 = vunpack.c.l.b16 %v4393_v15  ;;  %v4335_v12 = vadd.f32 %v4334_v11, %v4333_v58  ;;  %v4355_v6 = vrot.slane %v4354_v29, 1  ;;  %v4358_v49 = vrot.slane %v4357_v33, 4 }
0x114e   :  { %v4395_v25 = vpack.c.bf16 %v8174_v9, %v8174_v9  ;;  %v8603_v32 = vrot.slane %v8600_v47, 3  ;;  %v4347_v4 = vadd.f32 %v4346_v13, %v4345_v45  ;;  %v4367_v40 = vrot.slane %v4366_v20, 2 }
0x114f   :  { %v8604_v2 = vrot.slane %v8600_v47, 2  ;;  %v4356_v26 = vadd.f32 %v4355_v6, %v4354_v29  ;;  %v4359_v36 = vadd.f32 %v4358_v49, %v4357_v33  ;;  %v4620_v63 = vsel %vm2154_vm4, %v4619_v24, %v8127_v19 }
0x1150   :  { %v8185_v52 = vmul.f32 %v4342_v56, %v8603_v32  ;;  %v4512_v39 = vrot.slane %v4491_v31, 7  ;;  %v4348_v0 = vrot.slane %v4347_v4, 1  ;;  %v4368_v23 = vadd.f32 %v4367_v40, %v4366_v20 }
0x1151   :  { %v8189_v17 = vmul.f32 %v4335_v12, %v8604_v2  ;;  %v4632_v58 = vsel %vm2151_vm3, %v4631_v30, %v8174_v9  ;;  %v8605_v43 = vrot.slane %v8600_v47, 5  ;;  %v4360_v45 = vrot.slane %v4359_v36, 2 }
0x1152   :  { %v4398_v15 = vpack.c.bf16 %v8185_v52, %v8185_v52  ;;  %v4490_v1 = vunpack.c.l.b16 %v4395_v25  ;;  %v4349_v51 = vadd.f32 %v4348_v0, %v4347_v4  ;;  %v4369_v19 = vrot.slane %v4368_v23, 1 }
0x1153   :  { %v4397_v61 = vpack.c.bf16 %v8189_v17, %v8189_v17  ;;  %v8203_v60 = vmul.f32 %v4356_v26, %v8605_v43  ;;  %v4622_v24 = vsel %vm2157_vm5, %v4621_v42, %v4620_v63  ;;  %v4633_v11 = vrot.slane %v8189_v17, 6 }
0x1154   :  { %v4361_v29 = vadd.f32 %v4360_v45, %v4359_v36  ;;  %v4624_v30 = vsel %vm2160_vm6, %v4623_v55, %v4622_v24  ;;  %v4493_v56 = vunpack.c.l.b16 %v4398_v15  ;;  %v8606_v13 = vrot.slane %v8600_v47, 4 }
0x1155   :  { %v4492_v31 = vunpack.c.l.b16 %v4397_v61  ;;  %v4370_v33 = vadd.f32 %v4369_v19, %v4368_v23  ;;  %v4625_v12 = vrot.slane %v8118_v5, 3  ;;  %v4400_v42 = vpack.c.bf16 %v8203_v60, %v8203_v60 }
0x1156   :  { %v8214_v20 = vmul.f32 %v4349_v51, %v8606_v13  ;;  %v4362_v49 = vrot.slane %v4361_v29, 1  ;;  %v4627_v25 = vrot.slane %v8160_v34, 2  ;;  %v4513_v32 = vsel %vm2151_vm3, %v4512_v39, %v4490_v1 }
0x1157   :  { %v4514_v6 = vrot.slane %v4492_v31, 6  ;;  %v8607_v4 = vrot.slane %v8600_v47, 7  ;;  %v4626_v2 = vsel %vm2163_vm7, %v4625_v12, %v4624_v30  ;;  %v4635_v26 = vrot.slane %v8185_v52, 5 }
0x1158   :  { %v4399_v55 = vpack.c.bf16 %v8214_v20, %v8214_v20  ;;  %v4637_v36 = vrot.slane %v8214_v20, 4  ;;  %v4363_v63 = vadd.f32 %v4362_v49, %v4361_v29  ;;  %v4628_v15 = vsel %vm2166_vm8, %v4627_v25, %v4626_v2 }
0x1159   :  { %v8225_v40 = vmul.f32 %v4370_v33, %v8607_v4  ;;  %v4516_v0 = vrot.slane %v4493_v56, 5  ;;  %v4629_v61 = vrot.slane %v8141_v50, 1  ;;  %v4515_v43 = vsel %vm2154_vm4, %v4514_v6, %v4513_v32 }
0x115a   :  { %v4494_v23 = vunpack.c.l.b16 %v4399_v55  ;;  %v4495_v45 = vunpack.c.l.b16 %v4400_v42  ;;  %v8608_v1 = vrot.slane %v8600_v47, 6  ;;  %v4634_v19 = vsel %vm2154_vm4, %v4633_v11, %v4632_v58 }
0x115b   :  { %v4402_v39 = vpack.c.bf16 %v8225_v40, %v8225_v40  ;;  %v4630_v31 = vsel %vm2169_vm9, %v4629_v61, %v4628_v15  ;;  %v4636_v29 = vsel %vm2157_vm5, %v4635_v26, %v4634_v19  ;;  %v4639_v30 = vrot.slane %v8203_v60, 3  ;;  %v5875_v61 = vld [vmem:[%s8439_s10 + $0x10] sm:$0xff]  }
0x115c   :  { %v8237_v51 = vmul.f32 %v4363_v63, %v8608_v1  ;;  %v4518_v24 = vrot.slane %v4494_v23, 4  ;;  %v4508_v56 = vrot.slane %v8179_v18, 2  ;;  %4645 = vrot.lane.b32.xlu1 %v4630_v31, %s6129_s17  ;;  %v4638_v47 = vsel %vm2160_vm6, %v4637_v36, %v4636_v29 }
0x115d   :  { %v4517_v58 = vsel %vm2157_vm5, %v4516_v0, %v4515_v43  ;;  %v4497_v11 = vunpack.c.l.b16 %v4402_v39  ;;  %v4640_v12 = vsel %vm2163_vm7, %v4639_v30, %v4638_v47  ;;  %v4643_v6 = vrot.slane %v8225_v40, 1  ;;  %v5876_v43 = vld [vmem:[%s8439_s10 + $0x18] sm:$0xff]  }
0x115e   :  { %v4401_v13 = vpack.c.bf16 %v8237_v51, %v8237_v51  ;;  %v4641_v33 = vrot.slane %v8237_v51, 2  ;;  %v4519_v42 = vsel %vm2160_vm6, %v4518_v24, %v4517_v58  ;;  %v4520_v25 = vrot.slane %v4495_v45, 3 }
0x115f   :  { %v4507_v55 = vsel %vm2163_vm7, %v4506_v57, %v8164_v8  ;;  %v4510_v26 = vrot.slane %v8169_v48, 1  ;;  %v4524_v36 = vrot.slane %v4497_v11, 1 }
0x1160   :  { %v4496_v49 = vunpack.c.l.b16 %v4401_v13  ;;  %v4642_v18 = vsel %vm2166_vm8, %v4641_v33, %v4640_v12  ;;  %v4509_v2 = vsel %vm2166_vm8, %v4508_v56, %v4507_v55  ;;  %v4521_v63 = vsel %vm2163_vm7, %v4520_v25, %v4519_v42 }
0x1161   :  { %v4644_v32 = vsel %vm2169_vm9, %v4643_v6, %v4642_v18  ;;  %v4511_v0 = vsel %vm2169_vm9, %v4510_v26, %v4509_v2 }
0x1162   :  { %v4522_v4 = vrot.slane %v4496_v49, 2  ;;  %4647 = vrot.lane.b32.xlu0 %v4644_v32, %s6129_s17 }
0x1164   :  { %v4523_v15 = vsel %vm2166_vm8, %v4522_v4, %v4521_v63 }
0x1165   :  { %v4525_v23 = vsel %vm2169_vm9, %v4524_v36, %v4523_v15 }
0x1166   :  { %v4526_v39 = vpack.c.b16 %v4525_v23, %v4511_v0 }
0x1168   :  { %5780 = vmatmul.mubr.msk.bf16.vlgmr.msra.gmra.mrb[60].mxu0 %vm221_vm0, %v4526_v39 }
0x1169   :  { %5787 = vmatprep.mubr.msk.bf16.mxu0 %vm6127_vm1, %v8542_v37  ;;  %5784 = vmatpush3.bf16.msra.mxu0 %v5875_v61 }
0x116a   :  { %5785 = vmatprep.subr.bf16.mxu0 %v8542_v37 }
0x116d   :  { %5786 = vmatpush3.bf16.msra.mxu0 %v5876_v43 }
0x116e   :  { %5791 = vmatprep.subr.bf16.mxu0 %v8542_v37 }
0x11ce   :  { %v4646_v53 = vpop.permute.xlu1 %4645 }
0x11cf   :  { %v4651_v57 = vsub.f32 %v7713_v27, %v4646_v53  ;;  %v8284_v27 = vld [vmem:[%s8445_s16 + $0x4] sm:$0x7] }
0x11d1   :  { %4655 = vrot.lane.b32.xlu1 %v4651_v57, %s6128_s24 }
0x11d4   :  { %v4648_v8 = vpop.permute.xlu0 %4647 }
0x11d5   :  { %v4652_v48 = vsub.f32 %v7727_v14, %v4648_v8  ;;  %v4586_v14 = vrot.slane %v8284_v27, %v6530_v38 }
0x11d7   :  { %4657 = vrot.lane.b32.xlu0 %v4652_v48, %s6128_s24 }
0x123b   :  { %v4576_v45 = vpop.f32.mrb[60].mxu0 }
0x123c   :  { %v4577_v1 = vadd.f32 %v4576_v45, %v7906_v7  ;;  %v5781_v19 = vpop.f32.mrb[61].mxu0 }
0x123d   :  { %v4579_v24 = vpop.f32.mrb[62].mxu0 }
0x123e   :  { %v4587_v31 = vadd.f32 %v4586_v14, %v4577_v1  ;;  %v4580_v29 = vadd.f32 %v4579_v24, %v7910_v41  ;;  %v5782_v30 = vpop.f32.mrb[63].mxu0 }
0x1240   :  { %v5316_v56 = vmul.f32 -1.442695, %v4587_v31  ;;  %v4588_v13 = vadd.f32 %v4586_v14, %v4580_v29 }
0x1242   :  { %6075 = vpow2.f32 %v5316_v56  ;;  %v5317_v47 = vmul.f32 -1.442695, %v4588_v13 }
0x1243   :  { %v4656_v6 = vpop.permute.xlu1 %4655 }
0x1244   :  { %6077 = vpow2.f32 %v5317_v47 }
0x1249   :  { %v4658_v49 = vpop.permute.xlu0 %4657 }
0x124c   :  { %v6076_v33 = vpop.eup %6075 }
0x124d   :  { %v4595_v58 = vadd.f32 1.0, %v6076_v33 }
0x124e   :  { %v6078_v11 = vpop.eup %6077 }
0x124f   :  { %6079 = vrcp.f32 %v4595_v58  ;;  %v4596_v12 = vadd.f32 1.0, %v6078_v11 }
0x1251   :  { %6081 = vrcp.f32 %v4596_v12 }
0x1259   :  { %v6080_v38 = vpop.eup %6079 }
0x125a   :  { %v4661_v7 = vmul.f32 %v6080_v38, %v4656_v6 }
0x125b   :  { %v6082_v42 = vpop.eup %6081 }
0x125c   :  { %v4662_v18 = vmul.f32 %v6082_v42, %v4658_v49  ;;  %v4665_v25 = vrot.slane %v4661_v7, 1  ;;  %v4666_v41 = vrot.slane %v4661_v7, 2  ;;  %v4667_v32 = vrot.slane %v4661_v7, 3 }
0x125d   :  { %v4668_v4 = vrot.slane %v4661_v7, 4  ;;  %v4669_v2 = vrot.slane %v4661_v7, 5  ;;  %v4670_v36 = vrot.slane %v4661_v7, 6  ;;  %v4671_v63 = vrot.slane %v4661_v7, 7 }
0x125e   :  { %v4672_v55 = vrot.slane %v4662_v18, 1  ;;  %v4673_v26 = vrot.slane %v4662_v18, 2  ;;  %v4674_v15 = vrot.slane %v4662_v18, 3  ;;  %v4675_v0 = vrot.slane %v4662_v18, 4 }
0x125f   :  { %v4676_v23 = vrot.slane %v4662_v18, 5  ;;  %v4696_v39 = vadd.f32 %v4665_v25, %v8085_v3  ;;  %v4697_v53 = vadd.f32 %v4666_v41, %v8109_v22  ;;  %v4677_v57 = vrot.slane %v4662_v18, 6 }
0x1260   :  { %v4678_v8 = vrot.slane %v4662_v18, 7  ;;  %v4695_v48 = vadd.f32 %v4661_v7, %v8092_v35  ;;  %v4698_v61 = vadd.f32 %v4667_v32, %v8103_v16  ;;  %v4699_v43 = vadd.f32 %v4668_v4, %v8122_v21 }
0x1261   :  { %v4700_v14 = vadd.f32 %v4669_v2, %v8118_v5  ;;  %v4704_v45 = vadd.f32 %v4672_v55, %v8150_v44  ;;  %v4705_v1 = vadd.f32 %v4673_v26, %v8189_v17  ;;  %v4701_v19 = vadd.f32 %v4670_v36, %v8160_v34 }
0x1262   :  { %v4702_v3 = vadd.f32 %v4671_v63, %v8141_v50  ;;  %v4703_v22 = vadd.f32 %v4662_v18, %v8174_v9  ;;  %v4706_v24 = vadd.f32 %v4674_v15, %v8185_v52  ;;  %v4707_v35 = vadd.f32 %v4675_v0, %v8214_v20 }
0x1263   :  { %v4708_v16 = vadd.f32 %v4676_v23, %v8203_v60  ;;  %v4712_v31 = vpack.c.bf16 %v4696_v39, %v4696_v39  ;;  %v4713_v21 = vpack.c.bf16 %v4697_v53, %v4697_v53  ;;  %v4709_v5 = vadd.f32 %v4677_v57, %v8237_v51 }
0x1264   :  { %v4710_v44 = vadd.f32 %v4678_v8, %v8225_v40  ;;  %v4711_v29 = vpack.c.bf16 %v4695_v48, %v4695_v48  ;;  %v4714_v17 = vpack.c.bf16 %v4698_v61, %v4698_v61  ;;  %v4715_v30 = vpack.c.bf16 %v4699_v43, %v4699_v43 }
0x1265   :  { %v4716_v34 = vpack.c.bf16 %v4700_v14, %v4700_v14  ;;  %v4720_v56 = vpack.c.bf16 %v4704_v45, %v4704_v45  ;;  %v4721_v50 = vpack.c.bf16 %v4705_v1, %v4705_v1  ;;  %v4717_v13 = vpack.c.bf16 %v4701_v19, %v4701_v19 }
0x1266   :  { %v4718_v9 = vpack.c.bf16 %v4702_v3, %v4702_v3  ;;  %v4719_v47 = vpack.c.bf16 %v4703_v22, %v4703_v22  ;;  %v4722_v52 = vpack.c.bf16 %v4706_v24, %v4706_v24  ;;  %v4723_v33 = vpack.c.bf16 %v4707_v35, %v4707_v35 }
0x1267   :  { %v4724_v20 = vpack.c.bf16 %v4708_v16, %v4708_v16  ;;  %v4753_v58 = vunpack.c.l.b16 %v4712_v31  ;;  %v4754_v60 = vunpack.c.l.b16 %v4713_v21  ;;  %v4725_v11 = vpack.c.bf16 %v4709_v5, %v4709_v5 }
0x1268   :  { %v4726_v12 = vpack.c.bf16 %v4710_v44, %v4710_v44  ;;  %v4752_v38 = vunpack.c.l.b16 %v4711_v29  ;;  %v4755_v51 = vunpack.c.l.b16 %v4714_v17  ;;  %v4756_v6 = vunpack.c.l.b16 %v4715_v30 }
0x1269   :  { %v4757_v40 = vunpack.c.l.b16 %v4716_v34  ;;  %v4761_v7 = vunpack.c.l.b16 %v4720_v56  ;;  %v4762_v42 = vunpack.c.l.b16 %v4721_v50  ;;  %v4758_v49 = vunpack.c.l.b16 %v4717_v13 }
0x126a   :  { %v4759_v18 = vunpack.c.l.b16 %v4718_v9  ;;  %v4763_v25 = vunpack.c.l.b16 %v4722_v52  ;;  %v4768_v41 = vrot.slane %v4753_v58, 7  ;;  %v4760_v32 = vunpack.c.l.b16 %v4719_v47 }
0x126b   :  { %v4764_v55 = vunpack.c.l.b16 %v4723_v33  ;;  %v4765_v4 = vunpack.c.l.b16 %v4724_v20  ;;  %v4770_v2 = vrot.slane %v4754_v60, 6  ;;  %v4766_v26 = vunpack.c.l.b16 %v4725_v11 }
0x126c   :  { %v4769_v36 = vsel %vm2151_vm3, %v4768_v41, %v4752_v38  ;;  %v4772_v63 = vrot.slane %v4755_v51, 5  ;;  %v4782_v15 = vrot.slane %v4761_v7, 7  ;;  %v4767_v0 = vunpack.c.l.b16 %v4726_v12 }
0x126d   :  { %v4771_v23 = vsel %vm2154_vm4, %v4770_v2, %v4769_v36  ;;  %v4774_v39 = vrot.slane %v4756_v6, 4  ;;  %v4784_v53 = vrot.slane %v4762_v42, 6  ;;  %v4776_v8 = vrot.slane %v4757_v40, 3  ;;  %v8339_v36 = vld [vmem:[%s8444_s15 + $0x8] sm:$0x1f] }
0x126e   :  { %v4773_v57 = vsel %vm2157_vm5, %v4772_v63, %v4771_v23  ;;  %v4783_v48 = vsel %vm2151_vm3, %v4782_v15, %v4760_v32  ;;  %v4786_v61 = vrot.slane %v4763_v25, 5  ;;  %v4778_v14 = vrot.slane %v4758_v49, 2 }
0x126f   :  { %v4775_v43 = vsel %vm2160_vm6, %v4774_v39, %v4773_v57  ;;  %v4785_v45 = vsel %vm2154_vm4, %v4784_v53, %v4783_v48  ;;  %v4788_v1 = vrot.slane %v4764_v55, 4  ;;  %v4790_v22 = vrot.slane %v4765_v4, 3  ;;  %v8332_v55 = vld [vmem:[%s8443_s14 + $0x8] sm:$0x1f] }
0x1270   :  { %v4777_v19 = vsel %vm2163_vm7, %v4776_v8, %v4775_v43  ;;  %v4787_v3 = vsel %vm2157_vm5, %v4786_v61, %v4785_v45  ;;  %v4792_v16 = vrot.slane %v4766_v26, 2  ;;  %v4780_v31 = vrot.slane %v4759_v18, 1 }
0x1271   :  { %v4779_v24 = vsel %vm2166_vm8, %v4778_v14, %v4777_v19  ;;  %v4789_v35 = vsel %vm2160_vm6, %v4788_v1, %v4787_v3  ;;  %v4794_v5 = vrot.slane %v4767_v0, 1  ;;  %v4735_v34 = vrot.slane %v8284_v27, %v6494_v54 }
0x1272   :  { %v4791_v21 = vsel %vm2163_vm7, %v4790_v22, %v4789_v35  ;;  %v4781_v29 = vsel %vm2169_vm9, %v4780_v31, %v4779_v24  ;;  %v4882_v4 = vrot.slane %v8332_v55, %v6787_v46  ;;  %v4888_v63 = vrot.slane %v8339_v36, %v6787_v46  ;;  %v5878_v31 = vld [vmem:[%s8440_s11 + $0x18] sm:$0xff]  }
0x1273   :  { %v4793_v44 = vsel %vm2166_vm8, %v4792_v16, %v4791_v21  ;;  %v5877_v16 = vld [vmem:[%s8440_s11 + $0x10] sm:$0xff]   ;;  %v5879_v21 = vld [vmem:[%s8442_s13 + $0x40] sm:$0xff]  }
0x1274   :  { %v4795_v17 = vsel %vm2169_vm9, %v4794_v5, %v4793_v44  ;;  %5800 = vmatpush3.bf16.msra.mxu1 %v5879_v21  ;;  %v5880_v5 = vld [vmem:[%s8442_s13 + $0x48] sm:$0xff]   ;;  %v5881_v44 = vld [vmem:[%s8442_s13 + $0x50] sm:$0xff]  }
0x1275   :  { %v4796_v30 = vpack.c.b16 %v4795_v17, %v4781_v29  ;;  %5801 = vmatprep.subr.bf16.mxu1 %v8542_v37  ;;  %v5882_v29 = vld [vmem:[%s8442_s13 + $0x58] sm:$0xff]   ;;  %v5883_v17 = vld [vmem:[%s8442_s13 + $0x60] sm:$0xff]  }
0x1277   :  { %5788 = vmatmul.mubr.msk.bf16.vlgmr.msra.gmra.mrb[64].mxu0 %vm221_vm0, %v4796_v30  ;;  %v5884_v30 = vld [vmem:[%s8442_s13 + $0x68] sm:$0xff]  }
0x1278   :  { %5795 = vmatprep.mubr.msk.bf16.mxu0 %vm6127_vm1, %v8542_v37  ;;  %5792 = vmatpush3.bf16.msra.mxu0 %v5877_v16 }
0x1279   :  { %5793 = vmatprep.subr.bf16.mxu0 %v8542_v37  ;;  %5802 = vmatpush3.bf16.msra.mxu1 %v5880_v5  ;;  %v5143_v5 = vrot.slane %v8332_v55, %v8572_v62 }
0x127a   :  { %5803 = vmatprep.subr.bf16.mxu1 %v8542_v37 }
0x127c   :  { %5794 = vmatpush3.bf16.msra.mxu0 %v5878_v31 }
0x127d   :  { %5804 = vmatpush3.bf16.msra.mxu1 %v5881_v44 }
0x127e   :  { %5805 = vmatprep.subr.bf16.mxu1 %v8542_v37 }
0x1281   :  { %5806 = vmatpush3.bf16.msra.mxu1 %v5882_v29 }
0x1282   :  { %5807 = vmatprep.subr.bf16.mxu1 %v8542_v37 }
0x1285   :  { %5808 = vmatpush3.bf16.msra.mxu1 %v5883_v17  ;;  %v5149_v17 = vrot.slane %v8339_v36, %v8572_v62 }
0x1286   :  { %5809 = vmatprep.subr.bf16.mxu1 %v8542_v37 }
0x1289   :  { %5810 = vmatpush3.bf16.msra.mxu1 %v5884_v30 }
0x128a   :  { %5811 = vmatprep.subr.bf16.mxu1 %v8542_v37 }
0x134a   :  { %v4846_v56 = vpop.f32.mrb[64].mxu0 }
0x134b   :  { %v4847_v50 = vadd.f32 %v4846_v56, %v4735_v34  ;;  %v5789_v13 = vpop.f32.mrb[65].mxu0 }
0x134c   :  { %v4849_v9 = vpop.f32.mrb[66].mxu0 }
0x134d   :  { %v4850_v47 = vadd.f32 %v4849_v9, %v4735_v34  ;;  %v5790_v52 = vpop.f32.mrb[67].mxu0  ;;  %v4853_v33 = vsel %vm221_vm0, %v4847_v50, 0.0 }
0x134e   :  { %4854 = vadd.xlane.f32.xlu1 %v4853_v33  ;;  %v4922_v33 = vrot.slane %v8332_v55, %v6793_v28 }
0x134f   :  { %v4856_v20 = vsel %vm221_vm0, %v4850_v47, 0.0 }
0x1350   :  { %4857 = vadd.xlane.f32.xlu0 %v4856_v20 }
0x13db   :  { %v4855_v58 = vpop.xlane.xlu1 %4854 }
0x13dc   :  { %v4859_v60 = vmul.f32 0.03125, %v4855_v58 }
0x13dd   :  { %v4858_v11 = vpop.xlane.xlu0 %4857 }
0x13de   :  { %v4861_v12 = vsub.f32 %v4847_v50, %v4859_v60  ;;  %v4860_v38 = vmul.f32 0.03125, %v4858_v11 }
0x13e0   :  { %v4862_v51 = vsub.f32 %v4850_v47, %v4860_v38  ;;  %v4863_v6 = vmul.f32 %v4861_v12, %v4861_v12 }
0x13e2   :  { %v4865_v54 = vsel %vm221_vm0, %v4863_v6, 0.0  ;;  %v4864_v40 = vmul.f32 %v4862_v51, %v4862_v51 }
0x13e3   :  { %4866 = vadd.xlane.f32.xlu0 %v4865_v54 }
0x13e4   :  { %v4868_v7 = vsel %vm221_vm0, %v4864_v40, 0.0  ;;  %v5885_v40 = vld [vmem:[%s8442_s13 + $0x70] sm:$0xff]  }
0x13e5   :  { %5812 = vmatpush3.bf16.msra.mxu1 %v5885_v40 }
0x13e6   :  { %5813 = vmatprep.subr.bf16.mxu1 %v8542_v37  ;;  %v5024_v37 = vrot.slane %v8284_v27, %v6787_v46 }
0x13e7   :  { %4869 = vadd.xlane.f32.xlu0 %v4868_v7  ;;  %v5886_v7 = vld [vmem:[%s8442_s13 + $0x78] sm:$0xff]  }
0x13e9   :  { %5814 = vmatpush3.bf16.msra.mxu1 %v5886_v7 }
0x1470   :  { %v4867_v42 = vpop.xlane.xlu0 %4866 }
0x1471   :  { %v4871_v49 = vmul.f32 0.03125, %v4867_v42 }
0x1473   :  { %v4873_v18 = vadd.f32 1e-05, %v4871_v49 }
0x1474   :  { %v4870_v25 = vpop.xlane.xlu0 %4869 }
0x1475   :  { %6083 = vrsqrt.f32 %v4873_v18  ;;  %v4872_v41 = vmul.f32 0.03125, %v4870_v25 }
0x1477   :  { %v4874_v32 = vadd.f32 1e-05, %v4872_v41 }
0x1479   :  { %6085 = vrsqrt.f32 %v4874_v32 }
0x147f   :  { %v6084_v2 = vpop.eup %6083 }
0x1480   :  { %v4877_v26 = vmul.f32 %v6084_v2, %v4861_v12  ;;  %v4928_v12 = vrot.slane %v8339_v36, %v6793_v28  ;;  %v5330_v28 = vld [vmem:[%s8441_s12 + $0x1] ss:$0 sm:$0xff]  ;;  %s6133_s12 = smov [#allocation2]  }
0x1481   :  { %s5161_s13 = sshll.u32 %s6133_s12, 4  ;;  %s5162_s13 = int_to_ptr.vmem [resolvable:$true] %s5161_s13 }
0x1482   :  { %v4883_v15 = vmul.f32 %v4882_v4, %v4877_v26  ;;  %s6102_s7 = scalar_lea.vmem %s5162_s13, 256  ;;  %p6107_p1 = scmp.lt.s32.totalorder %s5162_s13, %s5162_s13 }
0x1483   :  { %v6086_v0 = vpop.eup %6085  ;;  %p6103_p0 = scmp.ne.s32.totalorder %s5162_s13, %s6102_s7  ;;  %p6108_p2 = scmp.lt.s32.totalorder %s6102_s7, %s6102_s7 }
0x1484   :  { %v4889_v23 = vadd.f32 %v4888_v63, %v4883_v15  ;;  %v4878_v39 = vmul.f32 %v6086_v0, %v4862_v51 }
0x1485   :  { %p6109_p3 = por %p6108_p2, %p6107_p1 }
0x1486   :  { %v8344_v53 = vadd.f32 %v4889_v23, %v7638_v10  ;;  %v4884_v57 = vmul.f32 %v4882_v4, %v4878_v39 }
0x1487   :  { %p6110_p4 = pnand %p6109_p3, %p6103_p0 }
0x1488   :  { %v4893_v8 = vsel %vm221_vm0, %v8344_v53, 0.0  ;;  %v4890_v48 = vadd.f32 %v4888_v63, %v4884_v57 }
0x1489   :  { %4894 = vadd.xlane.f32.xlu1 %v4893_v8 }
0x148a   :  { %v8349_v61 = vadd.f32 %v4890_v48, %v7643_v59 }
0x148c   :  { %v4896_v43 = vsel %vm221_vm0, %v8349_v61, 0.0 }
0x148d   :  { %4897 = vadd.xlane.f32.xlu0 %v4896_v43 }
0x1516   :  { %v4895_v14 = vpop.xlane.xlu1 %4894 }
0x1517   :  { %v4899_v45 = vmul.f32 0.03125, %v4895_v14 }
0x1519   :  { %v4901_v1 = vsub.f32 %v8344_v53, %v4899_v45 }
0x151a   :  { %v4898_v19 = vpop.xlane.xlu0 %4897 }
0x151b   :  { %v4900_v10 = vmul.f32 0.03125, %v4898_v19  ;;  %v4903_v3 = vmul.f32 %v4901_v1, %v4901_v1 }
0x151d   :  { %v4902_v22 = vsub.f32 %v8349_v61, %v4900_v10  ;;  %v4905_v24 = vsel %vm221_vm0, %v4903_v3, 0.0 }
0x151e   :  { %4906 = vadd.xlane.f32.xlu1 %v4905_v24 }
0x151f   :  { %v4904_v35 = vmul.f32 %v4902_v22, %v4902_v22 }
0x1521   :  { %v4908_v59 = vsel %vm221_vm0, %v4904_v35, 0.0 }
0x1522   :  { %4909 = vadd.xlane.f32.xlu0 %v4908_v59 }
0x15ab   :  { %v4907_v34 = vpop.xlane.xlu1 %4906 }
0x15ac   :  { %v4911_v56 = vmul.f32 0.03125, %v4907_v34 }
0x15ae   :  { %v4913_v50 = vadd.f32 1e-05, %v4911_v56 }
0x15af   :  { %v4910_v13 = vpop.xlane.xlu0 %4909 }
0x15b0   :  { %6087 = vrsqrt.f32 %v4913_v50  ;;  %v4912_v9 = vmul.f32 0.03125, %v4910_v13 }
0x15b2   :  { %v4914_v47 = vadd.f32 1e-05, %v4912_v9 }
0x15b4   :  { %6089 = vrsqrt.f32 %v4914_v47 }
0x15ba   :  { %v6088_v52 = vpop.eup %6087 }
0x15bb   :  { %v4917_v20 = vmul.f32 %v6088_v52, %v4901_v1 }
0x15bd   :  { %v4923_v60 = vmul.f32 %v4922_v33, %v4917_v20 }
0x15be   :  { %v6090_v58 = vpop.eup %6089 }
0x15bf   :  { %v4918_v11 = vmul.f32 %v6090_v58, %v4902_v22  ;;  %v4929_v51 = vadd.f32 %v4928_v12, %v4923_v60 }
0x15c1   :  { %v4924_v38 = vmul.f32 %v4922_v33, %v4918_v11 }
0x15c3   :  { %v4930_v6 = vadd.f32 %v4928_v12, %v4924_v38 }
0x15c5   :  { %v4931_v54 = vpack.c.bf16 %v4930_v6, %v4929_v51 }
0x15c7   :  { %5796 = vmatmul.mubr.msk.bf16.vlgmr.msra.gmra.mrb[68].mxu0 %vm221_vm0, %v4931_v54 }
0x169a   :  { %v4994_v42 = vpop.f32.mrb[68].mxu0 }
0x169b   :  { %v4995_v49 = vadd.f32 %v5330_v28, %v4994_v42  ;;  %v5797_v18 = vpop.f32.mrb[69].mxu0 }
0x169c   :  { %v4997_v25 = vpop.f32.mrb[70].mxu0 }
0x169d   :  { %v4998_v41 = vadd.f32 %v5330_v28, %v4997_v25  ;;  %v5798_v32 = vpop.f32.mrb[71].mxu0  ;;  %v5001_v4 = vmax.f32 %v4995_v49, 0.0 }
0x169f   :  { %v5002_v2 = vmax.f32 %v4998_v41, 0.0 }
0x16a1   :  { %v5003_v26 = vpack.c.bf16 %v5002_v2, %v5001_v4 }
0x16a3   :  { %5816 = vmatmul.mubr.bf16.vlgmr.msra.gmra.mrb[68].mxu1 %v5003_v26 }
0x1776   :  { %v5107_v63 = vpop.f32.mrb[68].mxu1 }
0x1777   :  { %v5108_v15 = vadd.f32 %v5107_v63, %v5024_v37  ;;  %v5817_v0 = vpop.f32.mrb[69].mxu1 }
0x1778   :  { %v5110_v23 = vpop.f32.mrb[70].mxu1 }
0x1779   :  { %v5111_v39 = vadd.f32 %v5110_v23, %v5024_v37  ;;  %v5818_v57 = vpop.f32.mrb[71].mxu1  ;;  %v5114_v8 = vsel %vm221_vm0, %v5108_v15, 0.0 }
0x177a   :  { %5115 = vadd.xlane.f32.xlu1 %v5114_v8 }
0x177b   :  { %v5117_v48 = vsel %vm221_vm0, %v5111_v39, 0.0 }
0x177c   :  { %5118 = vadd.xlane.f32.xlu0 %v5117_v48 }
0x1807   :  { %v5116_v43 = vpop.xlane.xlu1 %5115 }
0x1808   :  { %v5120_v14 = vmul.f32 0.03125, %v5116_v43 }
0x1809   :  { %v5119_v45 = vpop.xlane.xlu0 %5118 }
0x180a   :  { %v5122_v1 = vsub.f32 %v5108_v15, %v5120_v14  ;;  %v5121_v19 = vmul.f32 0.03125, %v5119_v45 }
0x180c   :  { %v5123_v10 = vsub.f32 %v5111_v39, %v5121_v19  ;;  %v5124_v3 = vmul.f32 %v5122_v1, %v5122_v1 }
0x180e   :  { %v5126_v46 = vsel %vm221_vm0, %v5124_v3, 0.0  ;;  %v5125_v27 = vmul.f32 %v5123_v10, %v5123_v10 }
0x180f   :  { %5127 = vadd.xlane.f32.xlu1 %v5126_v46 }
0x1810   :  { %v5129_v22 = vsel %vm221_vm0, %v5125_v27, 0.0 }
0x1811   :  { %5130 = vadd.xlane.f32.xlu0 %v5129_v22 }
0x189c   :  { %v5128_v24 = vpop.xlane.xlu1 %5127 }
0x189d   :  { %v5132_v35 = vmul.f32 0.03125, %v5128_v24 }
0x189e   :  { %v5131_v59 = vpop.xlane.xlu0 %5130 }
0x189f   :  { %v5134_v16 = vadd.f32 1e-05, %v5132_v35  ;;  %v5133_v31 = vmul.f32 0.03125, %v5131_v59 }
0x18a1   :  { %6091 = vrsqrt.f32 %v5134_v16  ;;  %v5135_v21 = vadd.f32 1e-05, %v5133_v31 }
0x18a3   :  { %6093 = vrsqrt.f32 %v5135_v21 }
0x18ab   :  { %v6092_v44 = vpop.eup %6091 }
0x18ac   :  { %v5138_v29 = vmul.f32 %v6092_v44, %v5122_v1 }
0x18ad   :  { %v6094_v30 = vpop.eup %6093 }
0x18ae   :  { %v5144_v34 = vmul.f32 %v5143_v5, %v5138_v29  ;;  %v5139_v56 = vmul.f32 %v6094_v30, %v5123_v10 }
0x18b0   :  { %v5145_v50 = vmul.f32 %v5143_v5, %v5139_v56  ;;  %v5150_v13 = vadd.f32 %v5149_v17, %v5144_v34 }
0x18b2   :  { %v5151_v9 = vadd.f32 %v5149_v17, %v5145_v50  ;;  %v5152_v47 = vadd.f32 %v5150_v13, %v8344_v53 }
0x18b4   :  { %v5153_v52 = vadd.f32 %v5151_v9, %v8349_v61  ;;  %5154 = vst.msk [vmem:[#allocation2] sm:$0xff] %vm221_vm0, %v5152_v47 }
0x18b6   :  { %5155 = vst.msk [vmem:[#allocation2 + $0x8] sm:$0xff] %vm221_vm0, %v5153_v52 }
0x18b7   :  { %6113 = shalt.err (!%p6110_p4)
}
0x18b8   :  { %s6114_s16 = scalar_lea.hbm %s8448_s19, 256 }
0x18b9   :  { %p6115_p5 = scmp.ne.s32.totalorder %s8448_s19, %s6114_s16  ;;  %p6118_p6 = scmp.lt.u32.totalorder %s6114_s16, %s8448_s19 }
0x18bb   :  { %p6120_p7 = pnand %p6118_p6, %p6115_p5 }
0x18bd   :  { %6123 = shalt.err (!%p6120_p7)
}
0x18be   :  { %s6134_s29 = smov 128   ;;  %s6135_s4 = smov 8  }
0x18bf   :  { %5167 = dma.vmem_to_hbm [thread:$0]  %s5162_s13, 256, %s8448_s19, [#allocation3], %s6134_s29, %s6134_s29, %s6135_s4  }
0x18c0   :  { %6124 = dma.done.wait [#allocation3], 256  }
0x18c1   :  { %6125 = vsyncadd [#allocation3], 4294967040 }
0x18c2   :  { %5171 = vsyncpa [#allocation3], 1 }

</bundles_post_ra>
